<compile_context>
chip_gen: v7x
topology: tpu7x:2x2x1
jax: 0.10.0
libtpu: 0.0.40
codegen_flags: <defaults>
</compile_context>

<pallas_src>
import functools

import jax
import jax.numpy as jnp
from jax.experimental import pallas as pl
from jax.experimental.pallas import tpu as pltpu


# ----------------------------------------------------------------------------
# Static conv configuration: name, kh, kw, ph, pw, dh, dw   (stride == 1)
# ----------------------------------------------------------------------------
_CONV_CFGS = (
    ("b0_0", 1, 1, 0, 0, 1, 1),
    ("b1_0", 1, 1, 0, 0, 1, 1),
    ("b1_1", 1, 3, 0, 1, 1, 1),
    ("b1_2", 3, 1, 1, 0, 1, 1),
    ("b1_3", 3, 3, 3, 3, 3, 3),
    ("b2_0", 1, 1, 0, 0, 1, 1),
    ("b2_1", 1, 5, 0, 2, 1, 1),
    ("b2_2", 5, 1, 2, 0, 1, 1),
    ("b2_3", 3, 3, 5, 5, 5, 5),
    ("b3_0", 1, 1, 0, 0, 1, 1),
    ("b3_1", 1, 7, 0, 3, 1, 1),
    ("b3_2", 7, 1, 3, 0, 1, 1),
    ("b3_3", 3, 3, 7, 7, 7, 7),
    ("cat",  3, 3, 1, 1, 1, 1),
    ("res",  1, 1, 0, 0, 1, 1),
)
_CFG = {c[0]: c[1:] for c in _CONV_CFGS}


# ----------------------------------------------------------------------------
# Fused Pallas kernel: whole MSRF forward in one invocation (no grid).
# ----------------------------------------------------------------------------
def _msrf_fused_kernel(x_ref, hidx_ref, widx_ref, *refs, img_h, img_w, m):
    """Inputs:
         x_ref:    (Cin, M)  activations, M = N*H*W on the lane axis
         hidx_ref: (1, M)    int32 row index of each flattened position
         widx_ref: (1, M)    int32 col index of each flattened position
         then, for each conv in _CONV_CFGS: weight ref, bias ref
       Output:
         o_ref:    (Cout, M)
    """
    o_ref = refs[-1]
    wb_refs = refs[:-1]
    wb = {name: (wb_refs[2 * i], wb_refs[2 * i + 1])
          for i, (name, *_rest) in enumerate(_CONV_CFGS)}

    x = x_ref[...]                      # (Cin, M), lane-dense
    h_idx = hidx_ref[...]               # (1, M) int32
    w_idx = widx_ref[...]               # (1, M) int32

    mask_cache = {}                     # memoize masks across convs (trace-time)

    def tap_mask(di, dj):
        """f32 (1, M): 1 where the (h+di, w+dj) source pixel is in-bounds."""
        key = (di, dj)
        if key not in mask_cache:
            valid = ((h_idx + di >= 0) & (h_idx + di < img_h) &
                     (w_idx + dj >= 0) & (w_idx + dj < img_w))
            mask_cache[key] = jnp.where(valid, 1.0, 0.0)
        return mask_cache[key]

    def lane_shift(v, s):
        """out[:, i] = v[:, (i + s) % M]  (circular; wrapped lanes get masked)."""
        s = s % m
        if s == 0:
            return v
        return jnp.concatenate([v[:, s:], v[:, :s]], axis=-1)

    def conv_apply(v, wmat, kh, kw, ph, pw, dh, dw):
        """Dilated 'same' conv as one im2col matmul: (Cout,K) @ (K, M)."""
        if kh == 1 and kw == 1:
            return jnp.dot(wmat, v, preferred_element_type=jnp.float32)
        pieces = []
        for i in range(kh):
            di = i * dh - ph
            for j in range(kw):
                dj = j * dw - pw
                if di == 0 and dj == 0:
                    pieces.append(v)
                else:
                    pieces.append(lane_shift(v, di * img_w + dj)
                                  * tap_mask(di, dj))
        xcol = jnp.concatenate(pieces, axis=0)          # (kh*kw*Cin, M)
        return jnp.dot(wmat, xcol, preferred_element_type=jnp.float32)

    def basic_conv(name, v):
        kh, kw, ph, pw, dh, dw = _CFG[name]
        w_ref, b_ref = wb[name]
        # BN scale is already folded into the weights; epilogue is "+ bias".
        return conv_apply(v, w_ref[...], kh, kw, ph, pw, dh, dw) + b_ref[...]

    # branch 0
    x0 = basic_conv("b0_0", x)
    # branch 1
    y = basic_conv("b1_0", x)
    y = basic_conv("b1_1", y)
    y = basic_conv("b1_2", y)
    x1 = basic_conv("b1_3", y)
    # branch 2
    y = basic_conv("b2_0", x)
    y = basic_conv("b2_1", y)
    y = basic_conv("b2_2", y)
    x2 = basic_conv("b2_3", y)
    # branch 3
    y = basic_conv("b3_0", x)
    y = basic_conv("b3_1", y)
    y = basic_conv("b3_2", y)
    x3 = basic_conv("b3_3", y)

    # conv_cat over concat([x0..x3], channel) == sum of per-slice convs.
    kh, kw, ph, pw, dh, dw = _CFG["cat"]
    wcat_ref, bcat_ref = wb["cat"]                      # (4, Cout, 9*Cout), (Cout, 1)
    y_cat = bcat_ref[...]
    for k, xk in enumerate((x0, x1, x2, x3)):
        y_cat = y_cat + conv_apply(xk, wcat_ref[k], kh, kw, ph, pw, dh, dw)

    # residual 1x1 conv, fused add + ReLU epilogue.
    y_res = basic_conv("res", x)
    o_ref[...] = jnp.maximum(y_cat + y_res, 0.0)


# ----------------------------------------------------------------------------
# Parameter preparation: fold BN scale into weights, lay out as (Cout, K).
# ----------------------------------------------------------------------------
def _fold_conv(wp):
    w, scale, bias = wp                  # (T, Cin, Cout), (1, Cout), (1, Cout)
    t, cin, cout = w.shape
    wmat = jnp.transpose(w, (2, 0, 1)).reshape(cout, t * cin)
    wmat = wmat * scale.reshape(cout, 1)                 # fold BN scale
    return wmat, bias.reshape(cout, 1)


def _prep_params(p):
    prep = {}
    for name, *_rest in _CONV_CFGS:
        if name == "cat":
            continue
        prep[name] = _fold_conv(p[name])
    # conv_cat: split its 4*Cout input channels into 4 per-branch weight slabs.
    w, scale, bias = p["cat"]                            # (9, 4*Cout, Cout)
    t, cin4, cout = w.shape
    w4 = w.reshape(t, 4, cout, cout)                     # (T, branch, Cin_slc, Cout)
    wmat4 = jnp.transpose(w4, (1, 3, 0, 2)).reshape(4, cout, t * cout)
    wmat4 = wmat4 * scale.reshape(1, cout, 1)
    prep["cat"] = (wmat4, bias.reshape(cout, 1))
    return prep


# ----------------------------------------------------------------------------
# Pallas wrapper
# ----------------------------------------------------------------------------
def msrf_forward_pallas(x_nchw, params):
    n, cin, img_h, img_w = x_nchw.shape
    m = n * img_h * img_w

    prep = _prep_params(params)
    cout = prep["b0_0"][0].shape[0]

    # NCHW -> channels-on-sublanes, flattened-spatial-on-lanes: (C, N*H*W).
    x_flat = jnp.transpose(x_nchw, (1, 0, 2, 3)).reshape(cin, m)

    pos = jnp.arange(m, dtype=jnp.int32)
    w_idx = (pos % img_w).reshape(1, m)
    h_idx = ((pos // img_w) % img_h).reshape(1, m)

    inputs = [x_flat, h_idx, w_idx]
    for name, *_rest in _CONV_CFGS:
        wmat, bias = prep[name]
        inputs += [wmat, bias]

    kernel = functools.partial(_msrf_fused_kernel,
                               img_h=img_h, img_w=img_w, m=m)
    vmem_spec = pl.BlockSpec(memory_space=pltpu.MemorySpace.VMEM)
    out_flat = pl.pallas_call(
        kernel,
        out_shape=jax.ShapeDtypeStruct((cout, m), jnp.float32),
        in_specs=[vmem_spec] * len(inputs),
        out_specs=vmem_spec,
    )(*inputs)

    return jnp.transpose(out_flat.reshape(cout, n, img_h, img_w), (1, 0, 2, 3))


# ----------------------------------------------------------------------------
# Parameter init (deterministic, synthetic; mirrors the PyTorch shapes)
# ----------------------------------------------------------------------------
def make_conv_params(key, cin, cout, kh, kw):
    k1, k2, k3, k4, k5 = jax.random.split(key, 5)
    fan_in = cin * kh * kw
    w = jax.random.normal(k1, (kh * kw, cin, cout), jnp.float32) / jnp.sqrt(fan_in)
    gamma = 1.0 + 0.1 * jax.random.normal(k2, (cout,), jnp.float32)
    beta = 0.1 * jax.random.normal(k3, (cout,), jnp.float32)
    mean = 0.1 * jax.random.normal(k4, (cout,), jnp.float32)
    var = jnp.abs(jax.random.normal(k5, (cout,), jnp.float32)) + 0.5
    eps = 1e-5  # PyTorch BatchNorm2d default
    scale = gamma / jnp.sqrt(var + eps)
    bias = beta - mean * scale
    return w, scale.reshape(1, cout), bias.reshape(1, cout)


def init_msrf_params(key, in_ch, out_ch):
    keys = iter(jax.random.split(key, 15))
    p = {}
    p["b0_0"] = make_conv_params(next(keys), in_ch, out_ch, 1, 1)

    p["b1_0"] = make_conv_params(next(keys), in_ch, out_ch, 1, 1)
    p["b1_1"] = make_conv_params(next(keys), out_ch, out_ch, 1, 3)
    p["b1_2"] = make_conv_params(next(keys), out_ch, out_ch, 3, 1)
    p["b1_3"] = make_conv_params(next(keys), out_ch, out_ch, 3, 3)

    p["b2_0"] = make_conv_params(next(keys), in_ch, out_ch, 1, 1)
    p["b2_1"] = make_conv_params(next(keys), out_ch, out_ch, 1, 5)
    p["b2_2"] = make_conv_params(next(keys), out_ch, out_ch, 5, 1)
    p["b2_3"] = make_conv_params(next(keys), out_ch, out_ch, 3, 3)

    p["b3_0"] = make_conv_params(next(keys), in_ch, out_ch, 1, 1)
    p["b3_1"] = make_conv_params(next(keys), out_ch, out_ch, 1, 7)
    p["b3_2"] = make_conv_params(next(keys), out_ch, out_ch, 7, 1)
    p["b3_3"] = make_conv_params(next(keys), out_ch, out_ch, 3, 3)

    p["cat"] = make_conv_params(next(keys), 4 * out_ch, out_ch, 3, 3)
    p["res"] = make_conv_params(next(keys), in_ch, out_ch, 1, 1)
    return p


# ----------------------------------------------------------------------------
# Plain-JAX reference (numerical sanity check only)
# ----------------------------------------------------------------------------
def _ref_conv_bn(x, w_flat, scale, bias, *, ksize, padding, dilation):
    kh, kw = ksize
    cin, cout = w_flat.shape[1], w_flat.shape[2]
    w = w_flat.reshape(kh, kw, cin, cout)
    y = jax.lax.conv_general_dilated(
        x, w, window_strides=(1, 1),
        padding=((padding[0], padding[0]), (padding[1], padding[1])),
        rhs_dilation=dilation,
        dimension_numbers=("NHWC", "HWIO", "NHWC"),
        precision=jax.lax.Precision.HIGHEST)
    return y * scale.reshape(1, 1, 1, cout) + bias.reshape(1, 1, 1, cout)


def msrf_forward_reference(x_nchw, p):
    x = jnp.transpose(x_nchw, (0, 2, 3, 1))
    c = _ref_conv_bn
    x0 = c(x, *p["b0_0"], ksize=(1, 1), padding=(0, 0), dilation=(1, 1))

    y = c(x, *p["b1_0"], ksize=(1, 1), padding=(0, 0), dilation=(1, 1))
    y = c(y, *p["b1_1"], ksize=(1, 3), padding=(0, 1), dilation=(1, 1))
    y = c(y, *p["b1_2"], ksize=(3, 1), padding=(1, 0), dilation=(1, 1))
    x1 = c(y, *p["b1_3"], ksize=(3, 3), padding=(3, 3), dilation=(3, 3))

    y = c(x, *p["b2_0"], ksize=(1, 1), padding=(0, 0), dilation=(1, 1))
    y = c(y, *p["b2_1"], ksize=(1, 5), padding=(0, 2), dilation=(1, 1))
    y = c(y, *p["b2_2"], ksize=(5, 1), padding=(2, 0), dilation=(1, 1))
    x2 = c(y, *p["b2_3"], ksize=(3, 3), padding=(5, 5), dilation=(5, 5))

    y = c(x, *p["b3_0"], ksize=(1, 1), padding=(0, 0), dilation=(1, 1))
    y = c(y, *p["b3_1"], ksize=(1, 7), padding=(0, 3), dilation=(1, 1))
    y = c(y, *p["b3_2"], ksize=(7, 1), padding=(3, 0), dilation=(1, 1))
    x3 = c(y, *p["b3_3"], ksize=(3, 3), padding=(7, 7), dilation=(7, 7))

    x_cat = c(jnp.concatenate([x0, x1, x2, x3], axis=-1),
              *p["cat"], ksize=(3, 3), padding=(1, 1), dilation=(1, 1))
    x_res = c(x, *p["res"], ksize=(1, 1), padding=(0, 0), dilation=(1, 1))
    out = jnp.maximum(x_cat + x_res, 0.0)
    return jnp.transpose(out, (0, 3, 1, 2))


# ----------------------------------------------------------------------------
if __name__ == "__main__":
    key = jax.random.PRNGKey(0)
    k_x, k_p = jax.random.split(key)

    batch, in_ch, out_ch, hw = 2, 4, 8, 16
    x = jax.random.normal(k_x, (batch, in_ch, hw, hw), jnp.float32)   # NCHW
    params = init_msrf_params(k_p, in_ch, out_ch)

    out = jax.block_until_ready(jax.jit(msrf_forward_pallas)(x, params))
    ref = jax.block_until_ready(msrf_forward_reference(x, params))

    assert out.shape == (batch, out_ch, hw, hw), out.shape
    assert jnp.allclose(out, ref, rtol=1e-2, atol=1e-2), \
        float(jnp.max(jnp.abs(out - ref)))

    print("KERNEL_OK")
</pallas_src>

<mosaic_0001>
module attributes {stable_mosaic.version = 11 : i64} {
  func.func @_msrf_fused_kernel(%arg0: memref<4x512xf32, #tpu.memory_space<vmem>>, %arg1: memref<1x512xi32, #tpu.memory_space<vmem>>, %arg2: memref<1x512xi32, #tpu.memory_space<vmem>>, %arg3: memref<8x4xf32, #tpu.memory_space<vmem>>, %arg4: memref<8x1xf32, #tpu.memory_space<vmem>>, %arg5: memref<8x4xf32, #tpu.memory_space<vmem>>, %arg6: memref<8x1xf32, #tpu.memory_space<vmem>>, %arg7: memref<8x24xf32, #tpu.memory_space<vmem>>, %arg8: memref<8x1xf32, #tpu.memory_space<vmem>>, %arg9: memref<8x24xf32, #tpu.memory_space<vmem>>, %arg10: memref<8x1xf32, #tpu.memory_space<vmem>>, %arg11: memref<8x72xf32, #tpu.memory_space<vmem>>, %arg12: memref<8x1xf32, #tpu.memory_space<vmem>>, %arg13: memref<8x4xf32, #tpu.memory_space<vmem>>, %arg14: memref<8x1xf32, #tpu.memory_space<vmem>>, %arg15: memref<8x40xf32, #tpu.memory_space<vmem>>, %arg16: memref<8x1xf32, #tpu.memory_space<vmem>>, %arg17: memref<8x40xf32, #tpu.memory_space<vmem>>, %arg18: memref<8x1xf32, #tpu.memory_space<vmem>>, %arg19: memref<8x72xf32, #tpu.memory_space<vmem>>, %arg20: memref<8x1xf32, #tpu.memory_space<vmem>>, %arg21: memref<8x4xf32, #tpu.memory_space<vmem>>, %arg22: memref<8x1xf32, #tpu.memory_space<vmem>>, %arg23: memref<8x56xf32, #tpu.memory_space<vmem>>, %arg24: memref<8x1xf32, #tpu.memory_space<vmem>>, %arg25: memref<8x56xf32, #tpu.memory_space<vmem>>, %arg26: memref<8x1xf32, #tpu.memory_space<vmem>>, %arg27: memref<8x72xf32, #tpu.memory_space<vmem>>, %arg28: memref<8x1xf32, #tpu.memory_space<vmem>>, %arg29: memref<4x8x72xf32, #tpu.memory_space<vmem>>, %arg30: memref<8x1xf32, #tpu.memory_space<vmem>>, %arg31: memref<8x4xf32, #tpu.memory_space<vmem>>, %arg32: memref<8x1xf32, #tpu.memory_space<vmem>>, %arg33: memref<8x512xf32, #tpu.memory_space<vmem>>) attributes {dimension_semantics = [], scalar_prefetch = 0 : i64, scratch_operands = 0 : i64, tpu.core_type = #tpu.core_type<tc>} {
    %c0 = arith.constant 0 : index
    %c0_0 = arith.constant 0 : index
    %0 = vector.load %arg0[%c0, %c0_0] : memref<4x512xf32, #tpu.memory_space<vmem>>, vector<4x512xf32>
    %c0_1 = arith.constant 0 : index
    %c0_2 = arith.constant 0 : index
    %1 = vector.load %arg1[%c0_1, %c0_2] : memref<1x512xi32, #tpu.memory_space<vmem>>, vector<1x512xi32>
    %c0_3 = arith.constant 0 : index
    %c0_4 = arith.constant 0 : index
    %2 = vector.load %arg2[%c0_3, %c0_4] : memref<1x512xi32, #tpu.memory_space<vmem>>, vector<1x512xi32>
    %c0_5 = arith.constant 0 : index
    %c0_6 = arith.constant 0 : index
    %3 = vector.load %arg3[%c0_5, %c0_6] : memref<8x4xf32, #tpu.memory_space<vmem>>, vector<8x4xf32>
    %cst = arith.constant dense<0.000000e+00> : vector<8x512xf32>
    %4 = tpu.matmul %3, %0, %cst {dimension_numbers = #tpu.dot_dimension_numbers<[1], [0], [0], [1], [0, 0, 1, 1], [], []>} : vector<8x4xf32>, vector<4x512xf32>, vector<8x512xf32> -> vector<8x512xf32>
    %c0_7 = arith.constant 0 : index
    %c0_8 = arith.constant 0 : index
    %5 = vector.load %arg4[%c0_7, %c0_8] : memref<8x1xf32, #tpu.memory_space<vmem>>, vector<8x1xf32>
    %6 = vector.broadcast %5 : vector<8x1xf32> to vector<8x512xf32>
    %7 = arith.addf %4, %6 : vector<8x512xf32>
    %c0_9 = arith.constant 0 : index
    %c0_10 = arith.constant 0 : index
    %8 = vector.load %arg5[%c0_9, %c0_10] : memref<8x4xf32, #tpu.memory_space<vmem>>, vector<8x4xf32>
    %cst_11 = arith.constant dense<0.000000e+00> : vector<8x512xf32>
    %9 = tpu.matmul %8, %0, %cst_11 {dimension_numbers = #tpu.dot_dimension_numbers<[1], [0], [0], [1], [0, 0, 1, 1], [], []>} : vector<8x4xf32>, vector<4x512xf32>, vector<8x512xf32> -> vector<8x512xf32>
    %c0_12 = arith.constant 0 : index
    %c0_13 = arith.constant 0 : index
    %10 = vector.load %arg6[%c0_12, %c0_13] : memref<8x1xf32, #tpu.memory_space<vmem>>, vector<8x1xf32>
    %11 = vector.broadcast %10 : vector<8x1xf32> to vector<8x512xf32>
    %12 = arith.addf %9, %11 : vector<8x512xf32>
    %c0_14 = arith.constant 0 : index
    %c0_15 = arith.constant 0 : index
    %13 = vector.load %arg7[%c0_14, %c0_15] : memref<8x24xf32, #tpu.memory_space<vmem>>, vector<8x24xf32>
    %14 = vector.extract_strided_slice %12 {offsets = [0, 511], sizes = [8, 1], strides = [1, 1]} : vector<8x512xf32> to vector<8x1xf32>
    %15 = vector.extract_strided_slice %12 {offsets = [0, 0], sizes = [8, 511], strides = [1, 1]} : vector<8x512xf32> to vector<8x511xf32>
    %16 = tpu.concatenate %14, %15 in 1 : vector<8x1xf32>, vector<8x511xf32> -> vector<8x512xf32>
    %c0_i32 = arith.constant 0 : i32
    %17 = vector.broadcast %c0_i32 : i32 to vector<1x512xi32>
    %18 = arith.addi %1, %17 : vector<1x512xi32>
    %c0_i32_16 = arith.constant 0 : i32
    %19 = vector.broadcast %c0_i32_16 : i32 to vector<1x512xi32>
    %20 = arith.cmpi sge, %18, %19 : vector<1x512xi32>
    %c0_i32_17 = arith.constant 0 : i32
    %21 = vector.broadcast %c0_i32_17 : i32 to vector<1x512xi32>
    %22 = arith.addi %1, %21 : vector<1x512xi32>
    %c16_i32 = arith.constant 16 : i32
    %23 = vector.broadcast %c16_i32 : i32 to vector<1x512xi32>
    %24 = arith.cmpi slt, %22, %23 : vector<1x512xi32>
    %25 = arith.andi %20, %24 : vector<1x512xi1>
    %c-1_i32 = arith.constant -1 : i32
    %26 = vector.broadcast %c-1_i32 : i32 to vector<1x512xi32>
    %27 = arith.addi %2, %26 : vector<1x512xi32>
    %c0_i32_18 = arith.constant 0 : i32
    %28 = vector.broadcast %c0_i32_18 : i32 to vector<1x512xi32>
    %29 = arith.cmpi sge, %27, %28 : vector<1x512xi32>
    %30 = arith.andi %25, %29 : vector<1x512xi1>
    %c-1_i32_19 = arith.constant -1 : i32
    %31 = vector.broadcast %c-1_i32_19 : i32 to vector<1x512xi32>
    %32 = arith.addi %2, %31 : vector<1x512xi32>
    %c16_i32_20 = arith.constant 16 : i32
    %33 = vector.broadcast %c16_i32_20 : i32 to vector<1x512xi32>
    %34 = arith.cmpi slt, %32, %33 : vector<1x512xi32>
    %35 = arith.andi %30, %34 : vector<1x512xi1>
    %cst_21 = arith.constant 1.000000e+00 : f32
    %cst_22 = arith.constant 0.000000e+00 : f32
    %36 = vector.broadcast %cst_21 : f32 to vector<1x512xf32>
    %37 = vector.broadcast %cst_22 : f32 to vector<1x512xf32>
    %38 = arith.select %35, %36, %37 : vector<1x512xi1>, vector<1x512xf32>
    %39 = vector.broadcast %38 : vector<1x512xf32> to vector<8x512xf32>
    %40 = arith.mulf %16, %39 : vector<8x512xf32>
    %41 = vector.extract_strided_slice %12 {offsets = [0, 1], sizes = [8, 511], strides = [1, 1]} : vector<8x512xf32> to vector<8x511xf32>
    %42 = vector.extract_strided_slice %12 {offsets = [0, 0], sizes = [8, 1], strides = [1, 1]} : vector<8x512xf32> to vector<8x1xf32>
    %43 = tpu.concatenate %41, %42 in 1 : vector<8x511xf32>, vector<8x1xf32> -> vector<8x512xf32>
    %c0_i32_23 = arith.constant 0 : i32
    %44 = vector.broadcast %c0_i32_23 : i32 to vector<1x512xi32>
    %45 = arith.addi %1, %44 : vector<1x512xi32>
    %c0_i32_24 = arith.constant 0 : i32
    %46 = vector.broadcast %c0_i32_24 : i32 to vector<1x512xi32>
    %47 = arith.cmpi sge, %45, %46 : vector<1x512xi32>
    %c0_i32_25 = arith.constant 0 : i32
    %48 = vector.broadcast %c0_i32_25 : i32 to vector<1x512xi32>
    %49 = arith.addi %1, %48 : vector<1x512xi32>
    %c16_i32_26 = arith.constant 16 : i32
    %50 = vector.broadcast %c16_i32_26 : i32 to vector<1x512xi32>
    %51 = arith.cmpi slt, %49, %50 : vector<1x512xi32>
    %52 = arith.andi %47, %51 : vector<1x512xi1>
    %c1_i32 = arith.constant 1 : i32
    %53 = vector.broadcast %c1_i32 : i32 to vector<1x512xi32>
    %54 = arith.addi %2, %53 : vector<1x512xi32>
    %c0_i32_27 = arith.constant 0 : i32
    %55 = vector.broadcast %c0_i32_27 : i32 to vector<1x512xi32>
    %56 = arith.cmpi sge, %54, %55 : vector<1x512xi32>
    %57 = arith.andi %52, %56 : vector<1x512xi1>
    %c1_i32_28 = arith.constant 1 : i32
    %58 = vector.broadcast %c1_i32_28 : i32 to vector<1x512xi32>
    %59 = arith.addi %2, %58 : vector<1x512xi32>
    %c16_i32_29 = arith.constant 16 : i32
    %60 = vector.broadcast %c16_i32_29 : i32 to vector<1x512xi32>
    %61 = arith.cmpi slt, %59, %60 : vector<1x512xi32>
    %62 = arith.andi %57, %61 : vector<1x512xi1>
    %cst_30 = arith.constant 1.000000e+00 : f32
    %cst_31 = arith.constant 0.000000e+00 : f32
    %63 = vector.broadcast %cst_30 : f32 to vector<1x512xf32>
    %64 = vector.broadcast %cst_31 : f32 to vector<1x512xf32>
    %65 = arith.select %62, %63, %64 : vector<1x512xi1>, vector<1x512xf32>
    %66 = vector.broadcast %65 : vector<1x512xf32> to vector<8x512xf32>
    %67 = arith.mulf %43, %66 : vector<8x512xf32>
    %68 = tpu.concatenate %40, %12, %67 in 0 : vector<8x512xf32>, vector<8x512xf32>, vector<8x512xf32> -> vector<24x512xf32>
    %cst_32 = arith.constant dense<0.000000e+00> : vector<8x512xf32>
    %69 = tpu.matmul %13, %68, %cst_32 {dimension_numbers = #tpu.dot_dimension_numbers<[1], [0], [0], [1], [0, 0, 1, 1], [], []>} : vector<8x24xf32>, vector<24x512xf32>, vector<8x512xf32> -> vector<8x512xf32>
    %c0_33 = arith.constant 0 : index
    %c0_34 = arith.constant 0 : index
    %70 = vector.load %arg8[%c0_33, %c0_34] : memref<8x1xf32, #tpu.memory_space<vmem>>, vector<8x1xf32>
    %71 = vector.broadcast %70 : vector<8x1xf32> to vector<8x512xf32>
    %72 = arith.addf %69, %71 : vector<8x512xf32>
    %c0_35 = arith.constant 0 : index
    %c0_36 = arith.constant 0 : index
    %73 = vector.load %arg9[%c0_35, %c0_36] : memref<8x24xf32, #tpu.memory_space<vmem>>, vector<8x24xf32>
    %74 = vector.extract_strided_slice %72 {offsets = [0, 496], sizes = [8, 16], strides = [1, 1]} : vector<8x512xf32> to vector<8x16xf32>
    %75 = vector.extract_strided_slice %72 {offsets = [0, 0], sizes = [8, 496], strides = [1, 1]} : vector<8x512xf32> to vector<8x496xf32>
    %76 = tpu.concatenate %74, %75 in 1 : vector<8x16xf32>, vector<8x496xf32> -> vector<8x512xf32>
    %c-1_i32_37 = arith.constant -1 : i32
    %77 = vector.broadcast %c-1_i32_37 : i32 to vector<1x512xi32>
    %78 = arith.addi %1, %77 : vector<1x512xi32>
    %c0_i32_38 = arith.constant 0 : i32
    %79 = vector.broadcast %c0_i32_38 : i32 to vector<1x512xi32>
    %80 = arith.cmpi sge, %78, %79 : vector<1x512xi32>
    %c-1_i32_39 = arith.constant -1 : i32
    %81 = vector.broadcast %c-1_i32_39 : i32 to vector<1x512xi32>
    %82 = arith.addi %1, %81 : vector<1x512xi32>
    %c16_i32_40 = arith.constant 16 : i32
    %83 = vector.broadcast %c16_i32_40 : i32 to vector<1x512xi32>
    %84 = arith.cmpi slt, %82, %83 : vector<1x512xi32>
    %85 = arith.andi %80, %84 : vector<1x512xi1>
    %c0_i32_41 = arith.constant 0 : i32
    %86 = vector.broadcast %c0_i32_41 : i32 to vector<1x512xi32>
    %87 = arith.addi %2, %86 : vector<1x512xi32>
    %c0_i32_42 = arith.constant 0 : i32
    %88 = vector.broadcast %c0_i32_42 : i32 to vector<1x512xi32>
    %89 = arith.cmpi sge, %87, %88 : vector<1x512xi32>
    %90 = arith.andi %85, %89 : vector<1x512xi1>
    %c0_i32_43 = arith.constant 0 : i32
    %91 = vector.broadcast %c0_i32_43 : i32 to vector<1x512xi32>
    %92 = arith.addi %2, %91 : vector<1x512xi32>
    %c16_i32_44 = arith.constant 16 : i32
    %93 = vector.broadcast %c16_i32_44 : i32 to vector<1x512xi32>
    %94 = arith.cmpi slt, %92, %93 : vector<1x512xi32>
    %95 = arith.andi %90, %94 : vector<1x512xi1>
    %cst_45 = arith.constant 1.000000e+00 : f32
    %cst_46 = arith.constant 0.000000e+00 : f32
    %96 = vector.broadcast %cst_45 : f32 to vector<1x512xf32>
    %97 = vector.broadcast %cst_46 : f32 to vector<1x512xf32>
    %98 = arith.select %95, %96, %97 : vector<1x512xi1>, vector<1x512xf32>
    %99 = vector.broadcast %98 : vector<1x512xf32> to vector<8x512xf32>
    %100 = arith.mulf %76, %99 : vector<8x512xf32>
    %101 = vector.extract_strided_slice %72 {offsets = [0, 16], sizes = [8, 496], strides = [1, 1]} : vector<8x512xf32> to vector<8x496xf32>
    %102 = vector.extract_strided_slice %72 {offsets = [0, 0], sizes = [8, 16], strides = [1, 1]} : vector<8x512xf32> to vector<8x16xf32>
    %103 = tpu.concatenate %101, %102 in 1 : vector<8x496xf32>, vector<8x16xf32> -> vector<8x512xf32>
    %c1_i32_47 = arith.constant 1 : i32
    %104 = vector.broadcast %c1_i32_47 : i32 to vector<1x512xi32>
    %105 = arith.addi %1, %104 : vector<1x512xi32>
    %c0_i32_48 = arith.constant 0 : i32
    %106 = vector.broadcast %c0_i32_48 : i32 to vector<1x512xi32>
    %107 = arith.cmpi sge, %105, %106 : vector<1x512xi32>
    %c1_i32_49 = arith.constant 1 : i32
    %108 = vector.broadcast %c1_i32_49 : i32 to vector<1x512xi32>
    %109 = arith.addi %1, %108 : vector<1x512xi32>
    %c16_i32_50 = arith.constant 16 : i32
    %110 = vector.broadcast %c16_i32_50 : i32 to vector<1x512xi32>
    %111 = arith.cmpi slt, %109, %110 : vector<1x512xi32>
    %112 = arith.andi %107, %111 : vector<1x512xi1>
    %c0_i32_51 = arith.constant 0 : i32
    %113 = vector.broadcast %c0_i32_51 : i32 to vector<1x512xi32>
    %114 = arith.addi %2, %113 : vector<1x512xi32>
    %c0_i32_52 = arith.constant 0 : i32
    %115 = vector.broadcast %c0_i32_52 : i32 to vector<1x512xi32>
    %116 = arith.cmpi sge, %114, %115 : vector<1x512xi32>
    %117 = arith.andi %112, %116 : vector<1x512xi1>
    %c0_i32_53 = arith.constant 0 : i32
    %118 = vector.broadcast %c0_i32_53 : i32 to vector<1x512xi32>
    %119 = arith.addi %2, %118 : vector<1x512xi32>
    %c16_i32_54 = arith.constant 16 : i32
    %120 = vector.broadcast %c16_i32_54 : i32 to vector<1x512xi32>
    %121 = arith.cmpi slt, %119, %120 : vector<1x512xi32>
    %122 = arith.andi %117, %121 : vector<1x512xi1>
    %cst_55 = arith.constant 1.000000e+00 : f32
    %cst_56 = arith.constant 0.000000e+00 : f32
    %123 = vector.broadcast %cst_55 : f32 to vector<1x512xf32>
    %124 = vector.broadcast %cst_56 : f32 to vector<1x512xf32>
    %125 = arith.select %122, %123, %124 : vector<1x512xi1>, vector<1x512xf32>
    %126 = vector.broadcast %125 : vector<1x512xf32> to vector<8x512xf32>
    %127 = arith.mulf %103, %126 : vector<8x512xf32>
    %128 = tpu.concatenate %100, %72, %127 in 0 : vector<8x512xf32>, vector<8x512xf32>, vector<8x512xf32> -> vector<24x512xf32>
    %cst_57 = arith.constant dense<0.000000e+00> : vector<8x512xf32>
    %129 = tpu.matmul %73, %128, %cst_57 {dimension_numbers = #tpu.dot_dimension_numbers<[1], [0], [0], [1], [0, 0, 1, 1], [], []>} : vector<8x24xf32>, vector<24x512xf32>, vector<8x512xf32> -> vector<8x512xf32>
    %c0_58 = arith.constant 0 : index
    %c0_59 = arith.constant 0 : index
    %130 = vector.load %arg10[%c0_58, %c0_59] : memref<8x1xf32, #tpu.memory_space<vmem>>, vector<8x1xf32>
    %131 = vector.broadcast %130 : vector<8x1xf32> to vector<8x512xf32>
    %132 = arith.addf %129, %131 : vector<8x512xf32>
    %c0_60 = arith.constant 0 : index
    %c0_61 = arith.constant 0 : index
    %133 = vector.load %arg11[%c0_60, %c0_61] : memref<8x72xf32, #tpu.memory_space<vmem>>, vector<8x72xf32>
    %134 = vector.extract_strided_slice %132 {offsets = [0, 461], sizes = [8, 51], strides = [1, 1]} : vector<8x512xf32> to vector<8x51xf32>
    %135 = vector.extract_strided_slice %132 {offsets = [0, 0], sizes = [8, 461], strides = [1, 1]} : vector<8x512xf32> to vector<8x461xf32>
    %136 = tpu.concatenate %134, %135 in 1 : vector<8x51xf32>, vector<8x461xf32> -> vector<8x512xf32>
    %c-3_i32 = arith.constant -3 : i32
    %137 = vector.broadcast %c-3_i32 : i32 to vector<1x512xi32>
    %138 = arith.addi %1, %137 : vector<1x512xi32>
    %c0_i32_62 = arith.constant 0 : i32
    %139 = vector.broadcast %c0_i32_62 : i32 to vector<1x512xi32>
    %140 = arith.cmpi sge, %138, %139 : vector<1x512xi32>
    %c-3_i32_63 = arith.constant -3 : i32
    %141 = vector.broadcast %c-3_i32_63 : i32 to vector<1x512xi32>
    %142 = arith.addi %1, %141 : vector<1x512xi32>
    %c16_i32_64 = arith.constant 16 : i32
    %143 = vector.broadcast %c16_i32_64 : i32 to vector<1x512xi32>
    %144 = arith.cmpi slt, %142, %143 : vector<1x512xi32>
    %145 = arith.andi %140, %144 : vector<1x512xi1>
    %c-3_i32_65 = arith.constant -3 : i32
    %146 = vector.broadcast %c-3_i32_65 : i32 to vector<1x512xi32>
    %147 = arith.addi %2, %146 : vector<1x512xi32>
    %c0_i32_66 = arith.constant 0 : i32
    %148 = vector.broadcast %c0_i32_66 : i32 to vector<1x512xi32>
    %149 = arith.cmpi sge, %147, %148 : vector<1x512xi32>
    %150 = arith.andi %145, %149 : vector<1x512xi1>
    %c-3_i32_67 = arith.constant -3 : i32
    %151 = vector.broadcast %c-3_i32_67 : i32 to vector<1x512xi32>
    %152 = arith.addi %2, %151 : vector<1x512xi32>
    %c16_i32_68 = arith.constant 16 : i32
    %153 = vector.broadcast %c16_i32_68 : i32 to vector<1x512xi32>
    %154 = arith.cmpi slt, %152, %153 : vector<1x512xi32>
    %155 = arith.andi %150, %154 : vector<1x512xi1>
    %cst_69 = arith.constant 1.000000e+00 : f32
    %cst_70 = arith.constant 0.000000e+00 : f32
    %156 = vector.broadcast %cst_69 : f32 to vector<1x512xf32>
    %157 = vector.broadcast %cst_70 : f32 to vector<1x512xf32>
    %158 = arith.select %155, %156, %157 : vector<1x512xi1>, vector<1x512xf32>
    %159 = vector.broadcast %158 : vector<1x512xf32> to vector<8x512xf32>
    %160 = arith.mulf %136, %159 : vector<8x512xf32>
    %161 = vector.extract_strided_slice %132 {offsets = [0, 464], sizes = [8, 48], strides = [1, 1]} : vector<8x512xf32> to vector<8x48xf32>
    %162 = vector.extract_strided_slice %132 {offsets = [0, 0], sizes = [8, 464], strides = [1, 1]} : vector<8x512xf32> to vector<8x464xf32>
    %163 = tpu.concatenate %161, %162 in 1 : vector<8x48xf32>, vector<8x464xf32> -> vector<8x512xf32>
    %c-3_i32_71 = arith.constant -3 : i32
    %164 = vector.broadcast %c-3_i32_71 : i32 to vector<1x512xi32>
    %165 = arith.addi %1, %164 : vector<1x512xi32>
    %c0_i32_72 = arith.constant 0 : i32
    %166 = vector.broadcast %c0_i32_72 : i32 to vector<1x512xi32>
    %167 = arith.cmpi sge, %165, %166 : vector<1x512xi32>
    %c-3_i32_73 = arith.constant -3 : i32
    %168 = vector.broadcast %c-3_i32_73 : i32 to vector<1x512xi32>
    %169 = arith.addi %1, %168 : vector<1x512xi32>
    %c16_i32_74 = arith.constant 16 : i32
    %170 = vector.broadcast %c16_i32_74 : i32 to vector<1x512xi32>
    %171 = arith.cmpi slt, %169, %170 : vector<1x512xi32>
    %172 = arith.andi %167, %171 : vector<1x512xi1>
    %c0_i32_75 = arith.constant 0 : i32
    %173 = vector.broadcast %c0_i32_75 : i32 to vector<1x512xi32>
    %174 = arith.addi %2, %173 : vector<1x512xi32>
    %c0_i32_76 = arith.constant 0 : i32
    %175 = vector.broadcast %c0_i32_76 : i32 to vector<1x512xi32>
    %176 = arith.cmpi sge, %174, %175 : vector<1x512xi32>
    %177 = arith.andi %172, %176 : vector<1x512xi1>
    %c0_i32_77 = arith.constant 0 : i32
    %178 = vector.broadcast %c0_i32_77 : i32 to vector<1x512xi32>
    %179 = arith.addi %2, %178 : vector<1x512xi32>
    %c16_i32_78 = arith.constant 16 : i32
    %180 = vector.broadcast %c16_i32_78 : i32 to vector<1x512xi32>
    %181 = arith.cmpi slt, %179, %180 : vector<1x512xi32>
    %182 = arith.andi %177, %181 : vector<1x512xi1>
    %cst_79 = arith.constant 1.000000e+00 : f32
    %cst_80 = arith.constant 0.000000e+00 : f32
    %183 = vector.broadcast %cst_79 : f32 to vector<1x512xf32>
    %184 = vector.broadcast %cst_80 : f32 to vector<1x512xf32>
    %185 = arith.select %182, %183, %184 : vector<1x512xi1>, vector<1x512xf32>
    %186 = vector.broadcast %185 : vector<1x512xf32> to vector<8x512xf32>
    %187 = arith.mulf %163, %186 : vector<8x512xf32>
    %188 = vector.extract_strided_slice %132 {offsets = [0, 467], sizes = [8, 45], strides = [1, 1]} : vector<8x512xf32> to vector<8x45xf32>
    %189 = vector.extract_strided_slice %132 {offsets = [0, 0], sizes = [8, 467], strides = [1, 1]} : vector<8x512xf32> to vector<8x467xf32>
    %190 = tpu.concatenate %188, %189 in 1 : vector<8x45xf32>, vector<8x467xf32> -> vector<8x512xf32>
    %c-3_i32_81 = arith.constant -3 : i32
    %191 = vector.broadcast %c-3_i32_81 : i32 to vector<1x512xi32>
    %192 = arith.addi %1, %191 : vector<1x512xi32>
    %c0_i32_82 = arith.constant 0 : i32
    %193 = vector.broadcast %c0_i32_82 : i32 to vector<1x512xi32>
    %194 = arith.cmpi sge, %192, %193 : vector<1x512xi32>
    %c-3_i32_83 = arith.constant -3 : i32
    %195 = vector.broadcast %c-3_i32_83 : i32 to vector<1x512xi32>
    %196 = arith.addi %1, %195 : vector<1x512xi32>
    %c16_i32_84 = arith.constant 16 : i32
    %197 = vector.broadcast %c16_i32_84 : i32 to vector<1x512xi32>
    %198 = arith.cmpi slt, %196, %197 : vector<1x512xi32>
    %199 = arith.andi %194, %198 : vector<1x512xi1>
    %c3_i32 = arith.constant 3 : i32
    %200 = vector.broadcast %c3_i32 : i32 to vector<1x512xi32>
    %201 = arith.addi %2, %200 : vector<1x512xi32>
    %c0_i32_85 = arith.constant 0 : i32
    %202 = vector.broadcast %c0_i32_85 : i32 to vector<1x512xi32>
    %203 = arith.cmpi sge, %201, %202 : vector<1x512xi32>
    %204 = arith.andi %199, %203 : vector<1x512xi1>
    %c3_i32_86 = arith.constant 3 : i32
    %205 = vector.broadcast %c3_i32_86 : i32 to vector<1x512xi32>
    %206 = arith.addi %2, %205 : vector<1x512xi32>
    %c16_i32_87 = arith.constant 16 : i32
    %207 = vector.broadcast %c16_i32_87 : i32 to vector<1x512xi32>
    %208 = arith.cmpi slt, %206, %207 : vector<1x512xi32>
    %209 = arith.andi %204, %208 : vector<1x512xi1>
    %cst_88 = arith.constant 1.000000e+00 : f32
    %cst_89 = arith.constant 0.000000e+00 : f32
    %210 = vector.broadcast %cst_88 : f32 to vector<1x512xf32>
    %211 = vector.broadcast %cst_89 : f32 to vector<1x512xf32>
    %212 = arith.select %209, %210, %211 : vector<1x512xi1>, vector<1x512xf32>
    %213 = vector.broadcast %212 : vector<1x512xf32> to vector<8x512xf32>
    %214 = arith.mulf %190, %213 : vector<8x512xf32>
    %215 = vector.extract_strided_slice %132 {offsets = [0, 509], sizes = [8, 3], strides = [1, 1]} : vector<8x512xf32> to vector<8x3xf32>
    %216 = vector.extract_strided_slice %132 {offsets = [0, 0], sizes = [8, 509], strides = [1, 1]} : vector<8x512xf32> to vector<8x509xf32>
    %217 = tpu.concatenate %215, %216 in 1 : vector<8x3xf32>, vector<8x509xf32> -> vector<8x512xf32>
    %c0_i32_90 = arith.constant 0 : i32
    %218 = vector.broadcast %c0_i32_90 : i32 to vector<1x512xi32>
    %219 = arith.addi %1, %218 : vector<1x512xi32>
    %c0_i32_91 = arith.constant 0 : i32
    %220 = vector.broadcast %c0_i32_91 : i32 to vector<1x512xi32>
    %221 = arith.cmpi sge, %219, %220 : vector<1x512xi32>
    %c0_i32_92 = arith.constant 0 : i32
    %222 = vector.broadcast %c0_i32_92 : i32 to vector<1x512xi32>
    %223 = arith.addi %1, %222 : vector<1x512xi32>
    %c16_i32_93 = arith.constant 16 : i32
    %224 = vector.broadcast %c16_i32_93 : i32 to vector<1x512xi32>
    %225 = arith.cmpi slt, %223, %224 : vector<1x512xi32>
    %226 = arith.andi %221, %225 : vector<1x512xi1>
    %c-3_i32_94 = arith.constant -3 : i32
    %227 = vector.broadcast %c-3_i32_94 : i32 to vector<1x512xi32>
    %228 = arith.addi %2, %227 : vector<1x512xi32>
    %c0_i32_95 = arith.constant 0 : i32
    %229 = vector.broadcast %c0_i32_95 : i32 to vector<1x512xi32>
    %230 = arith.cmpi sge, %228, %229 : vector<1x512xi32>
    %231 = arith.andi %226, %230 : vector<1x512xi1>
    %c-3_i32_96 = arith.constant -3 : i32
    %232 = vector.broadcast %c-3_i32_96 : i32 to vector<1x512xi32>
    %233 = arith.addi %2, %232 : vector<1x512xi32>
    %c16_i32_97 = arith.constant 16 : i32
    %234 = vector.broadcast %c16_i32_97 : i32 to vector<1x512xi32>
    %235 = arith.cmpi slt, %233, %234 : vector<1x512xi32>
    %236 = arith.andi %231, %235 : vector<1x512xi1>
    %cst_98 = arith.constant 1.000000e+00 : f32
    %cst_99 = arith.constant 0.000000e+00 : f32
    %237 = vector.broadcast %cst_98 : f32 to vector<1x512xf32>
    %238 = vector.broadcast %cst_99 : f32 to vector<1x512xf32>
    %239 = arith.select %236, %237, %238 : vector<1x512xi1>, vector<1x512xf32>
    %240 = vector.broadcast %239 : vector<1x512xf32> to vector<8x512xf32>
    %241 = arith.mulf %217, %240 : vector<8x512xf32>
    %242 = vector.extract_strided_slice %132 {offsets = [0, 3], sizes = [8, 509], strides = [1, 1]} : vector<8x512xf32> to vector<8x509xf32>
    %243 = vector.extract_strided_slice %132 {offsets = [0, 0], sizes = [8, 3], strides = [1, 1]} : vector<8x512xf32> to vector<8x3xf32>
    %244 = tpu.concatenate %242, %243 in 1 : vector<8x509xf32>, vector<8x3xf32> -> vector<8x512xf32>
    %c0_i32_100 = arith.constant 0 : i32
    %245 = vector.broadcast %c0_i32_100 : i32 to vector<1x512xi32>
    %246 = arith.addi %1, %245 : vector<1x512xi32>
    %c0_i32_101 = arith.constant 0 : i32
    %247 = vector.broadcast %c0_i32_101 : i32 to vector<1x512xi32>
    %248 = arith.cmpi sge, %246, %247 : vector<1x512xi32>
    %c0_i32_102 = arith.constant 0 : i32
    %249 = vector.broadcast %c0_i32_102 : i32 to vector<1x512xi32>
    %250 = arith.addi %1, %249 : vector<1x512xi32>
    %c16_i32_103 = arith.constant 16 : i32
    %251 = vector.broadcast %c16_i32_103 : i32 to vector<1x512xi32>
    %252 = arith.cmpi slt, %250, %251 : vector<1x512xi32>
    %253 = arith.andi %248, %252 : vector<1x512xi1>
    %c3_i32_104 = arith.constant 3 : i32
    %254 = vector.broadcast %c3_i32_104 : i32 to vector<1x512xi32>
    %255 = arith.addi %2, %254 : vector<1x512xi32>
    %c0_i32_105 = arith.constant 0 : i32
    %256 = vector.broadcast %c0_i32_105 : i32 to vector<1x512xi32>
    %257 = arith.cmpi sge, %255, %256 : vector<1x512xi32>
    %258 = arith.andi %253, %257 : vector<1x512xi1>
    %c3_i32_106 = arith.constant 3 : i32
    %259 = vector.broadcast %c3_i32_106 : i32 to vector<1x512xi32>
    %260 = arith.addi %2, %259 : vector<1x512xi32>
    %c16_i32_107 = arith.constant 16 : i32
    %261 = vector.broadcast %c16_i32_107 : i32 to vector<1x512xi32>
    %262 = arith.cmpi slt, %260, %261 : vector<1x512xi32>
    %263 = arith.andi %258, %262 : vector<1x512xi1>
    %cst_108 = arith.constant 1.000000e+00 : f32
    %cst_109 = arith.constant 0.000000e+00 : f32
    %264 = vector.broadcast %cst_108 : f32 to vector<1x512xf32>
    %265 = vector.broadcast %cst_109 : f32 to vector<1x512xf32>
    %266 = arith.select %263, %264, %265 : vector<1x512xi1>, vector<1x512xf32>
    %267 = vector.broadcast %266 : vector<1x512xf32> to vector<8x512xf32>
    %268 = arith.mulf %244, %267 : vector<8x512xf32>
    %269 = vector.extract_strided_slice %132 {offsets = [0, 45], sizes = [8, 467], strides = [1, 1]} : vector<8x512xf32> to vector<8x467xf32>
    %270 = vector.extract_strided_slice %132 {offsets = [0, 0], sizes = [8, 45], strides = [1, 1]} : vector<8x512xf32> to vector<8x45xf32>
    %271 = tpu.concatenate %269, %270 in 1 : vector<8x467xf32>, vector<8x45xf32> -> vector<8x512xf32>
    %c3_i32_110 = arith.constant 3 : i32
    %272 = vector.broadcast %c3_i32_110 : i32 to vector<1x512xi32>
    %273 = arith.addi %1, %272 : vector<1x512xi32>
    %c0_i32_111 = arith.constant 0 : i32
    %274 = vector.broadcast %c0_i32_111 : i32 to vector<1x512xi32>
    %275 = arith.cmpi sge, %273, %274 : vector<1x512xi32>
    %c3_i32_112 = arith.constant 3 : i32
    %276 = vector.broadcast %c3_i32_112 : i32 to vector<1x512xi32>
    %277 = arith.addi %1, %276 : vector<1x512xi32>
    %c16_i32_113 = arith.constant 16 : i32
    %278 = vector.broadcast %c16_i32_113 : i32 to vector<1x512xi32>
    %279 = arith.cmpi slt, %277, %278 : vector<1x512xi32>
    %280 = arith.andi %275, %279 : vector<1x512xi1>
    %c-3_i32_114 = arith.constant -3 : i32
    %281 = vector.broadcast %c-3_i32_114 : i32 to vector<1x512xi32>
    %282 = arith.addi %2, %281 : vector<1x512xi32>
    %c0_i32_115 = arith.constant 0 : i32
    %283 = vector.broadcast %c0_i32_115 : i32 to vector<1x512xi32>
    %284 = arith.cmpi sge, %282, %283 : vector<1x512xi32>
    %285 = arith.andi %280, %284 : vector<1x512xi1>
    %c-3_i32_116 = arith.constant -3 : i32
    %286 = vector.broadcast %c-3_i32_116 : i32 to vector<1x512xi32>
    %287 = arith.addi %2, %286 : vector<1x512xi32>
    %c16_i32_117 = arith.constant 16 : i32
    %288 = vector.broadcast %c16_i32_117 : i32 to vector<1x512xi32>
    %289 = arith.cmpi slt, %287, %288 : vector<1x512xi32>
    %290 = arith.andi %285, %289 : vector<1x512xi1>
    %cst_118 = arith.constant 1.000000e+00 : f32
    %cst_119 = arith.constant 0.000000e+00 : f32
    %291 = vector.broadcast %cst_118 : f32 to vector<1x512xf32>
    %292 = vector.broadcast %cst_119 : f32 to vector<1x512xf32>
    %293 = arith.select %290, %291, %292 : vector<1x512xi1>, vector<1x512xf32>
    %294 = vector.broadcast %293 : vector<1x512xf32> to vector<8x512xf32>
    %295 = arith.mulf %271, %294 : vector<8x512xf32>
    %296 = vector.extract_strided_slice %132 {offsets = [0, 48], sizes = [8, 464], strides = [1, 1]} : vector<8x512xf32> to vector<8x464xf32>
    %297 = vector.extract_strided_slice %132 {offsets = [0, 0], sizes = [8, 48], strides = [1, 1]} : vector<8x512xf32> to vector<8x48xf32>
    %298 = tpu.concatenate %296, %297 in 1 : vector<8x464xf32>, vector<8x48xf32> -> vector<8x512xf32>
    %c3_i32_120 = arith.constant 3 : i32
    %299 = vector.broadcast %c3_i32_120 : i32 to vector<1x512xi32>
    %300 = arith.addi %1, %299 : vector<1x512xi32>
    %c0_i32_121 = arith.constant 0 : i32
    %301 = vector.broadcast %c0_i32_121 : i32 to vector<1x512xi32>
    %302 = arith.cmpi sge, %300, %301 : vector<1x512xi32>
    %c3_i32_122 = arith.constant 3 : i32
    %303 = vector.broadcast %c3_i32_122 : i32 to vector<1x512xi32>
    %304 = arith.addi %1, %303 : vector<1x512xi32>
    %c16_i32_123 = arith.constant 16 : i32
    %305 = vector.broadcast %c16_i32_123 : i32 to vector<1x512xi32>
    %306 = arith.cmpi slt, %304, %305 : vector<1x512xi32>
    %307 = arith.andi %302, %306 : vector<1x512xi1>
    %c0_i32_124 = arith.constant 0 : i32
    %308 = vector.broadcast %c0_i32_124 : i32 to vector<1x512xi32>
    %309 = arith.addi %2, %308 : vector<1x512xi32>
    %c0_i32_125 = arith.constant 0 : i32
    %310 = vector.broadcast %c0_i32_125 : i32 to vector<1x512xi32>
    %311 = arith.cmpi sge, %309, %310 : vector<1x512xi32>
    %312 = arith.andi %307, %311 : vector<1x512xi1>
    %c0_i32_126 = arith.constant 0 : i32
    %313 = vector.broadcast %c0_i32_126 : i32 to vector<1x512xi32>
    %314 = arith.addi %2, %313 : vector<1x512xi32>
    %c16_i32_127 = arith.constant 16 : i32
    %315 = vector.broadcast %c16_i32_127 : i32 to vector<1x512xi32>
    %316 = arith.cmpi slt, %314, %315 : vector<1x512xi32>
    %317 = arith.andi %312, %316 : vector<1x512xi1>
    %cst_128 = arith.constant 1.000000e+00 : f32
    %cst_129 = arith.constant 0.000000e+00 : f32
    %318 = vector.broadcast %cst_128 : f32 to vector<1x512xf32>
    %319 = vector.broadcast %cst_129 : f32 to vector<1x512xf32>
    %320 = arith.select %317, %318, %319 : vector<1x512xi1>, vector<1x512xf32>
    %321 = vector.broadcast %320 : vector<1x512xf32> to vector<8x512xf32>
    %322 = arith.mulf %298, %321 : vector<8x512xf32>
    %323 = vector.extract_strided_slice %132 {offsets = [0, 51], sizes = [8, 461], strides = [1, 1]} : vector<8x512xf32> to vector<8x461xf32>
    %324 = vector.extract_strided_slice %132 {offsets = [0, 0], sizes = [8, 51], strides = [1, 1]} : vector<8x512xf32> to vector<8x51xf32>
    %325 = tpu.concatenate %323, %324 in 1 : vector<8x461xf32>, vector<8x51xf32> -> vector<8x512xf32>
    %c3_i32_130 = arith.constant 3 : i32
    %326 = vector.broadcast %c3_i32_130 : i32 to vector<1x512xi32>
    %327 = arith.addi %1, %326 : vector<1x512xi32>
    %c0_i32_131 = arith.constant 0 : i32
    %328 = vector.broadcast %c0_i32_131 : i32 to vector<1x512xi32>
    %329 = arith.cmpi sge, %327, %328 : vector<1x512xi32>
    %c3_i32_132 = arith.constant 3 : i32
    %330 = vector.broadcast %c3_i32_132 : i32 to vector<1x512xi32>
    %331 = arith.addi %1, %330 : vector<1x512xi32>
    %c16_i32_133 = arith.constant 16 : i32
    %332 = vector.broadcast %c16_i32_133 : i32 to vector<1x512xi32>
    %333 = arith.cmpi slt, %331, %332 : vector<1x512xi32>
    %334 = arith.andi %329, %333 : vector<1x512xi1>
    %c3_i32_134 = arith.constant 3 : i32
    %335 = vector.broadcast %c3_i32_134 : i32 to vector<1x512xi32>
    %336 = arith.addi %2, %335 : vector<1x512xi32>
    %c0_i32_135 = arith.constant 0 : i32
    %337 = vector.broadcast %c0_i32_135 : i32 to vector<1x512xi32>
    %338 = arith.cmpi sge, %336, %337 : vector<1x512xi32>
    %339 = arith.andi %334, %338 : vector<1x512xi1>
    %c3_i32_136 = arith.constant 3 : i32
    %340 = vector.broadcast %c3_i32_136 : i32 to vector<1x512xi32>
    %341 = arith.addi %2, %340 : vector<1x512xi32>
    %c16_i32_137 = arith.constant 16 : i32
    %342 = vector.broadcast %c16_i32_137 : i32 to vector<1x512xi32>
    %343 = arith.cmpi slt, %341, %342 : vector<1x512xi32>
    %344 = arith.andi %339, %343 : vector<1x512xi1>
    %cst_138 = arith.constant 1.000000e+00 : f32
    %cst_139 = arith.constant 0.000000e+00 : f32
    %345 = vector.broadcast %cst_138 : f32 to vector<1x512xf32>
    %346 = vector.broadcast %cst_139 : f32 to vector<1x512xf32>
    %347 = arith.select %344, %345, %346 : vector<1x512xi1>, vector<1x512xf32>
    %348 = vector.broadcast %347 : vector<1x512xf32> to vector<8x512xf32>
    %349 = arith.mulf %325, %348 : vector<8x512xf32>
    %350 = tpu.concatenate %160, %187, %214, %241, %132, %268, %295, %322, %349 in 0 : vector<8x512xf32>, vector<8x512xf32>, vector<8x512xf32>, vector<8x512xf32>, vector<8x512xf32>, vector<8x512xf32>, vector<8x512xf32>, vector<8x512xf32>, vector<8x512xf32> -> vector<72x512xf32>
    %cst_140 = arith.constant dense<0.000000e+00> : vector<8x512xf32>
    %351 = tpu.matmul %133, %350, %cst_140 {dimension_numbers = #tpu.dot_dimension_numbers<[1], [0], [0], [1], [0, 0, 1, 1], [], []>} : vector<8x72xf32>, vector<72x512xf32>, vector<8x512xf32> -> vector<8x512xf32>
    %c0_141 = arith.constant 0 : index
    %c0_142 = arith.constant 0 : index
    %352 = vector.load %arg12[%c0_141, %c0_142] : memref<8x1xf32, #tpu.memory_space<vmem>>, vector<8x1xf32>
    %353 = vector.broadcast %352 : vector<8x1xf32> to vector<8x512xf32>
    %354 = arith.addf %351, %353 : vector<8x512xf32>
    %c0_143 = arith.constant 0 : index
    %c0_144 = arith.constant 0 : index
    %355 = vector.load %arg13[%c0_143, %c0_144] : memref<8x4xf32, #tpu.memory_space<vmem>>, vector<8x4xf32>
    %cst_145 = arith.constant dense<0.000000e+00> : vector<8x512xf32>
    %356 = tpu.matmul %355, %0, %cst_145 {dimension_numbers = #tpu.dot_dimension_numbers<[1], [0], [0], [1], [0, 0, 1, 1], [], []>} : vector<8x4xf32>, vector<4x512xf32>, vector<8x512xf32> -> vector<8x512xf32>
    %c0_146 = arith.constant 0 : index
    %c0_147 = arith.constant 0 : index
    %357 = vector.load %arg14[%c0_146, %c0_147] : memref<8x1xf32, #tpu.memory_space<vmem>>, vector<8x1xf32>
    %358 = vector.broadcast %357 : vector<8x1xf32> to vector<8x512xf32>
    %359 = arith.addf %356, %358 : vector<8x512xf32>
    %c0_148 = arith.constant 0 : index
    %c0_149 = arith.constant 0 : index
    %360 = vector.load %arg15[%c0_148, %c0_149] : memref<8x40xf32, #tpu.memory_space<vmem>>, vector<8x40xf32>
    %361 = vector.extract_strided_slice %359 {offsets = [0, 510], sizes = [8, 2], strides = [1, 1]} : vector<8x512xf32> to vector<8x2xf32>
    %362 = vector.extract_strided_slice %359 {offsets = [0, 0], sizes = [8, 510], strides = [1, 1]} : vector<8x512xf32> to vector<8x510xf32>
    %363 = tpu.concatenate %361, %362 in 1 : vector<8x2xf32>, vector<8x510xf32> -> vector<8x512xf32>
    %c0_i32_150 = arith.constant 0 : i32
    %364 = vector.broadcast %c0_i32_150 : i32 to vector<1x512xi32>
    %365 = arith.addi %1, %364 : vector<1x512xi32>
    %c0_i32_151 = arith.constant 0 : i32
    %366 = vector.broadcast %c0_i32_151 : i32 to vector<1x512xi32>
    %367 = arith.cmpi sge, %365, %366 : vector<1x512xi32>
    %c0_i32_152 = arith.constant 0 : i32
    %368 = vector.broadcast %c0_i32_152 : i32 to vector<1x512xi32>
    %369 = arith.addi %1, %368 : vector<1x512xi32>
    %c16_i32_153 = arith.constant 16 : i32
    %370 = vector.broadcast %c16_i32_153 : i32 to vector<1x512xi32>
    %371 = arith.cmpi slt, %369, %370 : vector<1x512xi32>
    %372 = arith.andi %367, %371 : vector<1x512xi1>
    %c-2_i32 = arith.constant -2 : i32
    %373 = vector.broadcast %c-2_i32 : i32 to vector<1x512xi32>
    %374 = arith.addi %2, %373 : vector<1x512xi32>
    %c0_i32_154 = arith.constant 0 : i32
    %375 = vector.broadcast %c0_i32_154 : i32 to vector<1x512xi32>
    %376 = arith.cmpi sge, %374, %375 : vector<1x512xi32>
    %377 = arith.andi %372, %376 : vector<1x512xi1>
    %c-2_i32_155 = arith.constant -2 : i32
    %378 = vector.broadcast %c-2_i32_155 : i32 to vector<1x512xi32>
    %379 = arith.addi %2, %378 : vector<1x512xi32>
    %c16_i32_156 = arith.constant 16 : i32
    %380 = vector.broadcast %c16_i32_156 : i32 to vector<1x512xi32>
    %381 = arith.cmpi slt, %379, %380 : vector<1x512xi32>
    %382 = arith.andi %377, %381 : vector<1x512xi1>
    %cst_157 = arith.constant 1.000000e+00 : f32
    %cst_158 = arith.constant 0.000000e+00 : f32
    %383 = vector.broadcast %cst_157 : f32 to vector<1x512xf32>
    %384 = vector.broadcast %cst_158 : f32 to vector<1x512xf32>
    %385 = arith.select %382, %383, %384 : vector<1x512xi1>, vector<1x512xf32>
    %386 = vector.broadcast %385 : vector<1x512xf32> to vector<8x512xf32>
    %387 = arith.mulf %363, %386 : vector<8x512xf32>
    %388 = vector.extract_strided_slice %359 {offsets = [0, 511], sizes = [8, 1], strides = [1, 1]} : vector<8x512xf32> to vector<8x1xf32>
    %389 = vector.extract_strided_slice %359 {offsets = [0, 0], sizes = [8, 511], strides = [1, 1]} : vector<8x512xf32> to vector<8x511xf32>
    %390 = tpu.concatenate %388, %389 in 1 : vector<8x1xf32>, vector<8x511xf32> -> vector<8x512xf32>
    %391 = vector.broadcast %38 : vector<1x512xf32> to vector<8x512xf32>
    %392 = arith.mulf %390, %391 : vector<8x512xf32>
    %393 = vector.extract_strided_slice %359 {offsets = [0, 1], sizes = [8, 511], strides = [1, 1]} : vector<8x512xf32> to vector<8x511xf32>
    %394 = vector.extract_strided_slice %359 {offsets = [0, 0], sizes = [8, 1], strides = [1, 1]} : vector<8x512xf32> to vector<8x1xf32>
    %395 = tpu.concatenate %393, %394 in 1 : vector<8x511xf32>, vector<8x1xf32> -> vector<8x512xf32>
    %396 = vector.broadcast %65 : vector<1x512xf32> to vector<8x512xf32>
    %397 = arith.mulf %395, %396 : vector<8x512xf32>
    %398 = vector.extract_strided_slice %359 {offsets = [0, 2], sizes = [8, 510], strides = [1, 1]} : vector<8x512xf32> to vector<8x510xf32>
    %399 = vector.extract_strided_slice %359 {offsets = [0, 0], sizes = [8, 2], strides = [1, 1]} : vector<8x512xf32> to vector<8x2xf32>
    %400 = tpu.concatenate %398, %399 in 1 : vector<8x510xf32>, vector<8x2xf32> -> vector<8x512xf32>
    %c0_i32_159 = arith.constant 0 : i32
    %401 = vector.broadcast %c0_i32_159 : i32 to vector<1x512xi32>
    %402 = arith.addi %1, %401 : vector<1x512xi32>
    %c0_i32_160 = arith.constant 0 : i32
    %403 = vector.broadcast %c0_i32_160 : i32 to vector<1x512xi32>
    %404 = arith.cmpi sge, %402, %403 : vector<1x512xi32>
    %c0_i32_161 = arith.constant 0 : i32
    %405 = vector.broadcast %c0_i32_161 : i32 to vector<1x512xi32>
    %406 = arith.addi %1, %405 : vector<1x512xi32>
    %c16_i32_162 = arith.constant 16 : i32
    %407 = vector.broadcast %c16_i32_162 : i32 to vector<1x512xi32>
    %408 = arith.cmpi slt, %406, %407 : vector<1x512xi32>
    %409 = arith.andi %404, %408 : vector<1x512xi1>
    %c2_i32 = arith.constant 2 : i32
    %410 = vector.broadcast %c2_i32 : i32 to vector<1x512xi32>
    %411 = arith.addi %2, %410 : vector<1x512xi32>
    %c0_i32_163 = arith.constant 0 : i32
    %412 = vector.broadcast %c0_i32_163 : i32 to vector<1x512xi32>
    %413 = arith.cmpi sge, %411, %412 : vector<1x512xi32>
    %414 = arith.andi %409, %413 : vector<1x512xi1>
    %c2_i32_164 = arith.constant 2 : i32
    %415 = vector.broadcast %c2_i32_164 : i32 to vector<1x512xi32>
    %416 = arith.addi %2, %415 : vector<1x512xi32>
    %c16_i32_165 = arith.constant 16 : i32
    %417 = vector.broadcast %c16_i32_165 : i32 to vector<1x512xi32>
    %418 = arith.cmpi slt, %416, %417 : vector<1x512xi32>
    %419 = arith.andi %414, %418 : vector<1x512xi1>
    %cst_166 = arith.constant 1.000000e+00 : f32
    %cst_167 = arith.constant 0.000000e+00 : f32
    %420 = vector.broadcast %cst_166 : f32 to vector<1x512xf32>
    %421 = vector.broadcast %cst_167 : f32 to vector<1x512xf32>
    %422 = arith.select %419, %420, %421 : vector<1x512xi1>, vector<1x512xf32>
    %423 = vector.broadcast %422 : vector<1x512xf32> to vector<8x512xf32>
    %424 = arith.mulf %400, %423 : vector<8x512xf32>
    %425 = tpu.concatenate %387, %392, %359, %397, %424 in 0 : vector<8x512xf32>, vector<8x512xf32>, vector<8x512xf32>, vector<8x512xf32>, vector<8x512xf32> -> vector<40x512xf32>
    %cst_168 = arith.constant dense<0.000000e+00> : vector<8x512xf32>
    %426 = tpu.matmul %360, %425, %cst_168 {dimension_numbers = #tpu.dot_dimension_numbers<[1], [0], [0], [1], [0, 0, 1, 1], [], []>} : vector<8x40xf32>, vector<40x512xf32>, vector<8x512xf32> -> vector<8x512xf32>
    %c0_169 = arith.constant 0 : index
    %c0_170 = arith.constant 0 : index
    %427 = vector.load %arg16[%c0_169, %c0_170] : memref<8x1xf32, #tpu.memory_space<vmem>>, vector<8x1xf32>
    %428 = vector.broadcast %427 : vector<8x1xf32> to vector<8x512xf32>
    %429 = arith.addf %426, %428 : vector<8x512xf32>
    %c0_171 = arith.constant 0 : index
    %c0_172 = arith.constant 0 : index
    %430 = vector.load %arg17[%c0_171, %c0_172] : memref<8x40xf32, #tpu.memory_space<vmem>>, vector<8x40xf32>
    %431 = vector.extract_strided_slice %429 {offsets = [0, 480], sizes = [8, 32], strides = [1, 1]} : vector<8x512xf32> to vector<8x32xf32>
    %432 = vector.extract_strided_slice %429 {offsets = [0, 0], sizes = [8, 480], strides = [1, 1]} : vector<8x512xf32> to vector<8x480xf32>
    %433 = tpu.concatenate %431, %432 in 1 : vector<8x32xf32>, vector<8x480xf32> -> vector<8x512xf32>
    %c-2_i32_173 = arith.constant -2 : i32
    %434 = vector.broadcast %c-2_i32_173 : i32 to vector<1x512xi32>
    %435 = arith.addi %1, %434 : vector<1x512xi32>
    %c0_i32_174 = arith.constant 0 : i32
    %436 = vector.broadcast %c0_i32_174 : i32 to vector<1x512xi32>
    %437 = arith.cmpi sge, %435, %436 : vector<1x512xi32>
    %c-2_i32_175 = arith.constant -2 : i32
    %438 = vector.broadcast %c-2_i32_175 : i32 to vector<1x512xi32>
    %439 = arith.addi %1, %438 : vector<1x512xi32>
    %c16_i32_176 = arith.constant 16 : i32
    %440 = vector.broadcast %c16_i32_176 : i32 to vector<1x512xi32>
    %441 = arith.cmpi slt, %439, %440 : vector<1x512xi32>
    %442 = arith.andi %437, %441 : vector<1x512xi1>
    %c0_i32_177 = arith.constant 0 : i32
    %443 = vector.broadcast %c0_i32_177 : i32 to vector<1x512xi32>
    %444 = arith.addi %2, %443 : vector<1x512xi32>
    %c0_i32_178 = arith.constant 0 : i32
    %445 = vector.broadcast %c0_i32_178 : i32 to vector<1x512xi32>
    %446 = arith.cmpi sge, %444, %445 : vector<1x512xi32>
    %447 = arith.andi %442, %446 : vector<1x512xi1>
    %c0_i32_179 = arith.constant 0 : i32
    %448 = vector.broadcast %c0_i32_179 : i32 to vector<1x512xi32>
    %449 = arith.addi %2, %448 : vector<1x512xi32>
    %c16_i32_180 = arith.constant 16 : i32
    %450 = vector.broadcast %c16_i32_180 : i32 to vector<1x512xi32>
    %451 = arith.cmpi slt, %449, %450 : vector<1x512xi32>
    %452 = arith.andi %447, %451 : vector<1x512xi1>
    %cst_181 = arith.constant 1.000000e+00 : f32
    %cst_182 = arith.constant 0.000000e+00 : f32
    %453 = vector.broadcast %cst_181 : f32 to vector<1x512xf32>
    %454 = vector.broadcast %cst_182 : f32 to vector<1x512xf32>
    %455 = arith.select %452, %453, %454 : vector<1x512xi1>, vector<1x512xf32>
    %456 = vector.broadcast %455 : vector<1x512xf32> to vector<8x512xf32>
    %457 = arith.mulf %433, %456 : vector<8x512xf32>
    %458 = vector.extract_strided_slice %429 {offsets = [0, 496], sizes = [8, 16], strides = [1, 1]} : vector<8x512xf32> to vector<8x16xf32>
    %459 = vector.extract_strided_slice %429 {offsets = [0, 0], sizes = [8, 496], strides = [1, 1]} : vector<8x512xf32> to vector<8x496xf32>
    %460 = tpu.concatenate %458, %459 in 1 : vector<8x16xf32>, vector<8x496xf32> -> vector<8x512xf32>
    %461 = vector.broadcast %98 : vector<1x512xf32> to vector<8x512xf32>
    %462 = arith.mulf %460, %461 : vector<8x512xf32>
    %463 = vector.extract_strided_slice %429 {offsets = [0, 16], sizes = [8, 496], strides = [1, 1]} : vector<8x512xf32> to vector<8x496xf32>
    %464 = vector.extract_strided_slice %429 {offsets = [0, 0], sizes = [8, 16], strides = [1, 1]} : vector<8x512xf32> to vector<8x16xf32>
    %465 = tpu.concatenate %463, %464 in 1 : vector<8x496xf32>, vector<8x16xf32> -> vector<8x512xf32>
    %466 = vector.broadcast %125 : vector<1x512xf32> to vector<8x512xf32>
    %467 = arith.mulf %465, %466 : vector<8x512xf32>
    %468 = vector.extract_strided_slice %429 {offsets = [0, 32], sizes = [8, 480], strides = [1, 1]} : vector<8x512xf32> to vector<8x480xf32>
    %469 = vector.extract_strided_slice %429 {offsets = [0, 0], sizes = [8, 32], strides = [1, 1]} : vector<8x512xf32> to vector<8x32xf32>
    %470 = tpu.concatenate %468, %469 in 1 : vector<8x480xf32>, vector<8x32xf32> -> vector<8x512xf32>
    %c2_i32_183 = arith.constant 2 : i32
    %471 = vector.broadcast %c2_i32_183 : i32 to vector<1x512xi32>
    %472 = arith.addi %1, %471 : vector<1x512xi32>
    %c0_i32_184 = arith.constant 0 : i32
    %473 = vector.broadcast %c0_i32_184 : i32 to vector<1x512xi32>
    %474 = arith.cmpi sge, %472, %473 : vector<1x512xi32>
    %c2_i32_185 = arith.constant 2 : i32
    %475 = vector.broadcast %c2_i32_185 : i32 to vector<1x512xi32>
    %476 = arith.addi %1, %475 : vector<1x512xi32>
    %c16_i32_186 = arith.constant 16 : i32
    %477 = vector.broadcast %c16_i32_186 : i32 to vector<1x512xi32>
    %478 = arith.cmpi slt, %476, %477 : vector<1x512xi32>
    %479 = arith.andi %474, %478 : vector<1x512xi1>
    %c0_i32_187 = arith.constant 0 : i32
    %480 = vector.broadcast %c0_i32_187 : i32 to vector<1x512xi32>
    %481 = arith.addi %2, %480 : vector<1x512xi32>
    %c0_i32_188 = arith.constant 0 : i32
    %482 = vector.broadcast %c0_i32_188 : i32 to vector<1x512xi32>
    %483 = arith.cmpi sge, %481, %482 : vector<1x512xi32>
    %484 = arith.andi %479, %483 : vector<1x512xi1>
    %c0_i32_189 = arith.constant 0 : i32
    %485 = vector.broadcast %c0_i32_189 : i32 to vector<1x512xi32>
    %486 = arith.addi %2, %485 : vector<1x512xi32>
    %c16_i32_190 = arith.constant 16 : i32
    %487 = vector.broadcast %c16_i32_190 : i32 to vector<1x512xi32>
    %488 = arith.cmpi slt, %486, %487 : vector<1x512xi32>
    %489 = arith.andi %484, %488 : vector<1x512xi1>
    %cst_191 = arith.constant 1.000000e+00 : f32
    %cst_192 = arith.constant 0.000000e+00 : f32
    %490 = vector.broadcast %cst_191 : f32 to vector<1x512xf32>
    %491 = vector.broadcast %cst_192 : f32 to vector<1x512xf32>
    %492 = arith.select %489, %490, %491 : vector<1x512xi1>, vector<1x512xf32>
    %493 = vector.broadcast %492 : vector<1x512xf32> to vector<8x512xf32>
    %494 = arith.mulf %470, %493 : vector<8x512xf32>
    %495 = tpu.concatenate %457, %462, %429, %467, %494 in 0 : vector<8x512xf32>, vector<8x512xf32>, vector<8x512xf32>, vector<8x512xf32>, vector<8x512xf32> -> vector<40x512xf32>
    %cst_193 = arith.constant dense<0.000000e+00> : vector<8x512xf32>
    %496 = tpu.matmul %430, %495, %cst_193 {dimension_numbers = #tpu.dot_dimension_numbers<[1], [0], [0], [1], [0, 0, 1, 1], [], []>} : vector<8x40xf32>, vector<40x512xf32>, vector<8x512xf32> -> vector<8x512xf32>
    %c0_194 = arith.constant 0 : index
    %c0_195 = arith.constant 0 : index
    %497 = vector.load %arg18[%c0_194, %c0_195] : memref<8x1xf32, #tpu.memory_space<vmem>>, vector<8x1xf32>
    %498 = vector.broadcast %497 : vector<8x1xf32> to vector<8x512xf32>
    %499 = arith.addf %496, %498 : vector<8x512xf32>
    %c0_196 = arith.constant 0 : index
    %c0_197 = arith.constant 0 : index
    %500 = vector.load %arg19[%c0_196, %c0_197] : memref<8x72xf32, #tpu.memory_space<vmem>>, vector<8x72xf32>
    %501 = vector.extract_strided_slice %499 {offsets = [0, 427], sizes = [8, 85], strides = [1, 1]} : vector<8x512xf32> to vector<8x85xf32>
    %502 = vector.extract_strided_slice %499 {offsets = [0, 0], sizes = [8, 427], strides = [1, 1]} : vector<8x512xf32> to vector<8x427xf32>
    %503 = tpu.concatenate %501, %502 in 1 : vector<8x85xf32>, vector<8x427xf32> -> vector<8x512xf32>
    %c-5_i32 = arith.constant -5 : i32
    %504 = vector.broadcast %c-5_i32 : i32 to vector<1x512xi32>
    %505 = arith.addi %1, %504 : vector<1x512xi32>
    %c0_i32_198 = arith.constant 0 : i32
    %506 = vector.broadcast %c0_i32_198 : i32 to vector<1x512xi32>
    %507 = arith.cmpi sge, %505, %506 : vector<1x512xi32>
    %c-5_i32_199 = arith.constant -5 : i32
    %508 = vector.broadcast %c-5_i32_199 : i32 to vector<1x512xi32>
    %509 = arith.addi %1, %508 : vector<1x512xi32>
    %c16_i32_200 = arith.constant 16 : i32
    %510 = vector.broadcast %c16_i32_200 : i32 to vector<1x512xi32>
    %511 = arith.cmpi slt, %509, %510 : vector<1x512xi32>
    %512 = arith.andi %507, %511 : vector<1x512xi1>
    %c-5_i32_201 = arith.constant -5 : i32
    %513 = vector.broadcast %c-5_i32_201 : i32 to vector<1x512xi32>
    %514 = arith.addi %2, %513 : vector<1x512xi32>
    %c0_i32_202 = arith.constant 0 : i32
    %515 = vector.broadcast %c0_i32_202 : i32 to vector<1x512xi32>
    %516 = arith.cmpi sge, %514, %515 : vector<1x512xi32>
    %517 = arith.andi %512, %516 : vector<1x512xi1>
    %c-5_i32_203 = arith.constant -5 : i32
    %518 = vector.broadcast %c-5_i32_203 : i32 to vector<1x512xi32>
    %519 = arith.addi %2, %518 : vector<1x512xi32>
    %c16_i32_204 = arith.constant 16 : i32
    %520 = vector.broadcast %c16_i32_204 : i32 to vector<1x512xi32>
    %521 = arith.cmpi slt, %519, %520 : vector<1x512xi32>
    %522 = arith.andi %517, %521 : vector<1x512xi1>
    %cst_205 = arith.constant 1.000000e+00 : f32
    %cst_206 = arith.constant 0.000000e+00 : f32
    %523 = vector.broadcast %cst_205 : f32 to vector<1x512xf32>
    %524 = vector.broadcast %cst_206 : f32 to vector<1x512xf32>
    %525 = arith.select %522, %523, %524 : vector<1x512xi1>, vector<1x512xf32>
    %526 = vector.broadcast %525 : vector<1x512xf32> to vector<8x512xf32>
    %527 = arith.mulf %503, %526 : vector<8x512xf32>
    %528 = vector.extract_strided_slice %499 {offsets = [0, 432], sizes = [8, 80], strides = [1, 1]} : vector<8x512xf32> to vector<8x80xf32>
    %529 = vector.extract_strided_slice %499 {offsets = [0, 0], sizes = [8, 432], strides = [1, 1]} : vector<8x512xf32> to vector<8x432xf32>
    %530 = tpu.concatenate %528, %529 in 1 : vector<8x80xf32>, vector<8x432xf32> -> vector<8x512xf32>
    %c-5_i32_207 = arith.constant -5 : i32
    %531 = vector.broadcast %c-5_i32_207 : i32 to vector<1x512xi32>
    %532 = arith.addi %1, %531 : vector<1x512xi32>
    %c0_i32_208 = arith.constant 0 : i32
    %533 = vector.broadcast %c0_i32_208 : i32 to vector<1x512xi32>
    %534 = arith.cmpi sge, %532, %533 : vector<1x512xi32>
    %c-5_i32_209 = arith.constant -5 : i32
    %535 = vector.broadcast %c-5_i32_209 : i32 to vector<1x512xi32>
    %536 = arith.addi %1, %535 : vector<1x512xi32>
    %c16_i32_210 = arith.constant 16 : i32
    %537 = vector.broadcast %c16_i32_210 : i32 to vector<1x512xi32>
    %538 = arith.cmpi slt, %536, %537 : vector<1x512xi32>
    %539 = arith.andi %534, %538 : vector<1x512xi1>
    %c0_i32_211 = arith.constant 0 : i32
    %540 = vector.broadcast %c0_i32_211 : i32 to vector<1x512xi32>
    %541 = arith.addi %2, %540 : vector<1x512xi32>
    %c0_i32_212 = arith.constant 0 : i32
    %542 = vector.broadcast %c0_i32_212 : i32 to vector<1x512xi32>
    %543 = arith.cmpi sge, %541, %542 : vector<1x512xi32>
    %544 = arith.andi %539, %543 : vector<1x512xi1>
    %c0_i32_213 = arith.constant 0 : i32
    %545 = vector.broadcast %c0_i32_213 : i32 to vector<1x512xi32>
    %546 = arith.addi %2, %545 : vector<1x512xi32>
    %c16_i32_214 = arith.constant 16 : i32
    %547 = vector.broadcast %c16_i32_214 : i32 to vector<1x512xi32>
    %548 = arith.cmpi slt, %546, %547 : vector<1x512xi32>
    %549 = arith.andi %544, %548 : vector<1x512xi1>
    %cst_215 = arith.constant 1.000000e+00 : f32
    %cst_216 = arith.constant 0.000000e+00 : f32
    %550 = vector.broadcast %cst_215 : f32 to vector<1x512xf32>
    %551 = vector.broadcast %cst_216 : f32 to vector<1x512xf32>
    %552 = arith.select %549, %550, %551 : vector<1x512xi1>, vector<1x512xf32>
    %553 = vector.broadcast %552 : vector<1x512xf32> to vector<8x512xf32>
    %554 = arith.mulf %530, %553 : vector<8x512xf32>
    %555 = vector.extract_strided_slice %499 {offsets = [0, 437], sizes = [8, 75], strides = [1, 1]} : vector<8x512xf32> to vector<8x75xf32>
    %556 = vector.extract_strided_slice %499 {offsets = [0, 0], sizes = [8, 437], strides = [1, 1]} : vector<8x512xf32> to vector<8x437xf32>
    %557 = tpu.concatenate %555, %556 in 1 : vector<8x75xf32>, vector<8x437xf32> -> vector<8x512xf32>
    %c-5_i32_217 = arith.constant -5 : i32
    %558 = vector.broadcast %c-5_i32_217 : i32 to vector<1x512xi32>
    %559 = arith.addi %1, %558 : vector<1x512xi32>
    %c0_i32_218 = arith.constant 0 : i32
    %560 = vector.broadcast %c0_i32_218 : i32 to vector<1x512xi32>
    %561 = arith.cmpi sge, %559, %560 : vector<1x512xi32>
    %c-5_i32_219 = arith.constant -5 : i32
    %562 = vector.broadcast %c-5_i32_219 : i32 to vector<1x512xi32>
    %563 = arith.addi %1, %562 : vector<1x512xi32>
    %c16_i32_220 = arith.constant 16 : i32
    %564 = vector.broadcast %c16_i32_220 : i32 to vector<1x512xi32>
    %565 = arith.cmpi slt, %563, %564 : vector<1x512xi32>
    %566 = arith.andi %561, %565 : vector<1x512xi1>
    %c5_i32 = arith.constant 5 : i32
    %567 = vector.broadcast %c5_i32 : i32 to vector<1x512xi32>
    %568 = arith.addi %2, %567 : vector<1x512xi32>
    %c0_i32_221 = arith.constant 0 : i32
    %569 = vector.broadcast %c0_i32_221 : i32 to vector<1x512xi32>
    %570 = arith.cmpi sge, %568, %569 : vector<1x512xi32>
    %571 = arith.andi %566, %570 : vector<1x512xi1>
    %c5_i32_222 = arith.constant 5 : i32
    %572 = vector.broadcast %c5_i32_222 : i32 to vector<1x512xi32>
    %573 = arith.addi %2, %572 : vector<1x512xi32>
    %c16_i32_223 = arith.constant 16 : i32
    %574 = vector.broadcast %c16_i32_223 : i32 to vector<1x512xi32>
    %575 = arith.cmpi slt, %573, %574 : vector<1x512xi32>
    %576 = arith.andi %571, %575 : vector<1x512xi1>
    %cst_224 = arith.constant 1.000000e+00 : f32
    %cst_225 = arith.constant 0.000000e+00 : f32
    %577 = vector.broadcast %cst_224 : f32 to vector<1x512xf32>
    %578 = vector.broadcast %cst_225 : f32 to vector<1x512xf32>
    %579 = arith.select %576, %577, %578 : vector<1x512xi1>, vector<1x512xf32>
    %580 = vector.broadcast %579 : vector<1x512xf32> to vector<8x512xf32>
    %581 = arith.mulf %557, %580 : vector<8x512xf32>
    %582 = vector.extract_strided_slice %499 {offsets = [0, 507], sizes = [8, 5], strides = [1, 1]} : vector<8x512xf32> to vector<8x5xf32>
    %583 = vector.extract_strided_slice %499 {offsets = [0, 0], sizes = [8, 507], strides = [1, 1]} : vector<8x512xf32> to vector<8x507xf32>
    %584 = tpu.concatenate %582, %583 in 1 : vector<8x5xf32>, vector<8x507xf32> -> vector<8x512xf32>
    %c0_i32_226 = arith.constant 0 : i32
    %585 = vector.broadcast %c0_i32_226 : i32 to vector<1x512xi32>
    %586 = arith.addi %1, %585 : vector<1x512xi32>
    %c0_i32_227 = arith.constant 0 : i32
    %587 = vector.broadcast %c0_i32_227 : i32 to vector<1x512xi32>
    %588 = arith.cmpi sge, %586, %587 : vector<1x512xi32>
    %c0_i32_228 = arith.constant 0 : i32
    %589 = vector.broadcast %c0_i32_228 : i32 to vector<1x512xi32>
    %590 = arith.addi %1, %589 : vector<1x512xi32>
    %c16_i32_229 = arith.constant 16 : i32
    %591 = vector.broadcast %c16_i32_229 : i32 to vector<1x512xi32>
    %592 = arith.cmpi slt, %590, %591 : vector<1x512xi32>
    %593 = arith.andi %588, %592 : vector<1x512xi1>
    %c-5_i32_230 = arith.constant -5 : i32
    %594 = vector.broadcast %c-5_i32_230 : i32 to vector<1x512xi32>
    %595 = arith.addi %2, %594 : vector<1x512xi32>
    %c0_i32_231 = arith.constant 0 : i32
    %596 = vector.broadcast %c0_i32_231 : i32 to vector<1x512xi32>
    %597 = arith.cmpi sge, %595, %596 : vector<1x512xi32>
    %598 = arith.andi %593, %597 : vector<1x512xi1>
    %c-5_i32_232 = arith.constant -5 : i32
    %599 = vector.broadcast %c-5_i32_232 : i32 to vector<1x512xi32>
    %600 = arith.addi %2, %599 : vector<1x512xi32>
    %c16_i32_233 = arith.constant 16 : i32
    %601 = vector.broadcast %c16_i32_233 : i32 to vector<1x512xi32>
    %602 = arith.cmpi slt, %600, %601 : vector<1x512xi32>
    %603 = arith.andi %598, %602 : vector<1x512xi1>
    %cst_234 = arith.constant 1.000000e+00 : f32
    %cst_235 = arith.constant 0.000000e+00 : f32
    %604 = vector.broadcast %cst_234 : f32 to vector<1x512xf32>
    %605 = vector.broadcast %cst_235 : f32 to vector<1x512xf32>
    %606 = arith.select %603, %604, %605 : vector<1x512xi1>, vector<1x512xf32>
    %607 = vector.broadcast %606 : vector<1x512xf32> to vector<8x512xf32>
    %608 = arith.mulf %584, %607 : vector<8x512xf32>
    %609 = vector.extract_strided_slice %499 {offsets = [0, 5], sizes = [8, 507], strides = [1, 1]} : vector<8x512xf32> to vector<8x507xf32>
    %610 = vector.extract_strided_slice %499 {offsets = [0, 0], sizes = [8, 5], strides = [1, 1]} : vector<8x512xf32> to vector<8x5xf32>
    %611 = tpu.concatenate %609, %610 in 1 : vector<8x507xf32>, vector<8x5xf32> -> vector<8x512xf32>
    %c0_i32_236 = arith.constant 0 : i32
    %612 = vector.broadcast %c0_i32_236 : i32 to vector<1x512xi32>
    %613 = arith.addi %1, %612 : vector<1x512xi32>
    %c0_i32_237 = arith.constant 0 : i32
    %614 = vector.broadcast %c0_i32_237 : i32 to vector<1x512xi32>
    %615 = arith.cmpi sge, %613, %614 : vector<1x512xi32>
    %c0_i32_238 = arith.constant 0 : i32
    %616 = vector.broadcast %c0_i32_238 : i32 to vector<1x512xi32>
    %617 = arith.addi %1, %616 : vector<1x512xi32>
    %c16_i32_239 = arith.constant 16 : i32
    %618 = vector.broadcast %c16_i32_239 : i32 to vector<1x512xi32>
    %619 = arith.cmpi slt, %617, %618 : vector<1x512xi32>
    %620 = arith.andi %615, %619 : vector<1x512xi1>
    %c5_i32_240 = arith.constant 5 : i32
    %621 = vector.broadcast %c5_i32_240 : i32 to vector<1x512xi32>
    %622 = arith.addi %2, %621 : vector<1x512xi32>
    %c0_i32_241 = arith.constant 0 : i32
    %623 = vector.broadcast %c0_i32_241 : i32 to vector<1x512xi32>
    %624 = arith.cmpi sge, %622, %623 : vector<1x512xi32>
    %625 = arith.andi %620, %624 : vector<1x512xi1>
    %c5_i32_242 = arith.constant 5 : i32
    %626 = vector.broadcast %c5_i32_242 : i32 to vector<1x512xi32>
    %627 = arith.addi %2, %626 : vector<1x512xi32>
    %c16_i32_243 = arith.constant 16 : i32
    %628 = vector.broadcast %c16_i32_243 : i32 to vector<1x512xi32>
    %629 = arith.cmpi slt, %627, %628 : vector<1x512xi32>
    %630 = arith.andi %625, %629 : vector<1x512xi1>
    %cst_244 = arith.constant 1.000000e+00 : f32
    %cst_245 = arith.constant 0.000000e+00 : f32
    %631 = vector.broadcast %cst_244 : f32 to vector<1x512xf32>
    %632 = vector.broadcast %cst_245 : f32 to vector<1x512xf32>
    %633 = arith.select %630, %631, %632 : vector<1x512xi1>, vector<1x512xf32>
    %634 = vector.broadcast %633 : vector<1x512xf32> to vector<8x512xf32>
    %635 = arith.mulf %611, %634 : vector<8x512xf32>
    %636 = vector.extract_strided_slice %499 {offsets = [0, 75], sizes = [8, 437], strides = [1, 1]} : vector<8x512xf32> to vector<8x437xf32>
    %637 = vector.extract_strided_slice %499 {offsets = [0, 0], sizes = [8, 75], strides = [1, 1]} : vector<8x512xf32> to vector<8x75xf32>
    %638 = tpu.concatenate %636, %637 in 1 : vector<8x437xf32>, vector<8x75xf32> -> vector<8x512xf32>
    %c5_i32_246 = arith.constant 5 : i32
    %639 = vector.broadcast %c5_i32_246 : i32 to vector<1x512xi32>
    %640 = arith.addi %1, %639 : vector<1x512xi32>
    %c0_i32_247 = arith.constant 0 : i32
    %641 = vector.broadcast %c0_i32_247 : i32 to vector<1x512xi32>
    %642 = arith.cmpi sge, %640, %641 : vector<1x512xi32>
    %c5_i32_248 = arith.constant 5 : i32
    %643 = vector.broadcast %c5_i32_248 : i32 to vector<1x512xi32>
    %644 = arith.addi %1, %643 : vector<1x512xi32>
    %c16_i32_249 = arith.constant 16 : i32
    %645 = vector.broadcast %c16_i32_249 : i32 to vector<1x512xi32>
    %646 = arith.cmpi slt, %644, %645 : vector<1x512xi32>
    %647 = arith.andi %642, %646 : vector<1x512xi1>
    %c-5_i32_250 = arith.constant -5 : i32
    %648 = vector.broadcast %c-5_i32_250 : i32 to vector<1x512xi32>
    %649 = arith.addi %2, %648 : vector<1x512xi32>
    %c0_i32_251 = arith.constant 0 : i32
    %650 = vector.broadcast %c0_i32_251 : i32 to vector<1x512xi32>
    %651 = arith.cmpi sge, %649, %650 : vector<1x512xi32>
    %652 = arith.andi %647, %651 : vector<1x512xi1>
    %c-5_i32_252 = arith.constant -5 : i32
    %653 = vector.broadcast %c-5_i32_252 : i32 to vector<1x512xi32>
    %654 = arith.addi %2, %653 : vector<1x512xi32>
    %c16_i32_253 = arith.constant 16 : i32
    %655 = vector.broadcast %c16_i32_253 : i32 to vector<1x512xi32>
    %656 = arith.cmpi slt, %654, %655 : vector<1x512xi32>
    %657 = arith.andi %652, %656 : vector<1x512xi1>
    %cst_254 = arith.constant 1.000000e+00 : f32
    %cst_255 = arith.constant 0.000000e+00 : f32
    %658 = vector.broadcast %cst_254 : f32 to vector<1x512xf32>
    %659 = vector.broadcast %cst_255 : f32 to vector<1x512xf32>
    %660 = arith.select %657, %658, %659 : vector<1x512xi1>, vector<1x512xf32>
    %661 = vector.broadcast %660 : vector<1x512xf32> to vector<8x512xf32>
    %662 = arith.mulf %638, %661 : vector<8x512xf32>
    %663 = vector.extract_strided_slice %499 {offsets = [0, 80], sizes = [8, 432], strides = [1, 1]} : vector<8x512xf32> to vector<8x432xf32>
    %664 = vector.extract_strided_slice %499 {offsets = [0, 0], sizes = [8, 80], strides = [1, 1]} : vector<8x512xf32> to vector<8x80xf32>
    %665 = tpu.concatenate %663, %664 in 1 : vector<8x432xf32>, vector<8x80xf32> -> vector<8x512xf32>
    %c5_i32_256 = arith.constant 5 : i32
    %666 = vector.broadcast %c5_i32_256 : i32 to vector<1x512xi32>
    %667 = arith.addi %1, %666 : vector<1x512xi32>
    %c0_i32_257 = arith.constant 0 : i32
    %668 = vector.broadcast %c0_i32_257 : i32 to vector<1x512xi32>
    %669 = arith.cmpi sge, %667, %668 : vector<1x512xi32>
    %c5_i32_258 = arith.constant 5 : i32
    %670 = vector.broadcast %c5_i32_258 : i32 to vector<1x512xi32>
    %671 = arith.addi %1, %670 : vector<1x512xi32>
    %c16_i32_259 = arith.constant 16 : i32
    %672 = vector.broadcast %c16_i32_259 : i32 to vector<1x512xi32>
    %673 = arith.cmpi slt, %671, %672 : vector<1x512xi32>
    %674 = arith.andi %669, %673 : vector<1x512xi1>
    %c0_i32_260 = arith.constant 0 : i32
    %675 = vector.broadcast %c0_i32_260 : i32 to vector<1x512xi32>
    %676 = arith.addi %2, %675 : vector<1x512xi32>
    %c0_i32_261 = arith.constant 0 : i32
    %677 = vector.broadcast %c0_i32_261 : i32 to vector<1x512xi32>
    %678 = arith.cmpi sge, %676, %677 : vector<1x512xi32>
    %679 = arith.andi %674, %678 : vector<1x512xi1>
    %c0_i32_262 = arith.constant 0 : i32
    %680 = vector.broadcast %c0_i32_262 : i32 to vector<1x512xi32>
    %681 = arith.addi %2, %680 : vector<1x512xi32>
    %c16_i32_263 = arith.constant 16 : i32
    %682 = vector.broadcast %c16_i32_263 : i32 to vector<1x512xi32>
    %683 = arith.cmpi slt, %681, %682 : vector<1x512xi32>
    %684 = arith.andi %679, %683 : vector<1x512xi1>
    %cst_264 = arith.constant 1.000000e+00 : f32
    %cst_265 = arith.constant 0.000000e+00 : f32
    %685 = vector.broadcast %cst_264 : f32 to vector<1x512xf32>
    %686 = vector.broadcast %cst_265 : f32 to vector<1x512xf32>
    %687 = arith.select %684, %685, %686 : vector<1x512xi1>, vector<1x512xf32>
    %688 = vector.broadcast %687 : vector<1x512xf32> to vector<8x512xf32>
    %689 = arith.mulf %665, %688 : vector<8x512xf32>
    %690 = vector.extract_strided_slice %499 {offsets = [0, 85], sizes = [8, 427], strides = [1, 1]} : vector<8x512xf32> to vector<8x427xf32>
    %691 = vector.extract_strided_slice %499 {offsets = [0, 0], sizes = [8, 85], strides = [1, 1]} : vector<8x512xf32> to vector<8x85xf32>
    %692 = tpu.concatenate %690, %691 in 1 : vector<8x427xf32>, vector<8x85xf32> -> vector<8x512xf32>
    %c5_i32_266 = arith.constant 5 : i32
    %693 = vector.broadcast %c5_i32_266 : i32 to vector<1x512xi32>
    %694 = arith.addi %1, %693 : vector<1x512xi32>
    %c0_i32_267 = arith.constant 0 : i32
    %695 = vector.broadcast %c0_i32_267 : i32 to vector<1x512xi32>
    %696 = arith.cmpi sge, %694, %695 : vector<1x512xi32>
    %c5_i32_268 = arith.constant 5 : i32
    %697 = vector.broadcast %c5_i32_268 : i32 to vector<1x512xi32>
    %698 = arith.addi %1, %697 : vector<1x512xi32>
    %c16_i32_269 = arith.constant 16 : i32
    %699 = vector.broadcast %c16_i32_269 : i32 to vector<1x512xi32>
    %700 = arith.cmpi slt, %698, %699 : vector<1x512xi32>
    %701 = arith.andi %696, %700 : vector<1x512xi1>
    %c5_i32_270 = arith.constant 5 : i32
    %702 = vector.broadcast %c5_i32_270 : i32 to vector<1x512xi32>
    %703 = arith.addi %2, %702 : vector<1x512xi32>
    %c0_i32_271 = arith.constant 0 : i32
    %704 = vector.broadcast %c0_i32_271 : i32 to vector<1x512xi32>
    %705 = arith.cmpi sge, %703, %704 : vector<1x512xi32>
    %706 = arith.andi %701, %705 : vector<1x512xi1>
    %c5_i32_272 = arith.constant 5 : i32
    %707 = vector.broadcast %c5_i32_272 : i32 to vector<1x512xi32>
    %708 = arith.addi %2, %707 : vector<1x512xi32>
    %c16_i32_273 = arith.constant 16 : i32
    %709 = vector.broadcast %c16_i32_273 : i32 to vector<1x512xi32>
    %710 = arith.cmpi slt, %708, %709 : vector<1x512xi32>
    %711 = arith.andi %706, %710 : vector<1x512xi1>
    %cst_274 = arith.constant 1.000000e+00 : f32
    %cst_275 = arith.constant 0.000000e+00 : f32
    %712 = vector.broadcast %cst_274 : f32 to vector<1x512xf32>
    %713 = vector.broadcast %cst_275 : f32 to vector<1x512xf32>
    %714 = arith.select %711, %712, %713 : vector<1x512xi1>, vector<1x512xf32>
    %715 = vector.broadcast %714 : vector<1x512xf32> to vector<8x512xf32>
    %716 = arith.mulf %692, %715 : vector<8x512xf32>
    %717 = tpu.concatenate %527, %554, %581, %608, %499, %635, %662, %689, %716 in 0 : vector<8x512xf32>, vector<8x512xf32>, vector<8x512xf32>, vector<8x512xf32>, vector<8x512xf32>, vector<8x512xf32>, vector<8x512xf32>, vector<8x512xf32>, vector<8x512xf32> -> vector<72x512xf32>
    %cst_276 = arith.constant dense<0.000000e+00> : vector<8x512xf32>
    %718 = tpu.matmul %500, %717, %cst_276 {dimension_numbers = #tpu.dot_dimension_numbers<[1], [0], [0], [1], [0, 0, 1, 1], [], []>} : vector<8x72xf32>, vector<72x512xf32>, vector<8x512xf32> -> vector<8x512xf32>
    %c0_277 = arith.constant 0 : index
    %c0_278 = arith.constant 0 : index
    %719 = vector.load %arg20[%c0_277, %c0_278] : memref<8x1xf32, #tpu.memory_space<vmem>>, vector<8x1xf32>
    %720 = vector.broadcast %719 : vector<8x1xf32> to vector<8x512xf32>
    %721 = arith.addf %718, %720 : vector<8x512xf32>
    %c0_279 = arith.constant 0 : index
    %c0_280 = arith.constant 0 : index
    %722 = vector.load %arg21[%c0_279, %c0_280] : memref<8x4xf32, #tpu.memory_space<vmem>>, vector<8x4xf32>
    %cst_281 = arith.constant dense<0.000000e+00> : vector<8x512xf32>
    %723 = tpu.matmul %722, %0, %cst_281 {dimension_numbers = #tpu.dot_dimension_numbers<[1], [0], [0], [1], [0, 0, 1, 1], [], []>} : vector<8x4xf32>, vector<4x512xf32>, vector<8x512xf32> -> vector<8x512xf32>
    %c0_282 = arith.constant 0 : index
    %c0_283 = arith.constant 0 : index
    %724 = vector.load %arg22[%c0_282, %c0_283] : memref<8x1xf32, #tpu.memory_space<vmem>>, vector<8x1xf32>
    %725 = vector.broadcast %724 : vector<8x1xf32> to vector<8x512xf32>
    %726 = arith.addf %723, %725 : vector<8x512xf32>
    %c0_284 = arith.constant 0 : index
    %c0_285 = arith.constant 0 : index
    %727 = vector.load %arg23[%c0_284, %c0_285] : memref<8x56xf32, #tpu.memory_space<vmem>>, vector<8x56xf32>
    %728 = vector.extract_strided_slice %726 {offsets = [0, 509], sizes = [8, 3], strides = [1, 1]} : vector<8x512xf32> to vector<8x3xf32>
    %729 = vector.extract_strided_slice %726 {offsets = [0, 0], sizes = [8, 509], strides = [1, 1]} : vector<8x512xf32> to vector<8x509xf32>
    %730 = tpu.concatenate %728, %729 in 1 : vector<8x3xf32>, vector<8x509xf32> -> vector<8x512xf32>
    %731 = vector.broadcast %239 : vector<1x512xf32> to vector<8x512xf32>
    %732 = arith.mulf %730, %731 : vector<8x512xf32>
    %733 = vector.extract_strided_slice %726 {offsets = [0, 510], sizes = [8, 2], strides = [1, 1]} : vector<8x512xf32> to vector<8x2xf32>
    %734 = vector.extract_strided_slice %726 {offsets = [0, 0], sizes = [8, 510], strides = [1, 1]} : vector<8x512xf32> to vector<8x510xf32>
    %735 = tpu.concatenate %733, %734 in 1 : vector<8x2xf32>, vector<8x510xf32> -> vector<8x512xf32>
    %736 = vector.broadcast %385 : vector<1x512xf32> to vector<8x512xf32>
    %737 = arith.mulf %735, %736 : vector<8x512xf32>
    %738 = vector.extract_strided_slice %726 {offsets = [0, 511], sizes = [8, 1], strides = [1, 1]} : vector<8x512xf32> to vector<8x1xf32>
    %739 = vector.extract_strided_slice %726 {offsets = [0, 0], sizes = [8, 511], strides = [1, 1]} : vector<8x512xf32> to vector<8x511xf32>
    %740 = tpu.concatenate %738, %739 in 1 : vector<8x1xf32>, vector<8x511xf32> -> vector<8x512xf32>
    %741 = vector.broadcast %38 : vector<1x512xf32> to vector<8x512xf32>
    %742 = arith.mulf %740, %741 : vector<8x512xf32>
    %743 = vector.extract_strided_slice %726 {offsets = [0, 1], sizes = [8, 511], strides = [1, 1]} : vector<8x512xf32> to vector<8x511xf32>
    %744 = vector.extract_strided_slice %726 {offsets = [0, 0], sizes = [8, 1], strides = [1, 1]} : vector<8x512xf32> to vector<8x1xf32>
    %745 = tpu.concatenate %743, %744 in 1 : vector<8x511xf32>, vector<8x1xf32> -> vector<8x512xf32>
    %746 = vector.broadcast %65 : vector<1x512xf32> to vector<8x512xf32>
    %747 = arith.mulf %745, %746 : vector<8x512xf32>
    %748 = vector.extract_strided_slice %726 {offsets = [0, 2], sizes = [8, 510], strides = [1, 1]} : vector<8x512xf32> to vector<8x510xf32>
    %749 = vector.extract_strided_slice %726 {offsets = [0, 0], sizes = [8, 2], strides = [1, 1]} : vector<8x512xf32> to vector<8x2xf32>
    %750 = tpu.concatenate %748, %749 in 1 : vector<8x510xf32>, vector<8x2xf32> -> vector<8x512xf32>
    %751 = vector.broadcast %422 : vector<1x512xf32> to vector<8x512xf32>
    %752 = arith.mulf %750, %751 : vector<8x512xf32>
    %753 = vector.extract_strided_slice %726 {offsets = [0, 3], sizes = [8, 509], strides = [1, 1]} : vector<8x512xf32> to vector<8x509xf32>
    %754 = vector.extract_strided_slice %726 {offsets = [0, 0], sizes = [8, 3], strides = [1, 1]} : vector<8x512xf32> to vector<8x3xf32>
    %755 = tpu.concatenate %753, %754 in 1 : vector<8x509xf32>, vector<8x3xf32> -> vector<8x512xf32>
    %756 = vector.broadcast %266 : vector<1x512xf32> to vector<8x512xf32>
    %757 = arith.mulf %755, %756 : vector<8x512xf32>
    %758 = tpu.concatenate %732, %737, %742, %726, %747, %752, %757 in 0 : vector<8x512xf32>, vector<8x512xf32>, vector<8x512xf32>, vector<8x512xf32>, vector<8x512xf32>, vector<8x512xf32>, vector<8x512xf32> -> vector<56x512xf32>
    %cst_286 = arith.constant dense<0.000000e+00> : vector<8x512xf32>
    %759 = tpu.matmul %727, %758, %cst_286 {dimension_numbers = #tpu.dot_dimension_numbers<[1], [0], [0], [1], [0, 0, 1, 1], [], []>} : vector<8x56xf32>, vector<56x512xf32>, vector<8x512xf32> -> vector<8x512xf32>
    %c0_287 = arith.constant 0 : index
    %c0_288 = arith.constant 0 : index
    %760 = vector.load %arg24[%c0_287, %c0_288] : memref<8x1xf32, #tpu.memory_space<vmem>>, vector<8x1xf32>
    %761 = vector.broadcast %760 : vector<8x1xf32> to vector<8x512xf32>
    %762 = arith.addf %759, %761 : vector<8x512xf32>
    %c0_289 = arith.constant 0 : index
    %c0_290 = arith.constant 0 : index
    %763 = vector.load %arg25[%c0_289, %c0_290] : memref<8x56xf32, #tpu.memory_space<vmem>>, vector<8x56xf32>
    %764 = vector.extract_strided_slice %762 {offsets = [0, 464], sizes = [8, 48], strides = [1, 1]} : vector<8x512xf32> to vector<8x48xf32>
    %765 = vector.extract_strided_slice %762 {offsets = [0, 0], sizes = [8, 464], strides = [1, 1]} : vector<8x512xf32> to vector<8x464xf32>
    %766 = tpu.concatenate %764, %765 in 1 : vector<8x48xf32>, vector<8x464xf32> -> vector<8x512xf32>
    %767 = vector.broadcast %185 : vector<1x512xf32> to vector<8x512xf32>
    %768 = arith.mulf %766, %767 : vector<8x512xf32>
    %769 = vector.extract_strided_slice %762 {offsets = [0, 480], sizes = [8, 32], strides = [1, 1]} : vector<8x512xf32> to vector<8x32xf32>
    %770 = vector.extract_strided_slice %762 {offsets = [0, 0], sizes = [8, 480], strides = [1, 1]} : vector<8x512xf32> to vector<8x480xf32>
    %771 = tpu.concatenate %769, %770 in 1 : vector<8x32xf32>, vector<8x480xf32> -> vector<8x512xf32>
    %772 = vector.broadcast %455 : vector<1x512xf32> to vector<8x512xf32>
    %773 = arith.mulf %771, %772 : vector<8x512xf32>
    %774 = vector.extract_strided_slice %762 {offsets = [0, 496], sizes = [8, 16], strides = [1, 1]} : vector<8x512xf32> to vector<8x16xf32>
    %775 = vector.extract_strided_slice %762 {offsets = [0, 0], sizes = [8, 496], strides = [1, 1]} : vector<8x512xf32> to vector<8x496xf32>
    %776 = tpu.concatenate %774, %775 in 1 : vector<8x16xf32>, vector<8x496xf32> -> vector<8x512xf32>
    %777 = vector.broadcast %98 : vector<1x512xf32> to vector<8x512xf32>
    %778 = arith.mulf %776, %777 : vector<8x512xf32>
    %779 = vector.extract_strided_slice %762 {offsets = [0, 16], sizes = [8, 496], strides = [1, 1]} : vector<8x512xf32> to vector<8x496xf32>
    %780 = vector.extract_strided_slice %762 {offsets = [0, 0], sizes = [8, 16], strides = [1, 1]} : vector<8x512xf32> to vector<8x16xf32>
    %781 = tpu.concatenate %779, %780 in 1 : vector<8x496xf32>, vector<8x16xf32> -> vector<8x512xf32>
    %782 = vector.broadcast %125 : vector<1x512xf32> to vector<8x512xf32>
    %783 = arith.mulf %781, %782 : vector<8x512xf32>
    %784 = vector.extract_strided_slice %762 {offsets = [0, 32], sizes = [8, 480], strides = [1, 1]} : vector<8x512xf32> to vector<8x480xf32>
    %785 = vector.extract_strided_slice %762 {offsets = [0, 0], sizes = [8, 32], strides = [1, 1]} : vector<8x512xf32> to vector<8x32xf32>
    %786 = tpu.concatenate %784, %785 in 1 : vector<8x480xf32>, vector<8x32xf32> -> vector<8x512xf32>
    %787 = vector.broadcast %492 : vector<1x512xf32> to vector<8x512xf32>
    %788 = arith.mulf %786, %787 : vector<8x512xf32>
    %789 = vector.extract_strided_slice %762 {offsets = [0, 48], sizes = [8, 464], strides = [1, 1]} : vector<8x512xf32> to vector<8x464xf32>
    %790 = vector.extract_strided_slice %762 {offsets = [0, 0], sizes = [8, 48], strides = [1, 1]} : vector<8x512xf32> to vector<8x48xf32>
    %791 = tpu.concatenate %789, %790 in 1 : vector<8x464xf32>, vector<8x48xf32> -> vector<8x512xf32>
    %792 = vector.broadcast %320 : vector<1x512xf32> to vector<8x512xf32>
    %793 = arith.mulf %791, %792 : vector<8x512xf32>
    %794 = tpu.concatenate %768, %773, %778, %762, %783, %788, %793 in 0 : vector<8x512xf32>, vector<8x512xf32>, vector<8x512xf32>, vector<8x512xf32>, vector<8x512xf32>, vector<8x512xf32>, vector<8x512xf32> -> vector<56x512xf32>
    %cst_291 = arith.constant dense<0.000000e+00> : vector<8x512xf32>
    %795 = tpu.matmul %763, %794, %cst_291 {dimension_numbers = #tpu.dot_dimension_numbers<[1], [0], [0], [1], [0, 0, 1, 1], [], []>} : vector<8x56xf32>, vector<56x512xf32>, vector<8x512xf32> -> vector<8x512xf32>
    %c0_292 = arith.constant 0 : index
    %c0_293 = arith.constant 0 : index
    %796 = vector.load %arg26[%c0_292, %c0_293] : memref<8x1xf32, #tpu.memory_space<vmem>>, vector<8x1xf32>
    %797 = vector.broadcast %796 : vector<8x1xf32> to vector<8x512xf32>
    %798 = arith.addf %795, %797 : vector<8x512xf32>
    %c0_294 = arith.constant 0 : index
    %c0_295 = arith.constant 0 : index
    %799 = vector.load %arg27[%c0_294, %c0_295] : memref<8x72xf32, #tpu.memory_space<vmem>>, vector<8x72xf32>
    %800 = vector.extract_strided_slice %798 {offsets = [0, 393], sizes = [8, 119], strides = [1, 1]} : vector<8x512xf32> to vector<8x119xf32>
    %801 = vector.extract_strided_slice %798 {offsets = [0, 0], sizes = [8, 393], strides = [1, 1]} : vector<8x512xf32> to vector<8x393xf32>
    %802 = tpu.concatenate %800, %801 in 1 : vector<8x119xf32>, vector<8x393xf32> -> vector<8x512xf32>
    %c-7_i32 = arith.constant -7 : i32
    %803 = vector.broadcast %c-7_i32 : i32 to vector<1x512xi32>
    %804 = arith.addi %1, %803 : vector<1x512xi32>
    %c0_i32_296 = arith.constant 0 : i32
    %805 = vector.broadcast %c0_i32_296 : i32 to vector<1x512xi32>
    %806 = arith.cmpi sge, %804, %805 : vector<1x512xi32>
    %c-7_i32_297 = arith.constant -7 : i32
    %807 = vector.broadcast %c-7_i32_297 : i32 to vector<1x512xi32>
    %808 = arith.addi %1, %807 : vector<1x512xi32>
    %c16_i32_298 = arith.constant 16 : i32
    %809 = vector.broadcast %c16_i32_298 : i32 to vector<1x512xi32>
    %810 = arith.cmpi slt, %808, %809 : vector<1x512xi32>
    %811 = arith.andi %806, %810 : vector<1x512xi1>
    %c-7_i32_299 = arith.constant -7 : i32
    %812 = vector.broadcast %c-7_i32_299 : i32 to vector<1x512xi32>
    %813 = arith.addi %2, %812 : vector<1x512xi32>
    %c0_i32_300 = arith.constant 0 : i32
    %814 = vector.broadcast %c0_i32_300 : i32 to vector<1x512xi32>
    %815 = arith.cmpi sge, %813, %814 : vector<1x512xi32>
    %816 = arith.andi %811, %815 : vector<1x512xi1>
    %c-7_i32_301 = arith.constant -7 : i32
    %817 = vector.broadcast %c-7_i32_301 : i32 to vector<1x512xi32>
    %818 = arith.addi %2, %817 : vector<1x512xi32>
    %c16_i32_302 = arith.constant 16 : i32
    %819 = vector.broadcast %c16_i32_302 : i32 to vector<1x512xi32>
    %820 = arith.cmpi slt, %818, %819 : vector<1x512xi32>
    %821 = arith.andi %816, %820 : vector<1x512xi1>
    %cst_303 = arith.constant 1.000000e+00 : f32
    %cst_304 = arith.constant 0.000000e+00 : f32
    %822 = vector.broadcast %cst_303 : f32 to vector<1x512xf32>
    %823 = vector.broadcast %cst_304 : f32 to vector<1x512xf32>
    %824 = arith.select %821, %822, %823 : vector<1x512xi1>, vector<1x512xf32>
    %825 = vector.broadcast %824 : vector<1x512xf32> to vector<8x512xf32>
    %826 = arith.mulf %802, %825 : vector<8x512xf32>
    %827 = vector.extract_strided_slice %798 {offsets = [0, 400], sizes = [8, 112], strides = [1, 1]} : vector<8x512xf32> to vector<8x112xf32>
    %828 = vector.extract_strided_slice %798 {offsets = [0, 0], sizes = [8, 400], strides = [1, 1]} : vector<8x512xf32> to vector<8x400xf32>
    %829 = tpu.concatenate %827, %828 in 1 : vector<8x112xf32>, vector<8x400xf32> -> vector<8x512xf32>
    %c-7_i32_305 = arith.constant -7 : i32
    %830 = vector.broadcast %c-7_i32_305 : i32 to vector<1x512xi32>
    %831 = arith.addi %1, %830 : vector<1x512xi32>
    %c0_i32_306 = arith.constant 0 : i32
    %832 = vector.broadcast %c0_i32_306 : i32 to vector<1x512xi32>
    %833 = arith.cmpi sge, %831, %832 : vector<1x512xi32>
    %c-7_i32_307 = arith.constant -7 : i32
    %834 = vector.broadcast %c-7_i32_307 : i32 to vector<1x512xi32>
    %835 = arith.addi %1, %834 : vector<1x512xi32>
    %c16_i32_308 = arith.constant 16 : i32
    %836 = vector.broadcast %c16_i32_308 : i32 to vector<1x512xi32>
    %837 = arith.cmpi slt, %835, %836 : vector<1x512xi32>
    %838 = arith.andi %833, %837 : vector<1x512xi1>
    %c0_i32_309 = arith.constant 0 : i32
    %839 = vector.broadcast %c0_i32_309 : i32 to vector<1x512xi32>
    %840 = arith.addi %2, %839 : vector<1x512xi32>
    %c0_i32_310 = arith.constant 0 : i32
    %841 = vector.broadcast %c0_i32_310 : i32 to vector<1x512xi32>
    %842 = arith.cmpi sge, %840, %841 : vector<1x512xi32>
    %843 = arith.andi %838, %842 : vector<1x512xi1>
    %c0_i32_311 = arith.constant 0 : i32
    %844 = vector.broadcast %c0_i32_311 : i32 to vector<1x512xi32>
    %845 = arith.addi %2, %844 : vector<1x512xi32>
    %c16_i32_312 = arith.constant 16 : i32
    %846 = vector.broadcast %c16_i32_312 : i32 to vector<1x512xi32>
    %847 = arith.cmpi slt, %845, %846 : vector<1x512xi32>
    %848 = arith.andi %843, %847 : vector<1x512xi1>
    %cst_313 = arith.constant 1.000000e+00 : f32
    %cst_314 = arith.constant 0.000000e+00 : f32
    %849 = vector.broadcast %cst_313 : f32 to vector<1x512xf32>
    %850 = vector.broadcast %cst_314 : f32 to vector<1x512xf32>
    %851 = arith.select %848, %849, %850 : vector<1x512xi1>, vector<1x512xf32>
    %852 = vector.broadcast %851 : vector<1x512xf32> to vector<8x512xf32>
    %853 = arith.mulf %829, %852 : vector<8x512xf32>
    %854 = vector.extract_strided_slice %798 {offsets = [0, 407], sizes = [8, 105], strides = [1, 1]} : vector<8x512xf32> to vector<8x105xf32>
    %855 = vector.extract_strided_slice %798 {offsets = [0, 0], sizes = [8, 407], strides = [1, 1]} : vector<8x512xf32> to vector<8x407xf32>
    %856 = tpu.concatenate %854, %855 in 1 : vector<8x105xf32>, vector<8x407xf32> -> vector<8x512xf32>
    %c-7_i32_315 = arith.constant -7 : i32
    %857 = vector.broadcast %c-7_i32_315 : i32 to vector<1x512xi32>
    %858 = arith.addi %1, %857 : vector<1x512xi32>
    %c0_i32_316 = arith.constant 0 : i32
    %859 = vector.broadcast %c0_i32_316 : i32 to vector<1x512xi32>
    %860 = arith.cmpi sge, %858, %859 : vector<1x512xi32>
    %c-7_i32_317 = arith.constant -7 : i32
    %861 = vector.broadcast %c-7_i32_317 : i32 to vector<1x512xi32>
    %862 = arith.addi %1, %861 : vector<1x512xi32>
    %c16_i32_318 = arith.constant 16 : i32
    %863 = vector.broadcast %c16_i32_318 : i32 to vector<1x512xi32>
    %864 = arith.cmpi slt, %862, %863 : vector<1x512xi32>
    %865 = arith.andi %860, %864 : vector<1x512xi1>
    %c7_i32 = arith.constant 7 : i32
    %866 = vector.broadcast %c7_i32 : i32 to vector<1x512xi32>
    %867 = arith.addi %2, %866 : vector<1x512xi32>
    %c0_i32_319 = arith.constant 0 : i32
    %868 = vector.broadcast %c0_i32_319 : i32 to vector<1x512xi32>
    %869 = arith.cmpi sge, %867, %868 : vector<1x512xi32>
    %870 = arith.andi %865, %869 : vector<1x512xi1>
    %c7_i32_320 = arith.constant 7 : i32
    %871 = vector.broadcast %c7_i32_320 : i32 to vector<1x512xi32>
    %872 = arith.addi %2, %871 : vector<1x512xi32>
    %c16_i32_321 = arith.constant 16 : i32
    %873 = vector.broadcast %c16_i32_321 : i32 to vector<1x512xi32>
    %874 = arith.cmpi slt, %872, %873 : vector<1x512xi32>
    %875 = arith.andi %870, %874 : vector<1x512xi1>
    %cst_322 = arith.constant 1.000000e+00 : f32
    %cst_323 = arith.constant 0.000000e+00 : f32
    %876 = vector.broadcast %cst_322 : f32 to vector<1x512xf32>
    %877 = vector.broadcast %cst_323 : f32 to vector<1x512xf32>
    %878 = arith.select %875, %876, %877 : vector<1x512xi1>, vector<1x512xf32>
    %879 = vector.broadcast %878 : vector<1x512xf32> to vector<8x512xf32>
    %880 = arith.mulf %856, %879 : vector<8x512xf32>
    %881 = vector.extract_strided_slice %798 {offsets = [0, 505], sizes = [8, 7], strides = [1, 1]} : vector<8x512xf32> to vector<8x7xf32>
    %882 = vector.extract_strided_slice %798 {offsets = [0, 0], sizes = [8, 505], strides = [1, 1]} : vector<8x512xf32> to vector<8x505xf32>
    %883 = tpu.concatenate %881, %882 in 1 : vector<8x7xf32>, vector<8x505xf32> -> vector<8x512xf32>
    %c0_i32_324 = arith.constant 0 : i32
    %884 = vector.broadcast %c0_i32_324 : i32 to vector<1x512xi32>
    %885 = arith.addi %1, %884 : vector<1x512xi32>
    %c0_i32_325 = arith.constant 0 : i32
    %886 = vector.broadcast %c0_i32_325 : i32 to vector<1x512xi32>
    %887 = arith.cmpi sge, %885, %886 : vector<1x512xi32>
    %c0_i32_326 = arith.constant 0 : i32
    %888 = vector.broadcast %c0_i32_326 : i32 to vector<1x512xi32>
    %889 = arith.addi %1, %888 : vector<1x512xi32>
    %c16_i32_327 = arith.constant 16 : i32
    %890 = vector.broadcast %c16_i32_327 : i32 to vector<1x512xi32>
    %891 = arith.cmpi slt, %889, %890 : vector<1x512xi32>
    %892 = arith.andi %887, %891 : vector<1x512xi1>
    %c-7_i32_328 = arith.constant -7 : i32
    %893 = vector.broadcast %c-7_i32_328 : i32 to vector<1x512xi32>
    %894 = arith.addi %2, %893 : vector<1x512xi32>
    %c0_i32_329 = arith.constant 0 : i32
    %895 = vector.broadcast %c0_i32_329 : i32 to vector<1x512xi32>
    %896 = arith.cmpi sge, %894, %895 : vector<1x512xi32>
    %897 = arith.andi %892, %896 : vector<1x512xi1>
    %c-7_i32_330 = arith.constant -7 : i32
    %898 = vector.broadcast %c-7_i32_330 : i32 to vector<1x512xi32>
    %899 = arith.addi %2, %898 : vector<1x512xi32>
    %c16_i32_331 = arith.constant 16 : i32
    %900 = vector.broadcast %c16_i32_331 : i32 to vector<1x512xi32>
    %901 = arith.cmpi slt, %899, %900 : vector<1x512xi32>
    %902 = arith.andi %897, %901 : vector<1x512xi1>
    %cst_332 = arith.constant 1.000000e+00 : f32
    %cst_333 = arith.constant 0.000000e+00 : f32
    %903 = vector.broadcast %cst_332 : f32 to vector<1x512xf32>
    %904 = vector.broadcast %cst_333 : f32 to vector<1x512xf32>
    %905 = arith.select %902, %903, %904 : vector<1x512xi1>, vector<1x512xf32>
    %906 = vector.broadcast %905 : vector<1x512xf32> to vector<8x512xf32>
    %907 = arith.mulf %883, %906 : vector<8x512xf32>
    %908 = vector.extract_strided_slice %798 {offsets = [0, 7], sizes = [8, 505], strides = [1, 1]} : vector<8x512xf32> to vector<8x505xf32>
    %909 = vector.extract_strided_slice %798 {offsets = [0, 0], sizes = [8, 7], strides = [1, 1]} : vector<8x512xf32> to vector<8x7xf32>
    %910 = tpu.concatenate %908, %909 in 1 : vector<8x505xf32>, vector<8x7xf32> -> vector<8x512xf32>
    %c0_i32_334 = arith.constant 0 : i32
    %911 = vector.broadcast %c0_i32_334 : i32 to vector<1x512xi32>
    %912 = arith.addi %1, %911 : vector<1x512xi32>
    %c0_i32_335 = arith.constant 0 : i32
    %913 = vector.broadcast %c0_i32_335 : i32 to vector<1x512xi32>
    %914 = arith.cmpi sge, %912, %913 : vector<1x512xi32>
    %c0_i32_336 = arith.constant 0 : i32
    %915 = vector.broadcast %c0_i32_336 : i32 to vector<1x512xi32>
    %916 = arith.addi %1, %915 : vector<1x512xi32>
    %c16_i32_337 = arith.constant 16 : i32
    %917 = vector.broadcast %c16_i32_337 : i32 to vector<1x512xi32>
    %918 = arith.cmpi slt, %916, %917 : vector<1x512xi32>
    %919 = arith.andi %914, %918 : vector<1x512xi1>
    %c7_i32_338 = arith.constant 7 : i32
    %920 = vector.broadcast %c7_i32_338 : i32 to vector<1x512xi32>
    %921 = arith.addi %2, %920 : vector<1x512xi32>
    %c0_i32_339 = arith.constant 0 : i32
    %922 = vector.broadcast %c0_i32_339 : i32 to vector<1x512xi32>
    %923 = arith.cmpi sge, %921, %922 : vector<1x512xi32>
    %924 = arith.andi %919, %923 : vector<1x512xi1>
    %c7_i32_340 = arith.constant 7 : i32
    %925 = vector.broadcast %c7_i32_340 : i32 to vector<1x512xi32>
    %926 = arith.addi %2, %925 : vector<1x512xi32>
    %c16_i32_341 = arith.constant 16 : i32
    %927 = vector.broadcast %c16_i32_341 : i32 to vector<1x512xi32>
    %928 = arith.cmpi slt, %926, %927 : vector<1x512xi32>
    %929 = arith.andi %924, %928 : vector<1x512xi1>
    %cst_342 = arith.constant 1.000000e+00 : f32
    %cst_343 = arith.constant 0.000000e+00 : f32
    %930 = vector.broadcast %cst_342 : f32 to vector<1x512xf32>
    %931 = vector.broadcast %cst_343 : f32 to vector<1x512xf32>
    %932 = arith.select %929, %930, %931 : vector<1x512xi1>, vector<1x512xf32>
    %933 = vector.broadcast %932 : vector<1x512xf32> to vector<8x512xf32>
    %934 = arith.mulf %910, %933 : vector<8x512xf32>
    %935 = vector.extract_strided_slice %798 {offsets = [0, 105], sizes = [8, 407], strides = [1, 1]} : vector<8x512xf32> to vector<8x407xf32>
    %936 = vector.extract_strided_slice %798 {offsets = [0, 0], sizes = [8, 105], strides = [1, 1]} : vector<8x512xf32> to vector<8x105xf32>
    %937 = tpu.concatenate %935, %936 in 1 : vector<8x407xf32>, vector<8x105xf32> -> vector<8x512xf32>
    %c7_i32_344 = arith.constant 7 : i32
    %938 = vector.broadcast %c7_i32_344 : i32 to vector<1x512xi32>
    %939 = arith.addi %1, %938 : vector<1x512xi32>
    %c0_i32_345 = arith.constant 0 : i32
    %940 = vector.broadcast %c0_i32_345 : i32 to vector<1x512xi32>
    %941 = arith.cmpi sge, %939, %940 : vector<1x512xi32>
    %c7_i32_346 = arith.constant 7 : i32
    %942 = vector.broadcast %c7_i32_346 : i32 to vector<1x512xi32>
    %943 = arith.addi %1, %942 : vector<1x512xi32>
    %c16_i32_347 = arith.constant 16 : i32
    %944 = vector.broadcast %c16_i32_347 : i32 to vector<1x512xi32>
    %945 = arith.cmpi slt, %943, %944 : vector<1x512xi32>
    %946 = arith.andi %941, %945 : vector<1x512xi1>
    %c-7_i32_348 = arith.constant -7 : i32
    %947 = vector.broadcast %c-7_i32_348 : i32 to vector<1x512xi32>
    %948 = arith.addi %2, %947 : vector<1x512xi32>
    %c0_i32_349 = arith.constant 0 : i32
    %949 = vector.broadcast %c0_i32_349 : i32 to vector<1x512xi32>
    %950 = arith.cmpi sge, %948, %949 : vector<1x512xi32>
    %951 = arith.andi %946, %950 : vector<1x512xi1>
    %c-7_i32_350 = arith.constant -7 : i32
    %952 = vector.broadcast %c-7_i32_350 : i32 to vector<1x512xi32>
    %953 = arith.addi %2, %952 : vector<1x512xi32>
    %c16_i32_351 = arith.constant 16 : i32
    %954 = vector.broadcast %c16_i32_351 : i32 to vector<1x512xi32>
    %955 = arith.cmpi slt, %953, %954 : vector<1x512xi32>
    %956 = arith.andi %951, %955 : vector<1x512xi1>
    %cst_352 = arith.constant 1.000000e+00 : f32
    %cst_353 = arith.constant 0.000000e+00 : f32
    %957 = vector.broadcast %cst_352 : f32 to vector<1x512xf32>
    %958 = vector.broadcast %cst_353 : f32 to vector<1x512xf32>
    %959 = arith.select %956, %957, %958 : vector<1x512xi1>, vector<1x512xf32>
    %960 = vector.broadcast %959 : vector<1x512xf32> to vector<8x512xf32>
    %961 = arith.mulf %937, %960 : vector<8x512xf32>
    %962 = vector.extract_strided_slice %798 {offsets = [0, 112], sizes = [8, 400], strides = [1, 1]} : vector<8x512xf32> to vector<8x400xf32>
    %963 = vector.extract_strided_slice %798 {offsets = [0, 0], sizes = [8, 112], strides = [1, 1]} : vector<8x512xf32> to vector<8x112xf32>
    %964 = tpu.concatenate %962, %963 in 1 : vector<8x400xf32>, vector<8x112xf32> -> vector<8x512xf32>
    %c7_i32_354 = arith.constant 7 : i32
    %965 = vector.broadcast %c7_i32_354 : i32 to vector<1x512xi32>
    %966 = arith.addi %1, %965 : vector<1x512xi32>
    %c0_i32_355 = arith.constant 0 : i32
    %967 = vector.broadcast %c0_i32_355 : i32 to vector<1x512xi32>
    %968 = arith.cmpi sge, %966, %967 : vector<1x512xi32>
    %c7_i32_356 = arith.constant 7 : i32
    %969 = vector.broadcast %c7_i32_356 : i32 to vector<1x512xi32>
    %970 = arith.addi %1, %969 : vector<1x512xi32>
    %c16_i32_357 = arith.constant 16 : i32
    %971 = vector.broadcast %c16_i32_357 : i32 to vector<1x512xi32>
    %972 = arith.cmpi slt, %970, %971 : vector<1x512xi32>
    %973 = arith.andi %968, %972 : vector<1x512xi1>
    %c0_i32_358 = arith.constant 0 : i32
    %974 = vector.broadcast %c0_i32_358 : i32 to vector<1x512xi32>
    %975 = arith.addi %2, %974 : vector<1x512xi32>
    %c0_i32_359 = arith.constant 0 : i32
    %976 = vector.broadcast %c0_i32_359 : i32 to vector<1x512xi32>
    %977 = arith.cmpi sge, %975, %976 : vector<1x512xi32>
    %978 = arith.andi %973, %977 : vector<1x512xi1>
    %c0_i32_360 = arith.constant 0 : i32
    %979 = vector.broadcast %c0_i32_360 : i32 to vector<1x512xi32>
    %980 = arith.addi %2, %979 : vector<1x512xi32>
    %c16_i32_361 = arith.constant 16 : i32
    %981 = vector.broadcast %c16_i32_361 : i32 to vector<1x512xi32>
    %982 = arith.cmpi slt, %980, %981 : vector<1x512xi32>
    %983 = arith.andi %978, %982 : vector<1x512xi1>
    %cst_362 = arith.constant 1.000000e+00 : f32
    %cst_363 = arith.constant 0.000000e+00 : f32
    %984 = vector.broadcast %cst_362 : f32 to vector<1x512xf32>
    %985 = vector.broadcast %cst_363 : f32 to vector<1x512xf32>
    %986 = arith.select %983, %984, %985 : vector<1x512xi1>, vector<1x512xf32>
    %987 = vector.broadcast %986 : vector<1x512xf32> to vector<8x512xf32>
    %988 = arith.mulf %964, %987 : vector<8x512xf32>
    %989 = vector.extract_strided_slice %798 {offsets = [0, 119], sizes = [8, 393], strides = [1, 1]} : vector<8x512xf32> to vector<8x393xf32>
    %990 = vector.extract_strided_slice %798 {offsets = [0, 0], sizes = [8, 119], strides = [1, 1]} : vector<8x512xf32> to vector<8x119xf32>
    %991 = tpu.concatenate %989, %990 in 1 : vector<8x393xf32>, vector<8x119xf32> -> vector<8x512xf32>
    %c7_i32_364 = arith.constant 7 : i32
    %992 = vector.broadcast %c7_i32_364 : i32 to vector<1x512xi32>
    %993 = arith.addi %1, %992 : vector<1x512xi32>
    %c0_i32_365 = arith.constant 0 : i32
    %994 = vector.broadcast %c0_i32_365 : i32 to vector<1x512xi32>
    %995 = arith.cmpi sge, %993, %994 : vector<1x512xi32>
    %c7_i32_366 = arith.constant 7 : i32
    %996 = vector.broadcast %c7_i32_366 : i32 to vector<1x512xi32>
    %997 = arith.addi %1, %996 : vector<1x512xi32>
    %c16_i32_367 = arith.constant 16 : i32
    %998 = vector.broadcast %c16_i32_367 : i32 to vector<1x512xi32>
    %999 = arith.cmpi slt, %997, %998 : vector<1x512xi32>
    %1000 = arith.andi %995, %999 : vector<1x512xi1>
    %c7_i32_368 = arith.constant 7 : i32
    %1001 = vector.broadcast %c7_i32_368 : i32 to vector<1x512xi32>
    %1002 = arith.addi %2, %1001 : vector<1x512xi32>
    %c0_i32_369 = arith.constant 0 : i32
    %1003 = vector.broadcast %c0_i32_369 : i32 to vector<1x512xi32>
    %1004 = arith.cmpi sge, %1002, %1003 : vector<1x512xi32>
    %1005 = arith.andi %1000, %1004 : vector<1x512xi1>
    %c7_i32_370 = arith.constant 7 : i32
    %1006 = vector.broadcast %c7_i32_370 : i32 to vector<1x512xi32>
    %1007 = arith.addi %2, %1006 : vector<1x512xi32>
    %c16_i32_371 = arith.constant 16 : i32
    %1008 = vector.broadcast %c16_i32_371 : i32 to vector<1x512xi32>
    %1009 = arith.cmpi slt, %1007, %1008 : vector<1x512xi32>
    %1010 = arith.andi %1005, %1009 : vector<1x512xi1>
    %cst_372 = arith.constant 1.000000e+00 : f32
    %cst_373 = arith.constant 0.000000e+00 : f32
    %1011 = vector.broadcast %cst_372 : f32 to vector<1x512xf32>
    %1012 = vector.broadcast %cst_373 : f32 to vector<1x512xf32>
    %1013 = arith.select %1010, %1011, %1012 : vector<1x512xi1>, vector<1x512xf32>
    %1014 = vector.broadcast %1013 : vector<1x512xf32> to vector<8x512xf32>
    %1015 = arith.mulf %991, %1014 : vector<8x512xf32>
    %1016 = tpu.concatenate %826, %853, %880, %907, %798, %934, %961, %988, %1015 in 0 : vector<8x512xf32>, vector<8x512xf32>, vector<8x512xf32>, vector<8x512xf32>, vector<8x512xf32>, vector<8x512xf32>, vector<8x512xf32>, vector<8x512xf32>, vector<8x512xf32> -> vector<72x512xf32>
    %cst_374 = arith.constant dense<0.000000e+00> : vector<8x512xf32>
    %1017 = tpu.matmul %799, %1016, %cst_374 {dimension_numbers = #tpu.dot_dimension_numbers<[1], [0], [0], [1], [0, 0, 1, 1], [], []>} : vector<8x72xf32>, vector<72x512xf32>, vector<8x512xf32> -> vector<8x512xf32>
    %c0_375 = arith.constant 0 : index
    %c0_376 = arith.constant 0 : index
    %1018 = vector.load %arg28[%c0_375, %c0_376] : memref<8x1xf32, #tpu.memory_space<vmem>>, vector<8x1xf32>
    %1019 = vector.broadcast %1018 : vector<8x1xf32> to vector<8x512xf32>
    %1020 = arith.addf %1017, %1019 : vector<8x512xf32>
    %c0_377 = arith.constant 0 : index
    %c0_378 = arith.constant 0 : index
    %1021 = vector.load %arg30[%c0_377, %c0_378] : memref<8x1xf32, #tpu.memory_space<vmem>>, vector<8x1xf32>
    %c0_379 = arith.constant 0 : index
    %c0_380 = arith.constant 0 : index
    %c0_381 = arith.constant 0 : index
    %1022 = vector.load %arg29[%c0_379, %c0_380, %c0_381] : memref<4x8x72xf32, #tpu.memory_space<vmem>>, vector<1x8x72xf32>
    %1023 = vector.shape_cast %1022 : vector<1x8x72xf32> to vector<8x72xf32>
    %1024 = vector.extract_strided_slice %7 {offsets = [0, 495], sizes = [8, 17], strides = [1, 1]} : vector<8x512xf32> to vector<8x17xf32>
    %1025 = vector.extract_strided_slice %7 {offsets = [0, 0], sizes = [8, 495], strides = [1, 1]} : vector<8x512xf32> to vector<8x495xf32>
    %1026 = tpu.concatenate %1024, %1025 in 1 : vector<8x17xf32>, vector<8x495xf32> -> vector<8x512xf32>
    %c-1_i32_382 = arith.constant -1 : i32
    %1027 = vector.broadcast %c-1_i32_382 : i32 to vector<1x512xi32>
    %1028 = arith.addi %1, %1027 : vector<1x512xi32>
    %c0_i32_383 = arith.constant 0 : i32
    %1029 = vector.broadcast %c0_i32_383 : i32 to vector<1x512xi32>
    %1030 = arith.cmpi sge, %1028, %1029 : vector<1x512xi32>
    %c-1_i32_384 = arith.constant -1 : i32
    %1031 = vector.broadcast %c-1_i32_384 : i32 to vector<1x512xi32>
    %1032 = arith.addi %1, %1031 : vector<1x512xi32>
    %c16_i32_385 = arith.constant 16 : i32
    %1033 = vector.broadcast %c16_i32_385 : i32 to vector<1x512xi32>
    %1034 = arith.cmpi slt, %1032, %1033 : vector<1x512xi32>
    %1035 = arith.andi %1030, %1034 : vector<1x512xi1>
    %c-1_i32_386 = arith.constant -1 : i32
    %1036 = vector.broadcast %c-1_i32_386 : i32 to vector<1x512xi32>
    %1037 = arith.addi %2, %1036 : vector<1x512xi32>
    %c0_i32_387 = arith.constant 0 : i32
    %1038 = vector.broadcast %c0_i32_387 : i32 to vector<1x512xi32>
    %1039 = arith.cmpi sge, %1037, %1038 : vector<1x512xi32>
    %1040 = arith.andi %1035, %1039 : vector<1x512xi1>
    %c-1_i32_388 = arith.constant -1 : i32
    %1041 = vector.broadcast %c-1_i32_388 : i32 to vector<1x512xi32>
    %1042 = arith.addi %2, %1041 : vector<1x512xi32>
    %c16_i32_389 = arith.constant 16 : i32
    %1043 = vector.broadcast %c16_i32_389 : i32 to vector<1x512xi32>
    %1044 = arith.cmpi slt, %1042, %1043 : vector<1x512xi32>
    %1045 = arith.andi %1040, %1044 : vector<1x512xi1>
    %cst_390 = arith.constant 1.000000e+00 : f32
    %cst_391 = arith.constant 0.000000e+00 : f32
    %1046 = vector.broadcast %cst_390 : f32 to vector<1x512xf32>
    %1047 = vector.broadcast %cst_391 : f32 to vector<1x512xf32>
    %1048 = arith.select %1045, %1046, %1047 : vector<1x512xi1>, vector<1x512xf32>
    %1049 = vector.broadcast %1048 : vector<1x512xf32> to vector<8x512xf32>
    %1050 = arith.mulf %1026, %1049 : vector<8x512xf32>
    %1051 = vector.extract_strided_slice %7 {offsets = [0, 496], sizes = [8, 16], strides = [1, 1]} : vector<8x512xf32> to vector<8x16xf32>
    %1052 = vector.extract_strided_slice %7 {offsets = [0, 0], sizes = [8, 496], strides = [1, 1]} : vector<8x512xf32> to vector<8x496xf32>
    %1053 = tpu.concatenate %1051, %1052 in 1 : vector<8x16xf32>, vector<8x496xf32> -> vector<8x512xf32>
    %1054 = vector.broadcast %98 : vector<1x512xf32> to vector<8x512xf32>
    %1055 = arith.mulf %1053, %1054 : vector<8x512xf32>
    %1056 = vector.extract_strided_slice %7 {offsets = [0, 497], sizes = [8, 15], strides = [1, 1]} : vector<8x512xf32> to vector<8x15xf32>
    %1057 = vector.extract_strided_slice %7 {offsets = [0, 0], sizes = [8, 497], strides = [1, 1]} : vector<8x512xf32> to vector<8x497xf32>
    %1058 = tpu.concatenate %1056, %1057 in 1 : vector<8x15xf32>, vector<8x497xf32> -> vector<8x512xf32>
    %c-1_i32_392 = arith.constant -1 : i32
    %1059 = vector.broadcast %c-1_i32_392 : i32 to vector<1x512xi32>
    %1060 = arith.addi %1, %1059 : vector<1x512xi32>
    %c0_i32_393 = arith.constant 0 : i32
    %1061 = vector.broadcast %c0_i32_393 : i32 to vector<1x512xi32>
    %1062 = arith.cmpi sge, %1060, %1061 : vector<1x512xi32>
    %c-1_i32_394 = arith.constant -1 : i32
    %1063 = vector.broadcast %c-1_i32_394 : i32 to vector<1x512xi32>
    %1064 = arith.addi %1, %1063 : vector<1x512xi32>
    %c16_i32_395 = arith.constant 16 : i32
    %1065 = vector.broadcast %c16_i32_395 : i32 to vector<1x512xi32>
    %1066 = arith.cmpi slt, %1064, %1065 : vector<1x512xi32>
    %1067 = arith.andi %1062, %1066 : vector<1x512xi1>
    %c1_i32_396 = arith.constant 1 : i32
    %1068 = vector.broadcast %c1_i32_396 : i32 to vector<1x512xi32>
    %1069 = arith.addi %2, %1068 : vector<1x512xi32>
    %c0_i32_397 = arith.constant 0 : i32
    %1070 = vector.broadcast %c0_i32_397 : i32 to vector<1x512xi32>
    %1071 = arith.cmpi sge, %1069, %1070 : vector<1x512xi32>
    %1072 = arith.andi %1067, %1071 : vector<1x512xi1>
    %c1_i32_398 = arith.constant 1 : i32
    %1073 = vector.broadcast %c1_i32_398 : i32 to vector<1x512xi32>
    %1074 = arith.addi %2, %1073 : vector<1x512xi32>
    %c16_i32_399 = arith.constant 16 : i32
    %1075 = vector.broadcast %c16_i32_399 : i32 to vector<1x512xi32>
    %1076 = arith.cmpi slt, %1074, %1075 : vector<1x512xi32>
    %1077 = arith.andi %1072, %1076 : vector<1x512xi1>
    %cst_400 = arith.constant 1.000000e+00 : f32
    %cst_401 = arith.constant 0.000000e+00 : f32
    %1078 = vector.broadcast %cst_400 : f32 to vector<1x512xf32>
    %1079 = vector.broadcast %cst_401 : f32 to vector<1x512xf32>
    %1080 = arith.select %1077, %1078, %1079 : vector<1x512xi1>, vector<1x512xf32>
    %1081 = vector.broadcast %1080 : vector<1x512xf32> to vector<8x512xf32>
    %1082 = arith.mulf %1058, %1081 : vector<8x512xf32>
    %1083 = vector.extract_strided_slice %7 {offsets = [0, 511], sizes = [8, 1], strides = [1, 1]} : vector<8x512xf32> to vector<8x1xf32>
    %1084 = vector.extract_strided_slice %7 {offsets = [0, 0], sizes = [8, 511], strides = [1, 1]} : vector<8x512xf32> to vector<8x511xf32>
    %1085 = tpu.concatenate %1083, %1084 in 1 : vector<8x1xf32>, vector<8x511xf32> -> vector<8x512xf32>
    %1086 = vector.broadcast %38 : vector<1x512xf32> to vector<8x512xf32>
    %1087 = arith.mulf %1085, %1086 : vector<8x512xf32>
    %1088 = vector.extract_strided_slice %7 {offsets = [0, 1], sizes = [8, 511], strides = [1, 1]} : vector<8x512xf32> to vector<8x511xf32>
    %1089 = vector.extract_strided_slice %7 {offsets = [0, 0], sizes = [8, 1], strides = [1, 1]} : vector<8x512xf32> to vector<8x1xf32>
    %1090 = tpu.concatenate %1088, %1089 in 1 : vector<8x511xf32>, vector<8x1xf32> -> vector<8x512xf32>
    %1091 = vector.broadcast %65 : vector<1x512xf32> to vector<8x512xf32>
    %1092 = arith.mulf %1090, %1091 : vector<8x512xf32>
    %1093 = vector.extract_strided_slice %7 {offsets = [0, 15], sizes = [8, 497], strides = [1, 1]} : vector<8x512xf32> to vector<8x497xf32>
    %1094 = vector.extract_strided_slice %7 {offsets = [0, 0], sizes = [8, 15], strides = [1, 1]} : vector<8x512xf32> to vector<8x15xf32>
    %1095 = tpu.concatenate %1093, %1094 in 1 : vector<8x497xf32>, vector<8x15xf32> -> vector<8x512xf32>
    %c1_i32_402 = arith.constant 1 : i32
    %1096 = vector.broadcast %c1_i32_402 : i32 to vector<1x512xi32>
    %1097 = arith.addi %1, %1096 : vector<1x512xi32>
    %c0_i32_403 = arith.constant 0 : i32
    %1098 = vector.broadcast %c0_i32_403 : i32 to vector<1x512xi32>
    %1099 = arith.cmpi sge, %1097, %1098 : vector<1x512xi32>
    %c1_i32_404 = arith.constant 1 : i32
    %1100 = vector.broadcast %c1_i32_404 : i32 to vector<1x512xi32>
    %1101 = arith.addi %1, %1100 : vector<1x512xi32>
    %c16_i32_405 = arith.constant 16 : i32
    %1102 = vector.broadcast %c16_i32_405 : i32 to vector<1x512xi32>
    %1103 = arith.cmpi slt, %1101, %1102 : vector<1x512xi32>
    %1104 = arith.andi %1099, %1103 : vector<1x512xi1>
    %c-1_i32_406 = arith.constant -1 : i32
    %1105 = vector.broadcast %c-1_i32_406 : i32 to vector<1x512xi32>
    %1106 = arith.addi %2, %1105 : vector<1x512xi32>
    %c0_i32_407 = arith.constant 0 : i32
    %1107 = vector.broadcast %c0_i32_407 : i32 to vector<1x512xi32>
    %1108 = arith.cmpi sge, %1106, %1107 : vector<1x512xi32>
    %1109 = arith.andi %1104, %1108 : vector<1x512xi1>
    %c-1_i32_408 = arith.constant -1 : i32
    %1110 = vector.broadcast %c-1_i32_408 : i32 to vector<1x512xi32>
    %1111 = arith.addi %2, %1110 : vector<1x512xi32>
    %c16_i32_409 = arith.constant 16 : i32
    %1112 = vector.broadcast %c16_i32_409 : i32 to vector<1x512xi32>
    %1113 = arith.cmpi slt, %1111, %1112 : vector<1x512xi32>
    %1114 = arith.andi %1109, %1113 : vector<1x512xi1>
    %cst_410 = arith.constant 1.000000e+00 : f32
    %cst_411 = arith.constant 0.000000e+00 : f32
    %1115 = vector.broadcast %cst_410 : f32 to vector<1x512xf32>
    %1116 = vector.broadcast %cst_411 : f32 to vector<1x512xf32>
    %1117 = arith.select %1114, %1115, %1116 : vector<1x512xi1>, vector<1x512xf32>
    %1118 = vector.broadcast %1117 : vector<1x512xf32> to vector<8x512xf32>
    %1119 = arith.mulf %1095, %1118 : vector<8x512xf32>
    %1120 = vector.extract_strided_slice %7 {offsets = [0, 16], sizes = [8, 496], strides = [1, 1]} : vector<8x512xf32> to vector<8x496xf32>
    %1121 = vector.extract_strided_slice %7 {offsets = [0, 0], sizes = [8, 16], strides = [1, 1]} : vector<8x512xf32> to vector<8x16xf32>
    %1122 = tpu.concatenate %1120, %1121 in 1 : vector<8x496xf32>, vector<8x16xf32> -> vector<8x512xf32>
    %1123 = vector.broadcast %125 : vector<1x512xf32> to vector<8x512xf32>
    %1124 = arith.mulf %1122, %1123 : vector<8x512xf32>
    %1125 = vector.extract_strided_slice %7 {offsets = [0, 17], sizes = [8, 495], strides = [1, 1]} : vector<8x512xf32> to vector<8x495xf32>
    %1126 = vector.extract_strided_slice %7 {offsets = [0, 0], sizes = [8, 17], strides = [1, 1]} : vector<8x512xf32> to vector<8x17xf32>
    %1127 = tpu.concatenate %1125, %1126 in 1 : vector<8x495xf32>, vector<8x17xf32> -> vector<8x512xf32>
    %c1_i32_412 = arith.constant 1 : i32
    %1128 = vector.broadcast %c1_i32_412 : i32 to vector<1x512xi32>
    %1129 = arith.addi %1, %1128 : vector<1x512xi32>
    %c0_i32_413 = arith.constant 0 : i32
    %1130 = vector.broadcast %c0_i32_413 : i32 to vector<1x512xi32>
    %1131 = arith.cmpi sge, %1129, %1130 : vector<1x512xi32>
    %c1_i32_414 = arith.constant 1 : i32
    %1132 = vector.broadcast %c1_i32_414 : i32 to vector<1x512xi32>
    %1133 = arith.addi %1, %1132 : vector<1x512xi32>
    %c16_i32_415 = arith.constant 16 : i32
    %1134 = vector.broadcast %c16_i32_415 : i32 to vector<1x512xi32>
    %1135 = arith.cmpi slt, %1133, %1134 : vector<1x512xi32>
    %1136 = arith.andi %1131, %1135 : vector<1x512xi1>
    %c1_i32_416 = arith.constant 1 : i32
    %1137 = vector.broadcast %c1_i32_416 : i32 to vector<1x512xi32>
    %1138 = arith.addi %2, %1137 : vector<1x512xi32>
    %c0_i32_417 = arith.constant 0 : i32
    %1139 = vector.broadcast %c0_i32_417 : i32 to vector<1x512xi32>
    %1140 = arith.cmpi sge, %1138, %1139 : vector<1x512xi32>
    %1141 = arith.andi %1136, %1140 : vector<1x512xi1>
    %c1_i32_418 = arith.constant 1 : i32
    %1142 = vector.broadcast %c1_i32_418 : i32 to vector<1x512xi32>
    %1143 = arith.addi %2, %1142 : vector<1x512xi32>
    %c16_i32_419 = arith.constant 16 : i32
    %1144 = vector.broadcast %c16_i32_419 : i32 to vector<1x512xi32>
    %1145 = arith.cmpi slt, %1143, %1144 : vector<1x512xi32>
    %1146 = arith.andi %1141, %1145 : vector<1x512xi1>
    %cst_420 = arith.constant 1.000000e+00 : f32
    %cst_421 = arith.constant 0.000000e+00 : f32
    %1147 = vector.broadcast %cst_420 : f32 to vector<1x512xf32>
    %1148 = vector.broadcast %cst_421 : f32 to vector<1x512xf32>
    %1149 = arith.select %1146, %1147, %1148 : vector<1x512xi1>, vector<1x512xf32>
    %1150 = vector.broadcast %1149 : vector<1x512xf32> to vector<8x512xf32>
    %1151 = arith.mulf %1127, %1150 : vector<8x512xf32>
    %1152 = tpu.concatenate %1050, %1055, %1082, %1087, %7, %1092, %1119, %1124, %1151 in 0 : vector<8x512xf32>, vector<8x512xf32>, vector<8x512xf32>, vector<8x512xf32>, vector<8x512xf32>, vector<8x512xf32>, vector<8x512xf32>, vector<8x512xf32>, vector<8x512xf32> -> vector<72x512xf32>
    %cst_422 = arith.constant dense<0.000000e+00> : vector<8x512xf32>
    %1153 = tpu.matmul %1023, %1152, %cst_422 {dimension_numbers = #tpu.dot_dimension_numbers<[1], [0], [0], [1], [0, 0, 1, 1], [], []>} : vector<8x72xf32>, vector<72x512xf32>, vector<8x512xf32> -> vector<8x512xf32>
    %1154 = vector.broadcast %1021 : vector<8x1xf32> to vector<8x512xf32>
    %1155 = arith.addf %1154, %1153 : vector<8x512xf32>
    %c1 = arith.constant 1 : index
    %c0_423 = arith.constant 0 : index
    %c0_424 = arith.constant 0 : index
    %1156 = vector.load %arg29[%c1, %c0_423, %c0_424] : memref<4x8x72xf32, #tpu.memory_space<vmem>>, vector<1x8x72xf32>
    %1157 = vector.shape_cast %1156 : vector<1x8x72xf32> to vector<8x72xf32>
    %1158 = vector.extract_strided_slice %354 {offsets = [0, 495], sizes = [8, 17], strides = [1, 1]} : vector<8x512xf32> to vector<8x17xf32>
    %1159 = vector.extract_strided_slice %354 {offsets = [0, 0], sizes = [8, 495], strides = [1, 1]} : vector<8x512xf32> to vector<8x495xf32>
    %1160 = tpu.concatenate %1158, %1159 in 1 : vector<8x17xf32>, vector<8x495xf32> -> vector<8x512xf32>
    %1161 = vector.broadcast %1048 : vector<1x512xf32> to vector<8x512xf32>
    %1162 = arith.mulf %1160, %1161 : vector<8x512xf32>
    %1163 = vector.extract_strided_slice %354 {offsets = [0, 496], sizes = [8, 16], strides = [1, 1]} : vector<8x512xf32> to vector<8x16xf32>
    %1164 = vector.extract_strided_slice %354 {offsets = [0, 0], sizes = [8, 496], strides = [1, 1]} : vector<8x512xf32> to vector<8x496xf32>
    %1165 = tpu.concatenate %1163, %1164 in 1 : vector<8x16xf32>, vector<8x496xf32> -> vector<8x512xf32>
    %1166 = vector.broadcast %98 : vector<1x512xf32> to vector<8x512xf32>
    %1167 = arith.mulf %1165, %1166 : vector<8x512xf32>
    %1168 = vector.extract_strided_slice %354 {offsets = [0, 497], sizes = [8, 15], strides = [1, 1]} : vector<8x512xf32> to vector<8x15xf32>
    %1169 = vector.extract_strided_slice %354 {offsets = [0, 0], sizes = [8, 497], strides = [1, 1]} : vector<8x512xf32> to vector<8x497xf32>
    %1170 = tpu.concatenate %1168, %1169 in 1 : vector<8x15xf32>, vector<8x497xf32> -> vector<8x512xf32>
    %1171 = vector.broadcast %1080 : vector<1x512xf32> to vector<8x512xf32>
    %1172 = arith.mulf %1170, %1171 : vector<8x512xf32>
    %1173 = vector.extract_strided_slice %354 {offsets = [0, 511], sizes = [8, 1], strides = [1, 1]} : vector<8x512xf32> to vector<8x1xf32>
    %1174 = vector.extract_strided_slice %354 {offsets = [0, 0], sizes = [8, 511], strides = [1, 1]} : vector<8x512xf32> to vector<8x511xf32>
    %1175 = tpu.concatenate %1173, %1174 in 1 : vector<8x1xf32>, vector<8x511xf32> -> vector<8x512xf32>
    %1176 = vector.broadcast %38 : vector<1x512xf32> to vector<8x512xf32>
    %1177 = arith.mulf %1175, %1176 : vector<8x512xf32>
    %1178 = vector.extract_strided_slice %354 {offsets = [0, 1], sizes = [8, 511], strides = [1, 1]} : vector<8x512xf32> to vector<8x511xf32>
    %1179 = vector.extract_strided_slice %354 {offsets = [0, 0], sizes = [8, 1], strides = [1, 1]} : vector<8x512xf32> to vector<8x1xf32>
    %1180 = tpu.concatenate %1178, %1179 in 1 : vector<8x511xf32>, vector<8x1xf32> -> vector<8x512xf32>
    %1181 = vector.broadcast %65 : vector<1x512xf32> to vector<8x512xf32>
    %1182 = arith.mulf %1180, %1181 : vector<8x512xf32>
    %1183 = vector.extract_strided_slice %354 {offsets = [0, 15], sizes = [8, 497], strides = [1, 1]} : vector<8x512xf32> to vector<8x497xf32>
    %1184 = vector.extract_strided_slice %354 {offsets = [0, 0], sizes = [8, 15], strides = [1, 1]} : vector<8x512xf32> to vector<8x15xf32>
    %1185 = tpu.concatenate %1183, %1184 in 1 : vector<8x497xf32>, vector<8x15xf32> -> vector<8x512xf32>
    %1186 = vector.broadcast %1117 : vector<1x512xf32> to vector<8x512xf32>
    %1187 = arith.mulf %1185, %1186 : vector<8x512xf32>
    %1188 = vector.extract_strided_slice %354 {offsets = [0, 16], sizes = [8, 496], strides = [1, 1]} : vector<8x512xf32> to vector<8x496xf32>
    %1189 = vector.extract_strided_slice %354 {offsets = [0, 0], sizes = [8, 16], strides = [1, 1]} : vector<8x512xf32> to vector<8x16xf32>
    %1190 = tpu.concatenate %1188, %1189 in 1 : vector<8x496xf32>, vector<8x16xf32> -> vector<8x512xf32>
    %1191 = vector.broadcast %125 : vector<1x512xf32> to vector<8x512xf32>
    %1192 = arith.mulf %1190, %1191 : vector<8x512xf32>
    %1193 = vector.extract_strided_slice %354 {offsets = [0, 17], sizes = [8, 495], strides = [1, 1]} : vector<8x512xf32> to vector<8x495xf32>
    %1194 = vector.extract_strided_slice %354 {offsets = [0, 0], sizes = [8, 17], strides = [1, 1]} : vector<8x512xf32> to vector<8x17xf32>
    %1195 = tpu.concatenate %1193, %1194 in 1 : vector<8x495xf32>, vector<8x17xf32> -> vector<8x512xf32>
    %1196 = vector.broadcast %1149 : vector<1x512xf32> to vector<8x512xf32>
    %1197 = arith.mulf %1195, %1196 : vector<8x512xf32>
    %1198 = tpu.concatenate %1162, %1167, %1172, %1177, %354, %1182, %1187, %1192, %1197 in 0 : vector<8x512xf32>, vector<8x512xf32>, vector<8x512xf32>, vector<8x512xf32>, vector<8x512xf32>, vector<8x512xf32>, vector<8x512xf32>, vector<8x512xf32>, vector<8x512xf32> -> vector<72x512xf32>
    %cst_425 = arith.constant dense<0.000000e+00> : vector<8x512xf32>
    %1199 = tpu.matmul %1157, %1198, %cst_425 {dimension_numbers = #tpu.dot_dimension_numbers<[1], [0], [0], [1], [0, 0, 1, 1], [], []>} : vector<8x72xf32>, vector<72x512xf32>, vector<8x512xf32> -> vector<8x512xf32>
    %1200 = arith.addf %1155, %1199 : vector<8x512xf32>
    %c2 = arith.constant 2 : index
    %c0_426 = arith.constant 0 : index
    %c0_427 = arith.constant 0 : index
    %1201 = vector.load %arg29[%c2, %c0_426, %c0_427] : memref<4x8x72xf32, #tpu.memory_space<vmem>>, vector<1x8x72xf32>
    %1202 = vector.shape_cast %1201 : vector<1x8x72xf32> to vector<8x72xf32>
    %1203 = vector.extract_strided_slice %721 {offsets = [0, 495], sizes = [8, 17], strides = [1, 1]} : vector<8x512xf32> to vector<8x17xf32>
    %1204 = vector.extract_strided_slice %721 {offsets = [0, 0], sizes = [8, 495], strides = [1, 1]} : vector<8x512xf32> to vector<8x495xf32>
    %1205 = tpu.concatenate %1203, %1204 in 1 : vector<8x17xf32>, vector<8x495xf32> -> vector<8x512xf32>
    %1206 = vector.broadcast %1048 : vector<1x512xf32> to vector<8x512xf32>
    %1207 = arith.mulf %1205, %1206 : vector<8x512xf32>
    %1208 = vector.extract_strided_slice %721 {offsets = [0, 496], sizes = [8, 16], strides = [1, 1]} : vector<8x512xf32> to vector<8x16xf32>
    %1209 = vector.extract_strided_slice %721 {offsets = [0, 0], sizes = [8, 496], strides = [1, 1]} : vector<8x512xf32> to vector<8x496xf32>
    %1210 = tpu.concatenate %1208, %1209 in 1 : vector<8x16xf32>, vector<8x496xf32> -> vector<8x512xf32>
    %1211 = vector.broadcast %98 : vector<1x512xf32> to vector<8x512xf32>
    %1212 = arith.mulf %1210, %1211 : vector<8x512xf32>
    %1213 = vector.extract_strided_slice %721 {offsets = [0, 497], sizes = [8, 15], strides = [1, 1]} : vector<8x512xf32> to vector<8x15xf32>
    %1214 = vector.extract_strided_slice %721 {offsets = [0, 0], sizes = [8, 497], strides = [1, 1]} : vector<8x512xf32> to vector<8x497xf32>
    %1215 = tpu.concatenate %1213, %1214 in 1 : vector<8x15xf32>, vector<8x497xf32> -> vector<8x512xf32>
    %1216 = vector.broadcast %1080 : vector<1x512xf32> to vector<8x512xf32>
    %1217 = arith.mulf %1215, %1216 : vector<8x512xf32>
    %1218 = vector.extract_strided_slice %721 {offsets = [0, 511], sizes = [8, 1], strides = [1, 1]} : vector<8x512xf32> to vector<8x1xf32>
    %1219 = vector.extract_strided_slice %721 {offsets = [0, 0], sizes = [8, 511], strides = [1, 1]} : vector<8x512xf32> to vector<8x511xf32>
    %1220 = tpu.concatenate %1218, %1219 in 1 : vector<8x1xf32>, vector<8x511xf32> -> vector<8x512xf32>
    %1221 = vector.broadcast %38 : vector<1x512xf32> to vector<8x512xf32>
    %1222 = arith.mulf %1220, %1221 : vector<8x512xf32>
    %1223 = vector.extract_strided_slice %721 {offsets = [0, 1], sizes = [8, 511], strides = [1, 1]} : vector<8x512xf32> to vector<8x511xf32>
    %1224 = vector.extract_strided_slice %721 {offsets = [0, 0], sizes = [8, 1], strides = [1, 1]} : vector<8x512xf32> to vector<8x1xf32>
    %1225 = tpu.concatenate %1223, %1224 in 1 : vector<8x511xf32>, vector<8x1xf32> -> vector<8x512xf32>
    %1226 = vector.broadcast %65 : vector<1x512xf32> to vector<8x512xf32>
    %1227 = arith.mulf %1225, %1226 : vector<8x512xf32>
    %1228 = vector.extract_strided_slice %721 {offsets = [0, 15], sizes = [8, 497], strides = [1, 1]} : vector<8x512xf32> to vector<8x497xf32>
    %1229 = vector.extract_strided_slice %721 {offsets = [0, 0], sizes = [8, 15], strides = [1, 1]} : vector<8x512xf32> to vector<8x15xf32>
    %1230 = tpu.concatenate %1228, %1229 in 1 : vector<8x497xf32>, vector<8x15xf32> -> vector<8x512xf32>
    %1231 = vector.broadcast %1117 : vector<1x512xf32> to vector<8x512xf32>
    %1232 = arith.mulf %1230, %1231 : vector<8x512xf32>
    %1233 = vector.extract_strided_slice %721 {offsets = [0, 16], sizes = [8, 496], strides = [1, 1]} : vector<8x512xf32> to vector<8x496xf32>
    %1234 = vector.extract_strided_slice %721 {offsets = [0, 0], sizes = [8, 16], strides = [1, 1]} : vector<8x512xf32> to vector<8x16xf32>
    %1235 = tpu.concatenate %1233, %1234 in 1 : vector<8x496xf32>, vector<8x16xf32> -> vector<8x512xf32>
    %1236 = vector.broadcast %125 : vector<1x512xf32> to vector<8x512xf32>
    %1237 = arith.mulf %1235, %1236 : vector<8x512xf32>
    %1238 = vector.extract_strided_slice %721 {offsets = [0, 17], sizes = [8, 495], strides = [1, 1]} : vector<8x512xf32> to vector<8x495xf32>
    %1239 = vector.extract_strided_slice %721 {offsets = [0, 0], sizes = [8, 17], strides = [1, 1]} : vector<8x512xf32> to vector<8x17xf32>
    %1240 = tpu.concatenate %1238, %1239 in 1 : vector<8x495xf32>, vector<8x17xf32> -> vector<8x512xf32>
    %1241 = vector.broadcast %1149 : vector<1x512xf32> to vector<8x512xf32>
    %1242 = arith.mulf %1240, %1241 : vector<8x512xf32>
    %1243 = tpu.concatenate %1207, %1212, %1217, %1222, %721, %1227, %1232, %1237, %1242 in 0 : vector<8x512xf32>, vector<8x512xf32>, vector<8x512xf32>, vector<8x512xf32>, vector<8x512xf32>, vector<8x512xf32>, vector<8x512xf32>, vector<8x512xf32>, vector<8x512xf32> -> vector<72x512xf32>
    %cst_428 = arith.constant dense<0.000000e+00> : vector<8x512xf32>
    %1244 = tpu.matmul %1202, %1243, %cst_428 {dimension_numbers = #tpu.dot_dimension_numbers<[1], [0], [0], [1], [0, 0, 1, 1], [], []>} : vector<8x72xf32>, vector<72x512xf32>, vector<8x512xf32> -> vector<8x512xf32>
    %1245 = arith.addf %1200, %1244 : vector<8x512xf32>
    %c3 = arith.constant 3 : index
    %c0_429 = arith.constant 0 : index
    %c0_430 = arith.constant 0 : index
    %1246 = vector.load %arg29[%c3, %c0_429, %c0_430] : memref<4x8x72xf32, #tpu.memory_space<vmem>>, vector<1x8x72xf32>
    %1247 = vector.shape_cast %1246 : vector<1x8x72xf32> to vector<8x72xf32>
    %1248 = vector.extract_strided_slice %1020 {offsets = [0, 495], sizes = [8, 17], strides = [1, 1]} : vector<8x512xf32> to vector<8x17xf32>
    %1249 = vector.extract_strided_slice %1020 {offsets = [0, 0], sizes = [8, 495], strides = [1, 1]} : vector<8x512xf32> to vector<8x495xf32>
    %1250 = tpu.concatenate %1248, %1249 in 1 : vector<8x17xf32>, vector<8x495xf32> -> vector<8x512xf32>
    %1251 = vector.broadcast %1048 : vector<1x512xf32> to vector<8x512xf32>
    %1252 = arith.mulf %1250, %1251 : vector<8x512xf32>
    %1253 = vector.extract_strided_slice %1020 {offsets = [0, 496], sizes = [8, 16], strides = [1, 1]} : vector<8x512xf32> to vector<8x16xf32>
    %1254 = vector.extract_strided_slice %1020 {offsets = [0, 0], sizes = [8, 496], strides = [1, 1]} : vector<8x512xf32> to vector<8x496xf32>
    %1255 = tpu.concatenate %1253, %1254 in 1 : vector<8x16xf32>, vector<8x496xf32> -> vector<8x512xf32>
    %1256 = vector.broadcast %98 : vector<1x512xf32> to vector<8x512xf32>
    %1257 = arith.mulf %1255, %1256 : vector<8x512xf32>
    %1258 = vector.extract_strided_slice %1020 {offsets = [0, 497], sizes = [8, 15], strides = [1, 1]} : vector<8x512xf32> to vector<8x15xf32>
    %1259 = vector.extract_strided_slice %1020 {offsets = [0, 0], sizes = [8, 497], strides = [1, 1]} : vector<8x512xf32> to vector<8x497xf32>
    %1260 = tpu.concatenate %1258, %1259 in 1 : vector<8x15xf32>, vector<8x497xf32> -> vector<8x512xf32>
    %1261 = vector.broadcast %1080 : vector<1x512xf32> to vector<8x512xf32>
    %1262 = arith.mulf %1260, %1261 : vector<8x512xf32>
    %1263 = vector.extract_strided_slice %1020 {offsets = [0, 511], sizes = [8, 1], strides = [1, 1]} : vector<8x512xf32> to vector<8x1xf32>
    %1264 = vector.extract_strided_slice %1020 {offsets = [0, 0], sizes = [8, 511], strides = [1, 1]} : vector<8x512xf32> to vector<8x511xf32>
    %1265 = tpu.concatenate %1263, %1264 in 1 : vector<8x1xf32>, vector<8x511xf32> -> vector<8x512xf32>
    %1266 = vector.broadcast %38 : vector<1x512xf32> to vector<8x512xf32>
    %1267 = arith.mulf %1265, %1266 : vector<8x512xf32>
    %1268 = vector.extract_strided_slice %1020 {offsets = [0, 1], sizes = [8, 511], strides = [1, 1]} : vector<8x512xf32> to vector<8x511xf32>
    %1269 = vector.extract_strided_slice %1020 {offsets = [0, 0], sizes = [8, 1], strides = [1, 1]} : vector<8x512xf32> to vector<8x1xf32>
    %1270 = tpu.concatenate %1268, %1269 in 1 : vector<8x511xf32>, vector<8x1xf32> -> vector<8x512xf32>
    %1271 = vector.broadcast %65 : vector<1x512xf32> to vector<8x512xf32>
    %1272 = arith.mulf %1270, %1271 : vector<8x512xf32>
    %1273 = vector.extract_strided_slice %1020 {offsets = [0, 15], sizes = [8, 497], strides = [1, 1]} : vector<8x512xf32> to vector<8x497xf32>
    %1274 = vector.extract_strided_slice %1020 {offsets = [0, 0], sizes = [8, 15], strides = [1, 1]} : vector<8x512xf32> to vector<8x15xf32>
    %1275 = tpu.concatenate %1273, %1274 in 1 : vector<8x497xf32>, vector<8x15xf32> -> vector<8x512xf32>
    %1276 = vector.broadcast %1117 : vector<1x512xf32> to vector<8x512xf32>
    %1277 = arith.mulf %1275, %1276 : vector<8x512xf32>
    %1278 = vector.extract_strided_slice %1020 {offsets = [0, 16], sizes = [8, 496], strides = [1, 1]} : vector<8x512xf32> to vector<8x496xf32>
    %1279 = vector.extract_strided_slice %1020 {offsets = [0, 0], sizes = [8, 16], strides = [1, 1]} : vector<8x512xf32> to vector<8x16xf32>
    %1280 = tpu.concatenate %1278, %1279 in 1 : vector<8x496xf32>, vector<8x16xf32> -> vector<8x512xf32>
    %1281 = vector.broadcast %125 : vector<1x512xf32> to vector<8x512xf32>
    %1282 = arith.mulf %1280, %1281 : vector<8x512xf32>
    %1283 = vector.extract_strided_slice %1020 {offsets = [0, 17], sizes = [8, 495], strides = [1, 1]} : vector<8x512xf32> to vector<8x495xf32>
    %1284 = vector.extract_strided_slice %1020 {offsets = [0, 0], sizes = [8, 17], strides = [1, 1]} : vector<8x512xf32> to vector<8x17xf32>
    %1285 = tpu.concatenate %1283, %1284 in 1 : vector<8x495xf32>, vector<8x17xf32> -> vector<8x512xf32>
    %1286 = vector.broadcast %1149 : vector<1x512xf32> to vector<8x512xf32>
    %1287 = arith.mulf %1285, %1286 : vector<8x512xf32>
    %1288 = tpu.concatenate %1252, %1257, %1262, %1267, %1020, %1272, %1277, %1282, %1287 in 0 : vector<8x512xf32>, vector<8x512xf32>, vector<8x512xf32>, vector<8x512xf32>, vector<8x512xf32>, vector<8x512xf32>, vector<8x512xf32>, vector<8x512xf32>, vector<8x512xf32> -> vector<72x512xf32>
    %cst_431 = arith.constant dense<0.000000e+00> : vector<8x512xf32>
    %1289 = tpu.matmul %1247, %1288, %cst_431 {dimension_numbers = #tpu.dot_dimension_numbers<[1], [0], [0], [1], [0, 0, 1, 1], [], []>} : vector<8x72xf32>, vector<72x512xf32>, vector<8x512xf32> -> vector<8x512xf32>
    %1290 = arith.addf %1245, %1289 : vector<8x512xf32>
    %c0_432 = arith.constant 0 : index
    %c0_433 = arith.constant 0 : index
    %1291 = vector.load %arg31[%c0_432, %c0_433] : memref<8x4xf32, #tpu.memory_space<vmem>>, vector<8x4xf32>
    %cst_434 = arith.constant dense<0.000000e+00> : vector<8x512xf32>
    %1292 = tpu.matmul %1291, %0, %cst_434 {dimension_numbers = #tpu.dot_dimension_numbers<[1], [0], [0], [1], [0, 0, 1, 1], [], []>} : vector<8x4xf32>, vector<4x512xf32>, vector<8x512xf32> -> vector<8x512xf32>
    %c0_435 = arith.constant 0 : index
    %c0_436 = arith.constant 0 : index
    %1293 = vector.load %arg32[%c0_435, %c0_436] : memref<8x1xf32, #tpu.memory_space<vmem>>, vector<8x1xf32>
    %1294 = vector.broadcast %1293 : vector<8x1xf32> to vector<8x512xf32>
    %1295 = arith.addf %1292, %1294 : vector<8x512xf32>
    %1296 = arith.addf %1290, %1295 : vector<8x512xf32>
    %cst_437 = arith.constant 0.000000e+00 : f32
    %1297 = vector.broadcast %cst_437 : f32 to vector<8x512xf32>
    %1298 = arith.maximumf %1296, %1297 : vector<8x512xf32>
    %c0_438 = arith.constant 0 : index
    %c0_439 = arith.constant 0 : index
    %1299 = vector.load %arg33[%c0_438, %c0_439] : memref<8x512xf32, #tpu.memory_space<vmem>>, vector<8x512xf32>
    tpu.vector_store %arg33[%c0_438, %c0_439], %1298 {strides = array<i32>} : memref<8x512xf32, #tpu.memory_space<vmem>>, vector<8x512xf32>,
    return
  }
}

</mosaic_0001>

<bundles_post_ra>
// kernel: msrf_forward_pallas.1
= control target key start
LH: loop header
LB: loop body
LE: loop exit
PB: predicated region body
PF: predicated region fallthrough
CT: control target
= control target key end

     0   :  { %v8614_v0 = vmov 0.0   ;;  %s6121_s6 = smov 3   ;;  %v6122_v1 = vmov 0   ;;  %s6123_s10 = smov 5   ;;  %vm8624_vm0 = vcmask 1043456   ;;  %vm8613_vm1 = vcmask 31744   ;;  %s8604_s0 = inlined_call_operand.smem [shape: u32[34], index: -1, kind: input, shape index: {}] }
   0x1   :  { %s6184_s5 = sld [smem:[%s8604_s0]]   ;;  %230 = vmatprep.mubr.f32.mxu0 %v8614_v0  ;;  %301 = vmatprep.mubr.f32.mxu1 %v8614_v0  ;;  %s6124_s14 = smov 6   ;;  %v493_v26 = vlaneseq  ;;  %v8711_v27 = vmov 0  ;;  %vm8612_vm10 = vcmask 7168   ;;  %vm8611_vm14 = vcmask 1039360  }
   0x2   :  { %s5618_s9 = sld [smem:[%s8604_s0 + %s6121_s6]]   ;;  %6108 = vset.pattern.permute.xlu0 %v6122_v1  ;;  %6109 = vset.pattern.permute.xlu1 %v6122_v1  ;;  %s6125_s18 = smov 1   ;;  %vm572_vm15 = vcmask 195584  }
   0x3   :  { %s5620_s13 = sld [smem:[%s8604_s0 + %s6123_s10]]   ;;  %s6126_s19 = smov 8   ;;  %v494_v28 = vshrl.u32 %v493_v26, 7 }
   0x4   :  { %s5621_s17 = sld [smem:[%s8604_s0 + %s6124_s14]]   ;;  %s6127_s23 = smov 127  }
   0x5   :  { %s5623_s22 = sld [smem:[%s8604_s0 + %s6126_s19]]   ;;  %s6128_s24 = smov 2   ;;  %v6310_v30 = vsub.s32 0, %v494_v28  ;;  %v6312_v31 = vsub.s32 3, %v494_v28  ;;  %v6314_v32 = vsub.s32 1, %v494_v28  ;;  %v6316_v33 = vsub.s32 2, %v494_v28 }
   0x6   :  { %s6276_s27 = sld [smem:[%s8604_s0 + %s6128_s24]]   ;;  %s6129_s1 = smov 7  }
   0x7   :  { %v6200_v2 = vld [vmem:[%s6184_s5] sm:$0xff]  ;;  %v6203_v3 = vld [vmem:[%s6184_s5 + $0x8] sm:$0xff]  ;;  %s6282_s30 = sld [smem:[%s8604_s0 + %s6125_s18]]   ;;  %s6130_s7 = smov 16  }
   0x8   :  { %v6207_v4 = vcombine.high %v6200_v2, %v6200_v2  ;;  %v6211_v5 = vcombine.high %v6203_v3, %v6203_v3  ;;  %v142_v6 = vld [vmem:[%s5618_s9] sm:$0xff]  ;;  %s5622_s4 = sld [smem:[%s8604_s0 + %s6129_s1]]   ;;  %s6131_s8 = smov 10  }
   0x9   :  { %v308_v7 = vld [vmem:[%s5620_s13] sm:$0xff]  ;;  %s5625_s12 = sld [smem:[%s8604_s0 + %s6131_s8]]   ;;  %s6132_s13 = smov 112  }
   0xa   :  { %8703 = vst [vmem:[#allocation2_spill] sm:$0xff] %v6207_v4  ;;  %8704 = vst [vmem:[#allocation3_spill] sm:$0xff] %v6211_v5  ;;  %5649 = vmatprep.subr.msk.mxu0 %vm8624_vm0, %v6207_v4  ;;  %5652 = vmatprep.subr.msk.mxu1 %vm8624_vm0, %v6211_v5  ;;  %v309_v8 = vld [vmem:[%s5621_s17] sm:$0xff]  ;;  %s6133_s14 = smov 9   ;;  %s6134_s19 = smov 125  }
   0xb   :  { %5650 = vmatpush1.msk.msra.mxu0 %vm8624_vm0, %v6200_v2  ;;  %5653 = vmatpush1.msk.msra.mxu1 %vm8624_vm0, %v6203_v3  ;;  %v566_v22 = vld [vmem:[%s5623_s22] sm:$0xff]  ;;  %s5624_s17 = sld [smem:[%s8604_s0 + %s6133_s14]]   ;;  %s6135_s20 = smov 51  }
   0xc   :  { %5651 = vmatmul.mubr.msk.f32.vlgmr.msra.gmra.mrb[0].mxu0 %vm8613_vm1, %v142_v6  ;;  %5654 = vmatmul.mubr.msk.f32.vlgmr.msra.gmra.mrb[0].mxu1 %vm8613_vm1, %v142_v6  ;;  %v6285_v23 = vld [vmem:[%s6276_s27] sm:$0xf]  ;;  %s6136_s21 = smov 83   ;;  %s6137_s22 = smov 48  }
   0xd   :  { %5658 = vmatprep.subr.msk.mxu1 %vm8624_vm0, %v6211_v5  ;;  %5655 = vmatprep.subr.msk.mxu0 %vm8624_vm0, %v6207_v4  ;;  %8709 = vst [vmem:[#allocation8_spill] sm:$0xff] %v6285_v23  ;;  %v6288_v24 = vld [vmem:[%s6282_s30] sm:$0xf]  ;;  %v6291_v25 = vadd.s32 4294967295, %v6285_v23  ;;  %v6306_v29 = vadd.s32 1, %v6285_v23  ;;  %s6138_s25 = smov 45  }
   0xe   :  { %5659 = vmatpush1.msk.msra.mxu1 %vm8624_vm0, %v6203_v3  ;;  %5656 = vmatpush1.msk.msra.mxu0 %vm8624_vm0, %v6200_v2  ;;  %vm483_vm2 = vcmp.ge.s32.totalorder %v6288_v24, 0  ;;  %vm484_vm3 = vcmp.lt.s32.totalorder %v6288_v24, 16  ;;  %s6139_s26 = smov 80   ;;  %s6140_s28 = smov 14  }
   0xf   :  { %382 = vmatprep.mubr.f32.mxu0 %v8614_v0  ;;  %453 = vmatprep.mubr.f32.mxu1 %v8614_v0  ;;  %8710 = vst [vmem:[#allocation9_spill] sm:$0xff] %v6291_v25  ;;  %vm6295_vm4 = vmand %vm483_vm2, %vm484_vm3  ;;  %vm8608_vm5 = vcmp.ge.s32.totalorder %v6291_v25, 0  ;;  %vm8607_vm7 = vcmp.lt.s32.totalorder %v6291_v25, 16  ;;  %vm8606_vm9 = vcmp.ge.s32.totalorder %v6306_v29, 0  ;;  %vm8605_vm12 = vcmp.lt.s32.totalorder %v6306_v29, 16  ;;  %s5629_s3 = sld [smem:[%s8604_s0 + %s6140_s28]]   ;;  %s6142_s8 = smov 11  }
  0x10   :  { %5657 = vmatmul.mubr.msk.f32.vlgmr.msra.gmra.mrb[2].mxu0 %vm8613_vm1, %v308_v7  ;;  %5660 = vmatmul.mubr.msk.f32.vlgmr.msra.gmra.mrb[2].mxu1 %vm8613_vm1, %v308_v7  ;;  %v8712_v27 = vsel %vm6295_vm4, 4294967295, %v8711_v27  ;;  %vm488_vm6 = vmand %vm6295_vm4, %vm8608_vm5  ;;  %8714 = vst [vmem:[#allocation11_spill] sm:$0xff] %v6306_v29  ;;  %s6143_s15 = smov 13   ;;  %s5631_s28 = sld [smem:[%s8604_s0 + %s6130_s7]]  }
  0x11   :  { %312 = vperm.xlu0 %6108, %v309_v8   ;;  %640 = vmatprep.mubr.f32.mxu0 %v8614_v0  ;;  %8713 = vst [vmem:[#allocation10_spill] sm:$0xff] %v8712_v27  ;;  %vm490_vm8 = vmand %vm488_vm6, %vm8607_vm7  ;;  %s6144_s29 = smov 126   ;;  %s6145_s2 = smov 15  }
  0x12   :  { %711 = vmatprep.mubr.f32.mxu1 %v8614_v0  ;;  %v491_v34 = vsel %vm490_vm8, 1.0, %v8614_v0  ;;  %vm537_vm11 = vmand %vm6295_vm4, %vm8606_vm9  ;;  %vm8699_vm8 = vcmp.ge.s32.totalorder %v6285_v23, 0  ;;  %s6146_s9 = smov 32   ;;  %s6147_s11 = smov 18  }
  0x13   :  { %v6326_v37 = vrot.slane %v491_v34, %v6310_v30  ;;  %v6329_v38 = vrot.slane %v491_v34, %v6312_v31  ;;  %v6332_v39 = vrot.slane %v491_v34, %v6314_v32  ;;  %v6335_v40 = vrot.slane %v491_v34, %v6316_v33  ;;  %vm539_vm13 = vmand %vm537_vm11, %vm8605_vm12  ;;  %s5633_s16 = sld [smem:[%s8604_s0 + %s6147_s11]]   ;;  %s6153_s11 = smov 75  }
  0x14   :  { %v540_v51 = vsel %vm539_vm13, 1.0, %v8614_v0  ;;  %vm8627_vm13 = vcmp.lt.s32.totalorder %v6285_v23, 16 }
  0x15   :  { %8715 = vst [vmem:[#allocation12_spill] sm:$0xff] %v6326_v37  ;;  %8716 = vst [vmem:[#allocation13_spill] sm:$0xff] %v6329_v38  ;;  %v6357_v58 = vrot.slane %v540_v51, %v6316_v33  ;;  %v6360_v59 = vrot.slane %v540_v51, %v6314_v32  ;;  %v6363_v60 = vrot.slane %v540_v51, %v6312_v31 }
  0x16   :  { %8717 = vst [vmem:[#allocation14_spill] sm:$0xff] %v6332_v39  ;;  %8718 = vst [vmem:[#allocation15_spill] sm:$0xff] %v6335_v40  ;;  %v6366_v61 = vrot.slane %v540_v51, %v6310_v30 }
  0x17   :  { %8719 = vst [vmem:[#allocation16_spill] sm:$0xff] %v6357_v58  ;;  %8720 = vst [vmem:[#allocation17_spill] sm:$0xff] %v6360_v59 }
  0x18   :  { %8721 = vst [vmem:[#allocation18_spill] sm:$0xff] %v6363_v60  ;;  %8722 = vst [vmem:[#allocation19_spill] sm:$0xff] %v6366_v61 }
  0x90   :  { %v313_v13 = vpop.permute.xlu0 %312 }
  0xdf   :  { %v6237_v9 = vpop.f32.mrb[0].mxu0  ;;  %v6239_v10 = vpop.f32.mrb[0].mxu1 }
  0xe0   :  { %8705 = vst [vmem:[#allocation4_spill] sm:$0xff] %v6237_v9  ;;  %8706 = vst [vmem:[#allocation5_spill] sm:$0xff] %v6239_v10  ;;  %v6241_v11 = vpop.f32.mrb[1].mxu0  ;;  %v6243_v12 = vpop.f32.mrb[1].mxu1 }
  0xe1   :  { %8707 = vst [vmem:[#allocation6_spill] sm:$0xff] %v6241_v11  ;;  %8708 = vst [vmem:[#allocation7_spill] sm:$0xff] %v6243_v12 }
  0xe3   :  { %v384_v14 = vpop.f32.mrb[2].mxu0  ;;  %v455_v15 = vpop.f32.mrb[2].mxu1 }
  0xe4   :  { %v6245_v16 = vadd.f32 %v384_v14, %v313_v13  ;;  %v6247_v17 = vadd.f32 %v455_v15, %v313_v13  ;;  %v386_v18 = vpop.f32.mrb[3].mxu0  ;;  %v457_v19 = vpop.f32.mrb[3].mxu1 }
  0xe5   :  { %v6253_v20 = vadd.f32 %v386_v18, %v313_v13  ;;  %v6255_v21 = vadd.f32 %v457_v19, %v313_v13 }
  0xe6   :  { %472 = vrot.lane.b32.xlu0 %v6247_v17, %s6125_s18  ;;  %468 = vrot.lane.b32.xlu1 %v6245_v16, %s6125_s18 }
  0xea   :  { %462 = vrot.lane.b32.xlu0 %v6255_v21, %s6125_s18  ;;  %470 = vrot.lane.b32.xlu1 %v6253_v20, %s6125_s18 }
  0xee   :  { %519 = vrot.lane.b32.xlu0 %v6253_v20, %s6127_s23  ;;  %517 = vrot.lane.b32.xlu1 %v6245_v16, %s6127_s23 }
  0xf2   :  { %523 = vrot.lane.b32.xlu0 %v6255_v21, %s6127_s23  ;;  %521 = vrot.lane.b32.xlu1 %v6247_v17, %s6127_s23 }
  0xf6   :  { %569 = vperm.xlu1 %6109, %v566_v22  }
 0x158   :  { %v473_v35 = vpop.permute.xlu0 %472  ;;  %v469_v36 = vpop.permute.xlu1 %468 }
 0x15c   :  { %v463_v41 = vpop.permute.xlu0 %462  ;;  %v471_v42 = vpop.permute.xlu1 %470 }
 0x15d   :  { %v477_v43 = vsel %vm8612_vm10, %v473_v35, %v463_v41  ;;  %v482_v44 = vsel %vm8612_vm10, %v463_v41, %v469_v36  ;;  %v475_v45 = vsel %vm8612_vm10, %v469_v36, %v471_v42  ;;  %v476_v46 = vsel %vm8612_vm10, %v471_v42, %v473_v35  ;;  %v825_v36 = vld [vmem:[%s5625_s12] sm:$0xff]  ;;  %s5626_s12 = sld [smem:[%s8604_s0 + %s6142_s8]]  }
 0x15e   :  { %v513_v47 = vmul.f32 %v6326_v37, %v482_v44  ;;  %v516_v48 = vmul.f32 %v6329_v38, %v477_v43  ;;  %v514_v49 = vmul.f32 %v6332_v39, %v475_v45  ;;  %v515_v50 = vmul.f32 %v6335_v40, %v476_v46  ;;  %s5630_s8 = sld [smem:[%s8604_s0 + %s6145_s2]]  }
 0x15f   :  { %v741_v41 = vadd.s32 4294967295, %v6288_v24  ;;  %v8723_v42 = vmov 0  ;;  %v793_v43 = vadd.s32 1, %v6288_v24  ;;  %v8726_v46 = vmov 0 }
 0x160   :  { %v5710_v52 = vpack.c.bf16 %v6245_v16, %v513_v47  ;;  %v5714_v53 = vpack.c.bf16 %v6247_v17, %v515_v50  ;;  %v520_v54 = vpop.permute.xlu0 %519  ;;  %v518_v55 = vpop.permute.xlu1 %517  ;;  %v5708_v56 = vpack.c.bf16 %v6253_v20, %v514_v49  ;;  %v5712_v57 = vpack.c.bf16 %v6255_v21, %v516_v48  ;;  %v460_v17 = vld [vmem:[%s5622_s4] sm:$0xff]  ;;  %s6141_s4 = smov 77  }
 0x161   :  { %v526_v62 = vsel %vm8611_vm14, %v518_v55, %v520_v54  ;;  %vm742_vm2 = vcmp.ge.s32.totalorder %v741_v41, 0  ;;  %vm743_vm3 = vcmp.lt.s32.totalorder %v741_v41, 16  ;;  %vm794_vm9 = vcmp.ge.s32.totalorder %v793_v43, 0 }
 0x162   :  { %5709 = vmatprep.subr.bf16.mxu0 %v5708_v56  ;;  %5713 = vmatprep.subr.bf16.mxu1 %v5712_v57  ;;  %v562_v16 = vmul.f32 %v6366_v61, %v526_v62  ;;  %vm6396_vm6 = vmand %vm742_vm2, %vm743_vm3  ;;  %vm795_vm7 = vcmp.lt.s32.totalorder %v793_v43, 16  ;;  %vm8610_vm2 = vcmask 130048  }
 0x163   :  { %5711 = vmatpush1.bf16.msra.mxu0 %v5710_v52  ;;  %5715 = vmatpush1.bf16.msra.mxu1 %v5714_v53  ;;  %v8724_v42 = vsel %vm6396_vm6, 4294967295, %v8723_v42  ;;  %vm746_vm11 = vmand %vm6396_vm6, %vm8699_vm8 }
 0x164   :  { %v524_v63 = vpop.permute.xlu0 %523  ;;  %v522_v1 = vpop.permute.xlu1 %521  ;;  %8725 = vst [vmem:[#allocation20_spill] sm:$0xff] %v8724_v42  ;;  %vm748_vm12 = vmand %vm746_vm11, %vm8627_vm13 }
 0x165   :  { %v534_v6 = vsel %vm8611_vm14, %v524_v63, %v518_v55  ;;  %v527_v7 = vsel %vm8611_vm14, %v520_v54, %v522_v1  ;;  %v528_v8 = vsel %vm8611_vm14, %v522_v1, %v524_v63  ;;  %v749_v44 = vsel %vm748_vm12, 1.0, %v8614_v0  ;;  %vm6410_vm3 = vmand %vm794_vm9, %vm795_vm7 }
 0x166   :  { %v564_v13 = vmul.f32 %v6357_v58, %v528_v8  ;;  %v563_v14 = vmul.f32 %v6360_v59, %v527_v7  ;;  %v565_v15 = vmul.f32 %v6363_v60, %v534_v6  ;;  %v8727_v46 = vsel %vm6410_vm3, 4294967295, %v8726_v46  ;;  %vm797_vm7 = vmand %vm6410_vm3, %vm8699_vm8 }
 0x167   :  { %8728 = vst [vmem:[#allocation21_spill] sm:$0xff] %v8727_v46  ;;  %v6415_v48 = vrot.slane %v749_v44, %v6310_v30  ;;  %v6418_v49 = vrot.slane %v749_v44, %v6312_v31  ;;  %v6422_v51 = vrot.slane %v749_v44, %v6314_v32  ;;  %v6425_v52 = vrot.slane %v749_v44, %v6316_v33  ;;  %vm798_vm9 = vmand %vm797_vm7, %vm8627_vm13 }
 0x168   :  { %580 = vmatprep.subr.mxu0 %v563_v14  ;;  %651 = vmatprep.subr.mxu1 %v565_v15  ;;  %v799_v14 = vsel %vm798_vm9, 1.0, %v8614_v0  ;;  %vm8609_vm12 = vcmask 916480   ;;  %vm990_vm14 = vcmask 416768  }
 0x169   :  { %581 = vmatpush1.msra.mxu0 %v562_v16  ;;  %652 = vmatpush1.msra.mxu1 %v564_v13  ;;  %8729 = vst [vmem:[#allocation22_spill] sm:$0xff] %v6415_v48  ;;  %8730 = vst [vmem:[#allocation23_spill] sm:$0xff] %v6418_v49 }
 0x16a   :  { %5661 = vmatmul.mubr.msk.f32.vlgmr.msra.gmra.mrb[4].mxu0 %vm572_vm15, %v460_v17  ;;  %5662 = vmatmul.mubr.msk.f32.vlgmr.msra.gmra.mrb[4].mxu1 %vm572_vm15, %v460_v17  ;;  %8731 = vst [vmem:[#allocation24_spill] sm:$0xff] %v6422_v51  ;;  %8732 = vst [vmem:[#allocation25_spill] sm:$0xff] %v6425_v52 }
 0x16b   :  { %969 = vmatprep.mubr.f32.mxu1 %v8614_v0  ;;  %898 = vmatprep.mubr.f32.mxu0 %v8614_v0 }
 0x175   :  { %v570_v18 = vpop.permute.xlu1 %569 }
 0x23d   :  { %v642_v19 = vpop.f32.mrb[4].mxu0  ;;  %v713_v20 = vpop.f32.mrb[4].mxu1 }
 0x23e   :  { %v644_v21 = vpop.f32.mrb[5].mxu0  ;;  %v715_v22 = vpop.f32.mrb[5].mxu1  ;;  %v6380_v26 = vadd.f32 %v642_v19, %v570_v18  ;;  %v714_v34 = vadd.f32 %v713_v20, %v570_v18  ;;  %v6450_v19 = vrot.slane %v799_v14, %v6316_v33  ;;  %v6453_v20 = vrot.slane %v799_v14, %v6314_v32 }
 0x23f   :  { %v716_v28 = vadd.f32 %v715_v22, %v570_v18  ;;  %v645_v35 = vadd.f32 %v644_v21, %v570_v18  ;;  %v6447_v18 = vrot.slane %v799_v14, %v6312_v31  ;;  %v6456_v21 = vrot.slane %v799_v14, %v6310_v30 }
 0x240   :  { %726 = vrot.lane.b32.xlu1 %v6380_v26, %s6130_s7  ;;  %8734 = vst [vmem:[#allocation27_spill] sm:$0xff] %v6450_v19  ;;  %8735 = vst [vmem:[#allocation28_spill] sm:$0xff] %v6453_v20 }
 0x241   :  { %720 = vrot.lane.b32.xlu0 %v716_v28, %s6130_s7  ;;  %8733 = vst [vmem:[#allocation26_spill] sm:$0xff] %v6447_v18  ;;  %8736 = vst [vmem:[#allocation29_spill] sm:$0xff] %v6456_v21 }
 0x244   :  { %730 = vrot.lane.b32.xlu1 %v714_v34, %s6130_s7 }
 0x245   :  { %728 = vrot.lane.b32.xlu0 %v645_v35, %s6130_s7 }
 0x248   :  { %777 = vrot.lane.b32.xlu1 %v645_v35, %s6132_s13 }
 0x249   :  { %775 = vrot.lane.b32.xlu0 %v6380_v26, %s6132_s13 }
 0x24c   :  { %781 = vrot.lane.b32.xlu1 %v716_v28, %s6132_s13 }
 0x24d   :  { %779 = vrot.lane.b32.xlu0 %v714_v34, %s6132_s13 }
 0x251   :  { %828 = vperm.xlu0 %6108, %v825_v36  }
 0x2b2   :  { %v727_v45 = vpop.permute.xlu1 %726 }
 0x2b3   :  { %v721_v47 = vpop.permute.xlu0 %720 }
 0x2b4   :  { %v740_v50 = vsel %vm8610_vm2, %v721_v47, %v727_v45 }
 0x2b5   :  { %v771_v56 = vmul.f32 %v6415_v48, %v740_v50 }
 0x2b6   :  { %v731_v53 = vpop.permute.xlu1 %730 }
 0x2b7   :  { %v735_v54 = vsel %vm8610_vm2, %v731_v53, %v721_v47  ;;  %v729_v55 = vpop.permute.xlu0 %728  ;;  %v5718_v17 = vpack.c.bf16 %v6380_v26, %v771_v56 }
 0x2b8   :  { %v774_v57 = vmul.f32 %v6418_v49, %v735_v54  ;;  %v733_v62 = vsel %vm8610_vm2, %v727_v45, %v729_v55  ;;  %v734_v63 = vsel %vm8610_vm2, %v729_v55, %v731_v53  ;;  %v718_v45 = vld [vmem:[%s5624_s17] sm:$0xff]  ;;  %s6148_s17 = smov 96  }
 0x2b9   :  { %v772_v1 = vmul.f32 %v6422_v51, %v733_v62  ;;  %v773_v6 = vmul.f32 %v6425_v52, %v734_v63 }
 0x2ba   :  { %v778_v7 = vpop.permute.xlu1 %777  ;;  %v5720_v8 = vpack.c.bf16 %v716_v28, %v774_v57 }
 0x2bb   :  { %v5722_v13 = vpack.c.bf16 %v714_v34, %v773_v6  ;;  %v776_v15 = vpop.permute.xlu0 %775  ;;  %v5716_v16 = vpack.c.bf16 %v645_v35, %v772_v1  ;;  %v1516_v6 = vld [vmem:[%s5629_s3] sm:$0xff]  ;;  %s6150_s3 = smov 123  }
 0x2bc   :  { %5721 = vmatprep.subr.bf16.mxu1 %v5720_v8  ;;  %v784_v26 = vsel %vm8609_vm12, %v776_v15, %v778_v7 }
 0x2bd   :  { %5717 = vmatprep.subr.bf16.mxu0 %v5716_v16  ;;  %5723 = vmatpush1.bf16.msra.mxu1 %v5722_v13  ;;  %v821_v47 = vmul.f32 %v6456_v21, %v784_v26  ;;  %v999_v13 = vadd.s32 4294967293, %v6288_v24  ;;  %v6535_v16 = vadd.s32 4294967293, %v6285_v23 }
 0x2be   :  { %5719 = vmatpush1.bf16.msra.mxu0 %v5718_v17  ;;  %v782_v22 = vpop.permute.xlu1 %781 }
 0x2bf   :  { %v792_v28 = vsel %vm8609_vm12, %v782_v22, %v776_v15  ;;  %v780_v34 = vpop.permute.xlu0 %779  ;;  %vm1001_vm11 = vcmp.lt.s32.totalorder %v999_v13, 16  ;;  %vm1004_vm9 = vcmp.ge.s32.totalorder %v6535_v16, 0 }
 0x2c0   :  { %v785_v35 = vsel %vm8609_vm12, %v778_v7, %v780_v34  ;;  %v786_v36 = vsel %vm8609_vm12, %v780_v34, %v782_v22  ;;  %v824_v41 = vmul.f32 %v6447_v18, %v792_v28  ;;  %vm1006_vm12 = vcmp.lt.s32.totalorder %v6535_v16, 16 }
 0x2c1   :  { %v823_v43 = vmul.f32 %v6450_v19, %v786_v36  ;;  %v822_v44 = vmul.f32 %v6453_v20, %v785_v35 }
 0x2c2   :  { %909 = vmatprep.subr.mxu1 %v824_v41  ;;  %v6562_v41 = vadd.s32 3, %v6285_v23 }
 0x2c3   :  { %838 = vmatprep.subr.mxu0 %v822_v44  ;;  %910 = vmatpush1.msra.mxu1 %v823_v43 }
 0x2c4   :  { %839 = vmatpush1.msra.mxu0 %v821_v47  ;;  %5664 = vmatmul.mubr.msk.f32.vlgmr.msra.gmra.mrb[6].mxu1 %vm572_vm15, %v718_v45  ;;  %vm1099_vm10 = vcmp.ge.s32.totalorder %v6562_v41, 0 }
 0x2c5   :  { %5663 = vmatmul.mubr.msk.f32.vlgmr.msra.gmra.mrb[6].mxu0 %vm572_vm15, %v718_v45  ;;  %1508 = vmatprep.mubr.f32.mxu1 %v8614_v0  ;;  %vm1000_vm15 = vcmp.ge.s32.totalorder %v999_v13, 0 }
 0x2c6   :  { %1437 = vmatprep.mubr.f32.mxu0 %v8614_v0  ;;  %vm6539_vm7 = vmand %vm1000_vm15, %vm1001_vm11 }
 0x2c7   :  { %vm1005_vm5 = vmand %vm6539_vm7, %vm1004_vm9 }
 0x2c8   :  { %vm1052_vm15 = vmand %vm6539_vm7, %vm8699_vm8 }
 0x2c9   :  { %vm1007_vm11 = vmand %vm1005_vm5, %vm1006_vm12  ;;  %vm8629_vm5 = vcmask 392192  }
 0x2ca   :  { %vm1053_vm2 = vmand %vm1052_vm15, %vm8627_vm13  ;;  %v1008_v43 = vsel %vm1007_vm11, 1.0, %v8614_v0  ;;  %vm1101_vm15 = vcmp.lt.s32.totalorder %v6562_v41, 16 }
 0x2cb   :  { %v1054_v44 = vsel %vm1053_vm2, 1.0, %v8614_v0  ;;  %vm1193_vm2 = vmand %vm6295_vm4, %vm1099_vm10  ;;  %v1021_v13 = vrot.slane %v1008_v43, %v6316_v33  ;;  %v1013_v12 = vrot.slane %v1008_v43, %v6310_v30 }
 0x2cc   :  { %v6585_v0 = vrot.slane %v1054_v44, %v6310_v30  ;;  %v6589_v29 = vrot.slane %v1054_v44, %v6314_v32  ;;  %v6594_v11 = vrot.slane %v1054_v44, %v6316_v33  ;;  %vm6598_vm0 = vmand %vm1193_vm2, %vm1101_vm15 }
 0x2cd   :  { %vm1100_vm2 = vmand %vm6539_vm7, %vm1099_vm10 }
 0x2ce   :  { %8740 = vst [vmem:[#allocation31_spill] sm:$0xff] %v6585_v0  ;;  %8741 = vst [vmem:[#allocation32_spill] sm:$0xff] %v6589_v29 }
 0x2cf   :  { %8742 = vst [vmem:[#allocation33_spill] sm:$0xff] %v6594_v11  ;;  %vm1102_vm7 = vmand %vm1100_vm2, %vm1101_vm15  ;;  %vm1089_vm2 = vcmask 367616  }
 0x2d0   :  { %v829_v50 = vpop.permute.xlu0 %828 }
 0x397   :  { %v971_v53 = vpop.f32.mrb[6].mxu1 }
 0x398   :  { %v900_v54 = vpop.f32.mrb[6].mxu0  ;;  %v973_v55 = vpop.f32.mrb[7].mxu1  ;;  %v6475_v62 = vadd.f32 %v971_v53, %v829_v50  ;;  %v1025_v53 = vrot.slane %v1008_v43, %v6312_v31 }
 0x399   :  { %v6470_v56 = vadd.f32 %v900_v54, %v829_v50  ;;  %v902_v57 = vpop.f32.mrb[7].mxu0  ;;  %v6486_v63 = vadd.f32 %v973_v55, %v829_v50  ;;  %v6572_v54 = vrot.slane %v1054_v44, %v6312_v31 }
 0x39a   :  { %v6490_v1 = vadd.f32 %v902_v57, %v829_v50  ;;  %v1239_v50 = vadd.s32 3, %v6288_v24  ;;  %v1017_v57 = vrot.slane %v1008_v43, %v6314_v32 }
 0x39b   :  { %1175 = vrot.lane.b32.xlu1 %v6470_v56, %s6134_s19  ;;  %984 = vrot.lane.b32.xlu0 %v6470_v56, %s6135_s20  ;;  %8739 = vst [vmem:[#allocation30_spill] sm:$0xff] %v6572_v54 }
 0x39c   :  { %vm1240_vm11 = vcmp.ge.s32.totalorder %v1239_v50, 0  ;;  %vm1241_vm1 = vcmp.lt.s32.totalorder %v1239_v50, 16 }
 0x39d   :  { %vm6605_vm13 = vmand %vm1240_vm11, %vm1241_vm1 }
 0x39e   :  { %vm1147_vm1 = vmand %vm6295_vm4, %vm1004_vm9 }
 0x39f   :  { %1179 = vrot.lane.b32.xlu1 %v6475_v62, %s6134_s19  ;;  %988 = vrot.lane.b32.xlu0 %v6475_v62, %s6135_s20  ;;  %vm1148_vm11 = vmand %vm1147_vm1, %vm1006_vm12  ;;  %vm8756_vm1 = vcmp.lt.s32.totalorder %v6285_v23, 16 }
 0x3a3   :  { %1221 = vrot.lane.b32.xlu1 %v6470_v56, %s6136_s21  ;;  %1037 = vrot.lane.b32.xlu0 %v6470_v56, %s6137_s22 }
 0x3a7   :  { %1225 = vrot.lane.b32.xlu1 %v6475_v62, %s6136_s21  ;;  %1041 = vrot.lane.b32.xlu0 %v6475_v62, %s6137_s22 }
 0x3ab   :  { %978 = vrot.lane.b32.xlu1 %v6486_v63, %s6135_s20  ;;  %1083 = vrot.lane.b32.xlu0 %v6470_v56, %s6138_s25 }
 0x3af   :  { %986 = vrot.lane.b32.xlu1 %v6490_v1, %s6135_s20  ;;  %1087 = vrot.lane.b32.xlu0 %v6475_v62, %s6138_s25  ;;  %s5628_s20 = sld [smem:[%s8604_s0 + %s6143_s15]]  }
 0x3b3   :  { %1034 = vrot.lane.b32.xlu1 %v6486_v63, %s6137_s22  ;;  %1132 = vrot.lane.b32.xlu0 %v6470_v56, %s6121_s6 }
 0x3b7   :  { %1039 = vrot.lane.b32.xlu1 %v6490_v1, %s6137_s22  ;;  %1136 = vrot.lane.b32.xlu0 %v6475_v62, %s6121_s6 }
 0x3bb   :  { %1080 = vrot.lane.b32.xlu1 %v6486_v63, %s6138_s25  ;;  %1177 = vrot.lane.b32.xlu0 %v6490_v1, %s6134_s19 }
 0x3bf   :  { %1085 = vrot.lane.b32.xlu1 %v6490_v1, %s6138_s25  ;;  %1181 = vrot.lane.b32.xlu0 %v6486_v63, %s6134_s19  ;;  %s6156_s25 = smov 19  }
 0x3c3   :  { %1129 = vrot.lane.b32.xlu1 %v6486_v63, %s6121_s6  ;;  %1223 = vrot.lane.b32.xlu0 %v6490_v1, %s6136_s21 }
 0x3c7   :  { %1134 = vrot.lane.b32.xlu1 %v6490_v1, %s6121_s6  ;;  %1227 = vrot.lane.b32.xlu0 %v6486_v63, %s6136_s21  ;;  %s6155_s21 = smov 43  }
 0x3cb   :  { %1271 = vrot.lane.b32.xlu1 %v6470_v56, %s6139_s26  ;;  %1273 = vrot.lane.b32.xlu0 %v6490_v1, %s6139_s26 }
 0x3cf   :  { %1275 = vrot.lane.b32.xlu1 %v6475_v62, %s6139_s26  ;;  %1277 = vrot.lane.b32.xlu0 %v6486_v63, %s6139_s26 }
 0x3d3   :  { %1317 = vrot.lane.b32.xlu1 %v6470_v56, %s6141_s4  ;;  %1319 = vrot.lane.b32.xlu0 %v6490_v1, %s6141_s4 }
 0x3d7   :  { %1321 = vrot.lane.b32.xlu1 %v6475_v62, %s6141_s4  ;;  %1323 = vrot.lane.b32.xlu0 %v6486_v63, %s6141_s4  ;;  %s6151_s4 = smov 85  }
 0x3db   :  { %1519 = vperm.xlu1 %6109, %v1516_v6  }
 0x40d   :  { %v985_v7 = vpop.permute.xlu0 %984  ;;  %v6529_v8 = vpop.permute.xlu1 %1175 }
 0x411   :  { %v989_v14 = vpop.permute.xlu0 %988  ;;  %v6532_v15 = vpop.permute.xlu1 %1179 }
 0x415   :  { %v1038_v17 = vpop.permute.xlu0 %1037  ;;  %v6537_v22 = vpop.permute.xlu1 %1221 }
 0x419   :  { %v1042_v28 = vpop.permute.xlu0 %1041  ;;  %v6544_v34 = vpop.permute.xlu1 %1225 }
 0x41d   :  { %v6557_v35 = vpop.permute.xlu0 %1083  ;;  %v979_v36 = vpop.permute.xlu1 %978 }
 0x41e   :  { %v993_v55 = vsel %vm990_vm14, %v989_v14, %v979_v36 }
 0x41f   :  { %v1033_v42 = vmul.f32 %v1025_v53, %v993_v55 }
 0x421   :  { %v6566_v45 = vpop.permute.xlu0 %1087  ;;  %v987_v47 = vpop.permute.xlu1 %986 }
 0x422   :  { %v991_v9 = vsel %vm990_vm14, %v985_v7, %v987_v47  ;;  %v992_v19 = vsel %vm990_vm14, %v987_v47, %v989_v14 }
 0x425   :  { %v6581_v6 = vpop.permute.xlu0 %1132  ;;  %v1035_v24 = vpop.permute.xlu1 %1034 }
 0x426   :  { %v1046_v46 = vsel %vm8629_vm5, %v1042_v28, %v1035_v24  ;;  %v1051_v25 = vsel %vm8629_vm5, %v1035_v24, %v1038_v17 }
 0x427   :  { %v1079_v10 = vmul.f32 %v6572_v54, %v1046_v46  ;;  %v998_v46 = vsel %vm990_vm14, %v979_v36, %v985_v7  ;;  %v1076_v43 = vmul.f32 %v6585_v0, %v1051_v25  ;;  %v1031_v7 = vmul.f32 %v1017_v57, %v991_v9  ;;  %vm1243_vm14 = vmand %vm6605_vm13, %vm1004_vm9 }
 0x428   :  { %v1032_v36 = vmul.f32 %v1021_v13, %v992_v19  ;;  %v1030_v25 = vmul.f32 %v1013_v12, %v998_v46  ;;  %v8747_v19 = vmov 0.0   ;;  %vm8651_vm9 = vcmask 1022976  }
 0x429   :  { %v6610_v44 = vpop.permute.xlu0 %1136  ;;  %v1040_v55 = vpop.permute.xlu1 %1039  ;;  %v5740_v24 = vpack.c.bf16 %v1079_v10, %v1033_v42  ;;  %v1103_v12 = vsel %vm1102_vm7, 1.0, %v8747_v19  ;;  %v1149_v57 = vsel %vm1148_vm11, 1.0, %v8747_v19  ;;  %vm1279_vm7 = vcmask 654336   ;;  %vm6745_vm11 = vmand %vm6605_vm13, %vm1099_vm10 }
 0x42a   :  { %v1044_v54 = vsel %vm8629_vm5, %v1038_v17, %v1040_v55  ;;  %v1045_v14 = vsel %vm8629_vm5, %v1040_v55, %v1042_v28  ;;  %v5726_v9 = vpack.c.bf16 %v1076_v43, %v1030_v25  ;;  %vm1244_vm5 = vmand %vm1243_vm14, %vm1006_vm12  ;;  %v1120_v43 = vrot.slane %v1103_v12, %v6312_v31 }
 0x42b   :  { %v1077_v10 = vmul.f32 %v6589_v29, %v1044_v54  ;;  %v1078_v42 = vmul.f32 %v6594_v11, %v1045_v14  ;;  %5741 = vmatprep.subr.bf16.mxu1 %v5740_v24  ;;  %v1195_v54 = vsel %vm6598_vm0, 1.0, %v8747_v19  ;;  %v6644_v50 = vsel %vm1244_vm5, 1.0, %v8747_v19  ;;  %vm6658_vm0 = vmand %vm6605_vm13, %vm8699_vm8 }
 0x42c   :  { %v6641_v13 = vrot.slane %v1195_v54, %v6310_v30  ;;  %v6647_v16 = vrot.slane %v1195_v54, %v6314_v32  ;;  %v1108_v24 = vrot.slane %v1103_v12, %v6310_v30  ;;  %v6652_v14 = vrot.slane %v1195_v54, %v6316_v33  ;;  %vm1290_vm14 = vmand %vm6658_vm0, %vm8756_vm1 }
 0x42d   :  { %v5742_v17 = vpack.c.bf16 %v1078_v42, %v1032_v36  ;;  %v1178_v26 = vpop.permute.xlu0 %1177  ;;  %v1081_v28 = vpop.permute.xlu1 %1080  ;;  %v5724_v47 = vpack.c.bf16 %v1077_v10, %v1031_v7  ;;  %v6663_v36 = vrot.slane %v1195_v54, %v6312_v31  ;;  %v1112_v10 = vrot.slane %v1103_v12, %v6314_v32  ;;  %vm1336_vm10 = vmand %vm6745_vm11, %vm1101_vm15 }
 0x42e   :  { %8748 = vst [vmem:[#allocation34_spill] sm:$0xff] %v6641_v13  ;;  %8749 = vst [vmem:[#allocation35_spill] sm:$0xff] %v6647_v16  ;;  %vm8662_vm12 = vcmask 23552   ;;  %v6667_v42 = vrot.slane %v1149_v57, %v6312_v31  ;;  %v1092_v25 = vsel %vm1089_vm2, %v6566_v45, %v1081_v28  ;;  %vm1229_vm5 = vcmask 678912  }
 0x42f   :  { %5725 = vmatprep.subr.bf16.mxu0 %v5724_v47  ;;  %5743 = vmatpush1.bf16.msra.mxu1 %v5742_v17  ;;  %8750 = vst [vmem:[#allocation36_spill] sm:$0xff] %v6652_v14  ;;  %8753 = vst [vmem:[#allocation37_spill] sm:$0xff] %v6663_v36  ;;  %v1116_v17 = vrot.slane %v1103_v12, %v6316_v33  ;;  %v6675_v0 = vrot.slane %v1149_v57, %v6310_v30  ;;  %v1291_v49 = vsel %vm1290_vm14, 1.0, %v8747_v19  ;;  %vm1325_vm13 = vcmask 629760  }
 0x430   :  { %5727 = vmatpush1.bf16.msra.mxu0 %v5726_v9  ;;  %8754 = vst [vmem:[#allocation38_spill] sm:$0xff] %v6667_v42  ;;  %v1258_v11 = vrot.slane %v6644_v50, %v6316_v33  ;;  %v6682_v20 = vrot.slane %v1149_v57, %v6314_v32  ;;  %v1185_v12 = vsel %vm8651_vm9, %v1178_v26, %v6532_v15  ;;  %vm8677_vm15 = vcmask 588800  }
 0x431   :  { %v1182_v46 = vpop.permute.xlu0 %1181  ;;  %v1086_v55 = vpop.permute.xlu1 %1085  ;;  %8755 = vst [vmem:[#allocation39_spill] sm:$0xff] %v6675_v0  ;;  %v6693_v18 = vrot.slane %v1149_v57, %v6316_v33  ;;  %v1128_v21 = vmul.f32 %v1120_v43, %v1092_v25  ;;  %v1184_v51 = vsel %vm8651_vm9, %v6529_v8, %v1178_v26  ;;  %v1218_v43 = vmul.f32 %v6647_v16, %v1185_v12 }
 0x432   :  { %v1192_v29 = vsel %vm8651_vm9, %v1182_v46, %v6529_v8  ;;  %v1090_v48 = vsel %vm1089_vm2, %v6557_v35, %v1086_v55  ;;  %v1091_v57 = vsel %vm1089_vm2, %v1086_v55, %v6566_v45  ;;  %v1097_v25 = vsel %vm1089_vm2, %v1081_v28, %v6557_v35 }
 0x433   :  { %v1220_v8 = vmul.f32 %v6663_v36, %v1192_v29  ;;  %v1126_v12 = vmul.f32 %v1112_v10, %v1090_v48  ;;  %v1127_v16 = vmul.f32 %v1116_v17, %v1091_v57  ;;  %v6722_v29 = vrot.slane %v1291_v49, %v6310_v30 }
 0x434   :  { %v6739_v57 = vrot.slane %v1291_v49, %v6316_v33  ;;  %v8763_v53 = vrot.slane %v6644_v50, %v6314_v32  ;;  %vm8765_vm2 = vcmask 1043456   ;;  %vm8769_vm14 = vcmask 31744  }
 0x435   :  { %v1224_v9 = vpop.permute.xlu0 %1223  ;;  %v1130_v54 = vpop.permute.xlu1 %1129  ;;  %8757 = vst [vmem:[#allocation40_spill] sm:$0xff] %v6722_v29  ;;  %v5748_v17 = vpack.c.bf16 %v1220_v8, %v6486_v63  ;;  %v1250_v63 = vrot.slane %v6644_v50, %v6310_v30  ;;  %vm8766_vm0 = vmmov %vm8765_vm2 }
 0x436   :  { %v1141_v47 = vsel %vm8662_vm12, %v6610_v44, %v1130_v54  ;;  %v1146_v52 = vsel %vm8662_vm12, %v1130_v54, %v6581_v6  ;;  %v1186_v54 = vsel %vm8651_vm9, %v6532_v15, %v1182_v46  ;;  %v1217_v15 = vmul.f32 %v6641_v13, %v1184_v51  ;;  %8760 = vst [vmem:[#allocation43_spill] sm:$0xff] %v6739_v57  ;;  %vm8768_vm1 = vmmov %vm8766_vm0 }
 0x437   :  { %v1174_v7 = vmul.f32 %v6667_v42, %v1141_v47  ;;  %v1171_v26 = vmul.f32 %v6675_v0, %v1146_v52  ;;  %v6725_v52 = vrot.slane %v1291_v49, %v6312_v31  ;;  %vm8770_vm11 = vmmov %vm8769_vm14 }
 0x439   :  { %v1228_v47 = vpop.permute.xlu0 %1227  ;;  %v1135_v42 = vpop.permute.xlu1 %1134  ;;  %v5744_v60 = vpack.c.bf16 %v1174_v7, %v1128_v21  ;;  %v1125_v21 = vmul.f32 %v1108_v24, %v1097_v25  ;;  %8758 = vst [vmem:[#allocation41_spill] sm:$0xff] %v6725_v52 }
 0x43a   :  { %v1139_v45 = vsel %vm8662_vm12, %v6581_v6, %v1135_v42  ;;  %v1140_v55 = vsel %vm8662_vm12, %v1135_v42, %v6610_v44  ;;  %v1219_v6 = vmul.f32 %v6652_v14, %v1186_v54  ;;  %v6729_v42 = vrot.slane %v1291_v49, %v6314_v32 }
 0x43b   :  { %v1172_v35 = vmul.f32 %v6682_v20, %v1139_v45  ;;  %v1173_v28 = vmul.f32 %v6693_v18, %v1140_v55  ;;  %5745 = vmatprep.subr.bf16.mxu1 %v5744_v60  ;;  %v1231_v60 = vsel %vm1229_vm5, %v1224_v9, %v6544_v34  ;;  %v5730_v51 = vpack.c.bf16 %v1171_v26, %v1125_v21 }
 0x43c   :  { %8759 = vst [vmem:[#allocation42_spill] sm:$0xff] %v6729_v42  ;;  %v1232_v24 = vsel %vm1229_vm5, %v6544_v34, %v1228_v47  ;;  %v5734_v34 = vpack.c.bf16 %v1217_v15, %v6470_v56  ;;  %v1238_v54 = vsel %vm1229_vm5, %v1228_v47, %v6537_v22  ;;  %v5750_v49 = vpack.c.bf16 %v1219_v6, %v6475_v62 }
 0x43d   :  { %v5746_v46 = vpack.c.bf16 %v1173_v28, %v1127_v16  ;;  %v1274_v44 = vpop.permute.xlu0 %1273  ;;  %v1272_v48 = vpop.permute.xlu1 %1271  ;;  %v5728_v10 = vpack.c.bf16 %v1172_v35, %v1126_v12  ;;  %v5732_v16 = vpack.c.bf16 %v1218_v43, %v6490_v1  ;;  %v1230_v1 = vsel %vm1229_vm5, %v6537_v22, %v1224_v9  ;;  %vm8767_vm5 = vmmov %vm8766_vm0 }
 0x43e   :  { %v1280_v7 = vsel %vm1279_vm7, %v1272_v48, %v1274_v44  ;;  %v1268_v43 = vmul.f32 %v8763_v53, %v1231_v60  ;;  %v1269_v8 = vmul.f32 %v1258_v11, %v1232_v24  ;;  %v8764_v62 = vrot.slane %v6644_v50, %v6312_v31  ;;  %v976_v53 = vld [vmem:[%s5626_s12] sm:$0xff]  ;;  %s6154_s12 = smov 22  }
 0x43f   :  { %5729 = vmatprep.subr.bf16.mxu0 %v5728_v10  ;;  %5747 = vmatpush1.bf16.msra.mxu1 %v5746_v46  ;;  %v1313_v45 = vmul.f32 %v6722_v29, %v1280_v7  ;;  %v1267_v28 = vmul.f32 %v1250_v63, %v1230_v1  ;;  %v1337_v21 = vsel %vm1336_vm10, 1.0, %v8747_v19 }
 0x440   :  { %5731 = vmatpush1.bf16.msra.mxu0 %v5730_v51  ;;  %5749 = vmatprep.subr.bf16.mxu1 %v5748_v17  ;;  %v1270_v11 = vmul.f32 %v8764_v62, %v1238_v54  ;;  %v1346_v10 = vrot.slane %v1337_v21, %v6314_v32  ;;  %v1354_v60 = vrot.slane %v1337_v21, %v6312_v31 }
 0x441   :  { %v1278_v26 = vpop.permute.xlu0 %1277  ;;  %5733 = vmatprep.subr.bf16.mxu0 %v5732_v16  ;;  %v1276_v56 = vpop.permute.xlu1 %1275  ;;  %v1342_v51 = vrot.slane %v1337_v21, %v6310_v30 }
 0x442   :  { %v1288_v55 = vsel %vm1279_vm7, %v1278_v26, %v1272_v48  ;;  %v1281_v47 = vsel %vm1279_vm7, %v1274_v44, %v1276_v56  ;;  %v1282_v12 = vsel %vm1279_vm7, %v1276_v56, %v1278_v26  ;;  %v5738_v44 = vpack.c.bf16 %v1313_v45, %v1267_v28 }
 0x443   :  { %v1316_v22 = vmul.f32 %v6725_v52, %v1288_v55  ;;  %v1314_v9 = vmul.f32 %v6729_v42, %v1281_v47  ;;  %v1315_v35 = vmul.f32 %v6739_v57, %v1282_v12  ;;  %5751 = vmatpush1.bf16.msra.mxu1 %v5750_v49  ;;  %v1350_v48 = vrot.slane %v1337_v21, %v6316_v33  ;;  %v8801_v57 = vld [vmem:[#allocation24_spill] sm:$0xff] }
 0x444   :  { %5735 = vmatpush1.bf16.msra.mxu0 %v5734_v34  ;;  %v1690_v28 = vadd.s32 4294967294, %v6285_v23 }
 0x445   :  { %v5754_v41 = vpack.c.bf16 %v1315_v35, %v1269_v8  ;;  %v1320_v15 = vpop.permute.xlu0 %1319  ;;  %v1318_v50 = vpop.permute.xlu1 %1317  ;;  %v5736_v6 = vpack.c.bf16 %v1314_v9, %v1268_v43  ;;  %v5752_v46 = vpack.c.bf16 %v1316_v22, %v1270_v11  ;;  %v1515_v43 = vld [vmem:[%s5628_s20] sm:$0xff]  ;;  %s6149_s20 = smov 17  }
 0x446   :  { %v1326_v24 = vsel %vm1325_vm13, %v1318_v50, %v1320_v15  ;;  %v1812_v35 = vld [vmem:[%s5631_s28] sm:$0xff]  ;;  %vm1691_vm10 = vcmp.ge.s32.totalorder %v1690_v28, 0  ;;  %s5632_s28 = sld [smem:[%s8604_s0 + %s6149_s20]]  }
 0x447   :  { %5737 = vmatprep.subr.bf16.mxu0 %v5736_v6  ;;  %5753 = vmatprep.subr.bf16.mxu1 %v5752_v46  ;;  %v1359_v1 = vmul.f32 %v1342_v51, %v1326_v24 }
 0x448   :  { %5739 = vmatpush1.bf16.msra.mxu0 %v5738_v44  ;;  %5755 = vmatpush1.bf16.msra.mxu1 %v5754_v41 }
 0x449   :  { %v1324_v17 = vpop.permute.xlu0 %1323  ;;  %v1322_v7 = vpop.permute.xlu1 %1321 }
 0x44a   :  { %v1334_v16 = vsel %vm1325_vm13, %v1324_v17, %v1318_v50  ;;  %v1327_v25 = vsel %vm1325_vm13, %v1320_v15, %v1322_v7  ;;  %v1328_v34 = vsel %vm1325_vm13, %v1322_v7, %v1324_v17  ;;  %vm1692_vm13 = vmand %vm6295_vm4, %vm1691_vm10 }
 0x44b   :  { %v1361_v63 = vmul.f32 %v1350_v48, %v1328_v34  ;;  %v1360_v54 = vmul.f32 %v1346_v10, %v1327_v25  ;;  %v1362_v49 = vmul.f32 %v1354_v60, %v1334_v16  ;;  %v1781_v60 = vadd.s32 2, %v6285_v23 }
 0x44d   :  { %1389 = vmatprep.subr.mxu0 %v1360_v54  ;;  %1460 = vmatprep.subr.mxu1 %v1362_v49  ;;  %vm1784_vm10 = vcmp.lt.s32.totalorder %v1781_v60, 16 }
 0x44e   :  { %1390 = vmatpush1.msra.mxu0 %v1359_v1  ;;  %1461 = vmatpush1.msra.mxu1 %v1361_v63 }
 0x44f   :  { %5665 = vmatmul.mubr.msk.f32.vlgmr.msra.gmra.mrb[8].mxu0 %vm8677_vm15, %v976_v53  ;;  %5666 = vmatmul.mubr.msk.f32.vlgmr.msra.gmra.mrb[8].mxu1 %vm8677_vm15, %v976_v53 }
 0x450   :  { %5667 = vmatprep.subr.msk.mxu0 %vm8765_vm2, %v6207_v4  ;;  %5670 = vmatprep.subr.msk.mxu1 %vm8766_vm0, %v6211_v5  ;;  %vm1693_vm2 = vcmp.lt.s32.totalorder %v1690_v28, 16 }
 0x451   :  { %5668 = vmatpush1.msk.msra.mxu0 %vm8767_vm5, %v6200_v2  ;;  %1589 = vmatprep.mubr.f32.mxu0 %v8747_v19  ;;  %vm1694_vm0 = vmand %vm1692_vm13, %vm1693_vm2  ;;  %vm8659_vm5 = vcmask 15360  }
 0x452   :  { %5671 = vmatpush1.msk.msra.mxu1 %vm8768_vm1, %v6203_v3  ;;  %1660 = vmatprep.mubr.f32.mxu1 %v8747_v19  ;;  %v1695_v6 = vsel %vm1694_vm0, 1.0, %v8747_v19  ;;  %vm8776_vm1 = vcmask 7168   ;;  %vm8780_vm0 = vcmask 1039360  }
 0x453   :  { %5669 = vmatmul.mubr.msk.f32.vlgmr.msra.gmra.mrb[10].mxu0 %vm8769_vm14, %v1515_v43  ;;  %5672 = vmatmul.mubr.msk.f32.vlgmr.msra.gmra.mrb[10].mxu1 %vm8770_vm11, %v1515_v43  ;;  %v6862_v48 = vrot.slane %v1695_v6, %v6312_v31  ;;  %v6867_v51 = vrot.slane %v1695_v6, %v6310_v30  ;;  %v6870_v7 = vrot.slane %v1695_v6, %v6314_v32  ;;  %vm8777_vm14 = vmmov %vm8776_vm1  ;;  %vm1782_vm11 = vcmp.ge.s32.totalorder %v1781_v60, 0 }
 0x454   :  { %1886 = vmatprep.mubr.f32.mxu0 %v8747_v19  ;;  %1957 = vmatprep.mubr.f32.mxu1 %v8747_v19  ;;  %v6873_v16 = vrot.slane %v1695_v6, %v6316_v33  ;;  %vm8778_vm13 = vmmov %vm8776_vm1 }
 0x455   :  { %vm8779_vm2 = vmmov %vm8776_vm1 }
 0x456   :  { %8775 = vst [vmem:[#allocation48_spill] sm:$0xff] %v6873_v16 }
 0x45a   :  { %v1520_v45 = vpop.permute.xlu1 %1519 }
 0x522   :  { %v6805_v8 = vpop.f32.mrb[8].mxu0  ;;  %v6807_v26 = vpop.f32.mrb[8].mxu1 }
 0x523   :  { %8771 = vst [vmem:[#allocation44_spill] sm:$0xff] %v6805_v8  ;;  %8772 = vst [vmem:[#allocation45_spill] sm:$0xff] %v6807_v26  ;;  %v6809_v2 = vpop.f32.mrb[9].mxu0  ;;  %v6811_v56 = vpop.f32.mrb[9].mxu1  ;;  %v8796_v26 = vld [vmem:[#allocation23_spill] sm:$0xff] }
 0x524   :  { %8773 = vst [vmem:[#allocation46_spill] sm:$0xff] %v6809_v2  ;;  %8774 = vst [vmem:[#allocation47_spill] sm:$0xff] %v6811_v56  ;;  %v8797_v56 = vld [vmem:[#allocation22_spill] sm:$0xff] }
 0x526   :  { %v1591_v3 = vpop.f32.mrb[10].mxu0  ;;  %v1662_v55 = vpop.f32.mrb[10].mxu1 }
 0x527   :  { %v6813_v47 = vadd.f32 %v1591_v3, %v1520_v45  ;;  %v1593_v12 = vpop.f32.mrb[11].mxu0  ;;  %v1664_v62 = vpop.f32.mrb[11].mxu1  ;;  %v6819_v11 = vadd.f32 %v1662_v55, %v1520_v45 }
 0x528   :  { %v6821_v22 = vadd.f32 %v1664_v62, %v1520_v45  ;;  %v6827_v9 = vadd.f32 %v1593_v12, %v1520_v45 }
 0x529   :  { %1742 = vrot.lane.b32.xlu0 %v6813_v47, %s6127_s23  ;;  %1675 = vrot.lane.b32.xlu1 %v6813_v47, %s6128_s24 }
 0x52d   :  { %1669 = vrot.lane.b32.xlu0 %v6821_v22, %s6128_s24  ;;  %1679 = vrot.lane.b32.xlu1 %v6819_v11, %s6128_s24 }
 0x531   :  { %1677 = vrot.lane.b32.xlu0 %v6827_v9, %s6128_s24  ;;  %1724 = vrot.lane.b32.xlu1 %v6813_v47, %s6125_s18 }
 0x535   :  { %1721 = vrot.lane.b32.xlu0 %v6821_v22, %s6125_s18  ;;  %1728 = vrot.lane.b32.xlu1 %v6819_v11, %s6125_s18 }
 0x539   :  { %1726 = vrot.lane.b32.xlu0 %v6827_v9, %s6125_s18  ;;  %1744 = vrot.lane.b32.xlu1 %v6827_v9, %s6127_s23 }
 0x53d   :  { %1746 = vrot.lane.b32.xlu0 %v6819_v11, %s6127_s23  ;;  %1748 = vrot.lane.b32.xlu1 %v6821_v22, %s6127_s23 }
 0x541   :  { %1763 = vrot.lane.b32.xlu0 %v6813_v47, %s6144_s29  ;;  %1765 = vrot.lane.b32.xlu1 %v6827_v9, %s6144_s29 }
 0x545   :  { %1767 = vrot.lane.b32.xlu0 %v6819_v11, %s6144_s29  ;;  %1769 = vrot.lane.b32.xlu1 %v6821_v22, %s6144_s29 }
 0x549   :  { %1815 = vperm.xlu0 %6108, %v1812_v35  }
 0x59b   :  { %v1743_v41 = vpop.permute.xlu0 %1742  ;;  %v1676_v15 = vpop.permute.xlu1 %1675 }
 0x59f   :  { %v1670_v21 = vpop.permute.xlu0 %1669  ;;  %v1680_v50 = vpop.permute.xlu1 %1679 }
 0x5a0   :  { %v1684_v10 = vsel %vm8659_vm5, %v1680_v50, %v1670_v21  ;;  %v1689_v63 = vsel %vm8659_vm5, %v1670_v21, %v1676_v15 }
 0x5a1   :  { %v1720_v54 = vmul.f32 %v6862_v48, %v1684_v10  ;;  %v1717_v12 = vmul.f32 %v6867_v51, %v1689_v63 }
 0x5a3   :  { %v1678_v46 = vpop.permute.xlu0 %1677  ;;  %v1725_v44 = vpop.permute.xlu1 %1724 }
 0x5a4   :  { %v1682_v49 = vsel %vm8659_vm5, %v1676_v15, %v1678_v46  ;;  %v1683_v53 = vsel %vm8659_vm5, %v1678_v46, %v1680_v50  ;;  %vm2276_vm5 = vcmask 695296  }
 0x5a5   :  { %v1718_v62 = vmul.f32 %v6870_v7, %v1682_v49  ;;  %v1719_v15 = vmul.f32 %v6873_v16, %v1683_v53  ;;  %v8784_v53 = vld [vmem:[#allocation18_spill] sm:$0xff] }
 0x5a7   :  { %v1722_v24 = vpop.permute.xlu0 %1721  ;;  %v1729_v17 = vpop.permute.xlu1 %1728 }
 0x5a8   :  { %v1737_v25 = vsel %vm8776_vm1, %v1722_v24, %v1725_v44  ;;  %v1732_v34 = vsel %vm8777_vm14, %v1729_v17, %v1722_v24  ;;  %vm1783_vm1 = vmand %vm6295_vm4, %vm1782_vm11  ;;  %vm8652_vm11 = vcmask 1031168  }
 0x5a9   :  { %v1741_v1 = vmul.f32 %v1732_v34, %v6329_v38  ;;  %v1738_v43 = vmul.f32 %v1737_v25, %v6326_v37  ;;  %vm8781_vm14 = vmmov %vm8780_vm0 }
 0x5ab   :  { %v1727_v45 = vpop.permute.xlu0 %1726  ;;  %v1745_v3 = vpop.permute.xlu1 %1744  ;;  %v5764_v55 = vpack.c.bf16 %v1741_v1, %v1720_v54  ;;  %v5758_v46 = vpack.c.bf16 %v1738_v43, %v1717_v12 }
 0x5ac   :  { %v1730_v35 = vsel %vm8778_vm13, %v1725_v44, %v1727_v45  ;;  %v1731_v28 = vsel %vm8779_vm2, %v1727_v45, %v1729_v17  ;;  %v1750_v6 = vsel %vm8780_vm0, %v1743_v41, %v1745_v3  ;;  %vm8782_vm13 = vmmov %vm8780_vm0 }
 0x5ad   :  { %v1739_v21 = vmul.f32 %v1730_v35, %v6332_v39  ;;  %v1740_v50 = vmul.f32 %v1731_v28, %v6335_v40  ;;  %5765 = vmatprep.subr.bf16.mxu1 %v5764_v55  ;;  %v1759_v17 = vmul.f32 %v1750_v6, %v6366_v61  ;;  %vm8783_vm2 = vmmov %vm8780_vm0 }
 0x5ae   :  { %vm1785_vm0 = vmand %vm1783_vm1, %vm1784_vm10  ;;  %vm1818_vm10 = vcmask 326656  }
 0x5af   :  { %v5766_v10 = vpack.c.bf16 %v1740_v50, %v1719_v15  ;;  %v1747_v24 = vpop.permute.xlu0 %1746  ;;  %v1749_v25 = vpop.permute.xlu1 %1748  ;;  %v5756_v44 = vpack.c.bf16 %v1739_v21, %v1718_v62  ;;  %v1786_v60 = vsel %vm1785_vm0, 1.0, %v8747_v19  ;;  %v5762_v62 = vpack.c.bf16 %v1759_v17, %v6813_v47 }
 0x5b0   :  { %v1751_v34 = vsel %vm8781_vm14, %v1745_v3, %v1747_v24  ;;  %v1752_v63 = vsel %vm8782_vm13, %v1747_v24, %v1749_v25  ;;  %v1758_v54 = vsel %vm8783_vm2, %v1749_v25, %v1743_v41  ;;  %v6912_v35 = vrot.slane %v1786_v60, %v6316_v33 }
 0x5b1   :  { %v1760_v49 = vmul.f32 %v1751_v34, %v6360_v59  ;;  %v1761_v1 = vmul.f32 %v1752_v63, %v6357_v58  ;;  %v1762_v43 = vmul.f32 %v1758_v54, %v8784_v53  ;;  %5757 = vmatprep.subr.bf16.mxu0 %v5756_v44  ;;  %5767 = vmatpush1.bf16.msra.mxu1 %v5766_v10  ;;  %v1667_v44 = vld [vmem:[%s5630_s8] sm:$0xff]  ;;  %vm8789_vm0 = vcmp.lt.s32.totalorder %v6285_v23, 16  ;;  %s6152_s8 = smov 53  }
 0x5b2   :  { %5759 = vmatpush1.bf16.msra.mxu0 %v5758_v46  ;;  %8785 = vst [vmem:[#allocation49_spill] sm:$0xff] %v6912_v35  ;;  %v6915_v28 = vrot.slane %v1786_v60, %v6314_v32  ;;  %v6921_v15 = vrot.slane %v1786_v60, %v6310_v30 }
 0x5b3   :  { %v5770_v45 = vpack.c.bf16 %v1761_v1, %v6819_v11  ;;  %v1764_v41 = vpop.permute.xlu0 %1763  ;;  %v1766_v3 = vpop.permute.xlu1 %1765  ;;  %v5760_v55 = vpack.c.bf16 %v1760_v49, %v6827_v9  ;;  %v5768_v12 = vpack.c.bf16 %v1762_v43, %v6821_v22  ;;  %v6918_v11 = vrot.slane %v1786_v60, %v6312_v31  ;;  %v2111_v60 = vld [vmem:[%s5633_s16] sm:$0xff] }
 0x5b4   :  { %8786 = vst [vmem:[#allocation50_spill] sm:$0xff] %v6915_v28  ;;  %8788 = vst [vmem:[#allocation52_spill] sm:$0xff] %v6921_v15  ;;  %v1772_v22 = vsel %vm8652_vm11, %v1764_v41, %v1766_v3 }
 0x5b5   :  { %5761 = vmatprep.subr.bf16.mxu0 %v5760_v55  ;;  %5769 = vmatprep.subr.bf16.mxu1 %v5768_v12  ;;  %8787 = vst [vmem:[#allocation51_spill] sm:$0xff] %v6918_v11  ;;  %v1808_v25 = vmul.f32 %v6921_v15, %v1772_v22 }
 0x5b6   :  { %5763 = vmatpush1.bf16.msra.mxu0 %v5762_v62  ;;  %5771 = vmatpush1.bf16.msra.mxu1 %v5770_v45 }
 0x5b7   :  { %v1768_v47 = vpop.permute.xlu0 %1767  ;;  %v1770_v9 = vpop.permute.xlu1 %1769 }
 0x5b8   :  { %v1773_v21 = vsel %vm8652_vm11, %v1766_v3, %v1768_v47  ;;  %v1774_v50 = vsel %vm8652_vm11, %v1768_v47, %v1770_v9  ;;  %v1780_v6 = vsel %vm8652_vm11, %v1770_v9, %v1764_v41  ;;  %v6979_v3 = vld [vmem:[%s6282_s30] sm:$0xf]  ;;  %vm8657_vm11 = vcmask 261120  }
 0x5b9   :  { %v1810_v46 = vmul.f32 %v6912_v35, %v1774_v50  ;;  %v1809_v10 = vmul.f32 %v6915_v28, %v1773_v21  ;;  %v1811_v24 = vmul.f32 %v6918_v11, %v1780_v6  ;;  %v1987_v55 = vadd.s32 4294967294, %v6979_v3 }
 0x5ba   :  { %v2079_v6 = vadd.s32 2, %v6979_v3 }
 0x5bb   :  { %1830 = vmatprep.subr.mxu0 %v1809_v10  ;;  %1901 = vmatprep.subr.mxu1 %v1811_v24  ;;  %vm1988_vm1 = vcmp.ge.s32.totalorder %v1987_v55, 0  ;;  %vm1989_vm14 = vcmp.lt.s32.totalorder %v1987_v55, 16 }
 0x5bc   :  { %1831 = vmatpush1.msra.mxu0 %v1808_v25  ;;  %1902 = vmatpush1.msra.mxu1 %v1810_v46  ;;  %vm1990_vm13 = vmand %vm1988_vm1, %vm1989_vm14  ;;  %vm2080_vm1 = vcmp.ge.s32.totalorder %v2079_v6, 0  ;;  %vm2081_vm14 = vcmp.lt.s32.totalorder %v2079_v6, 16 }
 0x5bd   :  { %5673 = vmatmul.mubr.msk.f32.vlgmr.msra.gmra.mrb[12].mxu0 %vm1818_vm10, %v1667_v44  ;;  %5674 = vmatmul.mubr.msk.f32.vlgmr.msra.gmra.mrb[12].mxu1 %vm1818_vm10, %v1667_v44  ;;  %vm1991_vm2 = vmand %vm1990_vm13, %vm8699_vm8 }
 0x5be   :  { %2184 = vmatprep.mubr.f32.mxu0 %v8747_v19  ;;  %2255 = vmatprep.mubr.f32.mxu1 %v8747_v19  ;;  %vm1992_vm9 = vmand %vm1991_vm2, %vm8789_vm0 }
 0x5bf   :  { %v1993_v9 = vsel %vm1992_vm9, 1.0, %v8747_v19  ;;  %vm8794_vm9 = vcmask 130048   ;;  %vm2082_vm2 = vmand %vm2080_vm1, %vm2081_vm14 }
 0x5c0   :  { %v6989_v46 = vrot.slane %v1993_v9, %v6312_v31  ;;  %v6993_v24 = vrot.slane %v1993_v9, %v6310_v30  ;;  %vm8795_vm13 = vmmov %vm8794_vm9 }
 0x5c1   :  { %vm8798_vm0 = vmmov %vm8794_vm9 }
 0x5c2   :  { %8790 = vst [vmem:[#allocation53_spill] sm:$0xff] %v6989_v46  ;;  %8791 = vst [vmem:[#allocation54_spill] sm:$0xff] %v6993_v24 }
 0x5c3   :  { %vm2083_vm1 = vmand %vm2082_vm2, %vm8699_vm8  ;;  %vm8658_vm2 = vcmask 785408  }
 0x5c8   :  { %v1816_v17 = vpop.permute.xlu0 %1815 }
 0x690   :  { %v1888_v34 = vpop.f32.mrb[12].mxu0  ;;  %v1959_v63 = vpop.f32.mrb[12].mxu1 }
 0x691   :  { %v6935_v54 = vadd.f32 %v1888_v34, %v1816_v17  ;;  %v1890_v49 = vpop.f32.mrb[13].mxu0  ;;  %v1961_v1 = vpop.f32.mrb[13].mxu1  ;;  %v6941_v43 = vadd.f32 %v1959_v63, %v1816_v17  ;;  %v6999_v34 = vrot.slane %v1993_v9, %v6316_v33 }
 0x692   :  { %v6943_v45 = vadd.f32 %v1961_v1, %v1816_v17  ;;  %v6949_v41 = vadd.f32 %v1890_v49, %v1816_v17  ;;  %v6996_v17 = vrot.slane %v1993_v9, %v6314_v32 }
 0x693   :  { %2040 = vrot.lane.b32.xlu1 %v6935_v54, %s6132_s13  ;;  %1972 = vrot.lane.b32.xlu0 %v6935_v54, %s6146_s9  ;;  %8793 = vst [vmem:[#allocation56_spill] sm:$0xff] %v6999_v34 }
 0x694   :  { %8792 = vst [vmem:[#allocation55_spill] sm:$0xff] %v6996_v17 }
 0x697   :  { %1966 = vrot.lane.b32.xlu1 %v6943_v45, %s6146_s9  ;;  %1976 = vrot.lane.b32.xlu0 %v6941_v43, %s6146_s9 }
 0x69b   :  { %1974 = vrot.lane.b32.xlu1 %v6949_v41, %s6146_s9  ;;  %2022 = vrot.lane.b32.xlu0 %v6935_v54, %s6130_s7 }
 0x69f   :  { %2019 = vrot.lane.b32.xlu1 %v6943_v45, %s6130_s7  ;;  %2026 = vrot.lane.b32.xlu0 %v6941_v43, %s6130_s7 }
 0x6a3   :  { %2024 = vrot.lane.b32.xlu1 %v6949_v41, %s6130_s7  ;;  %2042 = vrot.lane.b32.xlu0 %v6949_v41, %s6132_s13 }
 0x6a7   :  { %2044 = vrot.lane.b32.xlu1 %v6941_v43, %s6132_s13  ;;  %2046 = vrot.lane.b32.xlu0 %v6943_v45, %s6132_s13 }
 0x6ab   :  { %2061 = vrot.lane.b32.xlu1 %v6935_v54, %s6148_s17  ;;  %2063 = vrot.lane.b32.xlu0 %v6949_v41, %s6148_s17 }
 0x6af   :  { %2065 = vrot.lane.b32.xlu1 %v6941_v43, %s6148_s17  ;;  %2067 = vrot.lane.b32.xlu0 %v6943_v45, %s6148_s17 }
 0x6b3   :  { %2114 = vperm.xlu1 %6109, %v2111_v60  }
 0x705   :  { %v1973_v12 = vpop.permute.xlu0 %1972  ;;  %v2041_v62 = vpop.permute.xlu1 %2040 }
 0x709   :  { %v1977_v22 = vpop.permute.xlu0 %1976  ;;  %v1967_v47 = vpop.permute.xlu1 %1966 }
 0x70a   :  { %v1981_v10 = vsel %vm8657_vm11, %v1977_v22, %v1967_v47  ;;  %v1986_v1 = vsel %vm8657_vm11, %v1967_v47, %v1973_v12 }
 0x70b   :  { %v2018_v60 = vmul.f32 %v6989_v46, %v1981_v10  ;;  %v2015_v42 = vmul.f32 %v6993_v24, %v1986_v1 }
 0x70d   :  { %v2023_v21 = vpop.permute.xlu0 %2022  ;;  %v1975_v50 = vpop.permute.xlu1 %1974 }
 0x70e   :  { %v1979_v55 = vsel %vm8657_vm11, %v1973_v12, %v1975_v50  ;;  %v1980_v6 = vsel %vm8657_vm11, %v1975_v50, %v1977_v22  ;;  %v8802_v50 = vld [vmem:[#allocation25_spill] sm:$0xff] }
 0x70f   :  { %v2017_v12 = vmul.f32 %v6999_v34, %v1980_v6 }
 0x711   :  { %v2027_v25 = vpop.permute.xlu0 %2026  ;;  %v2020_v44 = vpop.permute.xlu1 %2019 }
 0x712   :  { %v2030_v63 = vsel %vm8794_vm9, %v2027_v25, %v2020_v44  ;;  %v2035_v49 = vsel %vm8795_vm13, %v2020_v44, %v2023_v21  ;;  %v2016_v44 = vmul.f32 %v6996_v17, %v1979_v55  ;;  %vm8799_vm9 = vmmov %vm8798_vm0  ;;  %vm8800_vm13 = vcmask 916480  }
 0x713   :  { %v2039_v2 = vmul.f32 %v2030_v63, %v8796_v26  ;;  %v2036_v8 = vmul.f32 %v2035_v49, %v8797_v56  ;;  %vm8804_vm14 = vmmov %vm8800_vm13 }
 0x715   :  { %v2043_v29 = vpop.permute.xlu0 %2042  ;;  %v2025_v9 = vpop.permute.xlu1 %2024  ;;  %v5780_v52 = vpack.c.bf16 %v2039_v2, %v2018_v60  ;;  %v5774_v2 = vpack.c.bf16 %v2036_v8, %v2015_v42  ;;  %v8810_v42 = vld [vmem:[#allocation27_spill] sm:$0xff] }
 0x716   :  { %v2028_v47 = vsel %vm8798_vm0, %v2023_v21, %v2025_v9  ;;  %v2029_v10 = vsel %vm8799_vm9, %v2025_v9, %v2027_v25  ;;  %v2048_v63 = vsel %vm8800_vm13, %v2041_v62, %v2043_v29  ;;  %v8803_v21 = vld [vmem:[#allocation29_spill] sm:$0xff]  ;;  %vm8805_vm0 = vmmov %vm8800_vm13  ;;  %vm8807_vm13 = vcmp.lt.s32.totalorder %v6285_v23, 16 }
 0x717   :  { %v2037_v22 = vmul.f32 %v2028_v47, %v8801_v57  ;;  %v2038_v26 = vmul.f32 %v2029_v10, %v8802_v50  ;;  %5781 = vmatprep.subr.bf16.mxu1 %v5780_v52  ;;  %v2057_v56 = vmul.f32 %v2048_v63, %v8803_v21  ;;  %vm8806_vm9 = vmmov %vm8805_vm0  ;;  %v8808_v52 = vld [vmem:[#allocation26_spill] sm:$0xff]  ;;  %v8809_v10 = vld [vmem:[#allocation28_spill] sm:$0xff] }
 0x718   :  { %vm2084_vm11 = vmand %vm2083_vm1, %vm8807_vm13 }
 0x719   :  { %v5782_v49 = vpack.c.bf16 %v2038_v26, %v2017_v12  ;;  %v2047_v1 = vpop.permute.xlu0 %2046  ;;  %v2045_v60 = vpop.permute.xlu1 %2044  ;;  %v5772_v55 = vpack.c.bf16 %v2037_v22, %v2016_v44  ;;  %v5778_v22 = vpack.c.bf16 %v2057_v56, %v6935_v54 }
 0x71a   :  { %v2056_v25 = vsel %vm8804_vm14, %v2047_v1, %v2041_v62  ;;  %v2049_v6 = vsel %vm8805_vm0, %v2043_v29, %v2045_v60  ;;  %v2050_v9 = vsel %vm8806_vm9, %v2045_v60, %v2047_v1  ;;  %v2085_v62 = vsel %vm2084_vm11, 1.0, %v8747_v19 }
 0x71b   :  { %v2060_v47 = vmul.f32 %v2056_v25, %v8808_v52  ;;  %v2058_v50 = vmul.f32 %v2049_v6, %v8809_v10  ;;  %v2059_v8 = vmul.f32 %v2050_v9, %v8810_v42  ;;  %5773 = vmatprep.subr.bf16.mxu0 %v5772_v55  ;;  %5783 = vmatpush1.bf16.msra.mxu1 %v5782_v49 }
 0x71c   :  { %5775 = vmatpush1.bf16.msra.mxu0 %v5774_v2  ;;  %v7038_v2 = vrot.slane %v2085_v62, %v6316_v33  ;;  %v7041_v49 = vrot.slane %v2085_v62, %v6314_v32  ;;  %v7047_v1 = vrot.slane %v2085_v62, %v6310_v30 }
 0x71d   :  { %v5786_v29 = vpack.c.bf16 %v2059_v8, %v6941_v43  ;;  %v2064_v26 = vpop.permute.xlu0 %2063  ;;  %v2062_v44 = vpop.permute.xlu1 %2061  ;;  %v5776_v12 = vpack.c.bf16 %v2058_v50, %v6949_v41  ;;  %v5784_v63 = vpack.c.bf16 %v2060_v47, %v6943_v45  ;;  %v7044_v43 = vrot.slane %v2085_v62, %v6312_v31  ;;  %v1964_v47 = vld [vmem:[%s5632_s28] sm:$0xff] }
 0x71e   :  { %8811 = vst [vmem:[#allocation57_spill] sm:$0xff] %v7038_v2  ;;  %8812 = vst [vmem:[#allocation58_spill] sm:$0xff] %v7041_v49  ;;  %v2070_v45 = vsel %vm8658_vm2, %v2062_v44, %v2064_v26 }
 0x71f   :  { %5777 = vmatprep.subr.bf16.mxu0 %v5776_v12  ;;  %5785 = vmatprep.subr.bf16.mxu1 %v5784_v63  ;;  %8813 = vst [vmem:[#allocation59_spill] sm:$0xff] %v7044_v43  ;;  %8814 = vst [vmem:[#allocation60_spill] sm:$0xff] %v7047_v1  ;;  %v2107_v9 = vmul.f32 %v7047_v1, %v2070_v45 }
 0x720   :  { %5779 = vmatpush1.bf16.msra.mxu0 %v5778_v22  ;;  %5787 = vmatpush1.bf16.msra.mxu1 %v5786_v29 }
 0x721   :  { %v2068_v56 = vpop.permute.xlu0 %2067  ;;  %v2066_v54 = vpop.permute.xlu1 %2065 }
 0x722   :  { %v2078_v41 = vsel %vm8658_vm2, %v2068_v56, %v2062_v44  ;;  %v2071_v50 = vsel %vm8658_vm2, %v2064_v26, %v2066_v54  ;;  %v2072_v60 = vsel %vm8658_vm2, %v2066_v54, %v2068_v56 }
 0x723   :  { %v2109_v55 = vmul.f32 %v7038_v2, %v2072_v60  ;;  %v2108_v25 = vmul.f32 %v7041_v49, %v2071_v50  ;;  %v2110_v6 = vmul.f32 %v7044_v43, %v2078_v41  ;;  %v2285_v50 = vadd.s32 4294967291, %v6979_v3 }
 0x724   :  { %v2524_v49 = vadd.s32 5, %v6979_v3 }
 0x725   :  { %2128 = vmatprep.subr.mxu0 %v2108_v25  ;;  %2199 = vmatprep.subr.mxu1 %v2110_v6  ;;  %v6113_v25 = vld [vmem:[%s6276_s27] sm:$0xf]  ;;  %vm2286_vm11 = vcmp.ge.s32.totalorder %v2285_v50, 0 }
 0x726   :  { %2129 = vmatpush1.msra.mxu0 %v2107_v9  ;;  %2200 = vmatpush1.msra.mxu1 %v2109_v55  ;;  %v7122_v6 = vadd.s32 4294967291, %v6113_v25 }
 0x727   :  { %5675 = vmatmul.mubr.msk.f32.vlgmr.msra.gmra.mrb[14].mxu0 %vm1818_vm10, %v1964_v47  ;;  %5676 = vmatmul.mubr.msk.f32.vlgmr.msra.gmra.mrb[14].mxu1 %vm1818_vm10, %v1964_v47  ;;  %vm2287_vm10 = vcmp.lt.s32.totalorder %v2285_v50, 16 }
 0x728   :  { %2720 = vmatprep.mubr.f32.mxu0 %v8747_v19  ;;  %2791 = vmatprep.mubr.f32.mxu1 %v8747_v19  ;;  %vm7126_vm1 = vmand %vm2286_vm11, %vm2287_vm10  ;;  %vm2290_vm14 = vcmp.ge.s32.totalorder %v7122_v6, 0  ;;  %vm2292_vm9 = vcmp.lt.s32.totalorder %v7122_v6, 16  ;;  %vm8817_vm10 = vcmp.lt.s32.totalorder %v6285_v23, 16 }
 0x729   :  { %vm2291_vm0 = vmand %vm7126_vm1, %vm2290_vm14 }
 0x72a   :  { %vm2337_vm13 = vmand %vm7126_vm1, %vm8699_vm8 }
 0x72b   :  { %vm2293_vm11 = vmand %vm2291_vm0, %vm2292_vm9 }
 0x72c   :  { %vm2338_vm2 = vmand %vm2337_vm13, %vm8817_vm10  ;;  %v2294_v50 = vsel %vm2293_vm11, 1.0, %v8747_v19  ;;  %vm2525_vm13 = vcmp.ge.s32.totalorder %v2524_v49, 0 }
 0x72d   :  { %v2339_v21 = vsel %vm2338_vm2, 1.0, %v8747_v19  ;;  %v2311_v1 = vrot.slane %v2294_v50, %v6312_v31  ;;  %v2303_v10 = vrot.slane %v2294_v50, %v6314_v32  ;;  %v2307_v3 = vrot.slane %v2294_v50, %v6316_v33  ;;  %vm2432_vm15 = vmand %vm6295_vm4, %vm2290_vm14 }
 0x72e   :  { %v2356_v52 = vrot.slane %v2339_v21, %v6312_v31  ;;  %v2344_v57 = vrot.slane %v2339_v21, %v6310_v30  ;;  %v2348_v46 = vrot.slane %v2339_v21, %v6314_v32  ;;  %v2352_v14 = vrot.slane %v2339_v21, %v6316_v33 }
 0x72f   :  { %v2299_v35 = vrot.slane %v2294_v50, %v6310_v30 }
 0x732   :  { %v2115_v8 = vpop.permute.xlu1 %2114 }
 0x7fa   :  { %v2186_v29 = vpop.f32.mrb[14].mxu0  ;;  %v2257_v26 = vpop.f32.mrb[14].mxu1 }
 0x7fb   :  { %v7061_v62 = vadd.f32 %v2186_v29, %v2115_v8  ;;  %v2188_v44 = vpop.f32.mrb[15].mxu0  ;;  %v2259_v12 = vpop.f32.mrb[15].mxu1  ;;  %v7065_v63 = vadd.f32 %v2257_v26, %v2115_v8 }
 0x7fc   :  { %v7075_v22 = vadd.f32 %v2259_v12, %v2115_v8  ;;  %v7079_v45 = vadd.f32 %v2188_v44, %v2115_v8 }
 0x7fd   :  { %2460 = vrot.lane.b32.xlu0 %v7061_v62, %s6150_s3  ;;  %2270 = vrot.lane.b32.xlu1 %v7061_v62, %s6151_s4 }
 0x801   :  { %2464 = vrot.lane.b32.xlu0 %v7065_v63, %s6150_s3  ;;  %2274 = vrot.lane.b32.xlu1 %v7065_v63, %s6151_s4 }
 0x805   :  { %2506 = vrot.lane.b32.xlu0 %v7061_v62, %s6152_s8  ;;  %2323 = vrot.lane.b32.xlu1 %v7061_v62, %s6139_s26 }
 0x809   :  { %2510 = vrot.lane.b32.xlu0 %v7065_v63, %s6152_s8  ;;  %2327 = vrot.lane.b32.xlu1 %v7065_v63, %s6139_s26 }
 0x80d   :  { %2264 = vrot.lane.b32.xlu0 %v7075_v22, %s6151_s4  ;;  %2368 = vrot.lane.b32.xlu1 %v7061_v62, %s6153_s11 }
 0x811   :  { %2272 = vrot.lane.b32.xlu0 %v7079_v45, %s6151_s4  ;;  %2372 = vrot.lane.b32.xlu1 %v7065_v63, %s6153_s11  ;;  %s5634_s4 = sld [smem:[%s8604_s0 + %s6156_s25]]  }
 0x815   :  { %2320 = vrot.lane.b32.xlu0 %v7075_v22, %s6139_s26  ;;  %2417 = vrot.lane.b32.xlu1 %v7061_v62, %s6123_s10 }
 0x819   :  { %2325 = vrot.lane.b32.xlu0 %v7079_v45, %s6139_s26  ;;  %2421 = vrot.lane.b32.xlu1 %v7065_v63, %s6123_s10 }
 0x81d   :  { %2365 = vrot.lane.b32.xlu0 %v7075_v22, %s6153_s11  ;;  %2462 = vrot.lane.b32.xlu1 %v7079_v45, %s6150_s3 }
 0x821   :  { %2370 = vrot.lane.b32.xlu0 %v7079_v45, %s6153_s11  ;;  %2466 = vrot.lane.b32.xlu1 %v7075_v22, %s6150_s3 }
 0x825   :  { %2414 = vrot.lane.b32.xlu0 %v7075_v22, %s6123_s10  ;;  %2508 = vrot.lane.b32.xlu1 %v7079_v45, %s6152_s8 }
 0x829   :  { %2419 = vrot.lane.b32.xlu0 %v7079_v45, %s6123_s10  ;;  %2512 = vrot.lane.b32.xlu1 %v7075_v22, %s6152_s8  ;;  %s5637_s10 = sld [smem:[%s8604_s0 + %s6154_s12]]   ;;  %s6157_s8 = smov 21  }
 0x82a   :  { %s5636_s15 = sld [smem:[%s8604_s0 + %s6157_s8]]   ;;  %s6162_s12 = smov 121  }
 0x82d   :  { %2556 = vrot.lane.b32.xlu0 %v7061_v62, %s6137_s22  ;;  %2558 = vrot.lane.b32.xlu1 %v7079_v45, %s6137_s22 }
 0x82f   :  { %v2799_v56 = vld [vmem:[%s5637_s10] sm:$0xff] }
 0x831   :  { %2560 = vrot.lane.b32.xlu0 %v7065_v63, %s6137_s22  ;;  %2562 = vrot.lane.b32.xlu1 %v7075_v22, %s6137_s22 }
 0x835   :  { %2601 = vrot.lane.b32.xlu0 %v7061_v62, %s6155_s21  ;;  %2603 = vrot.lane.b32.xlu1 %v7079_v45, %s6155_s21 }
 0x839   :  { %2605 = vrot.lane.b32.xlu0 %v7065_v63, %s6155_s21  ;;  %2607 = vrot.lane.b32.xlu1 %v7075_v22, %s6155_s21 }
 0x83d   :  { %2802 = vperm.xlu0 %6108, %v2799_v56   ;;  %v7148_v56 = vadd.s32 5, %v6113_v25 }
 0x83f   :  { %vm2384_vm12 = vcmp.ge.s32.totalorder %v7148_v56, 0  ;;  %vm2386_vm2 = vcmp.lt.s32.totalorder %v7148_v56, 16 }
 0x840   :  { %vm7163_vm0 = vmand %vm7126_vm1, %vm2384_vm12  ;;  %vm2526_vm1 = vcmp.lt.s32.totalorder %v2524_v49, 16 }
 0x841   :  { %vm7181_vm11 = vmand %vm7163_vm0, %vm2386_vm2 }
 0x842   :  { %vm7192_vm10 = vmand %vm6295_vm4, %vm2384_vm12 }
 0x843   :  { %vm7200_vm0 = vmand %vm2525_vm13, %vm2526_vm1 }
 0x844   :  { %vm2528_vm13 = vmand %vm7200_vm0, %vm2290_vm14  ;;  %vm2374_vm14 = vcmask 613376  }
 0x845   :  { %vm2433_vm1 = vmand %vm2432_vm15, %vm2292_vm9  ;;  %vm2468_vm15 = vcmask 1006592  }
 0x86f   :  { %v7116_v54 = vpop.permute.xlu0 %2460  ;;  %v2271_v41 = vpop.permute.xlu1 %2270 }
 0x873   :  { %v7119_v60 = vpop.permute.xlu0 %2464  ;;  %v2275_v55 = vpop.permute.xlu1 %2274 }
 0x877   :  { %v7124_v9 = vpop.permute.xlu0 %2506  ;;  %v2324_v47 = vpop.permute.xlu1 %2323 }
 0x87b   :  { %v7131_v29 = vpop.permute.xlu0 %2510  ;;  %v2328_v26 = vpop.permute.xlu1 %2327 }
 0x87f   :  { %v2265_v44 = vpop.permute.xlu0 %2264  ;;  %v7144_v12 = vpop.permute.xlu1 %2368 }
 0x880   :  { %v2279_v42 = vsel %vm2276_vm5, %v2275_v55, %v2265_v44 }
 0x881   :  { %v2319_v8 = vmul.f32 %v2311_v1, %v2279_v42 }
 0x883   :  { %v2273_v43 = vpop.permute.xlu0 %2272  ;;  %v7152_v2 = vpop.permute.xlu1 %2372 }
 0x884   :  { %v2277_v28 = vsel %vm2276_vm5, %v2271_v41, %v2273_v43  ;;  %v2278_v11 = vsel %vm2276_vm5, %v2273_v43, %v2275_v55 }
 0x887   :  { %v2321_v34 = vpop.permute.xlu0 %2320  ;;  %v7171_v17 = vpop.permute.xlu1 %2417 }
 0x888   :  { %v2331_v24 = vsel %vm1279_vm7, %v2328_v26, %v2321_v34  ;;  %v2336_v13 = vsel %vm1279_vm7, %v2321_v34, %v2324_v47  ;;  %v2284_v34 = vsel %vm2276_vm5, %v2265_v44, %v2271_v41  ;;  %v2317_v41 = vmul.f32 %v2303_v10, %v2277_v28  ;;  %vm2479_vm5 = vmand %vm7192_vm10, %vm2386_vm2 }
 0x889   :  { %v2364_v36 = vmul.f32 %v2356_v52, %v2331_v24  ;;  %v2361_v43 = vmul.f32 %v2344_v57, %v2336_v13  ;;  %v2318_v44 = vmul.f32 %v2307_v3, %v2278_v11  ;;  %v2316_v13 = vmul.f32 %v2299_v35, %v2284_v34  ;;  %vm2529_vm10 = vmand %vm2528_vm13, %vm2292_vm9 }
 0x88a   :  { %v2388_v28 = vsel %vm7181_vm11, 1.0, %v8747_v19  ;;  %v7224_v11 = vsel %vm2479_vm5, 1.0, %v8747_v19  ;;  %v2434_v35 = vsel %vm2433_vm1, 1.0, %v8747_v19  ;;  %v7236_v6 = vsel %vm2529_vm10, 1.0, %v8747_v19  ;;  %vm7242_vm9 = vmand %vm7200_vm0, %vm8699_vm8 }
 0x88b   :  { %v2326_v21 = vpop.permute.xlu0 %2325  ;;  %v7197_v52 = vpop.permute.xlu1 %2421  ;;  %v5804_v42 = vpack.c.bf16 %v2364_v36, %v2319_v8  ;;  %v2485_v61 = vrot.slane %v7224_v11, %v6310_v30  ;;  %v2489_v3 = vrot.slane %v7224_v11, %v6314_v32  ;;  %v2397_v24 = vrot.slane %v2388_v28, %v6314_v32 }
 0x88c   :  { %v2329_v55 = vsel %vm1279_vm7, %v2324_v47, %v2326_v21  ;;  %v2330_v50 = vsel %vm1279_vm7, %v2326_v21, %v2328_v26  ;;  %v2401_v34 = vrot.slane %v2388_v28, %v6316_v33  ;;  %vm2423_vm11 = vcmask 39936  }
 0x88d   :  { %v2362_v25 = vmul.f32 %v2348_v46, %v2329_v55  ;;  %v2363_v15 = vmul.f32 %v2352_v14, %v2330_v50  ;;  %5805 = vmatprep.subr.bf16.mxu1 %v5804_v42  ;;  %v5790_v14 = vpack.c.bf16 %v2361_v43, %v2316_v13  ;;  %v2405_v46 = vrot.slane %v2388_v28, %v6312_v31 }
 0x88e   :  { %v2451_v21 = vrot.slane %v2434_v35, %v6312_v31  ;;  %v2493_v43 = vrot.slane %v7224_v11, %v6316_v33  ;;  %v2497_v55 = vrot.slane %v7224_v11, %v6312_v31  ;;  %v2439_v50 = vrot.slane %v2434_v35, %v6310_v30 }
 0x88f   :  { %v5806_v36 = vpack.c.bf16 %v2363_v15, %v2318_v44  ;;  %v2366_v57 = vpop.permute.xlu0 %2365  ;;  %v2463_v49 = vpop.permute.xlu1 %2462  ;;  %v5788_v47 = vpack.c.bf16 %v2362_v25, %v2317_v41  ;;  %v2393_v15 = vrot.slane %v2388_v28, %v6310_v30  ;;  %vm2514_vm5 = vcmask 433152  }
 0x890   :  { %v2377_v42 = vsel %vm2374_vm14, %v7152_v2, %v2366_v57  ;;  %v2539_v44 = vrot.slane %v7236_v6, %v6314_v32  ;;  %v2443_v13 = vrot.slane %v2434_v35, %v6314_v32  ;;  %vm8828_vm13 = vcmp.lt.s32.totalorder %v6285_v23, 16 }
 0x891   :  { %5789 = vmatprep.subr.bf16.mxu0 %v5788_v47  ;;  %5807 = vmatpush1.bf16.msra.mxu1 %v5806_v36  ;;  %v2447_v36 = vrot.slane %v2434_v35, %v6316_v33  ;;  %vm2574_vm1 = vmand %vm7242_vm9, %vm8828_vm13  ;;  %v2470_v47 = vsel %vm2468_vm15, %v2463_v49, %v7119_v60  ;;  %v2543_v28 = vrot.slane %v7236_v6, %v6316_v33  ;;  %vm8829_vm10 = vcmask 392192  }
 0x892   :  { %5791 = vmatpush1.bf16.msra.mxu0 %v5790_v14  ;;  %v2547_v11 = vrot.slane %v7236_v6, %v6312_v31  ;;  %v2413_v27 = vmul.f32 %v2405_v46, %v2377_v42  ;;  %v2382_v53 = vsel %vm2374_vm14, %v2366_v57, %v7144_v12  ;;  %v2575_v40 = vsel %vm2574_vm1, 1.0, %v8747_v19 }
 0x893   :  { %v2371_v10 = vpop.permute.xlu0 %2370  ;;  %v2467_v26 = vpop.permute.xlu1 %2466  ;;  %v2469_v46 = vsel %vm2468_vm15, %v7116_v54, %v2463_v49  ;;  %v2503_v42 = vmul.f32 %v2489_v3, %v2470_v47  ;;  %vm8837_vm13 = vcmask 1043456  }
 0x894   :  { %v2477_v35 = vsel %vm2468_vm15, %v2467_v26, %v7116_v54  ;;  %v2375_v58 = vsel %vm2374_vm14, %v7144_v12, %v2371_v10  ;;  %v2376_v59 = vsel %vm2374_vm14, %v2371_v10, %v7152_v2  ;;  %v2471_v39 = vsel %vm2468_vm15, %v7119_v60, %v2467_v26  ;;  %vm7306_vm14 = vmand %vm7200_vm0, %vm2384_vm12 }
 0x895   :  { %v2505_v37 = vmul.f32 %v2497_v55, %v2477_v35  ;;  %v2411_v10 = vmul.f32 %v2397_v24, %v2375_v58  ;;  %v2412_v38 = vmul.f32 %v2401_v34, %v2376_v59  ;;  %v2410_v54 = vmul.f32 %v2393_v15, %v2382_v53  ;;  %vm8832_vm12 = vmmov %vm8829_vm10 }
 0x896   :  { %v2502_v49 = vmul.f32 %v2485_v61, %v2469_v46  ;;  %v2580_v60 = vrot.slane %v2575_v40, %v6310_v30  ;;  %v2584_v26 = vrot.slane %v2575_v40, %v6314_v32  ;;  %vm8833_vm0 = vmmov %vm8829_vm10 }
 0x897   :  { %v2415_v41 = vpop.permute.xlu0 %2414  ;;  %v2509_v25 = vpop.permute.xlu1 %2508  ;;  %v5812_v53 = vpack.c.bf16 %v2505_v37, %v7075_v22  ;;  %v2535_v37 = vrot.slane %v7236_v6, %v6310_v30  ;;  %vm8834_vm15 = vmmov %vm8833_vm0 }
 0x898   :  { %v2426_v14 = vsel %vm2423_vm11, %v7197_v52, %v2415_v41  ;;  %v2431_v8 = vsel %vm2423_vm11, %v2415_v41, %v7171_v17  ;;  %v2516_v58 = vsel %vm2514_vm5, %v2509_v25, %v7131_v29  ;;  %vm2620_vm9 = vmand %vm7306_vm14, %vm2386_vm2  ;;  %vm2609_vm2 = vcmask 351232  }
 0x899   :  { %v2459_v23 = vmul.f32 %v2451_v21, %v2426_v14  ;;  %v2456_v57 = vmul.f32 %v2439_v50, %v2431_v8  ;;  %vm8838_vm1 = vmmov %vm8837_vm13 }
 0x89a   :  { %vm8840_vm14 = vmmov %vm8838_vm1 }
 0x89b   :  { %v2420_v41 = vpop.permute.xlu0 %2419  ;;  %v2513_v21 = vpop.permute.xlu1 %2512  ;;  %v5808_v14 = vpack.c.bf16 %v2459_v23, %v2413_v27  ;;  %v2504_v23 = vmul.f32 %v2493_v43, %v2471_v39  ;;  %v5794_v47 = vpack.c.bf16 %v2456_v57, %v2410_v54  ;;  %v2592_v39 = vrot.slane %v2575_v40, %v6312_v31 }
 0x89c   :  { %v2424_v12 = vsel %vm2423_vm11, %v7171_v17, %v2420_v41  ;;  %v2425_v2 = vsel %vm2423_vm11, %v2420_v41, %v7197_v52  ;;  %v2588_v17 = vrot.slane %v2575_v40, %v6316_v33  ;;  %v2517_v59 = vsel %vm2514_vm5, %v7131_v29, %v2513_v21 }
 0x89d   :  { %v2457_v0 = vmul.f32 %v2443_v13, %v2424_v12  ;;  %v2458_v16 = vmul.f32 %v2447_v36, %v2425_v2  ;;  %5809 = vmatprep.subr.bf16.mxu1 %v5808_v14  ;;  %v2523_v22 = vsel %vm2514_vm5, %v2513_v21, %v7124_v9  ;;  %v5814_v40 = vpack.c.bf16 %v2504_v23, %v7065_v63 }
 0x89e   :  { %v2553_v29 = vmul.f32 %v2539_v44, %v2516_v58  ;;  %v2554_v1 = vmul.f32 %v2543_v28, %v2517_v59  ;;  %v2555_v63 = vmul.f32 %v2547_v11, %v2523_v22  ;;  %v2621_v28 = vsel %vm2620_vm9, 1.0, %v8747_v19 }
 0x89f   :  { %v5810_v27 = vpack.c.bf16 %v2458_v16, %v2412_v38  ;;  %v2557_v3 = vpop.permute.xlu0 %2556  ;;  %v2559_v55 = vpop.permute.xlu1 %2558  ;;  %v5792_v50 = vpack.c.bf16 %v2457_v0, %v2411_v10  ;;  %v5796_v38 = vpack.c.bf16 %v2503_v42, %v7079_v45  ;;  %v5798_v16 = vpack.c.bf16 %v2502_v49, %v7061_v62 }
 0x8a0   :  { %v2564_v52 = vsel %vm8829_vm10, %v2557_v3, %v2559_v55  ;;  %v2515_v45 = vsel %vm2514_vm5, %v7124_v9, %v2509_v25  ;;  %v2634_v11 = vrot.slane %v2621_v28, %v6316_v33  ;;  %v2630_v42 = vrot.slane %v2621_v28, %v6314_v32  ;;  %vm8839_vm10 = vmmov %vm8838_vm1 }
 0x8a1   :  { %5793 = vmatprep.subr.bf16.mxu0 %v5792_v50  ;;  %5811 = vmatpush1.bf16.msra.mxu1 %v5810_v27  ;;  %v2597_v24 = vmul.f32 %v2580_v60, %v2564_v52  ;;  %v2552_v25 = vmul.f32 %v2535_v37, %v2515_v45  ;;  %v2638_v41 = vrot.slane %v2621_v28, %v6312_v31  ;;  %v2262_v27 = vld [vmem:[%s5634_s4] sm:$0xff]  ;;  %vm8835_vm11 = vcmask 588800   ;;  %v6115_v50 = vld [vmem:[%s6184_s5 + $0x8] sm:$0xff] }
 0x8a2   :  { %5795 = vmatpush1.bf16.msra.mxu0 %v5794_v47  ;;  %5813 = vmatprep.subr.bf16.mxu1 %v5812_v53  ;;  %v2626_v21 = vrot.slane %v2621_v28, %v6310_v30  ;;  %vm8836_vm5 = vmmov %vm8835_vm11  ;;  %vm8844_vm9 = vcmask 15360  }
 0x8a3   :  { %v2561_v15 = vpop.permute.xlu0 %2560  ;;  %5797 = vmatprep.subr.bf16.mxu0 %v5796_v38  ;;  %v2563_v61 = vpop.permute.xlu1 %2562  ;;  %v5802_v46 = vpack.c.bf16 %v2597_v24, %v2552_v25 }
 0x8a4   :  { %v2565_v62 = vsel %vm8832_vm12, %v2559_v55, %v2561_v15  ;;  %v2566_v6 = vsel %vm8833_vm0, %v2561_v15, %v2563_v61  ;;  %v2572_v34 = vsel %vm8834_vm15, %v2563_v61, %v2557_v3  ;;  %v2798_v3 = vld [vmem:[%s5636_s15] sm:$0xff]  ;;  %vm8841_vm12 = vcmask 31744   ;;  %s6163_s15 = smov 119  }
 0x8a5   :  { %v2598_v43 = vmul.f32 %v2584_v26, %v2565_v62  ;;  %v2599_v9 = vmul.f32 %v2588_v17, %v2566_v6  ;;  %v2600_v44 = vmul.f32 %v2592_v39, %v2572_v34  ;;  %5815 = vmatpush1.bf16.msra.mxu1 %v5814_v40  ;;  %v6114_v55 = vld [vmem:[%s6184_s5] sm:$0xff]  ;;  %vm8842_vm0 = vmmov %vm8841_vm12  ;;  %vm8843_vm15 = vcmask 23552  }
 0x8a6   :  { %5799 = vmatpush1.bf16.msra.mxu0 %v5798_v16 }
 0x8a7   :  { %v5818_v13 = vpack.c.bf16 %v2599_v9, %v2554_v1  ;;  %v2602_v36 = vpop.permute.xlu0 %2601  ;;  %v2604_v56 = vpop.permute.xlu1 %2603  ;;  %v5800_v35 = vpack.c.bf16 %v2598_v43, %v2553_v29  ;;  %v5816_v8 = vpack.c.bf16 %v2600_v44, %v2555_v63 }
 0x8a8   :  { %v2610_v14 = vsel %vm2609_vm2, %v2602_v36, %v2604_v56 }
 0x8a9   :  { %5801 = vmatprep.subr.bf16.mxu0 %v5800_v35  ;;  %5817 = vmatprep.subr.bf16.mxu1 %v5816_v8  ;;  %v2643_v23 = vmul.f32 %v2626_v21, %v2610_v14 }
 0x8aa   :  { %5803 = vmatpush1.bf16.msra.mxu0 %v5802_v46  ;;  %5819 = vmatpush1.bf16.msra.mxu1 %v5818_v13 }
 0x8ab   :  { %v2606_v57 = vpop.permute.xlu0 %2605  ;;  %v2608_v12 = vpop.permute.xlu1 %2607 }
 0x8ac   :  { %v2611_v2 = vsel %vm2609_vm2, %v2604_v56, %v2606_v57  ;;  %v2612_v10 = vsel %vm2609_vm2, %v2606_v57, %v2608_v12  ;;  %v2618_v54 = vsel %vm2609_vm2, %v2608_v12, %v2602_v36  ;;  %v8845_v36 = vld [vmem:[#allocation38_spill] sm:$0xff]  ;;  %vm8846_vm2 = vmmov %vm8844_vm9 }
 0x8ad   :  { %v2645_v49 = vmul.f32 %v2634_v11, %v2612_v10  ;;  %v2644_v60 = vmul.f32 %v2630_v42, %v2611_v2  ;;  %v2646_v26 = vmul.f32 %v2638_v41, %v2618_v54  ;;  %v8852_v54 = vld [vmem:[#allocation48_spill] sm:$0xff] }
 0x8af   :  { %2672 = vmatprep.subr.mxu0 %v2644_v60  ;;  %2743 = vmatprep.subr.mxu1 %v2646_v26  ;;  %v8853_v60 = vld [vmem:[#allocation39_spill] sm:$0xff] }
 0x8b0   :  { %2673 = vmatpush1.msra.mxu0 %v2643_v23  ;;  %2744 = vmatpush1.msra.mxu1 %v2645_v49 }
 0x8b1   :  { %5677 = vmatmul.mubr.msk.f32.vlgmr.msra.gmra.mrb[16].mxu0 %vm8835_vm11, %v2262_v27  ;;  %5678 = vmatmul.mubr.msk.f32.vlgmr.msra.gmra.mrb[16].mxu1 %vm8836_vm5, %v2262_v27  ;;  %vm8847_vm11 = vmmov %vm8843_vm15 }
 0x8b2   :  { %5679 = vmatprep.subr.msk.mxu0 %vm8837_vm13, %v6207_v4  ;;  %5682 = vmatprep.subr.msk.mxu1 %vm8838_vm1, %v6211_v5  ;;  %vm8848_vm5 = vmmov %vm8847_vm11 }
 0x8b3   :  { %5680 = vmatpush1.msk.msra.mxu0 %vm8839_vm10, %v6114_v55  ;;  %2872 = vmatprep.mubr.f32.mxu0 %v8747_v19  ;;  %vm8849_vm13 = vmmov %vm8848_vm5 }
 0x8b4   :  { %5683 = vmatpush1.msk.msra.mxu1 %vm8840_vm14, %v6115_v50  ;;  %2943 = vmatprep.mubr.f32.mxu1 %v8747_v19  ;;  %vm8850_vm1 = vmmov %vm8846_vm2  ;;  %vm8854_vm14 = vcmask 7168  }
 0x8b5   :  { %5681 = vmatmul.mubr.msk.f32.vlgmr.msra.gmra.mrb[18].mxu0 %vm8841_vm12, %v2798_v3  ;;  %5684 = vmatmul.mubr.msk.f32.vlgmr.msra.gmra.mrb[18].mxu1 %vm8842_vm0, %v2798_v3  ;;  %vm8851_vm10 = vmmov %vm8850_vm1  ;;  %vm8857_vm0 = vcmask 1039360  }
 0x8b6   :  { %3155 = vmatprep.mubr.f32.mxu0 %v8747_v19  ;;  %3226 = vmatprep.mubr.f32.mxu1 %v8747_v19  ;;  %vm8855_vm12 = vmmov %vm8854_vm14 }
 0x8bc   :  { %v2803_v53 = vpop.permute.xlu0 %2802 }
 0x984   :  { %v7356_v17 = vpop.f32.mrb[16].mxu0  ;;  %v7358_v47 = vpop.f32.mrb[16].mxu1 }
 0x985   :  { %v7360_v58 = vpop.f32.mrb[17].mxu0  ;;  %v7362_v59 = vpop.f32.mrb[17].mxu1 }
 0x988   :  { %v2874_v52 = vpop.f32.mrb[18].mxu0  ;;  %v2945_v38 = vpop.f32.mrb[18].mxu1 }
 0x989   :  { %v7364_v39 = vadd.f32 %v2874_v52, %v2803_v53  ;;  %v2876_v0 = vpop.f32.mrb[19].mxu0  ;;  %v2947_v16 = vpop.f32.mrb[19].mxu1  ;;  %v7370_v37 = vadd.f32 %v2945_v38, %v2803_v53  ;;  %v8856_v52 = vld [vmem:[#allocation13_spill] sm:$0xff]  ;;  %v8859_v38 = vld [vmem:[#allocation12_spill] sm:$0xff] }
 0x98a   :  { %v7380_v22 = vadd.f32 %v2947_v16, %v2803_v53  ;;  %v7386_v40 = vadd.f32 %v2876_v0, %v2803_v53 }
 0x98b   :  { %3018 = vrot.lane.b32.xlu1 %v7364_v39, %s6127_s23  ;;  %2958 = vrot.lane.b32.xlu0 %v7364_v39, %s6121_s6 }
 0x98f   :  { %3022 = vrot.lane.b32.xlu1 %v7370_v37, %s6127_s23  ;;  %2962 = vrot.lane.b32.xlu0 %v7370_v37, %s6121_s6 }
 0x993   :  { %3039 = vrot.lane.b32.xlu1 %v7364_v39, %s6144_s29  ;;  %2979 = vrot.lane.b32.xlu0 %v7364_v39, %s6128_s24 }
 0x997   :  { %2952 = vrot.lane.b32.xlu1 %v7380_v22, %s6121_s6  ;;  %2983 = vrot.lane.b32.xlu0 %v7370_v37, %s6128_s24 }
 0x99b   :  { %2960 = vrot.lane.b32.xlu1 %v7386_v40, %s6121_s6  ;;  %3000 = vrot.lane.b32.xlu0 %v7364_v39, %s6125_s18  ;;  %s6158_s6 = smov 24  }
 0x99c   :  { %s5639_s10 = sld [smem:[%s8604_s0 + %s6158_s6]]   ;;  %s6164_s6 = smov 105  }
 0x99f   :  { %2976 = vrot.lane.b32.xlu1 %v7380_v22, %s6128_s24  ;;  %3004 = vrot.lane.b32.xlu0 %v7370_v37, %s6125_s18 }
 0x9a2   :  { %v3081_v45 = vld [vmem:[%s5639_s10] sm:$0xff] }
 0x9a3   :  { %2981 = vrot.lane.b32.xlu1 %v7386_v40, %s6128_s24  ;;  %3020 = vrot.lane.b32.xlu0 %v7386_v40, %s6127_s23  ;;  %s6165_s24 = smov 4  }
 0x9a7   :  { %2997 = vrot.lane.b32.xlu1 %v7380_v22, %s6125_s18  ;;  %3024 = vrot.lane.b32.xlu0 %v7380_v22, %s6127_s23 }
 0x9ab   :  { %3002 = vrot.lane.b32.xlu1 %v7386_v40, %s6125_s18  ;;  %3041 = vrot.lane.b32.xlu0 %v7386_v40, %s6144_s29 }
 0x9af   :  { %3043 = vrot.lane.b32.xlu1 %v7370_v37, %s6144_s29  ;;  %3045 = vrot.lane.b32.xlu0 %v7380_v22, %s6144_s29  ;;  %s6166_s29 = smov 12  }
 0x9b3   :  { %3060 = vrot.lane.b32.xlu1 %v7364_v39, %s6134_s19  ;;  %3062 = vrot.lane.b32.xlu0 %v7386_v40, %s6134_s19 }
 0x9b7   :  { %3064 = vrot.lane.b32.xlu1 %v7370_v37, %s6134_s19  ;;  %3066 = vrot.lane.b32.xlu0 %v7380_v22, %s6134_s19  ;;  %s6159_s19 = smov 23  }
 0x9b8   :  { %s5638_s25 = sld [smem:[%s8604_s0 + %s6159_s19]]  }
 0x9bb   :  { %3084 = vperm.xlu1 %6109, %v3081_v45  }
 0x9fd   :  { %v2959_v29 = vpop.permute.xlu0 %2958  ;;  %v3019_v1 = vpop.permute.xlu1 %3018 }
 0xa01   :  { %v2963_v15 = vpop.permute.xlu0 %2962  ;;  %v3023_v61 = vpop.permute.xlu1 %3022 }
 0xa05   :  { %v2980_v24 = vpop.permute.xlu0 %2979  ;;  %v3040_v62 = vpop.permute.xlu1 %3039 }
 0xa09   :  { %v2984_v6 = vpop.permute.xlu0 %2983  ;;  %v2953_v34 = vpop.permute.xlu1 %2952 }
 0xa0a   :  { %v2966_v9 = vsel %vm8843_vm15, %v2963_v15, %v2953_v34  ;;  %v2971_v11 = vsel %vm8849_vm13, %v2953_v34, %v2959_v29  ;;  %vm8858_vm15 = vmmov %vm8857_vm0 }
 0xa0b   :  { %v2975_v28 = vmul.f32 %v2966_v9, %v8845_v36  ;;  %v2972_v26 = vmul.f32 %v2971_v11, %v8853_v60  ;;  %vm8866_vm13 = vmmov %vm8857_vm0  ;;  %v8867_v36 = vld [vmem:[#allocation17_spill] sm:$0xff] }
 0xa0d   :  { %v3001_v63 = vpop.permute.xlu0 %3000  ;;  %v2961_v43 = vpop.permute.xlu1 %2960 }
 0xa0e   :  { %v2964_v8 = vsel %vm8847_vm11, %v2959_v29, %v2961_v43  ;;  %v2965_v46 = vsel %vm8848_vm5, %v2961_v43, %v2963_v15  ;;  %vm8863_vm5 = vcmask 1031168   ;;  %v8864_v43 = vld [vmem:[#allocation14_spill] sm:$0xff] }
 0xa0f   :  { %v2973_v2 = vmul.f32 %v2964_v8, %v6682_v20  ;;  %v2974_v10 = vmul.f32 %v2965_v46, %v6693_v18 }
 0xa11   :  { %v3005_v44 = vpop.permute.xlu0 %3004  ;;  %v2977_v25 = vpop.permute.xlu1 %2976 }
 0xa12   :  { %v2987_v13 = vsel %vm8844_vm9, %v2984_v6, %v2977_v25  ;;  %v2992_v56 = vsel %vm8846_vm2, %v2977_v25, %v2980_v24  ;;  %vm8860_vm9 = vmmov %vm8857_vm0  ;;  %v8865_v25 = vld [vmem:[#allocation15_spill] sm:$0xff] }
 0xa13   :  { %v2996_v35 = vmul.f32 %v2987_v13, %v6862_v48  ;;  %v2993_v14 = vmul.f32 %v2992_v56, %v6867_v51  ;;  %vm8861_vm2 = vmmov %vm8855_vm12  ;;  %v8868_v56 = vld [vmem:[#allocation16_spill] sm:$0xff] }
 0xa14   :  { %vm8862_vm11 = vmmov %vm8861_vm2 }
 0xa15   :  { %v3021_v42 = vpop.permute.xlu0 %3020  ;;  %v2982_v41 = vpop.permute.xlu1 %2981  ;;  %v5832_v21 = vpack.c.bf16 %v2996_v35, %v2975_v28  ;;  %v5822_v51 = vpack.c.bf16 %v2993_v14, %v2972_v26 }
 0xa16   :  { %v2985_v57 = vsel %vm8850_vm1, %v2980_v24, %v2982_v41  ;;  %v2986_v12 = vsel %vm8851_vm10, %v2982_v41, %v2984_v6  ;;  %v3027_v18 = vsel %vm8857_vm0, %v3021_v42, %v3023_v61  ;;  %vm8871_vm1 = vmmov %vm8863_vm5 }
 0xa17   :  { %v2994_v48 = vmul.f32 %v2985_v57, %v6870_v7  ;;  %v2995_v49 = vmul.f32 %v2986_v12, %v8852_v54  ;;  %5833 = vmatprep.subr.bf16.mxu1 %v5832_v21  ;;  %v3036_v28 = vmul.f32 %v3027_v18, %v8867_v36  ;;  %v8870_v21 = vld [vmem:[#allocation52_spill] sm:$0xff]  ;;  %vm8872_vm10 = vmmov %vm8871_vm1  ;;  %v8874_v12 = vld [vmem:[#allocation51_spill] sm:$0xff] }
 0xa18   :  { %v8876_v54 = vld [vmem:[#allocation49_spill] sm:$0xff]  ;;  %v8882_v18 = vld [vmem:[#allocation36_spill] sm:$0xff] }
 0xa19   :  { %v5834_v23 = vpack.c.bf16 %v2995_v49, %v2974_v10  ;;  %v3025_v27 = vpop.permute.xlu0 %3024  ;;  %v2998_v3 = vpop.permute.xlu1 %2997  ;;  %v5820_v55 = vpack.c.bf16 %v2994_v48, %v2973_v2  ;;  %v8875_v10 = vld [vmem:[#allocation50_spill] sm:$0xff] }
 0xa1a   :  { %v3008_v50 = vsel %vm8854_vm14, %v3005_v44, %v2998_v3  ;;  %v3013_v53 = vsel %vm8855_vm12, %v2998_v3, %v3001_v63  ;;  %v3028_v7 = vsel %vm8858_vm15, %v3023_v61, %v3025_v27  ;;  %v3034_v15 = vsel %vm8860_vm9, %v3025_v27, %v3019_v1  ;;  %vm8873_vm14 = vmmov %vm8871_vm1 }
 0xa1b   :  { %v3017_v20 = vmul.f32 %v3008_v50, %v8856_v52  ;;  %5821 = vmatprep.subr.bf16.mxu0 %v5820_v55  ;;  %5835 = vmatpush1.bf16.msra.mxu1 %v5834_v23  ;;  %v3014_v0 = vmul.f32 %v3013_v53, %v8859_v38  ;;  %v3026_v61 = vsel %vm8866_vm13, %v3019_v1, %v3021_v42  ;;  %vm8878_vm12 = vcmask 1022976  }
 0xa1c   :  { %5823 = vmatpush1.bf16.msra.mxu0 %v5822_v51  ;;  %v3037_v35 = vmul.f32 %v3028_v7, %v8868_v56  ;;  %vm8879_vm0 = vmmov %vm8878_vm12 }
 0xa1d   :  { %v3042_v16 = vpop.permute.xlu0 %3041  ;;  %v3003_v45 = vpop.permute.xlu1 %3002  ;;  %v5836_v29 = vpack.c.bf16 %v7380_v22, %v3017_v20  ;;  %v8869_v22 = vld [vmem:[#allocation18_spill] sm:$0xff]  ;;  %v5826_v46 = vpack.c.bf16 %v7364_v39, %v3014_v0  ;;  %vm8880_vm15 = vmmov %vm8879_vm0  ;;  %v8883_v0 = vld [vmem:[#allocation35_spill] sm:$0xff] }
 0xa1e   :  { %v3006_v24 = vsel %vm8861_vm2, %v3001_v63, %v3003_v45  ;;  %v3007_v6 = vsel %vm8862_vm11, %v3003_v45, %v3005_v44  ;;  %v3047_v34 = vsel %vm8863_vm5, %v3040_v62, %v3042_v16  ;;  %v3038_v8 = vmul.f32 %v3034_v15, %v8869_v22  ;;  %vm8881_vm9 = vmmov %vm8879_vm0  ;;  %v8884_v45 = vld [vmem:[#allocation37_spill] sm:$0xff]  ;;  %v8885_v15 = vld [vmem:[#allocation34_spill] sm:$0xff] }
 0xa1f   :  { %v3015_v9 = vmul.f32 %v3006_v24, %v8864_v43  ;;  %v3016_v13 = vmul.f32 %v3007_v6, %v8865_v25  ;;  %5837 = vmatprep.subr.bf16.mxu1 %v5836_v29  ;;  %v3056_v14 = vmul.f32 %v3047_v34, %v8870_v21  ;;  %v2950_v6 = vld [vmem:[%s5638_s25] sm:$0xff]  ;;  %vm3087_vm2 = vcmask 457728   ;;  %s5627_s25 = sld [smem:[%s8604_s0 + %s6166_s29]]  }
 0xa20   :  { %vm8886_vm11 = vcmask 392192   ;;  %vm8887_vm5 = vcmask 261120  }
 0xa21   :  { %v5838_v63 = vpack.c.bf16 %v7370_v37, %v3016_v13  ;;  %v3046_v44 = vpop.permute.xlu0 %3045  ;;  %v3044_v11 = vpop.permute.xlu1 %3043  ;;  %v5824_v41 = vpack.c.bf16 %v7386_v40, %v3015_v9  ;;  %v8877_v37 = vld [vmem:[#allocation19_spill] sm:$0xff]  ;;  %vm8889_vm13 = vmmov %vm8887_vm5 }
 0xa22   :  { %v3055_v57 = vsel %vm8871_vm1, %v3046_v44, %v3040_v62  ;;  %v3048_v1 = vsel %vm8872_vm10, %v3042_v16, %v3044_v11  ;;  %v3049_v42 = vsel %vm8873_vm14, %v3044_v11, %v3046_v44  ;;  %v3035_v49 = vmul.f32 %v3026_v61, %v8877_v37  ;;  %vm8891_vm1 = vmmov %vm8886_vm11 }
 0xa23   :  { %v3059_v2 = vmul.f32 %v3055_v57, %v8874_v12  ;;  %v3057_v48 = vmul.f32 %v3048_v1, %v8875_v10  ;;  %v3058_v39 = vmul.f32 %v3049_v42, %v8876_v54  ;;  %5825 = vmatprep.subr.bf16.mxu0 %v5824_v41  ;;  %5839 = vmatpush1.bf16.msra.mxu1 %v5838_v63  ;;  %vm8892_vm10 = vmmov %vm8891_vm1 }
 0xa24   :  { %5827 = vmatpush1.bf16.msra.mxu0 %v5826_v46  ;;  %v5830_v27 = vpack.c.bf16 %v3056_v14, %v3035_v49  ;;  %vm8893_vm14 = vmmov %vm8891_vm1 }
 0xa25   :  { %v5842_v40 = vpack.c.bf16 %v3058_v39, %v3037_v35  ;;  %v3063_v62 = vpop.permute.xlu0 %3062  ;;  %v3061_v60 = vpop.permute.xlu1 %3060  ;;  %v5828_v26 = vpack.c.bf16 %v3057_v48, %v3036_v28  ;;  %v5840_v23 = vpack.c.bf16 %v3059_v2, %v3038_v8 }
 0xa26   :  { %v3068_v3 = vsel %vm8878_vm12, %v3061_v60, %v3063_v62  ;;  %vm8895_vm12 = vmmov %vm8887_vm5 }
 0xa27   :  { %5829 = vmatprep.subr.bf16.mxu0 %v5828_v26  ;;  %5841 = vmatprep.subr.bf16.mxu1 %v5840_v23  ;;  %v3077_v24 = vmul.f32 %v3068_v3, %v8885_v15  ;;  %v8890_v26 = vld [vmem:[#allocation53_spill] sm:$0xff] }
 0xa28   :  { %5831 = vmatpush1.bf16.msra.mxu0 %v5830_v27  ;;  %5843 = vmatpush1.bf16.msra.mxu1 %v5842_v40  ;;  %v8888_v40 = vld [vmem:[#allocation30_spill] sm:$0xff] }
 0xa29   :  { %v3067_v55 = vpop.permute.xlu0 %3066  ;;  %v3065_v51 = vpop.permute.xlu1 %3064 }
 0xa2a   :  { %v3076_v50 = vsel %vm8879_vm0, %v3067_v55, %v3061_v60  ;;  %v3069_v53 = vsel %vm8880_vm15, %v3063_v62, %v3065_v51  ;;  %v3070_v20 = vsel %vm8881_vm9, %v3065_v51, %v3067_v55  ;;  %vm8896_vm0 = vmmov %vm8887_vm5  ;;  %vm8902_vm15 = vcmask 130048  }
 0xa2b   :  { %v3079_v7 = vmul.f32 %v3070_v20, %v8882_v18  ;;  %v3078_v16 = vmul.f32 %v3069_v53, %v8883_v0  ;;  %v3080_v29 = vmul.f32 %v3076_v50, %v8884_v45  ;;  %v8894_v20 = vld [vmem:[#allocation54_spill] sm:$0xff]  ;;  %vm8903_vm9 = vmmov %vm8902_vm15 }
 0xa2d   :  { %3103 = vmatprep.subr.mxu0 %v3078_v16  ;;  %3174 = vmatprep.subr.mxu1 %v3080_v29  ;;  %v8897_v16 = vld [vmem:[#allocation32_spill] sm:$0xff]  ;;  %v8898_v29 = vld [vmem:[#allocation33_spill] sm:$0xff] }
 0xa2e   :  { %3104 = vmatpush1.msra.mxu0 %v3077_v24  ;;  %3175 = vmatpush1.msra.mxu1 %v3079_v7  ;;  %v8899_v24 = vld [vmem:[#allocation55_spill] sm:$0xff] }
 0xa2f   :  { %5685 = vmatmul.mubr.msk.f32.vlgmr.msra.gmra.mrb[20].mxu0 %vm3087_vm2, %v2950_v6  ;;  %5686 = vmatmul.mubr.msk.f32.vlgmr.msra.gmra.mrb[20].mxu1 %vm3087_vm2, %v2950_v6 }
 0xa30   :  { %3437 = vmatprep.mubr.f32.mxu0 %v8747_v19  ;;  %3508 = vmatprep.mubr.f32.mxu1 %v8747_v19 }
 0xa3a   :  { %v3085_v34 = vpop.permute.xlu1 %3084 }
 0xb02   :  { %v3157_v9 = vpop.f32.mrb[20].mxu0  ;;  %v3228_v13 = vpop.f32.mrb[20].mxu1 }
 0xb03   :  { %v7483_v61 = vadd.f32 %v3157_v9, %v3085_v34  ;;  %v3159_v28 = vpop.f32.mrb[21].mxu0  ;;  %v3230_v35 = vpop.f32.mrb[21].mxu1  ;;  %v7489_v8 = vadd.f32 %v3228_v13, %v3085_v34  ;;  %v8901_v13 = vld [vmem:[#allocation31_spill] sm:$0xff] }
 0xb04   :  { %v7499_v46 = vadd.f32 %v3230_v35, %v3085_v34  ;;  %v7505_v63 = vadd.f32 %v3159_v28, %v3085_v34  ;;  %v8900_v34 = vld [vmem:[#allocation56_spill] sm:$0xff] }
 0xb05   :  { %3301 = vrot.lane.b32.xlu0 %v7483_v61, %s6132_s13  ;;  %3241 = vrot.lane.b32.xlu1 %v7483_v61, %s6137_s22 }
 0xb09   :  { %3305 = vrot.lane.b32.xlu0 %v7489_v8, %s6132_s13  ;;  %3245 = vrot.lane.b32.xlu1 %v7489_v8, %s6137_s22 }
 0xb0d   :  { %3322 = vrot.lane.b32.xlu0 %v7483_v61, %s6148_s17  ;;  %3262 = vrot.lane.b32.xlu1 %v7483_v61, %s6146_s9 }
 0xb11   :  { %3235 = vrot.lane.b32.xlu0 %v7499_v46, %s6137_s22  ;;  %3266 = vrot.lane.b32.xlu1 %v7489_v8, %s6146_s9 }
 0xb15   :  { %3243 = vrot.lane.b32.xlu0 %v7505_v63, %s6137_s22  ;;  %3283 = vrot.lane.b32.xlu1 %v7483_v61, %s6130_s7  ;;  %s6160_s22 = smov 26  }
 0xb16   :  { %s5641_s4 = sld [smem:[%s8604_s0 + %s6160_s22]]   ;;  %s6167_s22 = smov 20  }
 0xb19   :  { %3259 = vrot.lane.b32.xlu0 %v7499_v46, %s6146_s9  ;;  %3287 = vrot.lane.b32.xlu1 %v7489_v8, %s6130_s7 }
 0xb1c   :  { %v3364_v44 = vld [vmem:[%s5641_s4] sm:$0xff]  ;;  %s5635_s4 = sld [smem:[%s8604_s0 + %s6167_s22]]   ;;  %s6175_s22 = smov 33  }
 0xb1d   :  { %3264 = vrot.lane.b32.xlu0 %v7505_v63, %s6146_s9  ;;  %3303 = vrot.lane.b32.xlu1 %v7505_v63, %s6132_s13 }
 0xb21   :  { %3280 = vrot.lane.b32.xlu0 %v7499_v46, %s6130_s7  ;;  %3307 = vrot.lane.b32.xlu1 %v7499_v46, %s6132_s13 }
 0xb25   :  { %3285 = vrot.lane.b32.xlu0 %v7505_v63, %s6130_s7  ;;  %3324 = vrot.lane.b32.xlu1 %v7505_v63, %s6148_s17 }
 0xb29   :  { %3326 = vrot.lane.b32.xlu0 %v7489_v8, %s6148_s17  ;;  %3328 = vrot.lane.b32.xlu1 %v7499_v46, %s6148_s17 }
 0xb2d   :  { %3343 = vrot.lane.b32.xlu0 %v7483_v61, %s6139_s26  ;;  %3345 = vrot.lane.b32.xlu1 %v7505_v63, %s6139_s26 }
 0xb31   :  { %3347 = vrot.lane.b32.xlu0 %v7489_v8, %s6139_s26  ;;  %3349 = vrot.lane.b32.xlu1 %v7499_v46, %s6139_s26  ;;  %s6161_s26 = smov 25  }
 0xb32   :  { %s5640_s11 = sld [smem:[%s8604_s0 + %s6161_s26]]   ;;  %s6168_s26 = smov 28  }
 0xb35   :  { %3367 = vperm.xlu0 %6108, %v3364_v44  }
 0xb77   :  { %v3302_v11 = vpop.permute.xlu0 %3301  ;;  %v3242_v41 = vpop.permute.xlu1 %3241 }
 0xb7b   :  { %v3306_v21 = vpop.permute.xlu0 %3305  ;;  %v3246_v14 = vpop.permute.xlu1 %3245 }
 0xb7f   :  { %v7542_v57 = vpop.permute.xlu0 %3322  ;;  %v3263_v1 = vpop.permute.xlu1 %3262 }
 0xb83   :  { %v3236_v42 = vpop.permute.xlu0 %3235  ;;  %v3267_v12 = vpop.permute.xlu1 %3266 }
 0xb84   :  { %v3249_v48 = vsel %vm8886_vm11, %v3246_v14, %v3236_v42  ;;  %v3254_v55 = vsel %vm8893_vm14, %v3236_v42, %v3242_v41  ;;  %vm8905_vm11 = vcmask 916480   ;;  %vm8913_vm14 = vcmask 785408  }
 0xb85   :  { %v3258_v62 = vmul.f32 %v3249_v48, %v8888_v40  ;;  %v3255_v28 = vmul.f32 %v3254_v55, %v8901_v13 }
 0xb87   :  { %v3244_v2 = vpop.permute.xlu0 %3243  ;;  %v3284_v10 = vpop.permute.xlu1 %3283 }
 0xb88   :  { %v3247_v27 = vsel %vm8891_vm1, %v3242_v41, %v3244_v2  ;;  %v3248_v3 = vsel %vm8892_vm10, %v3244_v2, %v3246_v14  ;;  %v8904_v2 = vld [vmem:[#allocation23_spill] sm:$0xff]  ;;  %vm8909_vm1 = vmmov %vm8903_vm9 }
 0xb89   :  { %v3256_v45 = vmul.f32 %v3247_v27, %v8897_v16  ;;  %v3257_v15 = vmul.f32 %v3248_v3, %v8898_v29  ;;  %vm8910_vm10 = vmmov %vm8909_vm1 }
 0xb8b   :  { %v3260_v54 = vpop.permute.xlu0 %3259  ;;  %v3288_v39 = vpop.permute.xlu1 %3287 }
 0xb8c   :  { %v3270_v49 = vsel %vm8887_vm5, %v3267_v12, %v3260_v54  ;;  %v3275_v60 = vsel %vm8889_vm13, %v3260_v54, %v3263_v1  ;;  %vm8907_vm5 = vmmov %vm8905_vm11 }
 0xb8d   :  { %v3279_v23 = vmul.f32 %v3270_v49, %v8890_v26  ;;  %v3276_v18 = vmul.f32 %v3275_v60, %v8894_v20  ;;  %v8906_v49 = vld [vmem:[#allocation22_spill] sm:$0xff]  ;;  %vm8908_vm13 = vmmov %vm8907_vm5  ;;  %v8912_v20 = vld [vmem:[#allocation25_spill] sm:$0xff] }
 0xb8f   :  { %v3265_v51 = vpop.permute.xlu0 %3264  ;;  %v3304_v50 = vpop.permute.xlu1 %3303  ;;  %v5856_v53 = vpack.c.bf16 %v3279_v23, %v3258_v62  ;;  %v5846_v42 = vpack.c.bf16 %v3276_v18, %v3255_v28 }
 0xb90   :  { %v3268_v7 = vsel %vm8895_vm12, %v3263_v1, %v3265_v51  ;;  %v3269_v0 = vsel %vm8896_vm0, %v3265_v51, %v3267_v12  ;;  %v3310_v54 = vsel %vm8905_vm11, %v3304_v50, %v3306_v21  ;;  %v8911_v51 = vld [vmem:[#allocation24_spill] sm:$0xff]  ;;  %vm8914_vm12 = vmmov %vm8907_vm5 }
 0xb91   :  { %v3277_v6 = vmul.f32 %v3268_v7, %v8899_v24  ;;  %v3278_v9 = vmul.f32 %v3269_v0, %v8900_v34  ;;  %5857 = vmatprep.subr.bf16.mxu1 %v5856_v53  ;;  %v8915_v0 = vld [vmem:[#allocation28_spill] sm:$0xff]  ;;  %vm8919_vm0 = vmmov %vm8913_vm14 }
 0xb92   :  { %v3319_v16 = vmul.f32 %v3310_v54, %v8915_v0 }
 0xb93   :  { %v5858_v35 = vpack.c.bf16 %v3278_v9, %v3257_v15  ;;  %v3281_v44 = vpop.permute.xlu0 %3280  ;;  %v3308_v41 = vpop.permute.xlu1 %3307  ;;  %v5844_v14 = vpack.c.bf16 %v3277_v6, %v3256_v45  ;;  %v8916_v45 = vld [vmem:[#allocation27_spill] sm:$0xff]  ;;  %v8917_v15 = vld [vmem:[#allocation26_spill] sm:$0xff]  ;;  %v8918_v9 = vld [vmem:[#allocation60_spill] sm:$0xff] }
 0xb94   :  { %v3291_v1 = vsel %vm8902_vm15, %v3288_v39, %v3281_v44  ;;  %v3296_v12 = vsel %vm8903_vm9, %v3281_v44, %v3284_v10  ;;  %v3311_v62 = vsel %vm8907_vm5, %v3306_v21, %v3308_v41  ;;  %v3317_v27 = vsel %vm8908_vm13, %v3308_v41, %v3302_v11  ;;  %vm8920_vm15 = vmmov %vm8919_vm0 }
 0xb95   :  { %v3300_v48 = vmul.f32 %v3291_v1, %v8904_v2  ;;  %5845 = vmatprep.subr.bf16.mxu0 %v5844_v14  ;;  %5859 = vmatpush1.bf16.msra.mxu1 %v5858_v35  ;;  %v3297_v40 = vmul.f32 %v3296_v12, %v8906_v49  ;;  %v3309_v21 = vsel %vm8914_vm12, %v3302_v11, %v3304_v50  ;;  %vm8921_vm9 = vmmov %vm8919_vm0  ;;  %v8922_v35 = vld [vmem:[#allocation58_spill] sm:$0xff]  ;;  %v8924_v14 = vld [vmem:[#allocation59_spill] sm:$0xff] }
 0xb96   :  { %5847 = vmatpush1.bf16.msra.mxu0 %v5846_v42 }
 0xb97   :  { %v3286_v60 = vpop.permute.xlu0 %3285  ;;  %v3325_v26 = vpop.permute.xlu1 %3324  ;;  %v5860_v23 = vpack.c.bf16 %v7499_v46, %v3300_v48  ;;  %v3320_v46 = vmul.f32 %v3311_v62, %v8916_v45  ;;  %v5850_v29 = vpack.c.bf16 %v7483_v61, %v3297_v40  ;;  %v8923_v61 = vld [vmem:[#allocation57_spill] sm:$0xff] }
 0xb98   :  { %v3289_v3 = vsel %vm8909_vm1, %v3284_v10, %v3286_v60  ;;  %v3290_v55 = vsel %vm8910_vm10, %v3286_v60, %v3288_v39  ;;  %v3330_v7 = vsel %vm8913_vm14, %v7542_v57, %v3325_v26  ;;  %v3321_v10 = vmul.f32 %v3317_v27, %v8917_v15 }
 0xb99   :  { %v3298_v53 = vmul.f32 %v3289_v3, %v8911_v51  ;;  %v3299_v18 = vmul.f32 %v3290_v55, %v8912_v20  ;;  %5861 = vmatprep.subr.bf16.mxu1 %v5860_v23  ;;  %v3339_v13 = vmul.f32 %v3330_v7, %v8918_v9  ;;  %v8926_v55 = vld [vmem:[#allocation43_spill] sm:$0xff] }
 0xb9b   :  { %v5862_v39 = vpack.c.bf16 %v7489_v8, %v3299_v18  ;;  %v3327_v24 = vpop.permute.xlu0 %3326  ;;  %v3329_v6 = vpop.permute.xlu1 %3328  ;;  %v5848_v34 = vpack.c.bf16 %v7505_v63, %v3298_v53  ;;  %v8925_v8 = vld [vmem:[#allocation29_spill] sm:$0xff]  ;;  %v8927_v18 = vld [vmem:[#allocation42_spill] sm:$0xff] }
 0xb9c   :  { %v3331_v28 = vsel %vm8919_vm0, %v3325_v26, %v3327_v24  ;;  %v3332_v11 = vsel %vm8920_vm15, %v3327_v24, %v3329_v6  ;;  %v3338_v50 = vsel %vm8921_vm9, %v3329_v6, %v7542_v57  ;;  %v3318_v1 = vmul.f32 %v3309_v21, %v8925_v8  ;;  %v8928_v21 = vld [vmem:[#allocation41_spill] sm:$0xff] }
 0xb9d   :  { %v3340_v44 = vmul.f32 %v3331_v28, %v8922_v35  ;;  %v3341_v41 = vmul.f32 %v3332_v11, %v8923_v61  ;;  %v3342_v42 = vmul.f32 %v3338_v50, %v8924_v14  ;;  %5849 = vmatprep.subr.bf16.mxu0 %v5848_v34  ;;  %5863 = vmatpush1.bf16.msra.mxu1 %v5862_v39  ;;  %v2647_v61 = vld [vmem:[%s5635_s4] sm:$0xff]  ;;  %vm3529_vm15 = vcmask 973824   ;;  %s5648_s4 = sld [smem:[%s8604_s0 + %s6175_s22]]  }
 0xb9e   :  { %5851 = vmatpush1.bf16.msra.mxu0 %v5850_v29  ;;  %v5854_v40 = vpack.c.bf16 %v3339_v13, %v3318_v1  ;;  %v6116_v1 = vld [vmem:[%s6282_s30] sm:$0xf] }
 0xb9f   :  { %v5866_v63 = vpack.c.bf16 %v3341_v41, %v3320_v46  ;;  %v3344_v12 = vpop.permute.xlu0 %3343  ;;  %v3346_v48 = vpop.permute.xlu1 %3345  ;;  %v5852_v57 = vpack.c.bf16 %v3340_v44, %v3319_v16  ;;  %v5864_v54 = vpack.c.bf16 %v3342_v42, %v3321_v10  ;;  %v8929_v46 = vld [vmem:[#allocation40_spill] sm:$0xff]  ;;  %v3233_v10 = vld [vmem:[%s5640_s11] sm:$0xff]  ;;  %s5643_s11 = sld [smem:[%s8604_s0 + %s6168_s26]]  }
 0xba0   :  { %v3351_v62 = vsel %vm1279_vm7, %v3344_v12, %v3346_v48  ;;  %v1363_v44 = vld [vmem:[%s5627_s25] sm:$0xff] }
 0xba1   :  { %5853 = vmatprep.subr.bf16.mxu0 %v5852_v57  ;;  %5865 = vmatprep.subr.bf16.mxu1 %v5864_v54  ;;  %v3360_v29 = vmul.f32 %v3351_v62, %v8929_v46  ;;  %v6117_v57 = vld [vmem:[%s6276_s27] sm:$0xf]  ;;  %v3777_v46 = vadd.s32 7, %v6116_v1  ;;  %s6169_s27 = smov 27  }
 0xba2   :  { %5855 = vmatpush1.bf16.msra.mxu0 %v5854_v40  ;;  %5867 = vmatpush1.bf16.msra.mxu1 %v5866_v63  ;;  %v3538_v63 = vadd.s32 4294967289, %v6116_v1  ;;  %v7683_v54 = vadd.s32 4294967289, %v6117_v57 }
 0xba3   :  { %v3348_v60 = vpop.permute.xlu0 %3347  ;;  %v3350_v26 = vpop.permute.xlu1 %3349 }
 0xba4   :  { %v3352_v23 = vsel %vm1279_vm7, %v3346_v48, %v3348_v60  ;;  %v3353_v27 = vsel %vm1279_vm7, %v3348_v60, %v3350_v26  ;;  %v3359_v3 = vsel %vm1279_vm7, %v3350_v26, %v3344_v12  ;;  %vm3539_vm7 = vcmp.ge.s32.totalorder %v3538_v63, 0 }
 0xba5   :  { %v3362_v53 = vmul.f32 %v3353_v27, %v8926_v55  ;;  %v3361_v7 = vmul.f32 %v3352_v23, %v8927_v18  ;;  %v3363_v16 = vmul.f32 %v3359_v3, %v8928_v21  ;;  %v3900_v41 = vld [vmem:[%s5643_s11] sm:$0xff]  ;;  %vm3543_vm5 = vcmp.ge.s32.totalorder %v7683_v54, 0  ;;  %v8932_v27 = vld [vmem:[#allocation8_spill] sm:$0xff] }
 0xba6   :  { %vm3545_vm1 = vcmp.lt.s32.totalorder %v7683_v54, 16  ;;  %vm8933_vm12 = vcmp.lt.s32.totalorder %v8932_v27, 16 }
 0xba7   :  { %3385 = vmatprep.subr.mxu0 %v3361_v7  ;;  %3456 = vmatprep.subr.mxu1 %v3363_v16 }
 0xba8   :  { %3386 = vmatpush1.msra.mxu0 %v3360_v29  ;;  %3457 = vmatpush1.msra.mxu1 %v3362_v53  ;;  %v7709_v53 = vadd.s32 7, %v6117_v57 }
 0xba9   :  { %5687 = vmatmul.mubr.msk.f32.vlgmr.msra.gmra.mrb[22].mxu0 %vm3087_vm2, %v3233_v10  ;;  %5688 = vmatmul.mubr.msk.f32.vlgmr.msra.gmra.mrb[22].mxu1 %vm3087_vm2, %v3233_v10  ;;  %vm3540_vm2 = vcmp.lt.s32.totalorder %v3538_v63, 16 }
 0xbaa   :  { %3973 = vmatprep.mubr.f32.mxu0 %v8747_v19  ;;  %4044 = vmatprep.mubr.f32.mxu1 %v8747_v19  ;;  %vm7687_vm11 = vmand %vm3539_vm7, %vm3540_vm2  ;;  %vm3637_vm9 = vcmp.ge.s32.totalorder %v7709_v53, 0  ;;  %vm3639_vm7 = vcmp.lt.s32.totalorder %v7709_v53, 16 }
 0xbab   :  { %vm3544_vm13 = vmand %vm7687_vm11, %vm3543_vm5 }
 0xbac   :  { %vm3590_vm10 = vmand %vm7687_vm11, %vm8699_vm8 }
 0xbad   :  { %vm3546_vm14 = vmand %vm3544_vm13, %vm3545_vm1  ;;  %vm8935_vm13 = vcmask 916480  }
 0xbae   :  { %vm3591_vm0 = vmand %vm3590_vm10, %vm8933_vm12  ;;  %v3547_v18 = vsel %vm3546_vm14, 1.0, %v8747_v19  ;;  %vm3778_vm10 = vcmp.ge.s32.totalorder %v3777_v46, 0  ;;  %vm3779_vm14 = vcmp.lt.s32.totalorder %v3777_v46, 16 }
 0xbaf   :  { %v3592_v7 = vsel %vm3591_vm0, 1.0, %v8747_v19  ;;  %v3564_v29 = vrot.slane %v3547_v18, %v6312_v31  ;;  %vm3731_vm2 = vmand %vm6295_vm4, %vm3637_vm9  ;;  %v3552_v45 = vrot.slane %v3547_v18, %v6310_v30 }
 0xbb0   :  { %v3609_v10 = vrot.slane %v3592_v7, %v6312_v31  ;;  %vm8936_vm12 = vmmov %vm8935_vm13  ;;  %v3605_v5 = vrot.slane %v3592_v7, %v6316_v33 }
 0xbb1   :  { %vm7735_vm0 = vmand %vm3731_vm2, %vm3639_vm7 }
 0xbb2   :  { %vm7754_vm2 = vmand %vm3778_vm10, %vm3779_vm14  ;;  %vm3627_vm14 = vcmask 859136  }
 0xbb3   :  { %vm8943_vm8 = vmmov %vm8936_vm12 }
 0xbb4   :  { %v3368_v39 = vpop.permute.xlu0 %3367 }
 0xc7c   :  { %v3439_v24 = vpop.f32.mrb[22].mxu0  ;;  %v3510_v6 = vpop.f32.mrb[22].mxu1 }
 0xc7d   :  { %v7605_v34 = vadd.f32 %v3439_v24, %v3368_v39  ;;  %v3441_v9 = vpop.f32.mrb[23].mxu0  ;;  %v3512_v13 = vpop.f32.mrb[23].mxu1  ;;  %v7609_v28 = vadd.f32 %v3510_v6, %v3368_v39  ;;  %v3556_v6 = vrot.slane %v3547_v18, %v6314_v32 }
 0xc7e   :  { %v7621_v11 = vadd.f32 %v3512_v13, %v3368_v39  ;;  %v7625_v50 = vadd.f32 %v3441_v9, %v3368_v39  ;;  %v3560_v9 = vrot.slane %v3547_v18, %v6316_v33 }
 0xc7f   :  { %3713 = vrot.lane.b32.xlu1 %v7605_v34, %s6162_s12  ;;  %3523 = vrot.lane.b32.xlu0 %v7605_v34, %s6163_s15 }
 0xc83   :  { %3717 = vrot.lane.b32.xlu1 %v7609_v28, %s6162_s12  ;;  %3527 = vrot.lane.b32.xlu0 %v7609_v28, %s6163_s15 }
 0xc87   :  { %3759 = vrot.lane.b32.xlu1 %v7605_v34, %s6159_s19  ;;  %3576 = vrot.lane.b32.xlu0 %v7605_v34, %s6132_s13 }
 0xc8b   :  { %3763 = vrot.lane.b32.xlu1 %v7609_v28, %s6159_s19  ;;  %3580 = vrot.lane.b32.xlu0 %v7609_v28, %s6132_s13 }
 0xc8f   :  { %3517 = vrot.lane.b32.xlu1 %v7621_v11, %s6163_s15  ;;  %3621 = vrot.lane.b32.xlu0 %v7605_v34, %s6164_s6 }
 0xc93   :  { %3525 = vrot.lane.b32.xlu1 %v7625_v50, %s6163_s15  ;;  %3625 = vrot.lane.b32.xlu0 %v7609_v28, %s6164_s6  ;;  %s6170_s15 = smov 113  }
 0xc97   :  { %3573 = vrot.lane.b32.xlu1 %v7621_v11, %s6132_s13  ;;  %3670 = vrot.lane.b32.xlu0 %v7605_v34, %s6129_s1 }
 0xc9b   :  { %3578 = vrot.lane.b32.xlu1 %v7625_v50, %s6132_s13  ;;  %3674 = vrot.lane.b32.xlu0 %v7609_v28, %s6129_s1 }
 0xc9f   :  { %3618 = vrot.lane.b32.xlu1 %v7621_v11, %s6164_s6  ;;  %3715 = vrot.lane.b32.xlu0 %v7625_v50, %s6162_s12 }
 0xca3   :  { %3623 = vrot.lane.b32.xlu1 %v7625_v50, %s6164_s6  ;;  %3719 = vrot.lane.b32.xlu0 %v7621_v11, %s6162_s12  ;;  %s5642_s12 = sld [smem:[%s8604_s0 + %s6169_s27]]   ;;  %s6171_s6 = smov 111  }
 0xca7   :  { %3667 = vrot.lane.b32.xlu1 %v7621_v11, %s6129_s1  ;;  %3761 = vrot.lane.b32.xlu0 %v7625_v50, %s6159_s19 }
 0xcab   :  { %3672 = vrot.lane.b32.xlu1 %v7625_v50, %s6129_s1  ;;  %3765 = vrot.lane.b32.xlu0 %v7621_v11, %s6159_s19  ;;  %s5619_s1 = sld [smem:[%s8604_s0 + %s6165_s24]]   ;;  %s6172_s24 = smov 29  }
 0xcaf   :  { %3809 = vrot.lane.b32.xlu1 %v7605_v34, %s6130_s7  ;;  %3811 = vrot.lane.b32.xlu0 %v7625_v50, %s6130_s7 }
 0xcb1   :  { %v143_v35 = vld [vmem:[%s5619_s1] sm:$0xff]  ;;  %s8231_s1 = sld [smem:[%s8604_s0 + %s6172_s24]]  }
 0xcb3   :  { %3813 = vrot.lane.b32.xlu1 %v7609_v28, %s6130_s7  ;;  %3815 = vrot.lane.b32.xlu0 %v7621_v11, %s6130_s7 }
 0xcb7   :  { %3854 = vrot.lane.b32.xlu1 %v7605_v34, %s6133_s14  ;;  %3856 = vrot.lane.b32.xlu0 %v7625_v50, %s6133_s14 }
 0xcbb   :  { %3858 = vrot.lane.b32.xlu1 %v7609_v28, %s6133_s14  ;;  %3860 = vrot.lane.b32.xlu0 %v7621_v11, %s6133_s14 }
 0xcbf   :  { %146 = vperm.xlu1 %6109, %v143_v35   ;;  %1366 = vperm.xlu0 %6108, %v1363_v44   ;;  %v3597_v35 = vrot.slane %v3592_v7, %v6310_v30 }
 0xcc3   :  { %2650 = vperm.xlu1 %6109, %v2647_v61   ;;  %3903 = vperm.xlu0 %6108, %v3900_v41   ;;  %v3601_v41 = vrot.slane %v3592_v7, %v6314_v32 }
 0xcf1   :  { %v3524_v14 = vpop.permute.xlu0 %3523  ;;  %v7677_v42 = vpop.permute.xlu1 %3713 }
 0xcf5   :  { %v3528_v12 = vpop.permute.xlu0 %3527  ;;  %v7680_v48 = vpop.permute.xlu1 %3717 }
 0xcf9   :  { %v3577_v40 = vpop.permute.xlu0 %3576  ;;  %v7685_v62 = vpop.permute.xlu1 %3759 }
 0xcfd   :  { %v3581_v26 = vpop.permute.xlu0 %3580  ;;  %v7692_v23 = vpop.permute.xlu1 %3763 }
 0xd01   :  { %v7705_v3 = vpop.permute.xlu0 %3621  ;;  %v3518_v55 = vpop.permute.xlu1 %3517 }
 0xd02   :  { %v3532_v39 = vsel %vm3529_vm15, %v3528_v12, %v3518_v55  ;;  %v3537_v7 = vsel %vm3529_vm15, %v3518_v55, %v3524_v14 }
 0xd03   :  { %v3572_v1 = vmul.f32 %v3564_v29, %v3532_v39  ;;  %v3569_v46 = vmul.f32 %v3552_v45, %v3537_v7 }
 0xd05   :  { %v7713_v21 = vpop.permute.xlu0 %3625  ;;  %v3526_v16 = vpop.permute.xlu1 %3525 }
 0xd06   :  { %v3530_v0 = vsel %vm3529_vm15, %v3524_v14, %v3526_v16  ;;  %v3531_v15 = vsel %vm3529_vm15, %v3526_v16, %v3528_v12 }
 0xd07   :  { %v3570_v14 = vmul.f32 %v3556_v6, %v3530_v0  ;;  %v3571_v55 = vmul.f32 %v3560_v9, %v3531_v15  ;;  %v7777_v0 = vsel %vm7735_vm0, 1.0, %v8747_v19 }
 0xd08   :  { %v3742_v4 = vrot.slane %v7777_v0, %v6314_v32  ;;  %v3750_v29 = vrot.slane %v7777_v0, %v6312_v31 }
 0xd09   :  { %v7726_v13 = vpop.permute.xlu0 %3670  ;;  %v3574_v44 = vpop.permute.xlu1 %3573 }
 0xd0a   :  { %v3584_v61 = vsel %vm8935_vm13, %v3581_v26, %v3574_v44  ;;  %v3589_v63 = vsel %vm8936_vm12, %v3574_v44, %v3577_v40  ;;  %vm7746_vm13 = vmand %vm7687_vm11, %vm3637_vm9 }
 0xd0b   :  { %v3617_v57 = vmul.f32 %v3609_v10, %v3584_v61  ;;  %v3614_v12 = vmul.f32 %v3597_v35, %v3589_v63  ;;  %vm3685_vm11 = vmand %vm6295_vm4, %vm3543_vm5 }
 0xd0c   :  { %vm3640_vm15 = vmand %vm7746_vm13, %vm3639_vm7  ;;  %vm3676_vm13 = vcmask 56320  }
 0xd0d   :  { %v7751_v10 = vpop.permute.xlu0 %3674  ;;  %v3579_v39 = vpop.permute.xlu1 %3578  ;;  %v5884_v44 = vpack.c.bf16 %v3617_v57, %v3572_v1  ;;  %vm3686_vm4 = vmand %vm3685_vm11, %vm3545_vm1  ;;  %v3641_v45 = vsel %vm3640_vm15, 1.0, %v8747_v19  ;;  %v3746_v57 = vrot.slane %v7777_v0, %v6316_v33  ;;  %vm8947_vm11 = vcmp.lt.s32.totalorder %v8932_v27, 16 }
 0xd0e   :  { %v3582_v16 = vsel %vm8936_vm12, %v3577_v40, %v3579_v39  ;;  %v3583_v60 = vsel %vm8943_vm8, %v3579_v39, %v3581_v26  ;;  %vm3781_vm8 = vmand %vm7754_vm2, %vm3543_vm5  ;;  %v3687_v15 = vsel %vm3686_vm4, 1.0, %v8747_v19  ;;  %vm3721_vm5 = vcmask 990208  }
 0xd0f   :  { %v3615_v61 = vmul.f32 %v3601_v41, %v3582_v16  ;;  %v3616_v8 = vmul.f32 %v3605_v5, %v3583_v60  ;;  %5885 = vmatprep.subr.bf16.mxu1 %v5884_v44  ;;  %v5870_v5 = vpack.c.bf16 %v3614_v12, %v3569_v46  ;;  %vm3782_vm10 = vmand %vm3781_vm8, %vm3545_vm1  ;;  %v3646_v41 = vrot.slane %v3641_v45, %v6310_v30 }
 0xd10   :  { %v3658_v1 = vrot.slane %v3641_v45, %v6312_v31  ;;  %v7790_v54 = vsel %vm3782_vm10, 1.0, %v8747_v19  ;;  %vm8944_vm1 = vcmp.ge.s32.totalorder %v8932_v27, 0  ;;  %v3704_v7 = vrot.slane %v3687_v15, %v6312_v31  ;;  %vm7860_vm4 = vmand %vm7754_vm2, %vm3637_vm9 }
 0xd11   :  { %v5886_v40 = vpack.c.bf16 %v3616_v8, %v3571_v55  ;;  %v3716_v26 = vpop.permute.xlu0 %3715  ;;  %v3619_v24 = vpop.permute.xlu1 %3618  ;;  %v5868_v35 = vpack.c.bf16 %v3615_v61, %v3570_v14  ;;  %v3738_v8 = vrot.slane %v7777_v0, %v6310_v30  ;;  %vm7796_vm0 = vmand %vm7754_vm2, %vm8944_vm1  ;;  %v3650_v44 = vrot.slane %v3641_v45, %v6314_v32 }
 0xd12   :  { %v3630_v39 = vsel %vm3627_vm14, %v7713_v21, %v3619_v24  ;;  %v3654_v12 = vrot.slane %v3641_v45, %v6316_v33  ;;  %vm3767_vm12 = vcmask 187392   ;;  %v3792_v16 = vrot.slane %v7790_v54, %v6314_v32  ;;  %vm3827_vm15 = vmand %vm7796_vm0, %vm8947_vm11 }
 0xd13   :  { %5869 = vmatprep.subr.bf16.mxu0 %v5868_v35  ;;  %5887 = vmatpush1.bf16.msra.mxu1 %v5886_v40  ;;  %v3692_v14 = vrot.slane %v3687_v15, %v6310_v30  ;;  %v3796_v61 = vrot.slane %v7790_v54, %v6316_v33  ;;  %v3723_v40 = vsel %vm3721_vm5, %v3716_v26, %v7680_v48  ;;  %v3828_v37 = vsel %vm3827_vm15, 1.0, %v8747_v19 }
 0xd14   :  { %5871 = vmatpush1.bf16.msra.mxu0 %v5870_v5  ;;  %v3696_v5 = vrot.slane %v3687_v15, %v6314_v32  ;;  %v3700_v0 = vrot.slane %v3687_v15, %v6316_v33  ;;  %v3666_v45 = vmul.f32 %v3658_v1, %v3630_v39  ;;  %v3722_v63 = vsel %vm3721_vm5, %v7677_v42, %v3716_v26 }
 0xd15   :  { %v3720_v6 = vpop.permute.xlu0 %3719  ;;  %v3624_v9 = vpop.permute.xlu1 %3623  ;;  %v3756_v15 = vmul.f32 %v3742_v4, %v3723_v40  ;;  %v3635_v1 = vsel %vm3627_vm14, %v3619_v24, %v7705_v3  ;;  %vm8948_vm8 = vcmask 130048   ;;  %vm4066_vm15 = vcmask 138240  }
 0xd16   :  { %v3730_v56 = vsel %vm3721_vm5, %v3720_v6, %v7677_v42  ;;  %v3628_v36 = vsel %vm3627_vm14, %v7705_v3, %v3624_v9  ;;  %v3629_v22 = vsel %vm3627_vm14, %v3624_v9, %v7713_v21  ;;  %v3724_v39 = vsel %vm3721_vm5, %v7680_v48, %v3720_v6  ;;  %vm8951_vm9 = vmmov %vm8948_vm8 }
 0xd17   :  { %v3758_v25 = vmul.f32 %v3750_v29, %v3730_v56  ;;  %v3664_v9 = vmul.f32 %v3650_v44, %v3628_v36  ;;  %v3665_v43 = vmul.f32 %v3654_v12, %v3629_v22  ;;  %v3755_v3 = vmul.f32 %v3738_v8, %v3722_v63  ;;  %vm8952_vm2 = vmmov %vm8948_vm8  ;;  %v8960_v44 = vld [vmem:[#allocation5_spill] sm:$0xff] }
 0xd18   :  { %v3663_v24 = vmul.f32 %v3646_v41, %v3635_v1  ;;  %v3833_v48 = vrot.slane %v3828_v37, %v6310_v30  ;;  %v3845_v6 = vrot.slane %v3828_v37, %v6312_v31  ;;  %vm8953_vm10 = vmmov %vm8952_vm2  ;;  %vm8955_vm14 = vcmask 588800  }
 0xd19   :  { %v3762_v60 = vpop.permute.xlu0 %3761  ;;  %v3668_v55 = vpop.permute.xlu1 %3667  ;;  %v5892_v8 = vpack.c.bf16 %v3758_v25, %v7621_v11  ;;  %v3788_v25 = vrot.slane %v7790_v54, %v6310_v30  ;;  %vm3873_vm5 = vmand %vm7860_vm4, %vm3639_vm7  ;;  %vm3862_vm7 = vcmask 72704  }
 0xd1a   :  { %v3679_v35 = vsel %vm3676_vm13, %v7751_v10, %v3668_v55  ;;  %v3684_v27 = vsel %vm3676_vm13, %v3668_v55, %v7726_v13  ;;  %v3769_v36 = vsel %vm3767_vm12, %v3762_v60, %v7692_v23  ;;  %vm8956_vm1 = vmmov %vm8955_vm14 }
 0xd1b   :  { %v3712_v46 = vmul.f32 %v3704_v7, %v3679_v35  ;;  %v3709_v42 = vmul.f32 %v3692_v14, %v3684_v27  ;;  %v3806_v18 = vmul.f32 %v3792_v16, %v3769_v36  ;;  %vm8972_vm4 = vmmov %vm8952_vm2 }
 0xd1d   :  { %v3766_v55 = vpop.permute.xlu0 %3765  ;;  %v3673_v7 = vpop.permute.xlu1 %3672  ;;  %v5888_v35 = vpack.c.bf16 %v3712_v46, %v3666_v45  ;;  %v3757_v46 = vmul.f32 %v3746_v57, %v3724_v39  ;;  %v5874_v22 = vpack.c.bf16 %v3709_v42, %v3663_v24  ;;  %v3841_v57 = vrot.slane %v3828_v37, %v6316_v33 }
 0xd1e   :  { %v3677_v26 = vsel %vm3676_vm13, %v7726_v13, %v3673_v7  ;;  %v3678_v21 = vsel %vm3676_vm13, %v3673_v7, %v7751_v10  ;;  %v3837_v13 = vrot.slane %v3828_v37, %v6314_v32  ;;  %v3770_v10 = vsel %vm3767_vm12, %v7692_v23, %v3766_v55 }
 0xd1f   :  { %v3710_v4 = vmul.f32 %v3696_v5, %v3677_v26  ;;  %v3711_v40 = vmul.f32 %v3700_v0, %v3678_v21  ;;  %5889 = vmatprep.subr.bf16.mxu1 %v5888_v35  ;;  %v5878_v23 = vpack.c.bf16 %v3755_v3, %v7605_v34  ;;  %v3776_v11 = vsel %vm3767_vm12, %v3766_v55, %v7685_v62 }
 0xd20   :  { %v5894_v37 = vpack.c.bf16 %v3757_v46, %v7609_v28  ;;  %v3807_v12 = vmul.f32 %v3796_v61, %v3770_v10  ;;  %v8954_v28 = vrot.slane %v7790_v54, %v6312_v31  ;;  %v3874_v55 = vsel %vm3873_vm5, 1.0, %v8747_v19 }
 0xd21   :  { %v5890_v56 = vpack.c.bf16 %v3711_v40, %v3665_v43  ;;  %v3812_v29 = vpop.permute.xlu0 %3811  ;;  %v3810_v14 = vpop.permute.xlu1 %3809  ;;  %v5872_v45 = vpack.c.bf16 %v3710_v4, %v3664_v9  ;;  %v5876_v43 = vpack.c.bf16 %v3756_v15, %v7625_v50  ;;  %v3768_v50 = vsel %vm3767_vm12, %v7685_v62, %v3762_v60 }
 0xd22   :  { %v3817_v41 = vsel %vm8948_vm8, %v3810_v14, %v3812_v29  ;;  %v3808_v62 = vmul.f32 %v8954_v28, %v3776_v11  ;;  %v3805_v1 = vmul.f32 %v3788_v25, %v3768_v50  ;;  %v3887_v26 = vrot.slane %v3874_v55, %v6316_v33  ;;  %v8961_v11 = vld [vmem:[#allocation44_spill] sm:$0xff]  ;;  %v8962_v50 = vld [vmem:[#allocation47_spill] sm:$0xff]  ;;  %vm8969_vm8 = vmmov %vm8952_vm2 }
 0xd23   :  { %5873 = vmatprep.subr.bf16.mxu0 %v5872_v45  ;;  %5891 = vmatpush1.bf16.msra.mxu1 %v5890_v56  ;;  %v3850_v27 = vmul.f32 %v3833_v48, %v3817_v41  ;;  %v3883_v21 = vrot.slane %v3874_v55, %v6314_v32  ;;  %v3891_v9 = vrot.slane %v3874_v55, %v6312_v31 }
 0xd24   :  { %5875 = vmatpush1.bf16.msra.mxu0 %v5874_v22  ;;  %5893 = vmatprep.subr.bf16.mxu1 %v5892_v8  ;;  %v3879_v4 = vrot.slane %v3874_v55, %v6310_v30  ;;  %v8957_v22 = vld [vmem:[#allocation4_spill] sm:$0xff]  ;;  %v8958_v8 = vld [vmem:[#allocation7_spill] sm:$0xff] }
 0xd25   :  { %v3816_v5 = vpop.permute.xlu0 %3815  ;;  %5877 = vmatprep.subr.bf16.mxu0 %v5876_v43  ;;  %v3814_v0 = vpop.permute.xlu1 %3813  ;;  %v5882_v54 = vpack.c.bf16 %v3850_v27, %v3805_v1  ;;  %v8959_v43 = vld [vmem:[#allocation6_spill] sm:$0xff] }
 0xd26   :  { %v3825_v34 = vsel %vm8951_vm9, %v3816_v5, %v3810_v14  ;;  %v3818_v63 = vsel %vm8952_vm2, %v3812_v29, %v3814_v0  ;;  %v3819_v15 = vsel %vm8953_vm10, %v3814_v0, %v3816_v5  ;;  %v8964_v0 = vld [vmem:[#allocation45_spill] sm:$0xff]  ;;  %vm8973_vm9 = vmmov %vm8952_vm2 }
 0xd27   :  { %v3853_v16 = vmul.f32 %v3845_v6, %v3825_v34  ;;  %v3851_v60 = vmul.f32 %v3837_v13, %v3818_v63  ;;  %v3852_v61 = vmul.f32 %v3841_v57, %v3819_v15  ;;  %5895 = vmatpush1.bf16.msra.mxu1 %v5894_v37  ;;  %v3515_v13 = vld [vmem:[%s5642_s12] sm:$0xff] }
 0xd28   :  { %5879 = vmatpush1.bf16.msra.mxu0 %v5878_v23 }
 0xd29   :  { %v5898_v39 = vpack.c.bf16 %v3852_v61, %v3807_v12  ;;  %v3857_v53 = vpop.permute.xlu0 %3856  ;;  %v3855_v7 = vpop.permute.xlu1 %3854  ;;  %v5880_v35 = vpack.c.bf16 %v3851_v60, %v3806_v18  ;;  %v5896_v42 = vpack.c.bf16 %v3853_v16, %v3808_v62  ;;  %v8963_v12 = vld [vmem:[#allocation46_spill] sm:$0xff]  ;;  %v8965_v62 = vld [vmem:[#allocation9_spill] sm:$0xff] }
 0xd2a   :  { %v3863_v40 = vsel %vm3862_vm7, %v3855_v7, %v3857_v53  ;;  %vm8966_vm0 = vcmp.ge.s32.totalorder %v8965_v62, 0  ;;  %vm8968_vm12 = vcmp.lt.s32.totalorder %v8965_v62, 16 }
 0xd2b   :  { %5881 = vmatprep.subr.bf16.mxu0 %v5880_v35  ;;  %5897 = vmatprep.subr.bf16.mxu1 %v5896_v42  ;;  %v3896_v45 = vmul.f32 %v3879_v4, %v3863_v40  ;;  %vm4075_vm13 = vmand %vm6396_vm6, %vm8966_vm0 }
 0xd2c   :  { %5883 = vmatpush1.bf16.msra.mxu0 %v5882_v54  ;;  %5899 = vmatpush1.bf16.msra.mxu1 %v5898_v39  ;;  %vm4076_vm11 = vmand %vm4075_vm13, %vm8968_vm12 }
 0xd2d   :  { %v3861_v3 = vpop.permute.xlu0 %3860  ;;  %v3859_v24 = vpop.permute.xlu1 %3858  ;;  %v4077_v1 = vsel %vm4076_vm11, 1.0, %v8747_v19  ;;  %vm8983_vm11 = vcmask 1039360  }
 0xd2e   :  { %v3871_v48 = vsel %vm3862_vm7, %v3861_v3, %v3855_v7  ;;  %v3864_v6 = vsel %vm3862_vm7, %v3857_v53, %v3859_v24  ;;  %v3865_v46 = vsel %vm3862_vm7, %v3859_v24, %v3861_v3  ;;  %v8052_v39 = vrot.slane %v4077_v1, %v6312_v31 }
 0xd2f   :  { %v3898_v56 = vmul.f32 %v3887_v26, %v3865_v46  ;;  %v3897_v29 = vmul.f32 %v3883_v21, %v3864_v6  ;;  %v3899_v14 = vmul.f32 %v3891_v9, %v3871_v48  ;;  %v8055_v53 = vrot.slane %v4077_v1, %v6314_v32 }
 0xd30   :  { %v8058_v55 = vrot.slane %v4077_v1, %v6316_v33  ;;  %v8075_v40 = vrot.slane %v4077_v1, %v6310_v30 }
 0xd31   :  { %3925 = vmatprep.subr.mxu0 %v3897_v29  ;;  %3996 = vmatprep.subr.mxu1 %v3899_v14 }
 0xd32   :  { %3926 = vmatpush1.msra.mxu0 %v3896_v45  ;;  %3997 = vmatpush1.msra.mxu1 %v3898_v56 }
 0xd33   :  { %5689 = vmatmul.mubr.msk.f32.vlgmr.msra.gmra.mrb[24].mxu0 %vm8955_vm14, %v3515_v13  ;;  %5690 = vmatmul.mubr.msk.f32.vlgmr.msra.gmra.mrb[24].mxu1 %vm8956_vm1, %v3515_v13  ;;  %vm8977_vm1 = vcmask 7168  }
 0xd34   :  { %4392 = vmatprep.mubr.f32.mxu0 %v8747_v19  ;;  %4463 = vmatprep.mubr.f32.mxu1 %v8747_v19  ;;  %vm8978_vm0 = vmmov %vm8977_vm1 }
 0xd35   :  { %vm8979_vm13 = vmmov %vm8978_vm0 }
 0xd36   :  { %vm8980_vm12 = vmmov %vm8978_vm0 }
 0xd3e   :  { %v147_v36 = vpop.permute.xlu1 %146  ;;  %v1367_v25 = vpop.permute.xlu0 %1366 }
 0xd3f   :  { %v7895_v10 = vadd.f32 %v8957_v22, %v147_v36  ;;  %v7898_v41 = vadd.f32 %v8958_v8, %v147_v36  ;;  %v7905_v57 = vadd.f32 %v8959_v43, %v147_v36  ;;  %v7908_v23 = vadd.f32 %v8960_v44, %v147_v36 }
 0xd40   :  { %v7971_v37 = vadd.f32 %v8961_v11, %v1367_v25  ;;  %v7974_v18 = vadd.f32 %v8962_v50, %v1367_v25  ;;  %v7981_v5 = vadd.f32 %v8963_v12, %v1367_v25  ;;  %v7984_v27 = vadd.f32 %v8964_v0, %v1367_v25  ;;  %v8974_v0 = vld [vmem:[#allocation11_spill] sm:$0xff] }
 0xd41   :  { %4054 = vrot.lane.b32.xlu1 %v7898_v41, %s6149_s20  ;;  %4060 = vrot.lane.b32.xlu0 %v7895_v10, %s6149_s20  ;;  %vm8975_vm10 = vcmp.ge.s32.totalorder %v8974_v0, 0  ;;  %vm8976_vm7 = vcmp.lt.s32.totalorder %v8974_v0, 16 }
 0xd42   :  { %v8030_v34 = vpop.permute.xlu0 %3903  ;;  %v2651_v63 = vpop.permute.xlu1 %2650  ;;  %vm4142_vm5 = vmand %vm6396_vm6, %vm8975_vm10  ;;  %vm4133_vm6 = vcmask 121856  }
 0xd43   :  { %v8069_v9 = vadd.f32 %v7356_v17, %v2651_v63  ;;  %v8072_v4 = vadd.f32 %v7362_v59, %v2651_v63  ;;  %v8093_v22 = vadd.f32 %v7360_v58, %v2651_v63  ;;  %v8096_v8 = vadd.f32 %v7358_v47, %v2651_v63  ;;  %vm4143_vm14 = vmand %vm4142_vm5, %vm8976_vm7 }
 0xd44   :  { %v4144_v63 = vsel %vm4143_vm14, 1.0, %v8747_v19  ;;  %vm8993_vm5 = vcmp.lt.s32.totalorder %v8965_v62, 16  ;;  %vm4220_vm14 = vcmask 924672  }
 0xd45   :  { %4062 = vrot.lane.b32.xlu1 %v7905_v57, %s6149_s20  ;;  %4064 = vrot.lane.b32.xlu0 %v7908_v23, %s6149_s20  ;;  %8970 = vst [vmem:[#allocation38_spill] sm:$0xff] %v8069_v9  ;;  %8971 = vst [vmem:[#allocation48_spill] sm:$0xff] %v8072_v4  ;;  %v8118_v16 = vrot.slane %v4144_v63, %v6314_v32 }
 0xd49   :  { %4103 = vrot.lane.b32.xlu1 %v7898_v41, %s6130_s7  ;;  %4106 = vrot.lane.b32.xlu0 %v7895_v10, %s6130_s7 }
 0xd4d   :  { %4108 = vrot.lane.b32.xlu1 %v7905_v57, %s6130_s7  ;;  %4110 = vrot.lane.b32.xlu0 %v7908_v23, %s6130_s7 }
 0xd51   :  { %4124 = vrot.lane.b32.xlu1 %v7898_v41, %s6145_s2  ;;  %4127 = vrot.lane.b32.xlu0 %v7895_v10, %s6145_s2 }
 0xd55   :  { %4129 = vrot.lane.b32.xlu1 %v7905_v57, %s6145_s2  ;;  %4131 = vrot.lane.b32.xlu0 %v7908_v23, %s6145_s2 }
 0xd59   :  { %4170 = vrot.lane.b32.xlu1 %v7898_v41, %s6125_s18  ;;  %4173 = vrot.lane.b32.xlu0 %v7895_v10, %s6125_s18 }
 0xd5d   :  { %4175 = vrot.lane.b32.xlu1 %v7905_v57, %s6125_s18  ;;  %4177 = vrot.lane.b32.xlu0 %v7908_v23, %s6125_s18 }
 0xd61   :  { %4191 = vrot.lane.b32.xlu1 %v7895_v10, %s6127_s23  ;;  %4193 = vrot.lane.b32.xlu0 %v7905_v57, %s6127_s23 }
 0xd65   :  { %4195 = vrot.lane.b32.xlu1 %v7908_v23, %s6127_s23  ;;  %4197 = vrot.lane.b32.xlu0 %v7898_v41, %s6127_s23 }
 0xd69   :  { %4212 = vrot.lane.b32.xlu1 %v7895_v10, %s6170_s15  ;;  %4214 = vrot.lane.b32.xlu0 %v7905_v57, %s6170_s15 }
 0xd6d   :  { %4216 = vrot.lane.b32.xlu1 %v7908_v23, %s6170_s15  ;;  %4218 = vrot.lane.b32.xlu0 %v7898_v41, %s6170_s15 }
 0xd71   :  { %4258 = vrot.lane.b32.xlu1 %v7895_v10, %s6132_s13  ;;  %4260 = vrot.lane.b32.xlu0 %v7905_v57, %s6132_s13 }
 0xd75   :  { %4262 = vrot.lane.b32.xlu1 %v7908_v23, %s6132_s13  ;;  %4264 = vrot.lane.b32.xlu0 %v7898_v41, %s6132_s13 }
 0xd79   :  { %4279 = vrot.lane.b32.xlu1 %v7895_v10, %s6171_s6  ;;  %4281 = vrot.lane.b32.xlu0 %v7905_v57, %s6171_s6 }
 0xd7d   :  { %4283 = vrot.lane.b32.xlu1 %v7908_v23, %s6171_s6  ;;  %4285 = vrot.lane.b32.xlu0 %v7898_v41, %s6171_s6 }
 0xd81   :  { %4482 = vrot.lane.b32.xlu1 %v7974_v18, %s6149_s20  ;;  %4488 = vrot.lane.b32.xlu0 %v7971_v37, %s6149_s20 }
 0xd85   :  { %4490 = vrot.lane.b32.xlu1 %v7981_v5, %s6149_s20  ;;  %4492 = vrot.lane.b32.xlu0 %v7984_v27, %s6149_s20 }
 0xd89   :  { %4506 = vrot.lane.b32.xlu1 %v7974_v18, %s6130_s7  ;;  %4509 = vrot.lane.b32.xlu0 %v7971_v37, %s6130_s7 }
 0xd8d   :  { %4511 = vrot.lane.b32.xlu1 %v7981_v5, %s6130_s7  ;;  %4513 = vrot.lane.b32.xlu0 %v7984_v27, %s6130_s7 }
 0xd91   :  { %4527 = vrot.lane.b32.xlu1 %v7974_v18, %s6145_s2  ;;  %4530 = vrot.lane.b32.xlu0 %v7971_v37, %s6145_s2 }
 0xd95   :  { %4532 = vrot.lane.b32.xlu1 %v7981_v5, %s6145_s2  ;;  %4534 = vrot.lane.b32.xlu0 %v7984_v27, %s6145_s2 }
 0xd99   :  { %4548 = vrot.lane.b32.xlu1 %v7974_v18, %s6125_s18  ;;  %4551 = vrot.lane.b32.xlu0 %v7971_v37, %s6125_s18 }
 0xd9d   :  { %4553 = vrot.lane.b32.xlu1 %v7981_v5, %s6125_s18  ;;  %4555 = vrot.lane.b32.xlu0 %v7984_v27, %s6125_s18 }
 0xda1   :  { %4569 = vrot.lane.b32.xlu1 %v7971_v37, %s6127_s23  ;;  %4571 = vrot.lane.b32.xlu0 %v7981_v5, %s6127_s23 }
 0xda5   :  { %4573 = vrot.lane.b32.xlu1 %v7984_v27, %s6127_s23  ;;  %4575 = vrot.lane.b32.xlu0 %v7974_v18, %s6127_s23 }
 0xda9   :  { %4590 = vrot.lane.b32.xlu1 %v7971_v37, %s6170_s15  ;;  %4592 = vrot.lane.b32.xlu0 %v7981_v5, %s6170_s15 }
 0xdad   :  { %4594 = vrot.lane.b32.xlu1 %v7984_v27, %s6170_s15  ;;  %4596 = vrot.lane.b32.xlu0 %v7974_v18, %s6170_s15 }
 0xdb1   :  { %4611 = vrot.lane.b32.xlu1 %v7971_v37, %s6132_s13  ;;  %4613 = vrot.lane.b32.xlu0 %v7981_v5, %s6132_s13 }
 0xdb3   :  { %v4061_v15 = vpop.permute.xlu0 %4060  ;;  %v4055_v28 = vpop.permute.xlu1 %4054 }
 0xdb4   :  { %v4074_v3 = vsel %vm4066_vm15, %v4055_v28, %v4061_v15 }
 0xdb5   :  { %4615 = vrot.lane.b32.xlu1 %v7984_v27, %s6132_s13  ;;  %4617 = vrot.lane.b32.xlu0 %v7974_v18, %s6132_s13  ;;  %v4099_v43 = vmul.f32 %v8075_v40, %v4074_v3 }
 0xdb7   :  { %v4065_v60 = vpop.permute.xlu0 %4064  ;;  %v4063_v61 = vpop.permute.xlu1 %4062 }
 0xdb8   :  { %v4069_v42 = vsel %vm4066_vm15, %v4065_v60, %v4055_v28  ;;  %v4067_v54 = vsel %vm4066_vm15, %v4061_v15, %v4063_v61  ;;  %v4068_v26 = vsel %vm4066_vm15, %v4063_v61, %v4065_v60  ;;  %v8115_v28 = vrot.slane %v4144_v63, %v6312_v31 }
 0xdb9   :  { %4632 = vrot.lane.b32.xlu1 %v7971_v37, %s6171_s6  ;;  %4634 = vrot.lane.b32.xlu0 %v7981_v5, %s6171_s6  ;;  %v4102_v24 = vmul.f32 %v8052_v39, %v4069_v42  ;;  %v4100_v48 = vmul.f32 %v8055_v53, %v4067_v54  ;;  %v4101_v6 = vmul.f32 %v8058_v55, %v4068_v26 }
 0xdba   :  { %v8121_v60 = vrot.slane %v4144_v63, %v6316_v33  ;;  %v8132_v26 = vrot.slane %v4144_v63, %v6310_v30 }
 0xdbb   :  { %v4107_v7 = vpop.permute.xlu0 %4106  ;;  %v4104_v35 = vpop.permute.xlu1 %4103 }
 0xdbc   :  { %v4119_v21 = vsel %vm8969_vm8, %v4104_v35, %v4107_v7  ;;  %vm8985_vm8 = vmmov %vm8983_vm11 }
 0xdbd   :  { %4636 = vrot.lane.b32.xlu1 %v7984_v27, %s6171_s6  ;;  %4638 = vrot.lane.b32.xlu0 %v7974_v18, %s6171_s6  ;;  %v4120_v29 = vmul.f32 %v4119_v21, %v8906_v49 }
 0xdbf   :  { %v4111_v46 = vpop.permute.xlu0 %4110  ;;  %v4109_v56 = vpop.permute.xlu1 %4108  ;;  %v5902_v15 = vpack.c.bf16 %v4120_v29, %v4099_v43 }
 0xdc0   :  { %v4114_v17 = vsel %vm8972_vm4, %v4111_v46, %v4104_v35  ;;  %v4112_v59 = vsel %vm8973_vm9, %v4107_v7, %v4109_v56  ;;  %v4113_v14 = vsel %vm8952_vm2, %v4109_v56, %v4111_v46  ;;  %vm8986_vm4 = vmmov %vm8985_vm8  ;;  %vm8991_vm2 = vcmp.ge.s32.totalorder %v8965_v62, 0 }
 0xdc1   :  { %v4123_v45 = vmul.f32 %v4114_v17, %v8904_v2  ;;  %v4121_v13 = vmul.f32 %v4112_v59, %v8911_v51  ;;  %v4122_v36 = vmul.f32 %v4113_v14, %v8912_v20  ;;  %4805 = vrot.lane.b32.xlu1 %v8072_v4, %s6149_s20  ;;  %4811 = vrot.lane.b32.xlu0 %v8069_v9, %s6149_s20  ;;  %vm8987_vm9 = vmmov %vm8986_vm4 }
 0xdc2   :  { %vm4230_vm10 = vmand %vm6410_vm3, %vm8991_vm2  ;;  %vm9004_vm2 = vcmask 588800  }
 0xdc3   :  { %v5918_v44 = vpack.c.bf16 %v4122_v36, %v4101_v6  ;;  %v4128_v25 = vpop.permute.xlu0 %4127  ;;  %v4125_v11 = vpop.permute.xlu1 %4124  ;;  %v5900_v50 = vpack.c.bf16 %v4121_v13, %v4100_v48  ;;  %v5916_v12 = vpack.c.bf16 %v4123_v45, %v4102_v24  ;;  %v8981_v45 = vld [vmem:[#allocation14_spill] sm:$0xff]  ;;  %v8982_v36 = vld [vmem:[#allocation15_spill] sm:$0xff]  ;;  %vm4231_vm7 = vmand %vm4230_vm10, %vm8993_vm5  ;;  %vm9006_vm5 = vcmask 130048  }
 0xdc4   :  { %v4141_v21 = vsel %vm4133_vm6, %v4125_v11, %v4128_v25  ;;  %vm9005_vm10 = vmmov %vm9004_vm2 }
 0xdc5   :  { %4813 = vrot.lane.b32.xlu1 %v8093_v22, %s6149_s20  ;;  %4815 = vrot.lane.b32.xlu0 %v8096_v8, %s6149_s20 }
 0xdc6   :  { %5901 = vmatprep.subr.bf16.mxu0 %v5900_v50  ;;  %5917 = vmatprep.subr.bf16.mxu1 %v5916_v12 }
 0xdc7   :  { %5903 = vmatpush1.bf16.msra.mxu0 %v5902_v15  ;;  %5919 = vmatpush1.bf16.msra.mxu1 %v5918_v44  ;;  %v4132_v47 = vpop.permute.xlu0 %4131  ;;  %v4130_v58 = vpop.permute.xlu1 %4129  ;;  %v4166_v44 = vmul.f32 %v8132_v26, %v4141_v21  ;;  %v8988_v21 = vld [vmem:[#allocation18_spill] sm:$0xff] }
 0xdc8   :  { %v4136_v7 = vsel %vm4133_vm6, %v4132_v47, %v4125_v11  ;;  %v4134_v35 = vsel %vm4133_vm6, %v4128_v25, %v4130_v58  ;;  %v4135_v42 = vsel %vm4133_vm6, %v4130_v58, %v4132_v47 }
 0xdc9   :  { %4829 = vrot.lane.b32.xlu1 %v8072_v4, %s6130_s7  ;;  %4832 = vrot.lane.b32.xlu0 %v8069_v9, %s6130_s7  ;;  %v4169_v3 = vmul.f32 %v8115_v28, %v4136_v7  ;;  %v4167_v24 = vmul.f32 %v8118_v16, %v4134_v35  ;;  %v4168_v48 = vmul.f32 %v8121_v60, %v4135_v42 }
 0xdcb   :  { %v4174_v61 = vpop.permute.xlu0 %4173  ;;  %v4171_v1 = vpop.permute.xlu1 %4170 }
 0xdcc   :  { %v4186_v54 = vsel %vm8977_vm1, %v4171_v1, %v4174_v61  ;;  %vm8994_vm1 = vcmp.ge.s32.totalorder %v8974_v0, 0 }
 0xdcd   :  { %4834 = vrot.lane.b32.xlu1 %v8093_v22, %s6130_s7  ;;  %4836 = vrot.lane.b32.xlu0 %v8096_v8, %s6130_s7  ;;  %v4187_v56 = vmul.f32 %v4186_v54, %v8859_v38 }
 0xdcf   :  { %v4178_v6 = vpop.permute.xlu0 %4177  ;;  %v4176_v46 = vpop.permute.xlu1 %4175  ;;  %v5906_v47 = vpack.c.bf16 %v4187_v56, %v4166_v44 }
 0xdd0   :  { %v4181_v29 = vsel %vm8978_vm0, %v4178_v6, %v4171_v1  ;;  %v4179_v17 = vsel %vm8979_vm13, %v4174_v61, %v4176_v46  ;;  %v4180_v59 = vsel %vm8980_vm12, %v4176_v46, %v4178_v6  ;;  %v8984_v1 = vld [vmem:[#allocation19_spill] sm:$0xff]  ;;  %v8990_v6 = vld [vmem:[#allocation16_spill] sm:$0xff]  ;;  %vm4297_vm0 = vmand %vm6410_vm3, %vm8994_vm1  ;;  %vm8995_vm13 = vcmask 916480  }
 0xdd1   :  { %v4190_v14 = vmul.f32 %v4181_v29, %v8856_v52  ;;  %v4188_v13 = vmul.f32 %v4179_v17, %v8981_v45  ;;  %v4189_v43 = vmul.f32 %v4180_v59, %v8982_v36  ;;  %4850 = vrot.lane.b32.xlu1 %v8072_v4, %s6145_s2  ;;  %4853 = vrot.lane.b32.xlu0 %v8069_v9, %s6145_s2  ;;  %vm8996_vm3 = vcmp.lt.s32.totalorder %v8974_v0, 16  ;;  %vm9008_vm1 = vmmov %vm9006_vm5 }
 0xdd2   :  { %vm4298_vm12 = vmand %vm4297_vm0, %vm8996_vm3 }
 0xdd3   :  { %v5922_v25 = vpack.c.bf16 %v4189_v43, %v4168_v48  ;;  %v4194_v11 = vpop.permute.xlu0 %4193  ;;  %v4192_v50 = vpop.permute.xlu1 %4191  ;;  %v5904_v12 = vpack.c.bf16 %v4188_v13, %v4167_v24  ;;  %v5920_v15 = vpack.c.bf16 %v4190_v14, %v4169_v3  ;;  %v8989_v24 = vld [vmem:[#allocation17_spill] sm:$0xff]  ;;  %v4299_v0 = vsel %vm4298_vm12, 1.0, %v8747_v19  ;;  %vm9009_vm0 = vmmov %vm9008_vm1 }
 0xdd4   :  { %v4199_v58 = vsel %vm8983_vm11, %v4192_v50, %v4194_v11  ;;  %vm8998_vm11 = vmmov %vm8995_vm13 }
 0xdd5   :  { %4855 = vrot.lane.b32.xlu1 %v8093_v22, %s6145_s2  ;;  %4857 = vrot.lane.b32.xlu0 %v8096_v8, %s6145_s2  ;;  %v4208_v7 = vmul.f32 %v4199_v58, %v8984_v1 }
 0xdd6   :  { %5905 = vmatprep.subr.bf16.mxu0 %v5904_v12  ;;  %5921 = vmatprep.subr.bf16.mxu1 %v5920_v15 }
 0xdd7   :  { %5907 = vmatpush1.bf16.msra.mxu0 %v5906_v47  ;;  %5923 = vmatpush1.bf16.msra.mxu1 %v5922_v25  ;;  %v4198_v63 = vpop.permute.xlu0 %4197  ;;  %v4196_v61 = vpop.permute.xlu1 %4195  ;;  %v5910_v43 = vpack.c.bf16 %v4208_v7, %v7895_v10  ;;  %v4232_v10 = vsel %vm4231_vm7, 1.0, %v8747_v19  ;;  %vm9007_vm7 = vmmov %vm9006_vm5 }
 0xdd8   :  { %v4207_v35 = vsel %vm8985_vm8, %v4198_v63, %v4192_v50  ;;  %v4200_v42 = vsel %vm8986_vm4, %v4194_v11, %v4196_v61  ;;  %v4201_v54 = vsel %vm8987_vm9, %v4196_v61, %v4198_v63  ;;  %v8189_v44 = vrot.slane %v4232_v10, %v6314_v32  ;;  %vm8999_vm8 = vmmov %vm8998_vm11 }
 0xdd9   :  { %v4211_v3 = vmul.f32 %v4207_v35, %v8988_v21  ;;  %v4209_v48 = vmul.f32 %v4200_v42, %v8989_v24  ;;  %v4210_v46 = vmul.f32 %v4201_v54, %v8990_v6  ;;  %4871 = vrot.lane.b32.xlu1 %v8072_v4, %s6125_s18  ;;  %4874 = vrot.lane.b32.xlu0 %v8069_v9, %s6125_s18  ;;  %vm9000_vm4 = vmmov %vm8999_vm8  ;;  %vm4287_vm9 = vcmask 908288  }
 0xdda   :  { %v8192_v62 = vrot.slane %v4232_v10, %v6316_v33  ;;  %v8207_v58 = vrot.slane %v4232_v10, %v6310_v30 }
 0xddb   :  { %v5926_v56 = vpack.c.bf16 %v4210_v46, %v7908_v23  ;;  %v4215_v29 = vpop.permute.xlu0 %4214  ;;  %v4213_v17 = vpop.permute.xlu1 %4212  ;;  %v5908_v59 = vpack.c.bf16 %v4209_v48, %v7905_v57  ;;  %v5924_v14 = vpack.c.bf16 %v4211_v3, %v7898_v41  ;;  %v8186_v23 = vrot.slane %v4232_v10, %v6312_v31  ;;  %v8997_v3 = vld [vmem:[#allocation29_spill] sm:$0xff] }
 0xddc   :  { %v4221_v63 = vsel %vm4220_vm14, %v4213_v17, %v4215_v29 }
 0xddd   :  { %4876 = vrot.lane.b32.xlu1 %v8093_v22, %s6125_s18  ;;  %4878 = vrot.lane.b32.xlu0 %v8096_v8, %s6125_s18 }
 0xdde   :  { %5909 = vmatprep.subr.bf16.mxu0 %v5908_v59  ;;  %5925 = vmatprep.subr.bf16.mxu1 %v5924_v14  ;;  %v9002_v14 = vld [vmem:[#allocation28_spill] sm:$0xff] }
 0xddf   :  { %5911 = vmatpush1.bf16.msra.mxu0 %v5910_v43  ;;  %5927 = vmatpush1.bf16.msra.mxu1 %v5926_v56  ;;  %v4219_v41 = vpop.permute.xlu0 %4218  ;;  %v4217_v57 = vpop.permute.xlu1 %4216  ;;  %v9003_v43 = vld [vmem:[#allocation27_spill] sm:$0xff] }
 0xde0   :  { %v4229_v50 = vsel %vm4220_vm14, %v4219_v41, %v4213_v17  ;;  %v4222_v12 = vsel %vm4220_vm14, %v4215_v29, %v4217_v57  ;;  %v4223_v15 = vsel %vm4220_vm14, %v4217_v57, %v4219_v41  ;;  %v9001_v29 = vld [vmem:[#allocation26_spill] sm:$0xff]  ;;  %v4254_v57 = vmul.f32 %v8207_v58, %v4221_v63 }
 0xde1   :  { %4892 = vrot.lane.b32.xlu1 %v8069_v9, %s6127_s23  ;;  %4894 = vrot.lane.b32.xlu0 %v8093_v22, %s6127_s23  ;;  %v4257_v61 = vmul.f32 %v8186_v23, %v4229_v50  ;;  %v4255_v7 = vmul.f32 %v8189_v44, %v4222_v12  ;;  %v4256_v35 = vmul.f32 %v8192_v62, %v4223_v15 }
 0xde2   :  { %v8234_v15 = vrot.slane %v4299_v0, %v6316_v33  ;;  %v8241_v63 = vrot.slane %v4299_v0, %v6314_v32 }
 0xde3   :  { %v4261_v25 = vpop.permute.xlu0 %4260  ;;  %v4259_v11 = vpop.permute.xlu1 %4258 }
 0xde4   :  { %v4266_v47 = vsel %vm8995_vm13, %v4259_v11, %v4261_v25  ;;  %vm9010_vm13 = vcmask 7168  }
 0xde5   :  { %4896 = vrot.lane.b32.xlu1 %v8096_v8, %s6127_s23  ;;  %4898 = vrot.lane.b32.xlu0 %v8072_v4, %s6127_s23  ;;  %v4275_v48 = vmul.f32 %v4266_v47, %v8997_v3  ;;  %vm9011_vm3 = vmmov %vm9010_vm13 }
 0xde6   :  { %vm9012_vm12 = vmmov %vm9011_vm3 }
 0xde7   :  { %v4265_v42 = vpop.permute.xlu0 %4264  ;;  %v4263_v54 = vpop.permute.xlu1 %4262  ;;  %v5914_v47 = vpack.c.bf16 %v4275_v48, %v4254_v57 }
 0xde8   :  { %v4274_v46 = vsel %vm8998_vm11, %v4265_v42, %v4259_v11  ;;  %v4267_v56 = vsel %vm8999_vm8, %v4261_v25, %v4263_v54  ;;  %v4268_v59 = vsel %vm9000_vm4, %v4263_v54, %v4265_v42  ;;  %vm9013_vm11 = vmmov %vm9011_vm3  ;;  %vm9014_vm8 = vcmask 1039360  }
 0xde9   :  { %v4278_v17 = vmul.f32 %v4274_v46, %v9001_v29  ;;  %v4276_v13 = vmul.f32 %v4267_v56, %v9002_v14  ;;  %v4277_v41 = vmul.f32 %v4268_v59, %v9003_v43  ;;  %4913 = vrot.lane.b32.xlu1 %v8069_v9, %s6170_s15  ;;  %4915 = vrot.lane.b32.xlu0 %v8093_v22, %s6170_s15  ;;  %vm9015_vm4 = vmmov %vm9014_vm8 }
 0xdeb   :  { %v5930_v10 = vpack.c.bf16 %v4277_v41, %v4256_v35  ;;  %v4282_v25 = vpop.permute.xlu0 %4281  ;;  %v4280_v11 = vpop.permute.xlu1 %4279  ;;  %v5912_v50 = vpack.c.bf16 %v4276_v13, %v4255_v7  ;;  %v5928_v12 = vpack.c.bf16 %v4278_v17, %v4257_v61  ;;  %v8244_v61 = vrot.slane %v4299_v0, %v6312_v31  ;;  %v4052_v13 = vld [vmem:[%s8231_s1] sm:$0xff] }
 0xdec   :  { %v8247_v7 = vrot.slane %v4299_v0, %v6310_v30  ;;  %v4288_v33 = vsel %vm4287_vm9, %v4280_v11, %v4282_v25 }
 0xded   :  { %4917 = vrot.lane.b32.xlu1 %v8096_v8, %s6170_s15  ;;  %4919 = vrot.lane.b32.xlu0 %v8072_v4, %s6170_s15 }
 0xdee   :  { %5913 = vmatprep.subr.bf16.mxu0 %v5912_v50  ;;  %5929 = vmatprep.subr.bf16.mxu1 %v5928_v12  ;;  %v4321_v56 = vmul.f32 %v8247_v7, %v4288_v33 }
 0xdef   :  { %5915 = vmatpush1.bf16.msra.mxu0 %v5914_v47  ;;  %5931 = vmatpush1.bf16.msra.mxu1 %v5930_v10  ;;  %v4286_v35 = vpop.permute.xlu0 %4285  ;;  %v4284_v42 = vpop.permute.xlu1 %4283 }
 0xdf0   :  { %v4296_v54 = vsel %vm4287_vm9, %v4286_v35, %v4280_v11  ;;  %v4289_v32 = vsel %vm4287_vm9, %v4282_v25, %v4284_v42  ;;  %v4290_v48 = vsel %vm4287_vm9, %v4284_v42, %v4286_v35 }
 0xdf1   :  { %v4323_v31 = vmul.f32 %v8234_v15, %v4290_v48  ;;  %4934 = vrot.lane.b32.xlu1 %v8069_v9, %s6132_s13  ;;  %4936 = vrot.lane.b32.xlu0 %v8093_v22, %s6132_s13  ;;  %v4322_v30 = vmul.f32 %v8241_v63, %v4289_v32  ;;  %v4324_v46 = vmul.f32 %v8244_v61, %v4296_v54 }
 0xdf3   :  { %v4489_v59 = vpop.permute.xlu0 %4488  ;;  %4344 = vmatprep.subr.mxu0 %v4322_v30  ;;  %4415 = vmatprep.subr.mxu1 %v4324_v46  ;;  %v4483_v17 = vpop.permute.xlu1 %4482 }
 0xdf4   :  { %4345 = vmatpush1.msra.mxu0 %v4321_v56  ;;  %4416 = vmatpush1.msra.mxu1 %v4323_v31  ;;  %v4501_v47 = vsel %vm4066_vm15, %v4483_v17, %v4489_v59 }
 0xdf5   :  { %4938 = vrot.lane.b32.xlu1 %v8096_v8, %s6132_s13  ;;  %4940 = vrot.lane.b32.xlu0 %v8072_v4, %s6132_s13 }
 0xdf6   :  { %5691 = vmatmul.mubr.msk.f32.vlgmr.msra.gmra.mrb[26].mxu0 %vm9004_vm2, %v4052_v13  ;;  %5692 = vmatmul.mubr.msk.f32.vlgmr.msra.gmra.mrb[26].mxu1 %vm9005_vm10, %v4052_v13  ;;  %v4502_v13 = vmul.f32 %v4501_v47, %v8075_v40  ;;  %vm9016_vm2 = vmmov %vm9015_vm4 }
 0xdf7   :  { %v4493_v41 = vpop.permute.xlu0 %4492  ;;  %v4491_v0 = vpop.permute.xlu1 %4490  ;;  %4720 = vmatprep.mubr.f32.mxu0 %v8747_v19  ;;  %4791 = vmatprep.mubr.f32.mxu1 %v8747_v19  ;;  %vm9017_vm10 = vmmov %vm9016_vm2 }
 0xdf8   :  { %v4496_v25 = vsel %vm4066_vm15, %v4493_v41, %v4483_v17  ;;  %v4494_v11 = vsel %vm4066_vm15, %v4489_v59, %v4491_v0  ;;  %v4495_v12 = vsel %vm4066_vm15, %v4491_v0, %v4493_v41 }
 0xdf9   :  { %4955 = vrot.lane.b32.xlu1 %v8069_v9, %s6171_s6  ;;  %4957 = vrot.lane.b32.xlu0 %v8093_v22, %s6171_s6  ;;  %v4505_v33 = vmul.f32 %v4496_v25, %v8052_v39  ;;  %v4503_v35 = vmul.f32 %v4494_v11, %v8055_v53  ;;  %v4504_v46 = vmul.f32 %v4495_v12, %v8058_v55 }
 0xdfb   :  { %v4510_v57 = vpop.permute.xlu0 %4509  ;;  %v4507_v10 = vpop.permute.xlu1 %4506 }
 0xdfc   :  { %v4522_v50 = vsel %vm9006_vm5, %v4507_v10, %v4510_v57  ;;  %vm9018_vm5 = vcmask 916480  }
 0xdfd   :  { %4959 = vrot.lane.b32.xlu1 %v8096_v8, %s6171_s6  ;;  %4961 = vrot.lane.b32.xlu0 %v8072_v4, %s6171_s6  ;;  %v4523_v32 = vmul.f32 %v4522_v50, %v8906_v49 }
 0xdff   :  { %v4514_v42 = vpop.permute.xlu0 %4513  ;;  %v4512_v54 = vpop.permute.xlu1 %4511 }
 0xe00   :  { %v4517_v48 = vsel %vm9007_vm7, %v4514_v42, %v4507_v10  ;;  %v4515_v31 = vsel %vm9008_vm1, %v4510_v57, %v4512_v54  ;;  %v4516_v30 = vsel %vm9009_vm0, %v4512_v54, %v4514_v42  ;;  %v5934_v10 = vpack.c.bf16 %v4523_v32, %v4502_v13  ;;  %vm9019_vm7 = vmmov %vm9018_vm5 }
 0xe01   :  { %v4526_v56 = vmul.f32 %v4517_v48, %v8904_v2  ;;  %v4524_v59 = vmul.f32 %v4515_v31, %v8911_v51  ;;  %v4525_v17 = vmul.f32 %v4516_v30, %v8912_v20  ;;  %vm9020_vm1 = vmmov %vm9018_vm5 }
 0xe02   :  { %vm9021_vm0 = vmmov %vm9020_vm1 }
 0xe03   :  { %v5950_v41 = vpack.c.bf16 %v4525_v17, %v4504_v46  ;;  %v4531_v0 = vpop.permute.xlu0 %4530  ;;  %v4528_v25 = vpop.permute.xlu1 %4527  ;;  %v5932_v11 = vpack.c.bf16 %v4524_v59, %v4503_v35  ;;  %v5948_v50 = vpack.c.bf16 %v4526_v56, %v4505_v33 }
 0xe04   :  { %v4543_v17 = vsel %vm4133_vm6, %v4528_v25, %v4531_v0 }
 0xe05   :  { %5933 = vmatprep.subr.bf16.mxu0 %v5932_v11  ;;  %5949 = vmatprep.subr.bf16.mxu1 %v5948_v50 }
 0xe06   :  { %v3975_v57 = vpop.f32.mrb[24].mxu0  ;;  %v4046_v42 = vpop.f32.mrb[24].mxu1  ;;  %5935 = vmatpush1.bf16.msra.mxu0 %v5934_v10  ;;  %5951 = vmatpush1.bf16.msra.mxu1 %v5950_v41 }
 0xe07   :  { %v8295_v12 = vadd.f32 %v3975_v57, %v8030_v34  ;;  %v3977_v54 = vpop.f32.mrb[25].mxu0  ;;  %v4048_v48 = vpop.f32.mrb[25].mxu1  ;;  %v8302_v47 = vadd.f32 %v4046_v42, %v8030_v34 }
 0xe08   :  { %v4535_v31 = vpop.permute.xlu0 %4534  ;;  %v4533_v30 = vpop.permute.xlu1 %4532 }
 0xe09   :  { %5215 = vrot.lane.b32.xlu1 %v8295_v12, %s6127_s23  ;;  %5134 = vrot.lane.b32.xlu0 %v8295_v12, %s6149_s20  ;;  %v4538_v32 = vsel %vm4133_vm6, %v4535_v31, %v4528_v25  ;;  %v4536_v46 = vsel %vm4133_vm6, %v4531_v0, %v4533_v30  ;;  %v4537_v59 = vsel %vm4133_vm6, %v4533_v30, %v4535_v31 }
 0xe0a   :  { %v4547_v13 = vmul.f32 %v4538_v32, %v8115_v28  ;;  %v4545_v41 = vmul.f32 %v4536_v46, %v8118_v16  ;;  %v4546_v0 = vmul.f32 %v4537_v59, %v8121_v60 }
 0xe0c   :  { %v4552_v33 = vpop.permute.xlu0 %4551  ;;  %v4549_v35 = vpop.permute.xlu1 %4548 }
 0xe0d   :  { %v4564_v56 = vsel %vm9010_vm13, %v4549_v35, %v4552_v33  ;;  %5138 = vrot.lane.b32.xlu0 %v8302_v47, %s6149_s20  ;;  %5219 = vrot.lane.b32.xlu1 %v8302_v47, %s6127_s23  ;;  %vm9022_vm13 = vcmask 588800  }
 0xe0e   :  { %v4565_v11 = vmul.f32 %v4564_v56, %v8859_v38 }
 0xe10   :  { %v4556_v50 = vpop.permute.xlu0 %4555  ;;  %v4554_v10 = vpop.permute.xlu1 %4553 }
 0xe11   :  { %v4559_v57 = vsel %vm9011_vm3, %v4556_v50, %v4549_v35  ;;  %v4557_v42 = vsel %vm9012_vm12, %v4552_v33, %v4554_v10  ;;  %v4558_v9 = vsel %vm9013_vm11, %v4554_v10, %v4556_v50  ;;  %5155 = vrot.lane.b32.xlu0 %v8295_v12, %s6130_s7  ;;  %5236 = vrot.lane.b32.xlu1 %v8295_v12, %s6170_s15  ;;  %vm9023_vm3 = vmmov %vm9022_vm13  ;;  %vm9024_vm12 = vcmask 130048  }
 0xe12   :  { %v4568_v25 = vmul.f32 %v4559_v57, %v8856_v52  ;;  %v4566_v31 = vmul.f32 %v4557_v42, %v8981_v45  ;;  %v4567_v30 = vmul.f32 %v4558_v9, %v8982_v36  ;;  %v4544_v35 = vmul.f32 %v4543_v17, %v8132_v26  ;;  %vm9025_vm11 = vmmov %vm9024_vm12 }
 0xe13   :  { %v8334_v9 = vadd.f32 %v4048_v48, %v8030_v34 }
 0xe14   :  { %v5954_v32 = vpack.c.bf16 %v4567_v30, %v4546_v0  ;;  %v4572_v33 = vpop.permute.xlu0 %4571  ;;  %v4570_v46 = vpop.permute.xlu1 %4569  ;;  %v5936_v56 = vpack.c.bf16 %v4566_v31, %v4545_v41  ;;  %v5952_v50 = vpack.c.bf16 %v4568_v25, %v4547_v13  ;;  %v5938_v10 = vpack.c.bf16 %v4565_v11, %v4544_v35 }
 0xe15   :  { %v4577_v4 = vsel %vm9014_vm8, %v4570_v46, %v4572_v33  ;;  %5159 = vrot.lane.b32.xlu0 %v8302_v47, %s6130_s7  ;;  %5240 = vrot.lane.b32.xlu1 %v8302_v47, %s6170_s15  ;;  %v8348_v0 = vadd.f32 %v3977_v54, %v8030_v34  ;;  %vm9026_vm8 = vmmov %vm9025_vm11 }
 0xe16   :  { %5937 = vmatprep.subr.bf16.mxu0 %v5936_v56  ;;  %5953 = vmatprep.subr.bf16.mxu1 %v5952_v50  ;;  %v4586_v59 = vmul.f32 %v4577_v4, %v8984_v1 }
 0xe17   :  { %5939 = vmatpush1.bf16.msra.mxu0 %v5938_v10  ;;  %5955 = vmatpush1.bf16.msra.mxu1 %v5954_v32 }
 0xe18   :  { %v4576_v17 = vpop.permute.xlu0 %4575  ;;  %v4574_v13 = vpop.permute.xlu1 %4573 }
 0xe19   :  { %v4585_v41 = vsel %vm9015_vm4, %v4576_v17, %v4570_v46  ;;  %v4578_v11 = vsel %vm9016_vm2, %v4572_v33, %v4574_v13  ;;  %v4579_v57 = vsel %vm9017_vm10, %v4574_v13, %v4576_v17  ;;  %5176 = vrot.lane.b32.xlu0 %v8295_v12, %s6145_s2  ;;  %5128 = vrot.lane.b32.xlu1 %v8334_v9, %s6149_s20  ;;  %vm9027_vm4 = vmmov %vm9026_vm8  ;;  %vm9028_vm2 = vcmask 7168  }
 0xe1a   :  { %v4589_v48 = vmul.f32 %v4585_v41, %v8988_v21  ;;  %v4587_v42 = vmul.f32 %v4578_v11, %v8989_v24  ;;  %v4588_v4 = vmul.f32 %v4579_v57, %v8990_v6  ;;  %v5942_v33 = vpack.c.bf16 %v4586_v59, %v7971_v37  ;;  %vm9029_vm10 = vmmov %vm9028_vm2 }
 0xe1c   :  { %v5958_v25 = vpack.c.bf16 %v4588_v4, %v7984_v27  ;;  %v4593_v31 = vpop.permute.xlu0 %4592  ;;  %v4591_v30 = vpop.permute.xlu1 %4590  ;;  %v5940_v35 = vpack.c.bf16 %v4587_v42, %v7981_v5  ;;  %v5956_v32 = vpack.c.bf16 %v4589_v48, %v7974_v18 }
 0xe1d   :  { %5180 = vrot.lane.b32.xlu0 %v8302_v47, %s6145_s2  ;;  %5136 = vrot.lane.b32.xlu1 %v8348_v0, %s6149_s20  ;;  %v4598_v50 = vsel %vm4220_vm14, %v4591_v30, %v4593_v31 }
 0xe1e   :  { %5941 = vmatprep.subr.bf16.mxu0 %v5940_v35  ;;  %5957 = vmatprep.subr.bf16.mxu1 %v5956_v32 }
 0xe1f   :  { %5943 = vmatpush1.bf16.msra.mxu0 %v5942_v33  ;;  %5959 = vmatpush1.bf16.msra.mxu1 %v5958_v25 }
 0xe20   :  { %v4597_v34 = vpop.permute.xlu0 %4596  ;;  %v4595_v27 = vpop.permute.xlu1 %4594 }
 0xe21   :  { %5197 = vrot.lane.b32.xlu0 %v8295_v12, %s6125_s18  ;;  %5152 = vrot.lane.b32.xlu1 %v8334_v9, %s6130_s7  ;;  %v4606_v5 = vsel %vm4220_vm14, %v4597_v34, %v4591_v30  ;;  %v4599_v54 = vsel %vm4220_vm14, %v4593_v31, %v4595_v27  ;;  %v4600_v56 = vsel %vm4220_vm14, %v4595_v27, %v4597_v34 }
 0xe22   :  { %v4610_v10 = vmul.f32 %v4606_v5, %v8186_v23  ;;  %v4608_v59 = vmul.f32 %v4599_v54, %v8189_v44  ;;  %v4609_v42 = vmul.f32 %v4600_v56, %v8192_v62  ;;  %v4607_v30 = vmul.f32 %v4598_v50, %v8207_v58 }
 0xe24   :  { %v4614_v18 = vpop.permute.xlu0 %4613  ;;  %v4612_v37 = vpop.permute.xlu1 %4611 }
 0xe25   :  { %v4619_v46 = vsel %vm9018_vm5, %v4612_v37, %v4614_v18  ;;  %5201 = vrot.lane.b32.xlu0 %v8302_v47, %s6125_s18  ;;  %5157 = vrot.lane.b32.xlu1 %v8348_v0, %s6130_s7  ;;  %s5647_s7 = sld [smem:[%s8604_s0 + %s6146_s9]]   ;;  %vm9030_vm5 = vmmov %vm9028_vm2 }
 0xe26   :  { %v4628_v17 = vmul.f32 %v4619_v46, %v8997_v3 }
 0xe28   :  { %v4618_v13 = vpop.permute.xlu0 %4617  ;;  %v4616_v41 = vpop.permute.xlu1 %4615 }
 0xe29   :  { %v4627_v11 = vsel %vm9019_vm7, %v4618_v13, %v4612_v37  ;;  %v4620_v57 = vsel %vm9020_vm1, %v4614_v18, %v4616_v41  ;;  %v4621_v48 = vsel %vm9021_vm0, %v4616_v41, %v4618_v13  ;;  %5217 = vrot.lane.b32.xlu0 %v8348_v0, %s6127_s23  ;;  %5173 = vrot.lane.b32.xlu1 %v8334_v9, %s6145_s2  ;;  %vm9031_vm7 = vmmov %vm9028_vm2  ;;  %vm9032_vm1 = vcmask 1039360  }
 0xe2a   :  { %v4631_v4 = vmul.f32 %v4627_v11, %v9001_v29  ;;  %v4629_v25 = vmul.f32 %v4620_v57, %v9002_v14  ;;  %v4630_v31 = vmul.f32 %v4621_v48, %v9003_v43  ;;  %v5946_v18 = vpack.c.bf16 %v4628_v17, %v4607_v30  ;;  %v5693_v57 = vld [vmem:[%s8231_s1 + $0x8] sm:$0xff]  ;;  %vm9033_vm0 = vmmov %vm9032_vm1 }
 0xe2c   :  { %v5962_v35 = vpack.c.bf16 %v4630_v31, %v4609_v42  ;;  %v4635_v32 = vpop.permute.xlu0 %4634  ;;  %v4633_v33 = vpop.permute.xlu1 %4632  ;;  %v5944_v34 = vpack.c.bf16 %v4629_v25, %v4608_v59  ;;  %v5960_v27 = vpack.c.bf16 %v4631_v4, %v4610_v10 }
 0xe2d   :  { %5221 = vrot.lane.b32.xlu0 %v8334_v9, %s6127_s23  ;;  %5178 = vrot.lane.b32.xlu1 %v8348_v0, %s6145_s2  ;;  %v4640_v37 = vsel %vm4287_vm9, %v4633_v33, %v4635_v32  ;;  %s6173_s2 = smov 30  }
 0xe2e   :  { %5945 = vmatprep.subr.bf16.mxu0 %v5944_v34  ;;  %5961 = vmatprep.subr.bf16.mxu1 %v5960_v27  ;;  %v4649_v13 = vmul.f32 %v4640_v37, %v8247_v7  ;;  %s5645_s21 = sld [smem:[%s8604_s0 + %s6173_s2]]  }
 0xe2f   :  { %5947 = vmatpush1.bf16.msra.mxu0 %v5946_v18  ;;  %5963 = vmatpush1.bf16.msra.mxu1 %v5962_v35 }
 0xe30   :  { %v4639_v5 = vpop.permute.xlu0 %4638  ;;  %v4637_v54 = vpop.permute.xlu1 %4636 }
 0xe31   :  { %v4648_v46 = vsel %vm4287_vm9, %v4639_v5, %v4633_v33  ;;  %v4641_v56 = vsel %vm4287_vm9, %v4635_v32, %v4637_v54  ;;  %v4642_v50 = vsel %vm4287_vm9, %v4637_v54, %v4639_v5  ;;  %5238 = vrot.lane.b32.xlu0 %v8348_v0, %s6170_s15  ;;  %5194 = vrot.lane.b32.xlu1 %v8334_v9, %s6125_s18 }
 0xe32   :  { %v4652_v10 = vmul.f32 %v4648_v46, %v8244_v61  ;;  %v4650_v59 = vmul.f32 %v4641_v56, %v8241_v63  ;;  %v4651_v17 = vmul.f32 %v4642_v50, %v8234_v15 }
 0xe34   :  { %v4812_v41 = vpop.permute.xlu0 %4811  ;;  %4672 = vmatprep.subr.mxu0 %v4650_v59  ;;  %4743 = vmatprep.subr.mxu1 %v4652_v10  ;;  %v4806_v11 = vpop.permute.xlu1 %4805 }
 0xe35   :  { %4673 = vmatpush1.msra.mxu0 %v4649_v13  ;;  %4744 = vmatpush1.msra.mxu1 %v4651_v17  ;;  %v4824_v33 = vsel %vm4066_vm15, %v4806_v11, %v4812_v41 }
 0xe36   :  { %5242 = vrot.lane.b32.xlu0 %v8334_v9, %s6170_s15  ;;  %5199 = vrot.lane.b32.xlu1 %v8348_v0, %s6125_s18  ;;  %v4825_v13 = vmul.f32 %v4824_v33, %v8075_v40 }
 0xe37   :  { %5694 = vmatmul.mubr.msk.f32.vlgmr.msra.gmra.mrb[26].mxu0 %vm9022_vm13, %v5693_v57  ;;  %5695 = vmatmul.mubr.msk.f32.vlgmr.msra.gmra.mrb[26].mxu1 %vm9023_vm3, %v5693_v57  ;;  %vm9034_vm13 = vmmov %vm9033_vm0 }
 0xe38   :  { %v4816_v48 = vpop.permute.xlu0 %4815  ;;  %v4814_v42 = vpop.permute.xlu1 %4813  ;;  %5114 = vmatprep.mubr.f32.mxu1 %v8747_v19  ;;  %5043 = vmatprep.mubr.f32.mxu0 %v8747_v19  ;;  %vm9035_vm3 = vmmov %vm9033_vm0 }
 0xe39   :  { %v4819_v31 = vsel %vm4066_vm15, %v4816_v48, %v4806_v11  ;;  %v4817_v30 = vsel %vm4066_vm15, %v4812_v41, %v4814_v42  ;;  %v4818_v35 = vsel %vm4066_vm15, %v4814_v42, %v4816_v48 }
 0xe3a   :  { %5259 = vrot.lane.b32.xlu0 %v8348_v0, %s6132_s13  ;;  %5257 = vrot.lane.b32.xlu1 %v8295_v12, %s6132_s13  ;;  %v4828_v34 = vmul.f32 %v4819_v31, %v8052_v39  ;;  %v4826_v27 = vmul.f32 %v4817_v30, %v8055_v53  ;;  %v4827_v18 = vmul.f32 %v4818_v35, %v8058_v55  ;;  %v4051_v31 = vld [vmem:[%s5645_s21] sm:$0xff] }
 0xe3c   :  { %v4833_v4 = vpop.permute.xlu0 %4832  ;;  %v4830_v25 = vpop.permute.xlu1 %4829 }
 0xe3d   :  { %v4845_v32 = vsel %vm9024_vm12, %v4830_v25, %v4833_v4  ;;  %vm9038_vm12 = vcmask 916480  }
 0xe3e   :  { %5263 = vrot.lane.b32.xlu0 %v8334_v9, %s6132_s13  ;;  %5261 = vrot.lane.b32.xlu1 %v8302_v47, %s6132_s13  ;;  %v4846_v54 = vmul.f32 %v4845_v32, %v8906_v49  ;;  %s6174_s13 = smov 31  }
 0xe3f   :  { %s5646_s25 = sld [smem:[%s8604_s0 + %s6174_s13]]  }
 0xe40   :  { %v4837_v37 = vpop.permute.xlu0 %4836  ;;  %v4835_v5 = vpop.permute.xlu1 %4834 }
 0xe41   :  { %v4840_v46 = vsel %vm9025_vm11, %v4837_v37, %v4830_v25  ;;  %v4838_v56 = vsel %vm9026_vm8, %v4833_v4, %v4835_v5  ;;  %v4839_v50 = vsel %vm9027_vm4, %v4835_v5, %v4837_v37  ;;  %v5966_v4 = vpack.c.bf16 %v4846_v54, %v4825_v13  ;;  %v5449_v25 = vld [vmem:[%s5647_s7] sm:$0xff]  ;;  %vm9039_vm11 = vmmov %vm9038_vm12 }
 0xe42   :  { %v4849_v10 = vmul.f32 %v4840_v46, %v8904_v2  ;;  %v4847_v59 = vmul.f32 %v4838_v56, %v8911_v51  ;;  %v4848_v17 = vmul.f32 %v4839_v50, %v8912_v20  ;;  %5280 = vrot.lane.b32.xlu0 %v8348_v0, %s6171_s6  ;;  %5278 = vrot.lane.b32.xlu1 %v8295_v12, %s6171_s6  ;;  %vm9040_vm8 = vmmov %vm9039_vm11 }
 0xe43   :  { %vm9041_vm4 = vmmov %vm9040_vm8 }
 0xe44   :  { %v5982_v41 = vpack.c.bf16 %v4848_v17, %v4827_v18  ;;  %v4854_v11 = vpop.permute.xlu0 %4853  ;;  %v4851_v57 = vpop.permute.xlu1 %4850  ;;  %v5964_v48 = vpack.c.bf16 %v4847_v59, %v4826_v27  ;;  %v5980_v42 = vpack.c.bf16 %v4849_v10, %v4828_v34 }
 0xe45   :  { %v4866_v5 = vsel %vm4133_vm6, %v4851_v57, %v4854_v11 }
 0xe46   :  { %5284 = vrot.lane.b32.xlu0 %v8334_v9, %s6171_s6  ;;  %5282 = vrot.lane.b32.xlu1 %v8302_v47, %s6171_s6 }
 0xe47   :  { %5965 = vmatprep.subr.bf16.mxu0 %v5964_v48  ;;  %5981 = vmatprep.subr.bf16.mxu1 %v5980_v42  ;;  %v4867_v42 = vmul.f32 %v4866_v5, %v8132_v26 }
 0xe48   :  { %5967 = vmatpush1.bf16.msra.mxu0 %v5966_v4  ;;  %5983 = vmatpush1.bf16.msra.mxu1 %v5982_v41  ;;  %v4858_v30 = vpop.permute.xlu0 %4857  ;;  %v4856_v35 = vpop.permute.xlu1 %4855 }
 0xe49   :  { %v4861_v34 = vsel %vm4133_vm6, %v4858_v30, %v4851_v57  ;;  %v4859_v27 = vsel %vm4133_vm6, %v4854_v11, %v4856_v35  ;;  %v4860_v37 = vsel %vm4133_vm6, %v4856_v35, %v4858_v30 }
 0xe4a   :  { %5452 = vperm.xlu0 %6108, %v5449_v25   ;;  %4472 = vperm.xlu1 %6109, %v4051_v31   ;;  %v4870_v54 = vmul.f32 %v4861_v34, %v8115_v28  ;;  %v4868_v46 = vmul.f32 %v4859_v27, %v8118_v16  ;;  %v4869_v41 = vmul.f32 %v4860_v37, %v8121_v60 }
 0xe4c   :  { %v4875_v32 = vpop.permute.xlu0 %4874  ;;  %v4872_v33 = vpop.permute.xlu1 %4871 }
 0xe4d   :  { %v4887_v18 = vsel %vm9028_vm2, %v4872_v33, %v4875_v32  ;;  %vm9042_vm2 = vcmask 588800  }
 0xe4e   :  { %v4888_v10 = vmul.f32 %v4887_v18, %v8859_v38 }
 0xe50   :  { %v4879_v56 = vpop.permute.xlu0 %4878  ;;  %v4877_v50 = vpop.permute.xlu1 %4876 }
 0xe51   :  { %v4882_v59 = vsel %vm9029_vm10, %v4879_v56, %v4872_v33  ;;  %v4880_v17 = vsel %vm9030_vm5, %v4875_v32, %v4877_v50  ;;  %v4881_v13 = vsel %vm9031_vm7, %v4877_v50, %v4879_v56  ;;  %v5970_v33 = vpack.c.bf16 %v4888_v10, %v4867_v42  ;;  %vm9043_vm10 = vmmov %vm9042_vm2 }
 0xe52   :  { %v4891_v48 = vmul.f32 %v4882_v59, %v8856_v52  ;;  %v4889_v11 = vmul.f32 %v4880_v17, %v8981_v45  ;;  %v4890_v57 = vmul.f32 %v4881_v13, %v8982_v36  ;;  %vm9044_vm5 = vcmask 130048  }
 0xe53   :  { %vm9045_vm7 = vmmov %vm9044_vm5 }
 0xe54   :  { %v5986_v4 = vpack.c.bf16 %v4890_v57, %v4869_v41  ;;  %v4895_v25 = vpop.permute.xlu0 %4894  ;;  %v4893_v31 = vpop.permute.xlu1 %4892  ;;  %v5968_v30 = vpack.c.bf16 %v4889_v11, %v4868_v46  ;;  %v5984_v35 = vpack.c.bf16 %v4891_v48, %v4870_v54  ;;  %v9036_v41 = vld [vmem:[#allocation48_spill] sm:$0xff]  ;;  %v9037_v11 = vld [vmem:[#allocation38_spill] sm:$0xff] }
 0xe55   :  { %v4900_v32 = vsel %vm9032_vm1, %v4893_v31, %v4895_v25  ;;  %vm9046_vm1 = vmmov %vm9044_vm5 }
 0xe56   :  { %5969 = vmatprep.subr.bf16.mxu0 %v5968_v30  ;;  %5985 = vmatprep.subr.bf16.mxu1 %v5984_v35  ;;  %v4909_v18 = vmul.f32 %v4900_v32, %v8984_v1 }
 0xe57   :  { %5971 = vmatpush1.bf16.msra.mxu0 %v5970_v33  ;;  %5987 = vmatpush1.bf16.msra.mxu1 %v5986_v4 }
 0xe58   :  { %v4899_v34 = vpop.permute.xlu0 %4898  ;;  %v4897_v27 = vpop.permute.xlu1 %4896  ;;  %v5974_v57 = vpack.c.bf16 %v4909_v18, %v9037_v11 }
 0xe59   :  { %v4908_v37 = vsel %vm9033_vm0, %v4899_v34, %v4893_v31  ;;  %v4901_v5 = vsel %vm9034_vm13, %v4895_v25, %v4897_v27  ;;  %v4902_v56 = vsel %vm9035_vm3, %v4897_v27, %v4899_v34  ;;  %vm9047_vm0 = vmmov %vm9046_vm1 }
 0xe5a   :  { %v4912_v46 = vmul.f32 %v4908_v37, %v8988_v21  ;;  %v4910_v54 = vmul.f32 %v4901_v5, %v8989_v24  ;;  %v4911_v50 = vmul.f32 %v4902_v56, %v8990_v6  ;;  %vm9049_vm13 = vmmov %vm9035_vm3 }
 0xe5c   :  { %v5990_v10 = vpack.c.bf16 %v4911_v50, %v8096_v8  ;;  %v4916_v59 = vpop.permute.xlu0 %4915  ;;  %v4914_v17 = vpop.permute.xlu1 %4913  ;;  %v5972_v13 = vpack.c.bf16 %v4910_v54, %v8093_v22  ;;  %v5988_v48 = vpack.c.bf16 %v4912_v46, %v9036_v41 }
 0xe5d   :  { %v4921_v33 = vsel %vm4220_vm14, %v4914_v17, %v4916_v59 }
 0xe5e   :  { %5973 = vmatprep.subr.bf16.mxu0 %v5972_v13  ;;  %5989 = vmatprep.subr.bf16.mxu1 %v5988_v48 }
 0xe5f   :  { %5975 = vmatpush1.bf16.msra.mxu0 %v5974_v57  ;;  %5991 = vmatpush1.bf16.msra.mxu1 %v5990_v10 }
 0xe60   :  { %v4920_v42 = vpop.permute.xlu0 %4919  ;;  %v4918_v4 = vpop.permute.xlu1 %4917 }
 0xe61   :  { %v4929_v30 = vsel %vm4220_vm14, %v4920_v42, %v4914_v17  ;;  %v4922_v8 = vsel %vm4220_vm14, %v4916_v59, %v4918_v4  ;;  %v4923_v22 = vsel %vm4220_vm14, %v4918_v4, %v4920_v42  ;;  %v4930_v17 = vmul.f32 %v4921_v33, %v8207_v58 }
 0xe62   :  { %v4933_v32 = vmul.f32 %v4929_v30, %v8186_v23  ;;  %v4931_v34 = vmul.f32 %v4922_v8, %v8189_v44  ;;  %v4932_v54 = vmul.f32 %v4923_v22, %v8192_v62 }
 0xe64   :  { %v4937_v25 = vpop.permute.xlu0 %4936  ;;  %v4935_v31 = vpop.permute.xlu1 %4934 }
 0xe65   :  { %v4942_v35 = vsel %vm9038_vm12, %v4935_v31, %v4937_v25 }
 0xe66   :  { %v4951_v37 = vmul.f32 %v4942_v35, %v8997_v3 }
 0xe68   :  { %v4941_v27 = vpop.permute.xlu0 %4940  ;;  %v4939_v18 = vpop.permute.xlu1 %4938  ;;  %v5978_v42 = vpack.c.bf16 %v4951_v37, %v4930_v17 }
 0xe69   :  { %v4950_v5 = vsel %vm9039_vm11, %v4941_v27, %v4935_v31  ;;  %v4943_v56 = vsel %vm9040_vm8, %v4937_v25, %v4939_v18  ;;  %v4944_v46 = vsel %vm9041_vm4, %v4939_v18, %v4941_v27  ;;  %v5696_v27 = vld [vmem:[%s8231_s1 + $0x10] sm:$0xff]  ;;  %vm9051_vm11 = vmmov %vm9035_vm3 }
 0xe6a   :  { %v4954_v50 = vmul.f32 %v4950_v5, %v9001_v29  ;;  %v4952_v10 = vmul.f32 %v4943_v56, %v9002_v14  ;;  %v4953_v59 = vmul.f32 %v4944_v46, %v9003_v43  ;;  %vm9052_vm8 = vmmov %vm9035_vm3 }
 0xe6c   :  { %v5994_v13 = vpack.c.bf16 %v4953_v59, %v4932_v54  ;;  %v4958_v41 = vpop.permute.xlu0 %4957  ;;  %v4956_v48 = vpop.permute.xlu1 %4955  ;;  %v5976_v11 = vpack.c.bf16 %v4952_v10, %v4931_v34  ;;  %v5992_v57 = vpack.c.bf16 %v4954_v50, %v4933_v32 }
 0xe6d   :  { %v4963_v4 = vsel %vm4287_vm9, %v4956_v48, %v4958_v41 }
 0xe6e   :  { %5977 = vmatprep.subr.bf16.mxu0 %v5976_v11  ;;  %5993 = vmatprep.subr.bf16.mxu1 %v5992_v57  ;;  %v4972_v34 = vmul.f32 %v4963_v4, %v8247_v7 }
 0xe6f   :  { %5979 = vmatpush1.bf16.msra.mxu0 %v5978_v42  ;;  %5995 = vmatpush1.bf16.msra.mxu1 %v5994_v13 }
 0xe70   :  { %v4962_v25 = vpop.permute.xlu0 %4961  ;;  %v4960_v31 = vpop.permute.xlu1 %4959 }
 0xe71   :  { %v4971_v30 = vsel %vm4287_vm9, %v4962_v25, %v4956_v48  ;;  %v4964_v8 = vsel %vm4287_vm9, %v4958_v41, %v4960_v31  ;;  %v4965_v35 = vsel %vm4287_vm9, %v4960_v31, %v4962_v25 }
 0xe72   :  { %v4975_v22 = vmul.f32 %v4971_v30, %v8244_v61  ;;  %v4973_v33 = vmul.f32 %v4964_v8, %v8241_v63  ;;  %v4974_v32 = vmul.f32 %v4965_v35, %v8234_v15 }
 0xe74   :  { %4995 = vmatprep.subr.mxu0 %v4973_v33  ;;  %5066 = vmatprep.subr.mxu1 %v4975_v22 }
 0xe75   :  { %4996 = vmatpush1.msra.mxu0 %v4972_v34  ;;  %5067 = vmatpush1.msra.mxu1 %v4974_v32 }
 0xe76   :  { %5698 = vmatmul.mubr.msk.f32.vlgmr.msra.gmra.mrb[26].mxu1 %vm9042_vm2, %v5696_v27  ;;  %5697 = vmatmul.mubr.msk.f32.vlgmr.msra.gmra.mrb[26].mxu0 %vm9043_vm10, %v5696_v27 }
 0xe77   :  { %5366 = vmatprep.mubr.f32.mxu0 %v8747_v19  ;;  %5437 = vmatprep.mubr.f32.mxu1 %v8747_v19 }
 0xe7b   :  { %v5135_v18 = vpop.permute.xlu0 %5134  ;;  %v5216_v37 = vpop.permute.xlu1 %5215 }
 0xe7f   :  { %v5139_v5 = vpop.permute.xlu0 %5138  ;;  %v5220_v56 = vpop.permute.xlu1 %5219 }
 0xe83   :  { %v5156_v46 = vpop.permute.xlu0 %5155  ;;  %v8507_v54 = vpop.permute.xlu1 %5236 }
 0xe87   :  { %v5160_v50 = vpop.permute.xlu0 %5159  ;;  %v8509_v10 = vpop.permute.xlu1 %5240 }
 0xe8b   :  { %v5177_v59 = vpop.permute.xlu0 %5176  ;;  %v5129_v17 = vpop.permute.xlu1 %5128 }
 0xe8c   :  { %v5142_v48 = vsel %vm4066_vm15, %v5139_v5, %v5129_v17  ;;  %v5147_v35 = vsel %vm4066_vm15, %v5129_v17, %v5135_v18 }
 0xe8d   :  { %v5151_v4 = vmul.f32 %v5142_v48, %v8052_v39 }
 0xe8f   :  { %v5181_v13 = vpop.permute.xlu0 %5180  ;;  %v5137_v41 = vpop.permute.xlu1 %5136 }
 0xe90   :  { %v5140_v30 = vsel %vm4066_vm15, %v5135_v18, %v5137_v41  ;;  %v5141_v8 = vsel %vm4066_vm15, %v5137_v41, %v5139_v5  ;;  %v5148_v18 = vmul.f32 %v5147_v35, %v8075_v40  ;;  %vm9048_vm15 = vcmask 7168  }
 0xe91   :  { %v5149_v39 = vmul.f32 %v5140_v30, %v8055_v53  ;;  %v5150_v48 = vmul.f32 %v5141_v8, %v8058_v55  ;;  %vm9050_vm12 = vmmov %vm9048_vm15 }
 0xe92   :  { %vm9053_vm4 = vmmov %vm9050_vm12 }
 0xe93   :  { %v5198_v11 = vpop.permute.xlu0 %5197  ;;  %v5153_v57 = vpop.permute.xlu1 %5152  ;;  %vm9054_vm2 = vmmov %vm9053_vm4 }
 0xe94   :  { %v5163_v42 = vsel %vm9044_vm5, %v5160_v50, %v5153_v57  ;;  %v5168_v25 = vsel %vm9045_vm7, %v5153_v57, %v5156_v46 }
 0xe95   :  { %v5172_v31 = vmul.f32 %v5163_v42, %v8904_v2  ;;  %v5169_v34 = vmul.f32 %v5168_v25, %v8906_v49 }
 0xe97   :  { %v5202_v22 = vpop.permute.xlu0 %5201  ;;  %v5158_v33 = vpop.permute.xlu1 %5157  ;;  %v6012_v32 = vpack.c.bf16 %v5172_v31, %v5151_v4  ;;  %v5998_v49 = vpack.c.bf16 %v5169_v34, %v5148_v18 }
 0xe98   :  { %v5161_v27 = vsel %vm9046_vm1, %v5156_v46, %v5158_v33  ;;  %v5162_v19 = vsel %vm9047_vm0, %v5158_v33, %v5160_v50  ;;  %vm9062_vm1 = vcmask 1043456  }
 0xe99   :  { %v5170_v2 = vmul.f32 %v5161_v27, %v8911_v51  ;;  %v5171_v57 = vmul.f32 %v5162_v19, %v8912_v20  ;;  %6013 = vmatprep.subr.bf16.mxu1 %v6012_v32  ;;  %vm9064_vm0 = vmmov %vm9062_vm1 }
 0xe9b   :  { %v6014_v5 = vpack.c.bf16 %v5171_v57, %v5150_v48  ;;  %v5218_v17 = vpop.permute.xlu0 %5217  ;;  %v5174_v41 = vpop.permute.xlu1 %5173  ;;  %v5996_v42 = vpack.c.bf16 %v5170_v2, %v5149_v39 }
 0xe9c   :  { %v5184_v53 = vsel %vm4133_vm6, %v5181_v13, %v5174_v41  ;;  %v5224_v19 = vsel %vm9049_vm13, %v5218_v17, %v5220_v56  ;;  %v5223_v33 = vsel %vm9051_vm11, %v5216_v37, %v5218_v17  ;;  %v5189_v34 = vsel %vm4133_vm6, %v5174_v41, %v5177_v59  ;;  %vm9066_vm13 = vmmov %vm9064_vm0 }
 0xe9d   :  { %5997 = vmatprep.subr.bf16.mxu0 %v5996_v42  ;;  %6015 = vmatpush1.bf16.msra.mxu1 %v6014_v5  ;;  %v5193_v20 = vmul.f32 %v5184_v53, %v8115_v28  ;;  %v5233_v32 = vmul.f32 %v5224_v19, %v8989_v24  ;;  %v5190_v18 = vmul.f32 %v5189_v34, %v8132_v26  ;;  %v5448_v34 = vld [vmem:[%s5646_s25] sm:$0xff] }
 0xe9e   :  { %5999 = vmatpush1.bf16.msra.mxu0 %v5998_v49 }
 0xe9f   :  { %v5222_v46 = vpop.permute.xlu0 %5221  ;;  %v5179_v50 = vpop.permute.xlu1 %5178  ;;  %v6004_v26 = vpack.c.bf16 %v5233_v32, %v8348_v0  ;;  %v9067_v32 = vmov 0.0  }
 0xea0   :  { %v5231_v25 = vsel %vm9035_vm3, %v5222_v46, %v5216_v37  ;;  %v5182_v30 = vsel %vm4133_vm6, %v5177_v59, %v5179_v50  ;;  %v5183_v8 = vsel %vm4133_vm6, %v5179_v50, %v5181_v13  ;;  %v5225_v27 = vsel %vm9052_vm8, %v5220_v56, %v5222_v46 }
 0xea1   :  { %v5191_v13 = vmul.f32 %v5182_v30, %v8118_v16  ;;  %v5192_v37 = vmul.f32 %v5183_v8, %v8121_v60  ;;  %v5232_v56 = vmul.f32 %v5223_v33, %v8984_v1  ;;  %vm9055_vm6 = vcmask 916480   ;;  %v5699_v33 = vld [vmem:[%s8231_s1 + $0x18] sm:$0xff] }
 0xea2   :  { %vm9056_vm10 = vmmov %vm9055_vm6  ;;  %vm9068_vm3 = vcmask 31744  }
 0xea3   :  { %v5239_v55 = vpop.permute.xlu0 %5238  ;;  %v5195_v4 = vpop.permute.xlu1 %5194  ;;  %v6006_v1 = vpack.c.bf16 %v5232_v56, %v8295_v12  ;;  %vm9057_vm5 = vmmov %vm9055_vm6 }
 0xea4   :  { %v5205_v51 = vsel %vm9048_vm15, %v5202_v22, %v5195_v4  ;;  %v5210_v31 = vsel %vm9050_vm12, %v5195_v4, %v5198_v11  ;;  %vm9058_vm7 = vmmov %vm9057_vm5 }
 0xea5   :  { %v5214_v40 = vmul.f32 %v5205_v51, %v8856_v52  ;;  %v5235_v52 = vmul.f32 %v5231_v25, %v8988_v21  ;;  %v5211_v48 = vmul.f32 %v5210_v31, %v8859_v38  ;;  %v5234_v21 = vmul.f32 %v5225_v27, %v8990_v6  ;;  %vm9065_vm15 = vmmov %vm9064_vm0 }
 0xea6   :  { %vm9069_vm12 = vmmov %vm9068_vm3 }
 0xea7   :  { %v6016_v35 = vpack.c.bf16 %v5214_v40, %v5193_v20  ;;  %v6002_v16 = vpack.c.bf16 %v5211_v48, %v5190_v18  ;;  %v6022_v41 = vpack.c.bf16 %v5234_v21, %v8302_v47 }
 0xea8   :  { %v5243_v28 = vpop.permute.xlu0 %5242  ;;  %v5200_v39 = vpop.permute.xlu1 %5199 }
 0xea9   :  { %v5203_v2 = vsel %vm9053_vm4, %v5198_v11, %v5200_v39  ;;  %v5204_v57 = vsel %vm9054_vm2, %v5200_v39, %v5202_v22  ;;  %6017 = vmatprep.subr.bf16.mxu1 %v6016_v35  ;;  %v5245_v22 = vsel %vm4220_vm14, %v5239_v55, %v8509_v10  ;;  %v5246_v60 = vsel %vm4220_vm14, %v8509_v10, %v5243_v28 }
 0xeaa   :  { %v5212_v24 = vmul.f32 %v5203_v2, %v8981_v45  ;;  %v5213_v59 = vmul.f32 %v5204_v57, %v8982_v36  ;;  %v6020_v45 = vpack.c.bf16 %v5235_v52, %v8334_v9  ;;  %v5252_v6 = vsel %vm4220_vm14, %v5243_v28, %v8507_v54 }
 0xeab   :  { %v5244_v10 = vsel %vm4220_vm14, %v8507_v54, %v5239_v55  ;;  %v5254_v9 = vmul.f32 %v5245_v22, %v8189_v44  ;;  %v5255_v42 = vmul.f32 %v5246_v60, %v8192_v62  ;;  %v5256_v47 = vmul.f32 %v5252_v6, %v8186_v23 }
 0xeac   :  { %v6018_v38 = vpack.c.bf16 %v5213_v59, %v5192_v37  ;;  %v5260_v5 = vpop.permute.xlu0 %5259  ;;  %v5258_v11 = vpop.permute.xlu1 %5257  ;;  %v6000_v17 = vpack.c.bf16 %v5212_v24, %v5191_v13  ;;  %v5253_v62 = vmul.f32 %v5244_v10, %v8207_v58  ;;  %vm9059_vm14 = vcmask 588800  }
 0xead   :  { %v5265_v36 = vsel %vm9055_vm6, %v5258_v11, %v5260_v5 }
 0xeae   :  { %6001 = vmatprep.subr.bf16.mxu0 %v6000_v17  ;;  %6019 = vmatpush1.bf16.msra.mxu1 %v6018_v38  ;;  %v5274_v0 = vmul.f32 %v5265_v36, %v8997_v3 }
 0xeaf   :  { %6003 = vmatpush1.bf16.msra.mxu0 %v6002_v16  ;;  %6021 = vmatprep.subr.bf16.mxu1 %v6020_v45 }
 0xeb0   :  { %v5264_v49 = vpop.permute.xlu0 %5263  ;;  %6005 = vmatprep.subr.bf16.mxu0 %v6004_v26  ;;  %v5262_v46 = vpop.permute.xlu1 %5261  ;;  %v6010_v40 = vpack.c.bf16 %v5274_v0, %v5253_v62 }
 0xeb1   :  { %v5273_v12 = vsel %vm9056_vm10, %v5264_v49, %v5258_v11  ;;  %v5266_v50 = vsel %vm9057_vm5, %v5260_v5, %v5262_v46  ;;  %v5267_v53 = vsel %vm9058_vm7, %v5262_v46, %v5264_v49 }
 0xeb2   :  { %v5277_v4 = vmul.f32 %v5273_v12, %v9001_v29  ;;  %v5275_v54 = vmul.f32 %v5266_v50, %v9002_v14  ;;  %v5276_v44 = vmul.f32 %v5267_v53, %v9003_v43  ;;  %6023 = vmatpush1.bf16.msra.mxu1 %v6022_v41 }
 0xeb3   :  { %6007 = vmatpush1.bf16.msra.mxu0 %v6006_v1 }
 0xeb4   :  { %v6026_v55 = vpack.c.bf16 %v5276_v44, %v5255_v42  ;;  %v5281_v3 = vpop.permute.xlu0 %5280  ;;  %v5279_v51 = vpop.permute.xlu1 %5278  ;;  %v6008_v19 = vpack.c.bf16 %v5275_v54, %v5254_v9  ;;  %v6024_v20 = vpack.c.bf16 %v5277_v4, %v5256_v47 }
 0xeb5   :  { %v5286_v23 = vsel %vm4287_vm9, %v5279_v51, %v5281_v3 }
 0xeb6   :  { %6009 = vmatprep.subr.bf16.mxu0 %v6008_v19  ;;  %6025 = vmatprep.subr.bf16.mxu1 %v6024_v20  ;;  %v5295_v35 = vmul.f32 %v5286_v23, %v8247_v7  ;;  %v6119_v7 = vld [vmem:[%s6184_s5 + $0x8] sm:$0xff] }
 0xeb7   :  { %6011 = vmatpush1.bf16.msra.mxu0 %v6010_v40  ;;  %6027 = vmatpush1.bf16.msra.mxu1 %v6026_v55 }
 0xeb8   :  { %v5285_v29 = vpop.permute.xlu0 %5284  ;;  %v5283_v14 = vpop.permute.xlu1 %5282 }
 0xeb9   :  { %v5294_v43 = vsel %vm4287_vm9, %v5285_v29, %v5279_v51  ;;  %v5287_v58 = vsel %vm4287_vm9, %v5281_v3, %v5283_v14  ;;  %v5288_v25 = vsel %vm4287_vm9, %v5283_v14, %v5285_v29  ;;  %vm9060_vm9 = vmmov %vm9059_vm14 }
 0xeba   :  { %v5298_v31 = vmul.f32 %v5294_v43, %v8244_v61  ;;  %v5296_v30 = vmul.f32 %v5287_v58, %v8241_v63  ;;  %v5297_v8 = vmul.f32 %v5288_v25, %v8234_v15  ;;  %v9061_v63 = vld [vmem:[#allocation2_spill] sm:$0xff]  ;;  %v9063_v15 = vld [vmem:[#allocation3_spill] sm:$0xff] }
 0xebb   :  { %v6118_v61 = vld [vmem:[%s6184_s5] sm:$0xff] }
 0xebc   :  { %5318 = vmatprep.subr.mxu0 %v5296_v30  ;;  %5389 = vmatprep.subr.mxu1 %v5298_v31 }
 0xebd   :  { %5319 = vmatpush1.msra.mxu0 %v5295_v35  ;;  %5390 = vmatpush1.msra.mxu1 %v5297_v8 }
 0xebe   :  { %5700 = vmatmul.mubr.msk.f32.vlgmr.msra.gmra.mrb[26].mxu0 %vm9059_vm14, %v5699_v33  ;;  %5701 = vmatmul.mubr.msk.f32.vlgmr.msra.gmra.mrb[26].mxu1 %vm9060_vm9, %v5699_v33 }
 0xebf   :  { %5702 = vmatprep.subr.msk.mxu0 %vm9062_vm1, %v9061_v63  ;;  %5705 = vmatprep.subr.msk.mxu1 %vm9064_vm0, %v9063_v15 }
 0xec0   :  { %5703 = vmatpush1.msk.msra.mxu0 %vm9065_vm15, %v6118_v61  ;;  %5706 = vmatpush1.msk.msra.mxu1 %vm9066_vm13, %v6119_v7 }
 0xec1   :  { %5522 = vmatprep.mubr.f32.mxu0 %v9067_v32  ;;  %5593 = vmatprep.mubr.f32.mxu1 %v9067_v32 }
 0xec6   :  { %5704 = vmatmul.mubr.msk.f32.vlgmr.msra.gmra.mrb[26].mxu0 %vm9068_vm3, %v5448_v34  ;;  %5707 = vmatmul.mubr.msk.f32.vlgmr.msra.gmra.mrb[26].mxu1 %vm9069_vm12, %v5448_v34 }
 0xec9   :  { %v5453_v27 = vpop.permute.xlu0 %5452  ;;  %v4473_v28 = vpop.permute.xlu1 %4472 }
 0xeca   :  { %v6028_v39 = vadd.f32 %v5453_v27, %v4473_v28 }
 0xf99   :  { %v5524_v52 = vpop.f32.mrb[26].mxu0  ;;  %v5595_v48 = vpop.f32.mrb[26].mxu1 }
 0xf9a   :  { %v6029_v2 = vadd.f32 %v6028_v39, %v5524_v52  ;;  %v6033_v57 = vadd.f32 %v6028_v39, %v5595_v48  ;;  %v5526_v13 = vpop.f32.mrb[27].mxu0  ;;  %v5597_v37 = vpop.f32.mrb[27].mxu1 }
 0xf9b   :  { %v6031_v24 = vadd.f32 %v6028_v39, %v5526_v13  ;;  %v6035_v59 = vadd.f32 %v6028_v39, %v5597_v37 }
 0xf9c   :  { %v5604_v56 = vmax.f32 %v6029_v2, 0.0  ;;  %v5606_v18 = vmax.f32 %v6033_v57, 0.0 }
 0xf9d   :  { %v5605_v21 = vmax.f32 %v6031_v24, 0.0  ;;  %v5607_v38 = vmax.f32 %v6035_v59, 0.0 }
 0xf9e   :  { %5608 = vst [vmem:[%s5648_s4] sm:$0xff] %v5604_v56  ;;  %5610 = vst [vmem:[%s5648_s4 + $0x10] sm:$0xff] %v5606_v18 }
 0xf9f   :  { %5609 = vst [vmem:[%s5648_s4 + $0x8] sm:$0xff] %v5605_v21  ;;  %5611 = vst [vmem:[%s5648_s4 + $0x18] sm:$0xff] %v5607_v38 }

</bundles_post_ra>
